<compile_context>
chip_gen: v6e
topology: v6e:2x2x1
jax: 0.10.0
libtpu: 0.0.40
codegen_flags: <defaults>
</compile_context>

<pallas_src>
import functools

import numpy as np

import jax
import jax.numpy as jnp
from jax.experimental import pallas as pl
from jax.experimental.pallas import tpu as pltpu

KW = 4           # kernel size of every conv in NoNormDiscriminator
PADW = 2         # int(np.ceil((4 - 1) / 2)) -> PyTorch zero padding of 2
NEG_SLOPE = 0.2  # LeakyReLU slope
SUB = 8          # TPU sublane width


def _round_up(x, m):
    return ((x + m - 1) // m) * m


def _layer_geometry(h, w, params, strides):
    """Static per-layer geometry (Python ints only)."""
    layers = []
    for i, (wt, _) in enumerate(params):
        s = strides[i]
        cout, cin = int(wt.shape[0]), int(wt.shape[1])
        hp = h + 2 * PADW                       # padded input height
        hf = hp - KW + 1                        # stride-1 output height
        wf = (w + 2 * PADW) - KW + 1            # stride-1 output width
        wfp = _round_up(wf, SUB)                # sublane-aligned stride-1 width
        wpp = wfp + KW - 1                      # padded scratch width (>= w+4)
        ho = (h + 2 * PADW - KW) // s + 1
        wo = (w + 2 * PADW - KW) // s + 1
        layers.append(dict(stride=s, cin=cin, cout=cout, hin=h, win=w,
                           hp=hp, wpp=wpp, hf=hf, wfp=wfp, ho=ho, wo=wo,
                           act=(i < len(params) - 1)))
        h, w = ho, wo
    return layers


def _vmem_bytes(shape, itemsize):
    """VMEM footprint of a buffer with (8, 128) tile padding on the minor dims."""
    lead = 1
    for d in shape[:-2]:
        lead *= d
    return lead * _round_up(shape[-2], SUB) * _round_up(shape[-1], 128) * itemsize


# ------------------------------ fused kernel ------------------------------- #

def _make_fused_kernel(layers, use_sigmoid):
    n = len(layers)
    n_s2 = sum(1 for L in layers if L["stride"] == 2)

    def kernel(*refs):
        x_ref = refs[0]
        w_refs = refs[1:1 + n]
        b_refs = refs[1 + n:1 + 2 * n]
        s_refs = refs[1 + 2 * n:1 + 2 * n + n_s2]
        o_ref = refs[1 + 2 * n + n_s2]
        a_refs = refs[2 + 2 * n + n_s2:]

        # Stage the raw input into the zeroed, spatially padded scratch.
        L0 = layers[0]
        a_refs[0][...] = jnp.zeros((L0["hp"], L0["wpp"], L0["cin"]), jnp.float32)
        a_refs[0][PADW:PADW + L0["hin"], PADW:PADW + L0["win"], :] = (
            x_ref[0].astype(jnp.float32))

        s_idx = 0
        for li, L in enumerate(layers):
            a = a_refs[li]
            hf, wfp, cin = L["hf"], L["wfp"], L["cin"]
            ho, wo, stride = L["ho"], L["wo"], L["stride"]

            # Tap-folded im2col built in VMEM: (hf*wfp, 16*cin) bf16 patch of
            # the stride-1 output grid (wfp sublane-aligned -> free collapse).
            blocks = []
            for ky in range(KW):
                for kx in range(KW):
                    blk = a[ky:ky + hf, kx:kx + wfp, :]
                    blocks.append(blk.reshape(hf * wfp, cin))
            patch = jnp.concatenate(blocks, axis=1).astype(jnp.bfloat16)

            # One MXU matmul per layer: K = 16 * real cin, f32 accumulation.
            out = jnp.dot(patch, w_refs[li][...],
                          preferred_element_type=jnp.float32)

            # Stride 2: pick rows (2*oy, 2*ox) of the stride-1 grid with a
            # small constant 0/1 selection matmul (no strided memory ops).
            if stride == 2:
                out = jnp.dot(s_refs[s_idx][...], out,
                              preferred_element_type=jnp.float32)
                s_idx += 1
                row_pitch = wo         # selected rows are densely packed
            else:
                row_pitch = wfp        # rows live in the stride-1 grid

            out = out + b_refs[li][...]                      # bias, f32
            if L["act"]:
                out = jnp.where(out >= 0.0, out, NEG_SLOPE * out)

            if li + 1 < n:
                # Write into the interior of the next layer's zeroed padded
                # scratch, one output row at a time (padding stays zero).
                Ln = layers[li + 1]
                nxt = a_refs[li + 1]
                nxt[...] = jnp.zeros((Ln["hp"], Ln["wpp"], Ln["cin"]),
                                     jnp.float32)
                for oy in range(ho):
                    nxt[PADW + oy, PADW:PADW + wo, :] = (
                        out[oy * row_pitch:oy * row_pitch + wo, :])
            else:
                if use_sigmoid:
                    out = 1.0 / (1.0 + jnp.exp(-out))
                for oy in range(ho):
                    o_ref[0, oy, :, :] = (
                        out[oy * row_pitch:oy * row_pitch + wo, :]
                        .astype(o_ref.dtype))

    return kernel


# ------------------------------ full forward ------------------------------- #

def no_norm_discriminator_forward(x_nchw, params, n_layers=3, use_sigmoid=False):
    """NoNormDiscriminator forward. x_nchw: (B, C, H, W) f32. Returns NCHW."""
    B, cin0, H, W = x_nchw.shape
    assert len(params) == n_layers + 2
    strides = [2] * n_layers + [1, 1]
    layers = _layer_geometry(H, W, params, strides)
    n = len(layers)

    # NHWC; the only wrapper-side relayout, applied to the small raw input.
    x = jnp.transpose(x_nchw, (0, 2, 3, 1)).astype(jnp.float32)

    cout_last = layers[-1]["cout"]
    cout_pad = max(cout_last, SUB)   # pad the final 1-channel matmul N dim

    wmats, bmats, smats = [], [], []
    for li, ((wt, bias), L) in enumerate(zip(params, layers)):
        cin, cout = L["cin"], L["cout"]
        # (Cout, Cin, ky, kx) -> (ky, kx, ci, co) -> (16*cin, cout); row order
        # matches the in-kernel tap concatenation (ky-major, kx, then ci).
        wm = jnp.transpose(wt.astype(jnp.float32), (2, 3, 1, 0)
                           ).reshape(KW * KW * cin, cout)
        bm = bias.astype(jnp.float32).reshape(1, cout)
        if li == n - 1 and cout_pad != cout:
            wm = jnp.pad(wm, ((0, 0), (0, cout_pad - cout)))
            bm = jnp.pad(bm, ((0, 0), (0, cout_pad - cout)))
        wmats.append(wm.astype(jnp.bfloat16))
        bmats.append(bm)
        if L["stride"] == 2:
            sel = np.zeros((L["ho"] * L["wo"], L["hf"] * L["wfp"]), np.float32)
            for oy in range(L["ho"]):
                for ox in range(L["wo"]):
                    sel[oy * L["wo"] + ox, (2 * oy) * L["wfp"] + 2 * ox] = 1.0
            smats.append(jnp.asarray(sel))

    ho_l, wo_l = layers[-1]["ho"], layers[-1]["wo"]

    operands = [x] + wmats + bmats + smats
    in_specs = [pl.BlockSpec((1, H, W, cin0), lambda b: (b, 0, 0, 0))]
    for arr in wmats + bmats + smats:
        in_specs.append(pl.BlockSpec(arr.shape, lambda b: (0, 0)))

    out_shape = jax.ShapeDtypeStruct((B, ho_l, wo_l, cout_pad), jnp.float32)
    out_specs = pl.BlockSpec((1, ho_l, wo_l, cout_pad), lambda b: (b, 0, 0, 0))

    scratch_shapes = [pltpu.VMEM((L["hp"], L["wpp"], L["cin"]), jnp.float32)
                      for L in layers]

    # VMEM budget: double-buffered operand/output blocks + resident scratch,
    # plus headroom for compiler temporaries (patch matrices, relayouts).
    buf_bytes = _vmem_bytes((1, H, W, cin0), 4)
    buf_bytes += sum(_vmem_bytes(a.shape, a.dtype.itemsize)
                     for a in wmats + bmats + smats)
    buf_bytes += _vmem_bytes((1, ho_l, wo_l, cout_pad), 4)
    scr_bytes = sum(_vmem_bytes((L["hp"], L["wpp"], L["cin"]), 4)
                    for L in layers)
    vmem_limit = min(64 * 1024 * 1024,
                     2 * buf_bytes + scr_bytes + 8 * 1024 * 1024)

    # Cost estimate from real (unpadded) dims.
    flops = 0
    for L in layers:
        flops += 2 * L["ho"] * L["wo"] * KW * KW * L["cin"] * L["cout"]
        if L["stride"] == 2:   # selection matmul
            flops += 2 * L["ho"] * L["wo"] * L["hf"] * L["wfp"] * L["cout"]
    flops *= B
    bytes_accessed = int(4 * x.size
                         + sum(a.size * a.dtype.itemsize
                               for a in wmats + bmats + smats)
                         + 4 * B * ho_l * wo_l * cout_pad)
    transcendentals = B * ho_l * wo_l if use_sigmoid else 0

    fused = pl.pallas_call(
        _make_fused_kernel(layers, use_sigmoid),
        out_shape=out_shape,
        grid_spec=pltpu.PrefetchScalarGridSpec(
            num_scalar_prefetch=0,
            grid=(B,),
            in_specs=in_specs,
            out_specs=out_specs,
            scratch_shapes=scratch_shapes),
        compiler_params=pltpu.CompilerParams(
            dimension_semantics=("parallel",),
            vmem_limit_bytes=int(vmem_limit)),
        cost_estimate=pl.CostEstimate(flops=int(flops),
                                      transcendentals=int(transcendentals),
                                      bytes_accessed=bytes_accessed),
    )(*operands)

    out = fused[..., :cout_last]                   # drop N-padding columns
    return jnp.transpose(out, (0, 3, 1, 2))        # NHWC -> NCHW


# ----------------------- pure-JAX reference (for check) -------------------- #

def _reference(x_nchw, params, n_layers=3, use_sigmoid=False):
    strides = [2] * n_layers + [1, 1]
    h = x_nchw
    for i, (w, b) in enumerate(params):
        h = jax.lax.conv_general_dilated(
            h, w, window_strides=(strides[i], strides[i]),
            padding=[(PADW, PADW), (PADW, PADW)],
            dimension_numbers=("NCHW", "OIHW", "NCHW"),
            precision=jax.lax.Precision.HIGHEST)
        h = h + b[None, :, None, None]
        if i < len(params) - 1:
            h = jnp.where(h >= 0, h, NEG_SLOPE * h)
    if use_sigmoid:
        h = jax.nn.sigmoid(h)
    return h


# --------------------------------- main ------------------------------------ #

if __name__ == "__main__":
    key = jax.random.PRNGKey(0)
    B, input_nc, H, W = 2, 4, 16, 16
    ndf, n_layers = 8, 3
    use_sigmoid = False

    # Channel plan exactly as in NoNormDiscriminator.__init__.
    chans = [input_nc, ndf]
    for nl in range(1, n_layers):
        chans.append(ndf * min(2 ** nl, 8))
    chans.append(ndf * min(2 ** n_layers, 8))
    chans.append(1)                                  # [4, 8, 16, 32, 64, 1]

    keys = jax.random.split(key, 1 + 2 * (len(chans) - 1))
    x = jax.random.normal(keys[0], (B, input_nc, H, W), dtype=jnp.float32)
    params = []
    for i in range(len(chans) - 1):
        cin, cout = chans[i], chans[i + 1]
        bound = 1.0 / (cin * KW * KW) ** 0.5         # PyTorch Conv2d init scale
        w = jax.random.uniform(keys[1 + 2 * i], (cout, cin, KW, KW),
                               jnp.float32, -bound, bound)
        b = jax.random.uniform(keys[2 + 2 * i], (cout,),
                               jnp.float32, -bound, bound)
        params.append((w, b))
    params = tuple(params)

    fwd = jax.jit(functools.partial(no_norm_discriminator_forward,
                                    n_layers=n_layers,
                                    use_sigmoid=use_sigmoid))
    out = jax.block_until_ready(fwd(x, params))
    ref = jax.block_until_ready(
        _reference(x, params, n_layers=n_layers, use_sigmoid=use_sigmoid))

    # 16 -s2-> 9 -s2-> 5 -s2-> 3 -s1-> 4 -s1-> 5 spatial; 1 output channel.
    assert out.shape == ref.shape == (B, 1, 5, 5), (out.shape, ref.shape)
    err = float(jnp.max(jnp.abs(out - ref)))
    scale = float(jnp.max(jnp.abs(ref))) + 1e-6
    # Tolerance sized for bf16 MXU operands (f32 accumulation) through five
    # chained convs (~1e-2 worst case); an all-f32 path would be ~1e-5.
    assert err / scale < 3e-2, f"mismatch vs reference: err={err}, scale={scale}"

    print("KERNEL_OK")
</pallas_src>

<mosaic_0001>
module attributes {stable_mosaic.version = 11 : i64} {
  func.func @kernel(%arg0: i32, %arg1: memref<1x16x16x4xf32, #tpu.memory_space<vmem>>, %arg2: memref<64x8xbf16, #tpu.memory_space<vmem>>, %arg3: memref<128x16xbf16, #tpu.memory_space<vmem>>, %arg4: memref<256x32xbf16, #tpu.memory_space<vmem>>, %arg5: memref<512x64xbf16, #tpu.memory_space<vmem>>, %arg6: memref<1024x8xbf16, #tpu.memory_space<vmem>>, %arg7: memref<1x8xf32, #tpu.memory_space<vmem>>, %arg8: memref<1x16xf32, #tpu.memory_space<vmem>>, %arg9: memref<1x32xf32, #tpu.memory_space<vmem>>, %arg10: memref<1x64xf32, #tpu.memory_space<vmem>>, %arg11: memref<1x8xf32, #tpu.memory_space<vmem>>, %arg12: memref<81x408xf32, #tpu.memory_space<vmem>>, %arg13: memref<25x160xf32, #tpu.memory_space<vmem>>, %arg14: memref<9x48xf32, #tpu.memory_space<vmem>>, %arg15: memref<1x5x5x8xf32, #tpu.memory_space<vmem>>, %arg16: memref<20x27x4xf32, #tpu.memory_space<vmem>>, %arg17: memref<13x19x8xf32, #tpu.memory_space<vmem>>, %arg18: memref<9x11x16xf32, #tpu.memory_space<vmem>>, %arg19: memref<7x11x32xf32, #tpu.memory_space<vmem>>, %arg20: memref<8x11x64xf32, #tpu.memory_space<vmem>>) attributes {dimension_semantics = [#tpu.dimension_semantics<parallel>], iteration_bounds = array<i64: 2>, scalar_prefetch = 0 : i64, scratch_operands = 5 : i64, tpu.core_type = #tpu.core_type<tc>, window_params = [{transform_indices = @transform_0, window_bounds = array<i64: 1, 16, 16, 4>}, {pipeline_mode = #tpu.pipeline_mode<synchronous>, transform_indices = @transform_1, window_bounds = array<i64: 64, 8>}, {pipeline_mode = #tpu.pipeline_mode<synchronous>, transform_indices = @transform_2, window_bounds = array<i64: 128, 16>}, {pipeline_mode = #tpu.pipeline_mode<synchronous>, transform_indices = @transform_3, window_bounds = array<i64: 256, 32>}, {pipeline_mode = #tpu.pipeline_mode<synchronous>, transform_indices = @transform_4, window_bounds = array<i64: 512, 64>}, {pipeline_mode = #tpu.pipeline_mode<synchronous>, transform_indices = @transform_5, window_bounds = array<i64: 1024, 8>}, {pipeline_mode = #tpu.pipeline_mode<synchronous>, transform_indices = @transform_6, window_bounds = array<i64: 1, 8>}, {pipeline_mode = #tpu.pipeline_mode<synchronous>, transform_indices = @transform_7, window_bounds = array<i64: 1, 16>}, {pipeline_mode = #tpu.pipeline_mode<synchronous>, transform_indices = @transform_8, window_bounds = array<i64: 1, 32>}, {pipeline_mode = #tpu.pipeline_mode<synchronous>, transform_indices = @transform_9, window_bounds = array<i64: 1, 64>}, {pipeline_mode = #tpu.pipeline_mode<synchronous>, transform_indices = @transform_10, window_bounds = array<i64: 1, 8>}, {pipeline_mode = #tpu.pipeline_mode<synchronous>, transform_indices = @transform_11, window_bounds = array<i64: 81, 408>}, {pipeline_mode = #tpu.pipeline_mode<synchronous>, transform_indices = @transform_12, window_bounds = array<i64: 25, 160>}, {pipeline_mode = #tpu.pipeline_mode<synchronous>, transform_indices = @transform_13, window_bounds = array<i64: 9, 48>}, {transform_indices = @transform_14, window_bounds = array<i64: 1, 5, 5, 8>}]} {
    %cst = arith.constant 0.000000e+00 : f32
    %0 = vector.broadcast %cst : f32 to vector<20x27x4xf32>
    %c0 = arith.constant 0 : index
    %c0_0 = arith.constant 0 : index
    %c0_1 = arith.constant 0 : index
    %1 = vector.load %arg16[%c0, %c0_0, %c0_1] : memref<20x27x4xf32, #tpu.memory_space<vmem>>, vector<20x27x4xf32>
    tpu.vector_store %arg16[%c0, %c0_0, %c0_1], %0 {strides = array<i32>} : memref<20x27x4xf32, #tpu.memory_space<vmem>>, vector<20x27x4xf32>,
    %c0_2 = arith.constant 0 : index
    %c0_3 = arith.constant 0 : index
    %c0_4 = arith.constant 0 : index
    %c0_5 = arith.constant 0 : index
    %2 = vector.load %arg1[%c0_2, %c0_3, %c0_4, %c0_5] : memref<1x16x16x4xf32, #tpu.memory_space<vmem>>, vector<1x16x16x4xf32>
    %3 = vector.shape_cast %2 : vector<1x16x16x4xf32> to vector<16x16x4xf32>
    %c2 = arith.constant 2 : index
    %c2_6 = arith.constant 2 : index
    %c0_7 = arith.constant 0 : index
    %4 = vector.load %arg16[%c2, %c2_6, %c0_7] : memref<20x27x4xf32, #tpu.memory_space<vmem>>, vector<16x16x4xf32>
    tpu.vector_store %arg16[%c2, %c2_6, %c0_7], %3 {strides = array<i32>} : memref<20x27x4xf32, #tpu.memory_space<vmem>>, vector<16x16x4xf32>,
    %c0_8 = arith.constant 0 : index
    %c0_9 = arith.constant 0 : index
    %c0_10 = arith.constant 0 : index
    %5 = vector.load %arg16[%c0_8, %c0_9, %c0_10] : memref<20x27x4xf32, #tpu.memory_space<vmem>>, vector<17x24x4xf32>
    %6 = vector.shape_cast %5 : vector<17x24x4xf32> to vector<408x4xf32>
    %c0_11 = arith.constant 0 : index
    %c1 = arith.constant 1 : index
    %c0_12 = arith.constant 0 : index
    %7 = vector.load %arg16[%c0_11, %c1, %c0_12] : memref<20x27x4xf32, #tpu.memory_space<vmem>>, vector<17x24x4xf32>
    %8 = vector.shape_cast %7 : vector<17x24x4xf32> to vector<408x4xf32>
    %c0_13 = arith.constant 0 : index
    %c2_14 = arith.constant 2 : index
    %c0_15 = arith.constant 0 : index
    %9 = vector.load %arg16[%c0_13, %c2_14, %c0_15] : memref<20x27x4xf32, #tpu.memory_space<vmem>>, vector<17x24x4xf32>
    %10 = vector.shape_cast %9 : vector<17x24x4xf32> to vector<408x4xf32>
    %c0_16 = arith.constant 0 : index
    %c3 = arith.constant 3 : index
    %c0_17 = arith.constant 0 : index
    %11 = vector.load %arg16[%c0_16, %c3, %c0_17] : memref<20x27x4xf32, #tpu.memory_space<vmem>>, vector<17x24x4xf32>
    %12 = vector.shape_cast %11 : vector<17x24x4xf32> to vector<408x4xf32>
    %c1_18 = arith.constant 1 : index
    %c0_19 = arith.constant 0 : index
    %c0_20 = arith.constant 0 : index
    %13 = vector.load %arg16[%c1_18, %c0_19, %c0_20] : memref<20x27x4xf32, #tpu.memory_space<vmem>>, vector<17x24x4xf32>
    %14 = vector.shape_cast %13 : vector<17x24x4xf32> to vector<408x4xf32>
    %c1_21 = arith.constant 1 : index
    %c1_22 = arith.constant 1 : index
    %c0_23 = arith.constant 0 : index
    %15 = vector.load %arg16[%c1_21, %c1_22, %c0_23] : memref<20x27x4xf32, #tpu.memory_space<vmem>>, vector<17x24x4xf32>
    %16 = vector.shape_cast %15 : vector<17x24x4xf32> to vector<408x4xf32>
    %c1_24 = arith.constant 1 : index
    %c2_25 = arith.constant 2 : index
    %c0_26 = arith.constant 0 : index
    %17 = vector.load %arg16[%c1_24, %c2_25, %c0_26] : memref<20x27x4xf32, #tpu.memory_space<vmem>>, vector<17x24x4xf32>
    %18 = vector.shape_cast %17 : vector<17x24x4xf32> to vector<408x4xf32>
    %c1_27 = arith.constant 1 : index
    %c3_28 = arith.constant 3 : index
    %c0_29 = arith.constant 0 : index
    %19 = vector.load %arg16[%c1_27, %c3_28, %c0_29] : memref<20x27x4xf32, #tpu.memory_space<vmem>>, vector<17x24x4xf32>
    %20 = vector.shape_cast %19 : vector<17x24x4xf32> to vector<408x4xf32>
    %c2_30 = arith.constant 2 : index
    %c0_31 = arith.constant 0 : index
    %c0_32 = arith.constant 0 : index
    %21 = vector.load %arg16[%c2_30, %c0_31, %c0_32] : memref<20x27x4xf32, #tpu.memory_space<vmem>>, vector<17x24x4xf32>
    %22 = vector.shape_cast %21 : vector<17x24x4xf32> to vector<408x4xf32>
    %c2_33 = arith.constant 2 : index
    %c1_34 = arith.constant 1 : index
    %c0_35 = arith.constant 0 : index
    %23 = vector.load %arg16[%c2_33, %c1_34, %c0_35] : memref<20x27x4xf32, #tpu.memory_space<vmem>>, vector<17x24x4xf32>
    %24 = vector.shape_cast %23 : vector<17x24x4xf32> to vector<408x4xf32>
    %c2_36 = arith.constant 2 : index
    %c2_37 = arith.constant 2 : index
    %c0_38 = arith.constant 0 : index
    %25 = vector.load %arg16[%c2_36, %c2_37, %c0_38] : memref<20x27x4xf32, #tpu.memory_space<vmem>>, vector<17x24x4xf32>
    %26 = vector.shape_cast %25 : vector<17x24x4xf32> to vector<408x4xf32>
    %c2_39 = arith.constant 2 : index
    %c3_40 = arith.constant 3 : index
    %c0_41 = arith.constant 0 : index
    %27 = vector.load %arg16[%c2_39, %c3_40, %c0_41] : memref<20x27x4xf32, #tpu.memory_space<vmem>>, vector<17x24x4xf32>
    %28 = vector.shape_cast %27 : vector<17x24x4xf32> to vector<408x4xf32>
    %c3_42 = arith.constant 3 : index
    %c0_43 = arith.constant 0 : index
    %c0_44 = arith.constant 0 : index
    %29 = vector.load %arg16[%c3_42, %c0_43, %c0_44] : memref<20x27x4xf32, #tpu.memory_space<vmem>>, vector<17x24x4xf32>
    %30 = vector.shape_cast %29 : vector<17x24x4xf32> to vector<408x4xf32>
    %c3_45 = arith.constant 3 : index
    %c1_46 = arith.constant 1 : index
    %c0_47 = arith.constant 0 : index
    %31 = vector.load %arg16[%c3_45, %c1_46, %c0_47] : memref<20x27x4xf32, #tpu.memory_space<vmem>>, vector<17x24x4xf32>
    %32 = vector.shape_cast %31 : vector<17x24x4xf32> to vector<408x4xf32>
    %c3_48 = arith.constant 3 : index
    %c2_49 = arith.constant 2 : index
    %c0_50 = arith.constant 0 : index
    %33 = vector.load %arg16[%c3_48, %c2_49, %c0_50] : memref<20x27x4xf32, #tpu.memory_space<vmem>>, vector<17x24x4xf32>
    %34 = vector.shape_cast %33 : vector<17x24x4xf32> to vector<408x4xf32>
    %c3_51 = arith.constant 3 : index
    %c3_52 = arith.constant 3 : index
    %c0_53 = arith.constant 0 : index
    %35 = vector.load %arg16[%c3_51, %c3_52, %c0_53] : memref<20x27x4xf32, #tpu.memory_space<vmem>>, vector<17x24x4xf32>
    %36 = vector.shape_cast %35 : vector<17x24x4xf32> to vector<408x4xf32>
    %37 = tpu.concatenate %6, %8, %10, %12, %14, %16, %18, %20, %22, %24, %26, %28, %30, %32, %34, %36 in 1 : vector<408x4xf32>, vector<408x4xf32>, vector<408x4xf32>, vector<408x4xf32>, vector<408x4xf32>, vector<408x4xf32>, vector<408x4xf32>, vector<408x4xf32>, vector<408x4xf32>, vector<408x4xf32>, vector<408x4xf32>, vector<408x4xf32>, vector<408x4xf32>, vector<408x4xf32>, vector<408x4xf32>, vector<408x4xf32> -> vector<408x64xf32>
    %38 = arith.truncf %37 : vector<408x64xf32> to vector<408x64xbf16>
    %c0_54 = arith.constant 0 : index
    %c0_55 = arith.constant 0 : index
    %39 = vector.load %arg2[%c0_54, %c0_55] : memref<64x8xbf16, #tpu.memory_space<vmem>>, vector<64x8xbf16>
    %cst_56 = arith.constant dense<0.000000e+00> : vector<408x8xf32>
    %40 = tpu.matmul %38, %39, %cst_56 {dimension_numbers = #tpu.dot_dimension_numbers<[1], [0], [0], [1], [0, 0, 1, 1], [], []>} : vector<408x64xbf16>, vector<64x8xbf16>, vector<408x8xf32> -> vector<408x8xf32>
    %c0_57 = arith.constant 0 : index
    %c0_58 = arith.constant 0 : index
    %41 = vector.load %arg12[%c0_57, %c0_58] : memref<81x408xf32, #tpu.memory_space<vmem>>, vector<81x408xf32>
    %cst_59 = arith.constant dense<0.000000e+00> : vector<81x8xf32>
    %42 = tpu.matmul %41, %40, %cst_59 {dimension_numbers = #tpu.dot_dimension_numbers<[1], [0], [0], [1], [0, 0, 1, 1], [], []>} : vector<81x408xf32>, vector<408x8xf32>, vector<81x8xf32> -> vector<81x8xf32>
    %c0_60 = arith.constant 0 : index
    %c0_61 = arith.constant 0 : index
    %43 = vector.load %arg7[%c0_60, %c0_61] : memref<1x8xf32, #tpu.memory_space<vmem>>, vector<1x8xf32>
    %44 = vector.broadcast %43 : vector<1x8xf32> to vector<81x8xf32>
    %45 = arith.addf %42, %44 : vector<81x8xf32>
    %cst_62 = arith.constant 0.000000e+00 : f32
    %46 = vector.broadcast %cst_62 : f32 to vector<81x8xf32>
    %47 = arith.cmpf oge, %45, %46 : vector<81x8xf32>
    %cst_63 = arith.constant 2.000000e-01 : f32
    %48 = vector.broadcast %cst_63 : f32 to vector<81x8xf32>
    %49 = arith.mulf %48, %45 : vector<81x8xf32>
    %50 = arith.select %47, %45, %49 : vector<81x8xi1>, vector<81x8xf32>
    %cst_64 = arith.constant 0.000000e+00 : f32
    %51 = vector.broadcast %cst_64 : f32 to vector<13x19x8xf32>
    %c0_65 = arith.constant 0 : index
    %c0_66 = arith.constant 0 : index
    %c0_67 = arith.constant 0 : index
    %52 = vector.load %arg17[%c0_65, %c0_66, %c0_67] : memref<13x19x8xf32, #tpu.memory_space<vmem>>, vector<13x19x8xf32>
    tpu.vector_store %arg17[%c0_65, %c0_66, %c0_67], %51 {strides = array<i32>} : memref<13x19x8xf32, #tpu.memory_space<vmem>>, vector<13x19x8xf32>,
    %53 = vector.extract_strided_slice %50 {offsets = [0, 0], sizes = [9, 8], strides = [1, 1]} : vector<81x8xf32> to vector<9x8xf32>
    %c2_68 = arith.constant 2 : index
    %c2_69 = arith.constant 2 : index
    %c0_70 = arith.constant 0 : index
    %54 = vector.load %arg17[%c2_68, %c2_69, %c0_70] : memref<13x19x8xf32, #tpu.memory_space<vmem>>, vector<1x9x8xf32>
    %55 = vector.shape_cast %54 : vector<1x9x8xf32> to vector<9x8xf32>
    %56 = vector.shape_cast %53 : vector<9x8xf32> to vector<1x9x8xf32>
    tpu.vector_store %arg17[%c2_68, %c2_69, %c0_70], %56 {strides = array<i32>} : memref<13x19x8xf32, #tpu.memory_space<vmem>>, vector<1x9x8xf32>,
    %57 = vector.extract_strided_slice %50 {offsets = [9, 0], sizes = [9, 8], strides = [1, 1]} : vector<81x8xf32> to vector<9x8xf32>
    %c3_71 = arith.constant 3 : index
    %c2_72 = arith.constant 2 : index
    %c0_73 = arith.constant 0 : index
    %58 = vector.load %arg17[%c3_71, %c2_72, %c0_73] : memref<13x19x8xf32, #tpu.memory_space<vmem>>, vector<1x9x8xf32>
    %59 = vector.shape_cast %58 : vector<1x9x8xf32> to vector<9x8xf32>
    %60 = vector.shape_cast %57 : vector<9x8xf32> to vector<1x9x8xf32>
    tpu.vector_store %arg17[%c3_71, %c2_72, %c0_73], %60 {strides = array<i32>} : memref<13x19x8xf32, #tpu.memory_space<vmem>>, vector<1x9x8xf32>,
    %61 = vector.extract_strided_slice %50 {offsets = [18, 0], sizes = [9, 8], strides = [1, 1]} : vector<81x8xf32> to vector<9x8xf32>
    %c4 = arith.constant 4 : index
    %c2_74 = arith.constant 2 : index
    %c0_75 = arith.constant 0 : index
    %62 = vector.load %arg17[%c4, %c2_74, %c0_75] : memref<13x19x8xf32, #tpu.memory_space<vmem>>, vector<1x9x8xf32>
    %63 = vector.shape_cast %62 : vector<1x9x8xf32> to vector<9x8xf32>
    %64 = vector.shape_cast %61 : vector<9x8xf32> to vector<1x9x8xf32>
    tpu.vector_store %arg17[%c4, %c2_74, %c0_75], %64 {strides = array<i32>} : memref<13x19x8xf32, #tpu.memory_space<vmem>>, vector<1x9x8xf32>,
    %65 = vector.extract_strided_slice %50 {offsets = [27, 0], sizes = [9, 8], strides = [1, 1]} : vector<81x8xf32> to vector<9x8xf32>
    %c5 = arith.constant 5 : index
    %c2_76 = arith.constant 2 : index
    %c0_77 = arith.constant 0 : index
    %66 = vector.load %arg17[%c5, %c2_76, %c0_77] : memref<13x19x8xf32, #tpu.memory_space<vmem>>, vector<1x9x8xf32>
    %67 = vector.shape_cast %66 : vector<1x9x8xf32> to vector<9x8xf32>
    %68 = vector.shape_cast %65 : vector<9x8xf32> to vector<1x9x8xf32>
    tpu.vector_store %arg17[%c5, %c2_76, %c0_77], %68 {strides = array<i32>} : memref<13x19x8xf32, #tpu.memory_space<vmem>>, vector<1x9x8xf32>,
    %69 = vector.extract_strided_slice %50 {offsets = [36, 0], sizes = [9, 8], strides = [1, 1]} : vector<81x8xf32> to vector<9x8xf32>
    %c6 = arith.constant 6 : index
    %c2_78 = arith.constant 2 : index
    %c0_79 = arith.constant 0 : index
    %70 = vector.load %arg17[%c6, %c2_78, %c0_79] : memref<13x19x8xf32, #tpu.memory_space<vmem>>, vector<1x9x8xf32>
    %71 = vector.shape_cast %70 : vector<1x9x8xf32> to vector<9x8xf32>
    %72 = vector.shape_cast %69 : vector<9x8xf32> to vector<1x9x8xf32>
    tpu.vector_store %arg17[%c6, %c2_78, %c0_79], %72 {strides = array<i32>} : memref<13x19x8xf32, #tpu.memory_space<vmem>>, vector<1x9x8xf32>,
    %73 = vector.extract_strided_slice %50 {offsets = [45, 0], sizes = [9, 8], strides = [1, 1]} : vector<81x8xf32> to vector<9x8xf32>
    %c7 = arith.constant 7 : index
    %c2_80 = arith.constant 2 : index
    %c0_81 = arith.constant 0 : index
    %74 = vector.load %arg17[%c7, %c2_80, %c0_81] : memref<13x19x8xf32, #tpu.memory_space<vmem>>, vector<1x9x8xf32>
    %75 = vector.shape_cast %74 : vector<1x9x8xf32> to vector<9x8xf32>
    %76 = vector.shape_cast %73 : vector<9x8xf32> to vector<1x9x8xf32>
    tpu.vector_store %arg17[%c7, %c2_80, %c0_81], %76 {strides = array<i32>} : memref<13x19x8xf32, #tpu.memory_space<vmem>>, vector<1x9x8xf32>,
    %77 = vector.extract_strided_slice %50 {offsets = [54, 0], sizes = [9, 8], strides = [1, 1]} : vector<81x8xf32> to vector<9x8xf32>
    %c8 = arith.constant 8 : index
    %c2_82 = arith.constant 2 : index
    %c0_83 = arith.constant 0 : index
    %78 = vector.load %arg17[%c8, %c2_82, %c0_83] : memref<13x19x8xf32, #tpu.memory_space<vmem>>, vector<1x9x8xf32>
    %79 = vector.shape_cast %78 : vector<1x9x8xf32> to vector<9x8xf32>
    %80 = vector.shape_cast %77 : vector<9x8xf32> to vector<1x9x8xf32>
    tpu.vector_store %arg17[%c8, %c2_82, %c0_83], %80 {strides = array<i32>} : memref<13x19x8xf32, #tpu.memory_space<vmem>>, vector<1x9x8xf32>,
    %81 = vector.extract_strided_slice %50 {offsets = [63, 0], sizes = [9, 8], strides = [1, 1]} : vector<81x8xf32> to vector<9x8xf32>
    %c9 = arith.constant 9 : index
    %c2_84 = arith.constant 2 : index
    %c0_85 = arith.constant 0 : index
    %82 = vector.load %arg17[%c9, %c2_84, %c0_85] : memref<13x19x8xf32, #tpu.memory_space<vmem>>, vector<1x9x8xf32>
    %83 = vector.shape_cast %82 : vector<1x9x8xf32> to vector<9x8xf32>
    %84 = vector.shape_cast %81 : vector<9x8xf32> to vector<1x9x8xf32>
    tpu.vector_store %arg17[%c9, %c2_84, %c0_85], %84 {strides = array<i32>} : memref<13x19x8xf32, #tpu.memory_space<vmem>>, vector<1x9x8xf32>,
    %85 = vector.extract_strided_slice %50 {offsets = [72, 0], sizes = [9, 8], strides = [1, 1]} : vector<81x8xf32> to vector<9x8xf32>
    %c10 = arith.constant 10 : index
    %c2_86 = arith.constant 2 : index
    %c0_87 = arith.constant 0 : index
    %86 = vector.load %arg17[%c10, %c2_86, %c0_87] : memref<13x19x8xf32, #tpu.memory_space<vmem>>, vector<1x9x8xf32>
    %87 = vector.shape_cast %86 : vector<1x9x8xf32> to vector<9x8xf32>
    %88 = vector.shape_cast %85 : vector<9x8xf32> to vector<1x9x8xf32>
    tpu.vector_store %arg17[%c10, %c2_86, %c0_87], %88 {strides = array<i32>} : memref<13x19x8xf32, #tpu.memory_space<vmem>>, vector<1x9x8xf32>,
    %c0_88 = arith.constant 0 : index
    %c0_89 = arith.constant 0 : index
    %c0_90 = arith.constant 0 : index
    %89 = vector.load %arg17[%c0_88, %c0_89, %c0_90] : memref<13x19x8xf32, #tpu.memory_space<vmem>>, vector<10x16x8xf32>
    %90 = vector.shape_cast %89 : vector<10x16x8xf32> to vector<160x8xf32>
    %c0_91 = arith.constant 0 : index
    %c1_92 = arith.constant 1 : index
    %c0_93 = arith.constant 0 : index
    %91 = vector.load %arg17[%c0_91, %c1_92, %c0_93] : memref<13x19x8xf32, #tpu.memory_space<vmem>>, vector<10x16x8xf32>
    %92 = vector.shape_cast %91 : vector<10x16x8xf32> to vector<160x8xf32>
    %c0_94 = arith.constant 0 : index
    %c2_95 = arith.constant 2 : index
    %c0_96 = arith.constant 0 : index
    %93 = vector.load %arg17[%c0_94, %c2_95, %c0_96] : memref<13x19x8xf32, #tpu.memory_space<vmem>>, vector<10x16x8xf32>
    %94 = vector.shape_cast %93 : vector<10x16x8xf32> to vector<160x8xf32>
    %c0_97 = arith.constant 0 : index
    %c3_98 = arith.constant 3 : index
    %c0_99 = arith.constant 0 : index
    %95 = vector.load %arg17[%c0_97, %c3_98, %c0_99] : memref<13x19x8xf32, #tpu.memory_space<vmem>>, vector<10x16x8xf32>
    %96 = vector.shape_cast %95 : vector<10x16x8xf32> to vector<160x8xf32>
    %c1_100 = arith.constant 1 : index
    %c0_101 = arith.constant 0 : index
    %c0_102 = arith.constant 0 : index
    %97 = vector.load %arg17[%c1_100, %c0_101, %c0_102] : memref<13x19x8xf32, #tpu.memory_space<vmem>>, vector<10x16x8xf32>
    %98 = vector.shape_cast %97 : vector<10x16x8xf32> to vector<160x8xf32>
    %c1_103 = arith.constant 1 : index
    %c1_104 = arith.constant 1 : index
    %c0_105 = arith.constant 0 : index
    %99 = vector.load %arg17[%c1_103, %c1_104, %c0_105] : memref<13x19x8xf32, #tpu.memory_space<vmem>>, vector<10x16x8xf32>
    %100 = vector.shape_cast %99 : vector<10x16x8xf32> to vector<160x8xf32>
    %c1_106 = arith.constant 1 : index
    %c2_107 = arith.constant 2 : index
    %c0_108 = arith.constant 0 : index
    %101 = vector.load %arg17[%c1_106, %c2_107, %c0_108] : memref<13x19x8xf32, #tpu.memory_space<vmem>>, vector<10x16x8xf32>
    %102 = vector.shape_cast %101 : vector<10x16x8xf32> to vector<160x8xf32>
    %c1_109 = arith.constant 1 : index
    %c3_110 = arith.constant 3 : index
    %c0_111 = arith.constant 0 : index
    %103 = vector.load %arg17[%c1_109, %c3_110, %c0_111] : memref<13x19x8xf32, #tpu.memory_space<vmem>>, vector<10x16x8xf32>
    %104 = vector.shape_cast %103 : vector<10x16x8xf32> to vector<160x8xf32>
    %c2_112 = arith.constant 2 : index
    %c0_113 = arith.constant 0 : index
    %c0_114 = arith.constant 0 : index
    %105 = vector.load %arg17[%c2_112, %c0_113, %c0_114] : memref<13x19x8xf32, #tpu.memory_space<vmem>>, vector<10x16x8xf32>
    %106 = vector.shape_cast %105 : vector<10x16x8xf32> to vector<160x8xf32>
    %c2_115 = arith.constant 2 : index
    %c1_116 = arith.constant 1 : index
    %c0_117 = arith.constant 0 : index
    %107 = vector.load %arg17[%c2_115, %c1_116, %c0_117] : memref<13x19x8xf32, #tpu.memory_space<vmem>>, vector<10x16x8xf32>
    %108 = vector.shape_cast %107 : vector<10x16x8xf32> to vector<160x8xf32>
    %c2_118 = arith.constant 2 : index
    %c2_119 = arith.constant 2 : index
    %c0_120 = arith.constant 0 : index
    %109 = vector.load %arg17[%c2_118, %c2_119, %c0_120] : memref<13x19x8xf32, #tpu.memory_space<vmem>>, vector<10x16x8xf32>
    %110 = vector.shape_cast %109 : vector<10x16x8xf32> to vector<160x8xf32>
    %c2_121 = arith.constant 2 : index
    %c3_122 = arith.constant 3 : index
    %c0_123 = arith.constant 0 : index
    %111 = vector.load %arg17[%c2_121, %c3_122, %c0_123] : memref<13x19x8xf32, #tpu.memory_space<vmem>>, vector<10x16x8xf32>
    %112 = vector.shape_cast %111 : vector<10x16x8xf32> to vector<160x8xf32>
    %c3_124 = arith.constant 3 : index
    %c0_125 = arith.constant 0 : index
    %c0_126 = arith.constant 0 : index
    %113 = vector.load %arg17[%c3_124, %c0_125, %c0_126] : memref<13x19x8xf32, #tpu.memory_space<vmem>>, vector<10x16x8xf32>
    %114 = vector.shape_cast %113 : vector<10x16x8xf32> to vector<160x8xf32>
    %c3_127 = arith.constant 3 : index
    %c1_128 = arith.constant 1 : index
    %c0_129 = arith.constant 0 : index
    %115 = vector.load %arg17[%c3_127, %c1_128, %c0_129] : memref<13x19x8xf32, #tpu.memory_space<vmem>>, vector<10x16x8xf32>
    %116 = vector.shape_cast %115 : vector<10x16x8xf32> to vector<160x8xf32>
    %c3_130 = arith.constant 3 : index
    %c2_131 = arith.constant 2 : index
    %c0_132 = arith.constant 0 : index
    %117 = vector.load %arg17[%c3_130, %c2_131, %c0_132] : memref<13x19x8xf32, #tpu.memory_space<vmem>>, vector<10x16x8xf32>
    %118 = vector.shape_cast %117 : vector<10x16x8xf32> to vector<160x8xf32>
    %c3_133 = arith.constant 3 : index
    %c3_134 = arith.constant 3 : index
    %c0_135 = arith.constant 0 : index
    %119 = vector.load %arg17[%c3_133, %c3_134, %c0_135] : memref<13x19x8xf32, #tpu.memory_space<vmem>>, vector<10x16x8xf32>
    %120 = vector.shape_cast %119 : vector<10x16x8xf32> to vector<160x8xf32>
    %121 = tpu.concatenate %90, %92, %94, %96, %98, %100, %102, %104, %106, %108, %110, %112, %114, %116, %118, %120 in 1 : vector<160x8xf32>, vector<160x8xf32>, vector<160x8xf32>, vector<160x8xf32>, vector<160x8xf32>, vector<160x8xf32>, vector<160x8xf32>, vector<160x8xf32>, vector<160x8xf32>, vector<160x8xf32>, vector<160x8xf32>, vector<160x8xf32>, vector<160x8xf32>, vector<160x8xf32>, vector<160x8xf32>, vector<160x8xf32> -> vector<160x128xf32>
    %122 = arith.truncf %121 : vector<160x128xf32> to vector<160x128xbf16>
    %c0_136 = arith.constant 0 : index
    %c0_137 = arith.constant 0 : index
    %123 = vector.load %arg3[%c0_136, %c0_137] : memref<128x16xbf16, #tpu.memory_space<vmem>>, vector<128x16xbf16>
    %cst_138 = arith.constant dense<0.000000e+00> : vector<160x16xf32>
    %124 = tpu.matmul %122, %123, %cst_138 {dimension_numbers = #tpu.dot_dimension_numbers<[1], [0], [0], [1], [0, 0, 1, 1], [], []>} : vector<160x128xbf16>, vector<128x16xbf16>, vector<160x16xf32> -> vector<160x16xf32>
    %c0_139 = arith.constant 0 : index
    %c0_140 = arith.constant 0 : index
    %125 = vector.load %arg13[%c0_139, %c0_140] : memref<25x160xf32, #tpu.memory_space<vmem>>, vector<25x160xf32>
    %cst_141 = arith.constant dense<0.000000e+00> : vector<25x16xf32>
    %126 = tpu.matmul %125, %124, %cst_141 {dimension_numbers = #tpu.dot_dimension_numbers<[1], [0], [0], [1], [0, 0, 1, 1], [], []>} : vector<25x160xf32>, vector<160x16xf32>, vector<25x16xf32> -> vector<25x16xf32>
    %c0_142 = arith.constant 0 : index
    %c0_143 = arith.constant 0 : index
    %127 = vector.load %arg8[%c0_142, %c0_143] : memref<1x16xf32, #tpu.memory_space<vmem>>, vector<1x16xf32>
    %128 = vector.broadcast %127 : vector<1x16xf32> to vector<25x16xf32>
    %129 = arith.addf %126, %128 : vector<25x16xf32>
    %cst_144 = arith.constant 0.000000e+00 : f32
    %130 = vector.broadcast %cst_144 : f32 to vector<25x16xf32>
    %131 = arith.cmpf oge, %129, %130 : vector<25x16xf32>
    %cst_145 = arith.constant 2.000000e-01 : f32
    %132 = vector.broadcast %cst_145 : f32 to vector<25x16xf32>
    %133 = arith.mulf %132, %129 : vector<25x16xf32>
    %134 = arith.select %131, %129, %133 : vector<25x16xi1>, vector<25x16xf32>
    %cst_146 = arith.constant 0.000000e+00 : f32
    %135 = vector.broadcast %cst_146 : f32 to vector<9x11x16xf32>
    %c0_147 = arith.constant 0 : index
    %c0_148 = arith.constant 0 : index
    %c0_149 = arith.constant 0 : index
    %136 = vector.load %arg18[%c0_147, %c0_148, %c0_149] : memref<9x11x16xf32, #tpu.memory_space<vmem>>, vector<9x11x16xf32>
    tpu.vector_store %arg18[%c0_147, %c0_148, %c0_149], %135 {strides = array<i32>} : memref<9x11x16xf32, #tpu.memory_space<vmem>>, vector<9x11x16xf32>,
    %137 = vector.extract_strided_slice %134 {offsets = [0, 0], sizes = [5, 16], strides = [1, 1]} : vector<25x16xf32> to vector<5x16xf32>
    %c2_150 = arith.constant 2 : index
    %c2_151 = arith.constant 2 : index
    %c0_152 = arith.constant 0 : index
    %138 = vector.load %arg18[%c2_150, %c2_151, %c0_152] : memref<9x11x16xf32, #tpu.memory_space<vmem>>, vector<1x5x16xf32>
    %139 = vector.shape_cast %138 : vector<1x5x16xf32> to vector<5x16xf32>
    %140 = vector.shape_cast %137 : vector<5x16xf32> to vector<1x5x16xf32>
    tpu.vector_store %arg18[%c2_150, %c2_151, %c0_152], %140 {strides = array<i32>} : memref<9x11x16xf32, #tpu.memory_space<vmem>>, vector<1x5x16xf32>,
    %141 = vector.extract_strided_slice %134 {offsets = [5, 0], sizes = [5, 16], strides = [1, 1]} : vector<25x16xf32> to vector<5x16xf32>
    %c3_153 = arith.constant 3 : index
    %c2_154 = arith.constant 2 : index
    %c0_155 = arith.constant 0 : index
    %142 = vector.load %arg18[%c3_153, %c2_154, %c0_155] : memref<9x11x16xf32, #tpu.memory_space<vmem>>, vector<1x5x16xf32>
    %143 = vector.shape_cast %142 : vector<1x5x16xf32> to vector<5x16xf32>
    %144 = vector.shape_cast %141 : vector<5x16xf32> to vector<1x5x16xf32>
    tpu.vector_store %arg18[%c3_153, %c2_154, %c0_155], %144 {strides = array<i32>} : memref<9x11x16xf32, #tpu.memory_space<vmem>>, vector<1x5x16xf32>,
    %145 = vector.extract_strided_slice %134 {offsets = [10, 0], sizes = [5, 16], strides = [1, 1]} : vector<25x16xf32> to vector<5x16xf32>
    %c4_156 = arith.constant 4 : index
    %c2_157 = arith.constant 2 : index
    %c0_158 = arith.constant 0 : index
    %146 = vector.load %arg18[%c4_156, %c2_157, %c0_158] : memref<9x11x16xf32, #tpu.memory_space<vmem>>, vector<1x5x16xf32>
    %147 = vector.shape_cast %146 : vector<1x5x16xf32> to vector<5x16xf32>
    %148 = vector.shape_cast %145 : vector<5x16xf32> to vector<1x5x16xf32>
    tpu.vector_store %arg18[%c4_156, %c2_157, %c0_158], %148 {strides = array<i32>} : memref<9x11x16xf32, #tpu.memory_space<vmem>>, vector<1x5x16xf32>,
    %149 = vector.extract_strided_slice %134 {offsets = [15, 0], sizes = [5, 16], strides = [1, 1]} : vector<25x16xf32> to vector<5x16xf32>
    %c5_159 = arith.constant 5 : index
    %c2_160 = arith.constant 2 : index
    %c0_161 = arith.constant 0 : index
    %150 = vector.load %arg18[%c5_159, %c2_160, %c0_161] : memref<9x11x16xf32, #tpu.memory_space<vmem>>, vector<1x5x16xf32>
    %151 = vector.shape_cast %150 : vector<1x5x16xf32> to vector<5x16xf32>
    %152 = vector.shape_cast %149 : vector<5x16xf32> to vector<1x5x16xf32>
    tpu.vector_store %arg18[%c5_159, %c2_160, %c0_161], %152 {strides = array<i32>} : memref<9x11x16xf32, #tpu.memory_space<vmem>>, vector<1x5x16xf32>,
    %153 = vector.extract_strided_slice %134 {offsets = [20, 0], sizes = [5, 16], strides = [1, 1]} : vector<25x16xf32> to vector<5x16xf32>
    %c6_162 = arith.constant 6 : index
    %c2_163 = arith.constant 2 : index
    %c0_164 = arith.constant 0 : index
    %154 = vector.load %arg18[%c6_162, %c2_163, %c0_164] : memref<9x11x16xf32, #tpu.memory_space<vmem>>, vector<1x5x16xf32>
    %155 = vector.shape_cast %154 : vector<1x5x16xf32> to vector<5x16xf32>
    %156 = vector.shape_cast %153 : vector<5x16xf32> to vector<1x5x16xf32>
    tpu.vector_store %arg18[%c6_162, %c2_163, %c0_164], %156 {strides = array<i32>} : memref<9x11x16xf32, #tpu.memory_space<vmem>>, vector<1x5x16xf32>,
    %c0_165 = arith.constant 0 : index
    %c0_166 = arith.constant 0 : index
    %c0_167 = arith.constant 0 : index
    %157 = vector.load %arg18[%c0_165, %c0_166, %c0_167] : memref<9x11x16xf32, #tpu.memory_space<vmem>>, vector<6x8x16xf32>
    %158 = vector.shape_cast %157 : vector<6x8x16xf32> to vector<48x16xf32>
    %c0_168 = arith.constant 0 : index
    %c1_169 = arith.constant 1 : index
    %c0_170 = arith.constant 0 : index
    %159 = vector.load %arg18[%c0_168, %c1_169, %c0_170] : memref<9x11x16xf32, #tpu.memory_space<vmem>>, vector<6x8x16xf32>
    %160 = vector.shape_cast %159 : vector<6x8x16xf32> to vector<48x16xf32>
    %c0_171 = arith.constant 0 : index
    %c2_172 = arith.constant 2 : index
    %c0_173 = arith.constant 0 : index
    %161 = vector.load %arg18[%c0_171, %c2_172, %c0_173] : memref<9x11x16xf32, #tpu.memory_space<vmem>>, vector<6x8x16xf32>
    %162 = vector.shape_cast %161 : vector<6x8x16xf32> to vector<48x16xf32>
    %c0_174 = arith.constant 0 : index
    %c3_175 = arith.constant 3 : index
    %c0_176 = arith.constant 0 : index
    %163 = vector.load %arg18[%c0_174, %c3_175, %c0_176] : memref<9x11x16xf32, #tpu.memory_space<vmem>>, vector<6x8x16xf32>
    %164 = vector.shape_cast %163 : vector<6x8x16xf32> to vector<48x16xf32>
    %c1_177 = arith.constant 1 : index
    %c0_178 = arith.constant 0 : index
    %c0_179 = arith.constant 0 : index
    %165 = vector.load %arg18[%c1_177, %c0_178, %c0_179] : memref<9x11x16xf32, #tpu.memory_space<vmem>>, vector<6x8x16xf32>
    %166 = vector.shape_cast %165 : vector<6x8x16xf32> to vector<48x16xf32>
    %c1_180 = arith.constant 1 : index
    %c1_181 = arith.constant 1 : index
    %c0_182 = arith.constant 0 : index
    %167 = vector.load %arg18[%c1_180, %c1_181, %c0_182] : memref<9x11x16xf32, #tpu.memory_space<vmem>>, vector<6x8x16xf32>
    %168 = vector.shape_cast %167 : vector<6x8x16xf32> to vector<48x16xf32>
    %c1_183 = arith.constant 1 : index
    %c2_184 = arith.constant 2 : index
    %c0_185 = arith.constant 0 : index
    %169 = vector.load %arg18[%c1_183, %c2_184, %c0_185] : memref<9x11x16xf32, #tpu.memory_space<vmem>>, vector<6x8x16xf32>
    %170 = vector.shape_cast %169 : vector<6x8x16xf32> to vector<48x16xf32>
    %c1_186 = arith.constant 1 : index
    %c3_187 = arith.constant 3 : index
    %c0_188 = arith.constant 0 : index
    %171 = vector.load %arg18[%c1_186, %c3_187, %c0_188] : memref<9x11x16xf32, #tpu.memory_space<vmem>>, vector<6x8x16xf32>
    %172 = vector.shape_cast %171 : vector<6x8x16xf32> to vector<48x16xf32>
    %c2_189 = arith.constant 2 : index
    %c0_190 = arith.constant 0 : index
    %c0_191 = arith.constant 0 : index
    %173 = vector.load %arg18[%c2_189, %c0_190, %c0_191] : memref<9x11x16xf32, #tpu.memory_space<vmem>>, vector<6x8x16xf32>
    %174 = vector.shape_cast %173 : vector<6x8x16xf32> to vector<48x16xf32>
    %c2_192 = arith.constant 2 : index
    %c1_193 = arith.constant 1 : index
    %c0_194 = arith.constant 0 : index
    %175 = vector.load %arg18[%c2_192, %c1_193, %c0_194] : memref<9x11x16xf32, #tpu.memory_space<vmem>>, vector<6x8x16xf32>
    %176 = vector.shape_cast %175 : vector<6x8x16xf32> to vector<48x16xf32>
    %c2_195 = arith.constant 2 : index
    %c2_196 = arith.constant 2 : index
    %c0_197 = arith.constant 0 : index
    %177 = vector.load %arg18[%c2_195, %c2_196, %c0_197] : memref<9x11x16xf32, #tpu.memory_space<vmem>>, vector<6x8x16xf32>
    %178 = vector.shape_cast %177 : vector<6x8x16xf32> to vector<48x16xf32>
    %c2_198 = arith.constant 2 : index
    %c3_199 = arith.constant 3 : index
    %c0_200 = arith.constant 0 : index
    %179 = vector.load %arg18[%c2_198, %c3_199, %c0_200] : memref<9x11x16xf32, #tpu.memory_space<vmem>>, vector<6x8x16xf32>
    %180 = vector.shape_cast %179 : vector<6x8x16xf32> to vector<48x16xf32>
    %c3_201 = arith.constant 3 : index
    %c0_202 = arith.constant 0 : index
    %c0_203 = arith.constant 0 : index
    %181 = vector.load %arg18[%c3_201, %c0_202, %c0_203] : memref<9x11x16xf32, #tpu.memory_space<vmem>>, vector<6x8x16xf32>
    %182 = vector.shape_cast %181 : vector<6x8x16xf32> to vector<48x16xf32>
    %c3_204 = arith.constant 3 : index
    %c1_205 = arith.constant 1 : index
    %c0_206 = arith.constant 0 : index
    %183 = vector.load %arg18[%c3_204, %c1_205, %c0_206] : memref<9x11x16xf32, #tpu.memory_space<vmem>>, vector<6x8x16xf32>
    %184 = vector.shape_cast %183 : vector<6x8x16xf32> to vector<48x16xf32>
    %c3_207 = arith.constant 3 : index
    %c2_208 = arith.constant 2 : index
    %c0_209 = arith.constant 0 : index
    %185 = vector.load %arg18[%c3_207, %c2_208, %c0_209] : memref<9x11x16xf32, #tpu.memory_space<vmem>>, vector<6x8x16xf32>
    %186 = vector.shape_cast %185 : vector<6x8x16xf32> to vector<48x16xf32>
    %c3_210 = arith.constant 3 : index
    %c3_211 = arith.constant 3 : index
    %c0_212 = arith.constant 0 : index
    %187 = vector.load %arg18[%c3_210, %c3_211, %c0_212] : memref<9x11x16xf32, #tpu.memory_space<vmem>>, vector<6x8x16xf32>
    %188 = vector.shape_cast %187 : vector<6x8x16xf32> to vector<48x16xf32>
    %189 = tpu.concatenate %158, %160, %162, %164, %166, %168, %170, %172, %174, %176, %178, %180, %182, %184, %186, %188 in 1 : vector<48x16xf32>, vector<48x16xf32>, vector<48x16xf32>, vector<48x16xf32>, vector<48x16xf32>, vector<48x16xf32>, vector<48x16xf32>, vector<48x16xf32>, vector<48x16xf32>, vector<48x16xf32>, vector<48x16xf32>, vector<48x16xf32>, vector<48x16xf32>, vector<48x16xf32>, vector<48x16xf32>, vector<48x16xf32> -> vector<48x256xf32>
    %190 = arith.truncf %189 : vector<48x256xf32> to vector<48x256xbf16>
    %c0_213 = arith.constant 0 : index
    %c0_214 = arith.constant 0 : index
    %191 = vector.load %arg4[%c0_213, %c0_214] : memref<256x32xbf16, #tpu.memory_space<vmem>>, vector<256x32xbf16>
    %cst_215 = arith.constant dense<0.000000e+00> : vector<48x32xf32>
    %192 = tpu.matmul %190, %191, %cst_215 {dimension_numbers = #tpu.dot_dimension_numbers<[1], [0], [0], [1], [0, 0, 1, 1], [], []>} : vector<48x256xbf16>, vector<256x32xbf16>, vector<48x32xf32> -> vector<48x32xf32>
    %c0_216 = arith.constant 0 : index
    %c0_217 = arith.constant 0 : index
    %193 = vector.load %arg14[%c0_216, %c0_217] : memref<9x48xf32, #tpu.memory_space<vmem>>, vector<9x48xf32>
    %cst_218 = arith.constant dense<0.000000e+00> : vector<9x32xf32>
    %194 = tpu.matmul %193, %192, %cst_218 {dimension_numbers = #tpu.dot_dimension_numbers<[1], [0], [0], [1], [0, 0, 1, 1], [], []>} : vector<9x48xf32>, vector<48x32xf32>, vector<9x32xf32> -> vector<9x32xf32>
    %c0_219 = arith.constant 0 : index
    %c0_220 = arith.constant 0 : index
    %195 = vector.load %arg9[%c0_219, %c0_220] : memref<1x32xf32, #tpu.memory_space<vmem>>, vector<1x32xf32>
    %196 = vector.broadcast %195 : vector<1x32xf32> to vector<9x32xf32>
    %197 = arith.addf %194, %196 : vector<9x32xf32>
    %cst_221 = arith.constant 0.000000e+00 : f32
    %198 = vector.broadcast %cst_221 : f32 to vector<9x32xf32>
    %199 = arith.cmpf oge, %197, %198 : vector<9x32xf32>
    %cst_222 = arith.constant 2.000000e-01 : f32
    %200 = vector.broadcast %cst_222 : f32 to vector<9x32xf32>
    %201 = arith.mulf %200, %197 : vector<9x32xf32>
    %202 = arith.select %199, %197, %201 : vector<9x32xi1>, vector<9x32xf32>
    %cst_223 = arith.constant 0.000000e+00 : f32
    %203 = vector.broadcast %cst_223 : f32 to vector<7x11x32xf32>
    %c0_224 = arith.constant 0 : index
    %c0_225 = arith.constant 0 : index
    %c0_226 = arith.constant 0 : index
    %204 = vector.load %arg19[%c0_224, %c0_225, %c0_226] : memref<7x11x32xf32, #tpu.memory_space<vmem>>, vector<7x11x32xf32>
    tpu.vector_store %arg19[%c0_224, %c0_225, %c0_226], %203 {strides = array<i32>} : memref<7x11x32xf32, #tpu.memory_space<vmem>>, vector<7x11x32xf32>,
    %205 = vector.extract_strided_slice %202 {offsets = [0, 0], sizes = [3, 32], strides = [1, 1]} : vector<9x32xf32> to vector<3x32xf32>
    %c2_227 = arith.constant 2 : index
    %c2_228 = arith.constant 2 : index
    %c0_229 = arith.constant 0 : index
    %206 = vector.load %arg19[%c2_227, %c2_228, %c0_229] : memref<7x11x32xf32, #tpu.memory_space<vmem>>, vector<1x3x32xf32>
    %207 = vector.shape_cast %206 : vector<1x3x32xf32> to vector<3x32xf32>
    %208 = vector.shape_cast %205 : vector<3x32xf32> to vector<1x3x32xf32>
    tpu.vector_store %arg19[%c2_227, %c2_228, %c0_229], %208 {strides = array<i32>} : memref<7x11x32xf32, #tpu.memory_space<vmem>>, vector<1x3x32xf32>,
    %209 = vector.extract_strided_slice %202 {offsets = [3, 0], sizes = [3, 32], strides = [1, 1]} : vector<9x32xf32> to vector<3x32xf32>
    %c3_230 = arith.constant 3 : index
    %c2_231 = arith.constant 2 : index
    %c0_232 = arith.constant 0 : index
    %210 = vector.load %arg19[%c3_230, %c2_231, %c0_232] : memref<7x11x32xf32, #tpu.memory_space<vmem>>, vector<1x3x32xf32>
    %211 = vector.shape_cast %210 : vector<1x3x32xf32> to vector<3x32xf32>
    %212 = vector.shape_cast %209 : vector<3x32xf32> to vector<1x3x32xf32>
    tpu.vector_store %arg19[%c3_230, %c2_231, %c0_232], %212 {strides = array<i32>} : memref<7x11x32xf32, #tpu.memory_space<vmem>>, vector<1x3x32xf32>,
    %213 = vector.extract_strided_slice %202 {offsets = [6, 0], sizes = [3, 32], strides = [1, 1]} : vector<9x32xf32> to vector<3x32xf32>
    %c4_233 = arith.constant 4 : index
    %c2_234 = arith.constant 2 : index
    %c0_235 = arith.constant 0 : index
    %214 = vector.load %arg19[%c4_233, %c2_234, %c0_235] : memref<7x11x32xf32, #tpu.memory_space<vmem>>, vector<1x3x32xf32>
    %215 = vector.shape_cast %214 : vector<1x3x32xf32> to vector<3x32xf32>
    %216 = vector.shape_cast %213 : vector<3x32xf32> to vector<1x3x32xf32>
    tpu.vector_store %arg19[%c4_233, %c2_234, %c0_235], %216 {strides = array<i32>} : memref<7x11x32xf32, #tpu.memory_space<vmem>>, vector<1x3x32xf32>,
    %c0_236 = arith.constant 0 : index
    %c0_237 = arith.constant 0 : index
    %c0_238 = arith.constant 0 : index
    %217 = vector.load %arg19[%c0_236, %c0_237, %c0_238] : memref<7x11x32xf32, #tpu.memory_space<vmem>>, vector<4x8x32xf32>
    %218 = vector.shape_cast %217 : vector<4x8x32xf32> to vector<32x32xf32>
    %c0_239 = arith.constant 0 : index
    %c1_240 = arith.constant 1 : index
    %c0_241 = arith.constant 0 : index
    %219 = vector.load %arg19[%c0_239, %c1_240, %c0_241] : memref<7x11x32xf32, #tpu.memory_space<vmem>>, vector<4x8x32xf32>
    %220 = vector.shape_cast %219 : vector<4x8x32xf32> to vector<32x32xf32>
    %c0_242 = arith.constant 0 : index
    %c2_243 = arith.constant 2 : index
    %c0_244 = arith.constant 0 : index
    %221 = vector.load %arg19[%c0_242, %c2_243, %c0_244] : memref<7x11x32xf32, #tpu.memory_space<vmem>>, vector<4x8x32xf32>
    %222 = vector.shape_cast %221 : vector<4x8x32xf32> to vector<32x32xf32>
    %c0_245 = arith.constant 0 : index
    %c3_246 = arith.constant 3 : index
    %c0_247 = arith.constant 0 : index
    %223 = vector.load %arg19[%c0_245, %c3_246, %c0_247] : memref<7x11x32xf32, #tpu.memory_space<vmem>>, vector<4x8x32xf32>
    %224 = vector.shape_cast %223 : vector<4x8x32xf32> to vector<32x32xf32>
    %c1_248 = arith.constant 1 : index
    %c0_249 = arith.constant 0 : index
    %c0_250 = arith.constant 0 : index
    %225 = vector.load %arg19[%c1_248, %c0_249, %c0_250] : memref<7x11x32xf32, #tpu.memory_space<vmem>>, vector<4x8x32xf32>
    %226 = vector.shape_cast %225 : vector<4x8x32xf32> to vector<32x32xf32>
    %c1_251 = arith.constant 1 : index
    %c1_252 = arith.constant 1 : index
    %c0_253 = arith.constant 0 : index
    %227 = vector.load %arg19[%c1_251, %c1_252, %c0_253] : memref<7x11x32xf32, #tpu.memory_space<vmem>>, vector<4x8x32xf32>
    %228 = vector.shape_cast %227 : vector<4x8x32xf32> to vector<32x32xf32>
    %c1_254 = arith.constant 1 : index
    %c2_255 = arith.constant 2 : index
    %c0_256 = arith.constant 0 : index
    %229 = vector.load %arg19[%c1_254, %c2_255, %c0_256] : memref<7x11x32xf32, #tpu.memory_space<vmem>>, vector<4x8x32xf32>
    %230 = vector.shape_cast %229 : vector<4x8x32xf32> to vector<32x32xf32>
    %c1_257 = arith.constant 1 : index
    %c3_258 = arith.constant 3 : index
    %c0_259 = arith.constant 0 : index
    %231 = vector.load %arg19[%c1_257, %c3_258, %c0_259] : memref<7x11x32xf32, #tpu.memory_space<vmem>>, vector<4x8x32xf32>
    %232 = vector.shape_cast %231 : vector<4x8x32xf32> to vector<32x32xf32>
    %c2_260 = arith.constant 2 : index
    %c0_261 = arith.constant 0 : index
    %c0_262 = arith.constant 0 : index
    %233 = vector.load %arg19[%c2_260, %c0_261, %c0_262] : memref<7x11x32xf32, #tpu.memory_space<vmem>>, vector<4x8x32xf32>
    %234 = vector.shape_cast %233 : vector<4x8x32xf32> to vector<32x32xf32>
    %c2_263 = arith.constant 2 : index
    %c1_264 = arith.constant 1 : index
    %c0_265 = arith.constant 0 : index
    %235 = vector.load %arg19[%c2_263, %c1_264, %c0_265] : memref<7x11x32xf32, #tpu.memory_space<vmem>>, vector<4x8x32xf32>
    %236 = vector.shape_cast %235 : vector<4x8x32xf32> to vector<32x32xf32>
    %c2_266 = arith.constant 2 : index
    %c2_267 = arith.constant 2 : index
    %c0_268 = arith.constant 0 : index
    %237 = vector.load %arg19[%c2_266, %c2_267, %c0_268] : memref<7x11x32xf32, #tpu.memory_space<vmem>>, vector<4x8x32xf32>
    %238 = vector.shape_cast %237 : vector<4x8x32xf32> to vector<32x32xf32>
    %c2_269 = arith.constant 2 : index
    %c3_270 = arith.constant 3 : index
    %c0_271 = arith.constant 0 : index
    %239 = vector.load %arg19[%c2_269, %c3_270, %c0_271] : memref<7x11x32xf32, #tpu.memory_space<vmem>>, vector<4x8x32xf32>
    %240 = vector.shape_cast %239 : vector<4x8x32xf32> to vector<32x32xf32>
    %c3_272 = arith.constant 3 : index
    %c0_273 = arith.constant 0 : index
    %c0_274 = arith.constant 0 : index
    %241 = vector.load %arg19[%c3_272, %c0_273, %c0_274] : memref<7x11x32xf32, #tpu.memory_space<vmem>>, vector<4x8x32xf32>
    %242 = vector.shape_cast %241 : vector<4x8x32xf32> to vector<32x32xf32>
    %c3_275 = arith.constant 3 : index
    %c1_276 = arith.constant 1 : index
    %c0_277 = arith.constant 0 : index
    %243 = vector.load %arg19[%c3_275, %c1_276, %c0_277] : memref<7x11x32xf32, #tpu.memory_space<vmem>>, vector<4x8x32xf32>
    %244 = vector.shape_cast %243 : vector<4x8x32xf32> to vector<32x32xf32>
    %c3_278 = arith.constant 3 : index
    %c2_279 = arith.constant 2 : index
    %c0_280 = arith.constant 0 : index
    %245 = vector.load %arg19[%c3_278, %c2_279, %c0_280] : memref<7x11x32xf32, #tpu.memory_space<vmem>>, vector<4x8x32xf32>
    %246 = vector.shape_cast %245 : vector<4x8x32xf32> to vector<32x32xf32>
    %c3_281 = arith.constant 3 : index
    %c3_282 = arith.constant 3 : index
    %c0_283 = arith.constant 0 : index
    %247 = vector.load %arg19[%c3_281, %c3_282, %c0_283] : memref<7x11x32xf32, #tpu.memory_space<vmem>>, vector<4x8x32xf32>
    %248 = vector.shape_cast %247 : vector<4x8x32xf32> to vector<32x32xf32>
    %249 = tpu.concatenate %218, %220, %222, %224, %226, %228, %230, %232, %234, %236, %238, %240, %242, %244, %246, %248 in 1 : vector<32x32xf32>, vector<32x32xf32>, vector<32x32xf32>, vector<32x32xf32>, vector<32x32xf32>, vector<32x32xf32>, vector<32x32xf32>, vector<32x32xf32>, vector<32x32xf32>, vector<32x32xf32>, vector<32x32xf32>, vector<32x32xf32>, vector<32x32xf32>, vector<32x32xf32>, vector<32x32xf32>, vector<32x32xf32> -> vector<32x512xf32>
    %250 = arith.truncf %249 : vector<32x512xf32> to vector<32x512xbf16>
    %c0_284 = arith.constant 0 : index
    %c0_285 = arith.constant 0 : index
    %251 = vector.load %arg5[%c0_284, %c0_285] : memref<512x64xbf16, #tpu.memory_space<vmem>>, vector<512x64xbf16>
    %cst_286 = arith.constant dense<0.000000e+00> : vector<32x64xf32>
    %252 = tpu.matmul %250, %251, %cst_286 {dimension_numbers = #tpu.dot_dimension_numbers<[1], [0], [0], [1], [0, 0, 1, 1], [], []>} : vector<32x512xbf16>, vector<512x64xbf16>, vector<32x64xf32> -> vector<32x64xf32>
    %c0_287 = arith.constant 0 : index
    %c0_288 = arith.constant 0 : index
    %253 = vector.load %arg10[%c0_287, %c0_288] : memref<1x64xf32, #tpu.memory_space<vmem>>, vector<1x64xf32>
    %254 = vector.broadcast %253 : vector<1x64xf32> to vector<32x64xf32>
    %255 = arith.addf %252, %254 : vector<32x64xf32>
    %cst_289 = arith.constant 0.000000e+00 : f32
    %256 = vector.broadcast %cst_289 : f32 to vector<32x64xf32>
    %257 = arith.cmpf oge, %255, %256 : vector<32x64xf32>
    %cst_290 = arith.constant 2.000000e-01 : f32
    %258 = vector.broadcast %cst_290 : f32 to vector<32x64xf32>
    %259 = arith.mulf %258, %255 : vector<32x64xf32>
    %260 = arith.select %257, %255, %259 : vector<32x64xi1>, vector<32x64xf32>
    %cst_291 = arith.constant 0.000000e+00 : f32
    %261 = vector.broadcast %cst_291 : f32 to vector<8x11x64xf32>
    %c0_292 = arith.constant 0 : index
    %c0_293 = arith.constant 0 : index
    %c0_294 = arith.constant 0 : index
    %262 = vector.load %arg20[%c0_292, %c0_293, %c0_294] : memref<8x11x64xf32, #tpu.memory_space<vmem>>, vector<8x11x64xf32>
    tpu.vector_store %arg20[%c0_292, %c0_293, %c0_294], %261 {strides = array<i32>} : memref<8x11x64xf32, #tpu.memory_space<vmem>>, vector<8x11x64xf32>,
    %263 = vector.extract_strided_slice %260 {offsets = [0, 0], sizes = [4, 64], strides = [1, 1]} : vector<32x64xf32> to vector<4x64xf32>
    %c2_295 = arith.constant 2 : index
    %c2_296 = arith.constant 2 : index
    %c0_297 = arith.constant 0 : index
    %264 = vector.load %arg20[%c2_295, %c2_296, %c0_297] : memref<8x11x64xf32, #tpu.memory_space<vmem>>, vector<1x4x64xf32>
    %265 = vector.shape_cast %264 : vector<1x4x64xf32> to vector<4x64xf32>
    %266 = vector.shape_cast %263 : vector<4x64xf32> to vector<1x4x64xf32>
    tpu.vector_store %arg20[%c2_295, %c2_296, %c0_297], %266 {strides = array<i32>} : memref<8x11x64xf32, #tpu.memory_space<vmem>>, vector<1x4x64xf32>,
    %267 = vector.extract_strided_slice %260 {offsets = [8, 0], sizes = [4, 64], strides = [1, 1]} : vector<32x64xf32> to vector<4x64xf32>
    %c3_298 = arith.constant 3 : index
    %c2_299 = arith.constant 2 : index
    %c0_300 = arith.constant 0 : index
    %268 = vector.load %arg20[%c3_298, %c2_299, %c0_300] : memref<8x11x64xf32, #tpu.memory_space<vmem>>, vector<1x4x64xf32>
    %269 = vector.shape_cast %268 : vector<1x4x64xf32> to vector<4x64xf32>
    %270 = vector.shape_cast %267 : vector<4x64xf32> to vector<1x4x64xf32>
    tpu.vector_store %arg20[%c3_298, %c2_299, %c0_300], %270 {strides = array<i32>} : memref<8x11x64xf32, #tpu.memory_space<vmem>>, vector<1x4x64xf32>,
    %271 = vector.extract_strided_slice %260 {offsets = [16, 0], sizes = [4, 64], strides = [1, 1]} : vector<32x64xf32> to vector<4x64xf32>
    %c4_301 = arith.constant 4 : index
    %c2_302 = arith.constant 2 : index
    %c0_303 = arith.constant 0 : index
    %272 = vector.load %arg20[%c4_301, %c2_302, %c0_303] : memref<8x11x64xf32, #tpu.memory_space<vmem>>, vector<1x4x64xf32>
    %273 = vector.shape_cast %272 : vector<1x4x64xf32> to vector<4x64xf32>
    %274 = vector.shape_cast %271 : vector<4x64xf32> to vector<1x4x64xf32>
    tpu.vector_store %arg20[%c4_301, %c2_302, %c0_303], %274 {strides = array<i32>} : memref<8x11x64xf32, #tpu.memory_space<vmem>>, vector<1x4x64xf32>,
    %275 = vector.extract_strided_slice %260 {offsets = [24, 0], sizes = [4, 64], strides = [1, 1]} : vector<32x64xf32> to vector<4x64xf32>
    %c5_304 = arith.constant 5 : index
    %c2_305 = arith.constant 2 : index
    %c0_306 = arith.constant 0 : index
    %276 = vector.load %arg20[%c5_304, %c2_305, %c0_306] : memref<8x11x64xf32, #tpu.memory_space<vmem>>, vector<1x4x64xf32>
    %277 = vector.shape_cast %276 : vector<1x4x64xf32> to vector<4x64xf32>
    %278 = vector.shape_cast %275 : vector<4x64xf32> to vector<1x4x64xf32>
    tpu.vector_store %arg20[%c5_304, %c2_305, %c0_306], %278 {strides = array<i32>} : memref<8x11x64xf32, #tpu.memory_space<vmem>>, vector<1x4x64xf32>,
    %c0_307 = arith.constant 0 : index
    %c0_308 = arith.constant 0 : index
    %c0_309 = arith.constant 0 : index
    %279 = vector.load %arg20[%c0_307, %c0_308, %c0_309] : memref<8x11x64xf32, #tpu.memory_space<vmem>>, vector<5x8x64xf32>
    %280 = vector.shape_cast %279 : vector<5x8x64xf32> to vector<40x64xf32>
    %c0_310 = arith.constant 0 : index
    %c1_311 = arith.constant 1 : index
    %c0_312 = arith.constant 0 : index
    %281 = vector.load %arg20[%c0_310, %c1_311, %c0_312] : memref<8x11x64xf32, #tpu.memory_space<vmem>>, vector<5x8x64xf32>
    %282 = vector.shape_cast %281 : vector<5x8x64xf32> to vector<40x64xf32>
    %c0_313 = arith.constant 0 : index
    %c2_314 = arith.constant 2 : index
    %c0_315 = arith.constant 0 : index
    %283 = vector.load %arg20[%c0_313, %c2_314, %c0_315] : memref<8x11x64xf32, #tpu.memory_space<vmem>>, vector<5x8x64xf32>
    %284 = vector.shape_cast %283 : vector<5x8x64xf32> to vector<40x64xf32>
    %c0_316 = arith.constant 0 : index
    %c3_317 = arith.constant 3 : index
    %c0_318 = arith.constant 0 : index
    %285 = vector.load %arg20[%c0_316, %c3_317, %c0_318] : memref<8x11x64xf32, #tpu.memory_space<vmem>>, vector<5x8x64xf32>
    %286 = vector.shape_cast %285 : vector<5x8x64xf32> to vector<40x64xf32>
    %c1_319 = arith.constant 1 : index
    %c0_320 = arith.constant 0 : index
    %c0_321 = arith.constant 0 : index
    %287 = vector.load %arg20[%c1_319, %c0_320, %c0_321] : memref<8x11x64xf32, #tpu.memory_space<vmem>>, vector<5x8x64xf32>
    %288 = vector.shape_cast %287 : vector<5x8x64xf32> to vector<40x64xf32>
    %c1_322 = arith.constant 1 : index
    %c1_323 = arith.constant 1 : index
    %c0_324 = arith.constant 0 : index
    %289 = vector.load %arg20[%c1_322, %c1_323, %c0_324] : memref<8x11x64xf32, #tpu.memory_space<vmem>>, vector<5x8x64xf32>
    %290 = vector.shape_cast %289 : vector<5x8x64xf32> to vector<40x64xf32>
    %c1_325 = arith.constant 1 : index
    %c2_326 = arith.constant 2 : index
    %c0_327 = arith.constant 0 : index
    %291 = vector.load %arg20[%c1_325, %c2_326, %c0_327] : memref<8x11x64xf32, #tpu.memory_space<vmem>>, vector<5x8x64xf32>
    %292 = vector.shape_cast %291 : vector<5x8x64xf32> to vector<40x64xf32>
    %c1_328 = arith.constant 1 : index
    %c3_329 = arith.constant 3 : index
    %c0_330 = arith.constant 0 : index
    %293 = vector.load %arg20[%c1_328, %c3_329, %c0_330] : memref<8x11x64xf32, #tpu.memory_space<vmem>>, vector<5x8x64xf32>
    %294 = vector.shape_cast %293 : vector<5x8x64xf32> to vector<40x64xf32>
    %c2_331 = arith.constant 2 : index
    %c0_332 = arith.constant 0 : index
    %c0_333 = arith.constant 0 : index
    %295 = vector.load %arg20[%c2_331, %c0_332, %c0_333] : memref<8x11x64xf32, #tpu.memory_space<vmem>>, vector<5x8x64xf32>
    %296 = vector.shape_cast %295 : vector<5x8x64xf32> to vector<40x64xf32>
    %c2_334 = arith.constant 2 : index
    %c1_335 = arith.constant 1 : index
    %c0_336 = arith.constant 0 : index
    %297 = vector.load %arg20[%c2_334, %c1_335, %c0_336] : memref<8x11x64xf32, #tpu.memory_space<vmem>>, vector<5x8x64xf32>
    %298 = vector.shape_cast %297 : vector<5x8x64xf32> to vector<40x64xf32>
    %c2_337 = arith.constant 2 : index
    %c2_338 = arith.constant 2 : index
    %c0_339 = arith.constant 0 : index
    %299 = vector.load %arg20[%c2_337, %c2_338, %c0_339] : memref<8x11x64xf32, #tpu.memory_space<vmem>>, vector<5x8x64xf32>
    %300 = vector.shape_cast %299 : vector<5x8x64xf32> to vector<40x64xf32>
    %c2_340 = arith.constant 2 : index
    %c3_341 = arith.constant 3 : index
    %c0_342 = arith.constant 0 : index
    %301 = vector.load %arg20[%c2_340, %c3_341, %c0_342] : memref<8x11x64xf32, #tpu.memory_space<vmem>>, vector<5x8x64xf32>
    %302 = vector.shape_cast %301 : vector<5x8x64xf32> to vector<40x64xf32>
    %c3_343 = arith.constant 3 : index
    %c0_344 = arith.constant 0 : index
    %c0_345 = arith.constant 0 : index
    %303 = vector.load %arg20[%c3_343, %c0_344, %c0_345] : memref<8x11x64xf32, #tpu.memory_space<vmem>>, vector<5x8x64xf32>
    %304 = vector.shape_cast %303 : vector<5x8x64xf32> to vector<40x64xf32>
    %c3_346 = arith.constant 3 : index
    %c1_347 = arith.constant 1 : index
    %c0_348 = arith.constant 0 : index
    %305 = vector.load %arg20[%c3_346, %c1_347, %c0_348] : memref<8x11x64xf32, #tpu.memory_space<vmem>>, vector<5x8x64xf32>
    %306 = vector.shape_cast %305 : vector<5x8x64xf32> to vector<40x64xf32>
    %c3_349 = arith.constant 3 : index
    %c2_350 = arith.constant 2 : index
    %c0_351 = arith.constant 0 : index
    %307 = vector.load %arg20[%c3_349, %c2_350, %c0_351] : memref<8x11x64xf32, #tpu.memory_space<vmem>>, vector<5x8x64xf32>
    %308 = vector.shape_cast %307 : vector<5x8x64xf32> to vector<40x64xf32>
    %c3_352 = arith.constant 3 : index
    %c3_353 = arith.constant 3 : index
    %c0_354 = arith.constant 0 : index
    %309 = vector.load %arg20[%c3_352, %c3_353, %c0_354] : memref<8x11x64xf32, #tpu.memory_space<vmem>>, vector<5x8x64xf32>
    %310 = vector.shape_cast %309 : vector<5x8x64xf32> to vector<40x64xf32>
    %311 = tpu.concatenate %280, %282, %284, %286, %288, %290, %292, %294, %296, %298, %300, %302, %304, %306, %308, %310 in 1 : vector<40x64xf32>, vector<40x64xf32>, vector<40x64xf32>, vector<40x64xf32>, vector<40x64xf32>, vector<40x64xf32>, vector<40x64xf32>, vector<40x64xf32>, vector<40x64xf32>, vector<40x64xf32>, vector<40x64xf32>, vector<40x64xf32>, vector<40x64xf32>, vector<40x64xf32>, vector<40x64xf32>, vector<40x64xf32> -> vector<40x1024xf32>
    %312 = arith.truncf %311 : vector<40x1024xf32> to vector<40x1024xbf16>
    %c0_355 = arith.constant 0 : index
    %c0_356 = arith.constant 0 : index
    %313 = vector.load %arg6[%c0_355, %c0_356] : memref<1024x8xbf16, #tpu.memory_space<vmem>>, vector<1024x8xbf16>
    %cst_357 = arith.constant dense<0.000000e+00> : vector<40x8xf32>
    %314 = tpu.matmul %312, %313, %cst_357 {dimension_numbers = #tpu.dot_dimension_numbers<[1], [0], [0], [1], [0, 0, 1, 1], [], []>} : vector<40x1024xbf16>, vector<1024x8xbf16>, vector<40x8xf32> -> vector<40x8xf32>
    %c0_358 = arith.constant 0 : index
    %c0_359 = arith.constant 0 : index
    %315 = vector.load %arg11[%c0_358, %c0_359] : memref<1x8xf32, #tpu.memory_space<vmem>>, vector<1x8xf32>
    %316 = vector.broadcast %315 : vector<1x8xf32> to vector<40x8xf32>
    %317 = arith.addf %314, %316 : vector<40x8xf32>
    %318 = vector.extract_strided_slice %317 {offsets = [0, 0], sizes = [5, 8], strides = [1, 1]} : vector<40x8xf32> to vector<5x8xf32>
    %c0_360 = arith.constant 0 : index
    %c0_361 = arith.constant 0 : index
    %c0_362 = arith.constant 0 : index
    %c0_363 = arith.constant 0 : index
    %319 = vector.load %arg15[%c0_360, %c0_361, %c0_362, %c0_363] : memref<1x5x5x8xf32, #tpu.memory_space<vmem>>, vector<1x1x5x8xf32>
    %320 = vector.shape_cast %319 : vector<1x1x5x8xf32> to vector<5x8xf32>
    %321 = vector.shape_cast %318 : vector<5x8xf32> to vector<1x1x5x8xf32>
    tpu.vector_store %arg15[%c0_360, %c0_361, %c0_362, %c0_363], %321 {strides = array<i32>} : memref<1x5x5x8xf32, #tpu.memory_space<vmem>>, vector<1x1x5x8xf32>,
    %322 = vector.extract_strided_slice %317 {offsets = [8, 0], sizes = [5, 8], strides = [1, 1]} : vector<40x8xf32> to vector<5x8xf32>
    %c0_364 = arith.constant 0 : index
    %c1_365 = arith.constant 1 : index
    %c0_366 = arith.constant 0 : index
    %c0_367 = arith.constant 0 : index
    %323 = vector.load %arg15[%c0_364, %c1_365, %c0_366, %c0_367] : memref<1x5x5x8xf32, #tpu.memory_space<vmem>>, vector<1x1x5x8xf32>
    %324 = vector.shape_cast %323 : vector<1x1x5x8xf32> to vector<5x8xf32>
    %325 = vector.shape_cast %322 : vector<5x8xf32> to vector<1x1x5x8xf32>
    tpu.vector_store %arg15[%c0_364, %c1_365, %c0_366, %c0_367], %325 {strides = array<i32>} : memref<1x5x5x8xf32, #tpu.memory_space<vmem>>, vector<1x1x5x8xf32>,
    %326 = vector.extract_strided_slice %317 {offsets = [16, 0], sizes = [5, 8], strides = [1, 1]} : vector<40x8xf32> to vector<5x8xf32>
    %c0_368 = arith.constant 0 : index
    %c2_369 = arith.constant 2 : index
    %c0_370 = arith.constant 0 : index
    %c0_371 = arith.constant 0 : index
    %327 = vector.load %arg15[%c0_368, %c2_369, %c0_370, %c0_371] : memref<1x5x5x8xf32, #tpu.memory_space<vmem>>, vector<1x1x5x8xf32>
    %328 = vector.shape_cast %327 : vector<1x1x5x8xf32> to vector<5x8xf32>
    %329 = vector.shape_cast %326 : vector<5x8xf32> to vector<1x1x5x8xf32>
    tpu.vector_store %arg15[%c0_368, %c2_369, %c0_370, %c0_371], %329 {strides = array<i32>} : memref<1x5x5x8xf32, #tpu.memory_space<vmem>>, vector<1x1x5x8xf32>,
    %330 = vector.extract_strided_slice %317 {offsets = [24, 0], sizes = [5, 8], strides = [1, 1]} : vector<40x8xf32> to vector<5x8xf32>
    %c0_372 = arith.constant 0 : index
    %c3_373 = arith.constant 3 : index
    %c0_374 = arith.constant 0 : index
    %c0_375 = arith.constant 0 : index
    %331 = vector.load %arg15[%c0_372, %c3_373, %c0_374, %c0_375] : memref<1x5x5x8xf32, #tpu.memory_space<vmem>>, vector<1x1x5x8xf32>
    %332 = vector.shape_cast %331 : vector<1x1x5x8xf32> to vector<5x8xf32>
    %333 = vector.shape_cast %330 : vector<5x8xf32> to vector<1x1x5x8xf32>
    tpu.vector_store %arg15[%c0_372, %c3_373, %c0_374, %c0_375], %333 {strides = array<i32>} : memref<1x5x5x8xf32, #tpu.memory_space<vmem>>, vector<1x1x5x8xf32>,
    %334 = vector.extract_strided_slice %317 {offsets = [32, 0], sizes = [5, 8], strides = [1, 1]} : vector<40x8xf32> to vector<5x8xf32>
    %c0_376 = arith.constant 0 : index
    %c4_377 = arith.constant 4 : index
    %c0_378 = arith.constant 0 : index
    %c0_379 = arith.constant 0 : index
    %335 = vector.load %arg15[%c0_376, %c4_377, %c0_378, %c0_379] : memref<1x5x5x8xf32, #tpu.memory_space<vmem>>, vector<1x1x5x8xf32>
    %336 = vector.shape_cast %335 : vector<1x1x5x8xf32> to vector<5x8xf32>
    %337 = vector.shape_cast %334 : vector<5x8xf32> to vector<1x1x5x8xf32>
    tpu.vector_store %arg15[%c0_376, %c4_377, %c0_378, %c0_379], %337 {strides = array<i32>} : memref<1x5x5x8xf32, #tpu.memory_space<vmem>>, vector<1x1x5x8xf32>,
    return
  }
  func.func @transform_0(%arg0: i32) -> (i32, i32, i32, i32) {
    %c0_i32 = arith.constant 0 : i32
    %c0_i32_0 = arith.constant 0 : i32
    %c0_i32_1 = arith.constant 0 : i32
    %c0_i32_2 = arith.constant 0 : i32
    return %arg0, %c0_i32, %c0_i32_0, %c0_i32_1 : i32, i32, i32, i32
  }
  func.func @transform_1(%arg0: i32) -> (i32, i32) {
    %c0_i32 = arith.constant 0 : i32
    %c0_i32_0 = arith.constant 0 : i32
    %c0_i32_1 = arith.constant 0 : i32
    return %c0_i32, %c0_i32_0 : i32, i32
  }
  func.func @transform_2(%arg0: i32) -> (i32, i32) {
    %c0_i32 = arith.constant 0 : i32
    %c0_i32_0 = arith.constant 0 : i32
    %c0_i32_1 = arith.constant 0 : i32
    return %c0_i32, %c0_i32_0 : i32, i32
  }
  func.func @transform_3(%arg0: i32) -> (i32, i32) {
    %c0_i32 = arith.constant 0 : i32
    %c0_i32_0 = arith.constant 0 : i32
    %c0_i32_1 = arith.constant 0 : i32
    return %c0_i32, %c0_i32_0 : i32, i32
  }
  func.func @transform_4(%arg0: i32) -> (i32, i32) {
    %c0_i32 = arith.constant 0 : i32
    %c0_i32_0 = arith.constant 0 : i32
    %c0_i32_1 = arith.constant 0 : i32
    return %c0_i32, %c0_i32_0 : i32, i32
  }
  func.func @transform_5(%arg0: i32) -> (i32, i32) {
    %c0_i32 = arith.constant 0 : i32
    %c0_i32_0 = arith.constant 0 : i32
    %c0_i32_1 = arith.constant 0 : i32
    return %c0_i32, %c0_i32_0 : i32, i32
  }
  func.func @transform_6(%arg0: i32) -> (i32, i32) {
    %c0_i32 = arith.constant 0 : i32
    %c0_i32_0 = arith.constant 0 : i32
    %c0_i32_1 = arith.constant 0 : i32
    return %c0_i32, %c0_i32_0 : i32, i32
  }
  func.func @transform_7(%arg0: i32) -> (i32, i32) {
    %c0_i32 = arith.constant 0 : i32
    %c0_i32_0 = arith.constant 0 : i32
    %c0_i32_1 = arith.constant 0 : i32
    return %c0_i32, %c0_i32_0 : i32, i32
  }
  func.func @transform_8(%arg0: i32) -> (i32, i32) {
    %c0_i32 = arith.constant 0 : i32
    %c0_i32_0 = arith.constant 0 : i32
    %c0_i32_1 = arith.constant 0 : i32
    return %c0_i32, %c0_i32_0 : i32, i32
  }
  func.func @transform_9(%arg0: i32) -> (i32, i32) {
    %c0_i32 = arith.constant 0 : i32
    %c0_i32_0 = arith.constant 0 : i32
    %c0_i32_1 = arith.constant 0 : i32
    return %c0_i32, %c0_i32_0 : i32, i32
  }
  func.func @transform_10(%arg0: i32) -> (i32, i32) {
    %c0_i32 = arith.constant 0 : i32
    %c0_i32_0 = arith.constant 0 : i32
    %c0_i32_1 = arith.constant 0 : i32
    return %c0_i32, %c0_i32_0 : i32, i32
  }
  func.func @transform_11(%arg0: i32) -> (i32, i32) {
    %c0_i32 = arith.constant 0 : i32
    %c0_i32_0 = arith.constant 0 : i32
    %c0_i32_1 = arith.constant 0 : i32
    return %c0_i32, %c0_i32_0 : i32, i32
  }
  func.func @transform_12(%arg0: i32) -> (i32, i32) {
    %c0_i32 = arith.constant 0 : i32
    %c0_i32_0 = arith.constant 0 : i32
    %c0_i32_1 = arith.constant 0 : i32
    return %c0_i32, %c0_i32_0 : i32, i32
  }
  func.func @transform_13(%arg0: i32) -> (i32, i32) {
    %c0_i32 = arith.constant 0 : i32
    %c0_i32_0 = arith.constant 0 : i32
    %c0_i32_1 = arith.constant 0 : i32
    return %c0_i32, %c0_i32_0 : i32, i32
  }
  func.func @transform_14(%arg0: i32) -> (i32, i32, i32, i32) {
    %c0_i32 = arith.constant 0 : i32
    %c0_i32_0 = arith.constant 0 : i32
    %c0_i32_1 = arith.constant 0 : i32
    %c0_i32_2 = arith.constant 0 : i32
    return %arg0, %c0_i32, %c0_i32_0, %c0_i32_1 : i32, i32, i32, i32
  }
}

</mosaic_0001>

<bundles_post_ra>
// kernel: no_norm_discriminator_forward.1
= control target key start
LH: loop header
LB: loop body
LE: loop exit
PB: predicated region body
PF: predicated region fallthrough
CT: control target
= control target key end

     0   :  { %s14903_s29 = smov 0   ;;  %s21344_s0 = inlined_call_operand.vmem [shape: f32[2,16,16,4], index: 0, kind: input, shape index: {}]   ;;  %s21345_s1 = inlined_call_operand.vmem [shape: bf16[64,8], index: 1, kind: input, shape index: {}]   ;;  %s21346_s2 = inlined_call_operand.vmem [shape: bf16[128,16], index: 2, kind: input, shape index: {}]   ;;  %s21347_s3 = inlined_call_operand.vmem [shape: bf16[256,32], index: 3, kind: input, shape index: {}]   ;;  %s21348_s4 = inlined_call_operand.vmem [shape: bf16[512,64], index: 4, kind: input, shape index: {}]   ;;  %s21349_s5 = inlined_call_operand.vmem [shape: bf16[1024,8], index: 5, kind: input, shape index: {}]   ;;  %s21350_s6 = inlined_call_operand.vmem [shape: f32[1,8], index: 6, kind: input, shape index: {}]   ;;  %s21351_s7 = inlined_call_operand.vmem [shape: f32[1,16], index: 7, kind: input, shape index: {}]   ;;  %s21352_s8 = inlined_call_operand.vmem [shape: f32[1,32], index: 8, kind: input, shape index: {}]   ;;  %s21353_s9 = inlined_call_operand.vmem [shape: f32[1,64], index: 9, kind: input, shape index: {}]   ;;  %s21354_s10 = inlined_call_operand.vmem [shape: f32[1,8], index: 10, kind: input, shape index: {}]   ;;  %s21355_s11 = inlined_call_operand.vmem [shape: f32[81,408], index: 11, kind: input, shape index: {}]   ;;  %s21356_s12 = inlined_call_operand.vmem [shape: f32[25,160], index: 12, kind: input, shape index: {}]   ;;  %s21357_s13 = inlined_call_operand.vmem [shape: f32[9,48], index: 13, kind: input, shape index: {}]   ;;  %s21358_s14 = inlined_call_operand.vmem [shape: f32[2,5,5,8], index: 14, kind: output, shape index: {}]  }
   0x1   :  { %21469 = sst [smem:[#allocation59_spill]] %s21344_s0 }
   0x2 LB: > { %s10919_s30 = sadd.s32 4294967295, %s14802_s29   ;;  %p10923_p0 = scmp.ge.s32.totalorder %s14802_s29, 1  ;;  %s14802_s29 = sphi %s14903_s29, %s24_s29  }
   0x3   : > { %p412_p1 = scmp.lt.s32.totalorder %s14802_s29, 3 }
   0x5   : > { %p413_p2 = pnand %p10923_p0, %p412_p1 }
   0x7   : > { %416 = sbr.rel (%p413_p2) target bundleno = 3544 (0xdd8), region = 76 }
   0xc   : > { %vm469_vm0 = vcmask 31744   ;;  %vm473_vm1 = vcmask 26624   ;;  %p14913_p3 = scmp.lt.s32.totalorder %s10919_s30, 1  ;;  %vm4545_vm2 = vcmask 64512   ;;  %v21365_v0 = vmov 0.0   ;;  %s21471_s0 = sld [smem:[#allocation59_spill]] }
   0xd   : > { %470 = vst.msk [vmem:[#allocation2] sm:$0xff] %vm469_vm0, %v21365_v0  ;;  %471 = vst.msk [vmem:[#allocation2 + $0x8] sm:$0xff] %vm469_vm0, %v21365_v0  ;;  %s14805_s20 = smov 4   ;;  %s21359_s21 = smov 8   ;;  %vm4649_vm3 = vcmask 130048   ;;  %vm4857_vm4 = vcmask 261120  }
   0xe   : > { %472 = vst.msk [vmem:[#allocation2 + $0x10] sm:$0xff] %vm469_vm0, %v21365_v0  ;;  %475 = vst.msk [vmem:[#allocation2 + $0x20] sm:$0xff] %vm469_vm0, %v21365_v0  ;;  %s21696_s30 = smov (!%p14913_p3, %s10919_s30), 1  ;;  %s21361_s22 = smov 12   ;;  %vm5331_vm5 = vcmask 523264   ;;  %vm4597_vm6 = vcmask 97280  }
   0xf   : > { %476 = vst.msk [vmem:[#allocation2 + $0x28] sm:$0xff] %vm469_vm0, %v21365_v0  ;;  %477 = vst.msk [vmem:[#allocation2 + $0x30] sm:$0xff] %vm469_vm0, %v21365_v0  ;;  %s11105_s16 = sshll.u32 %s21696_s30, 8  ;;  %s21363_s23 = smov 16   ;;  %vm4701_vm7 = vcmask 162816   ;;  %vm4753_vm8 = vcmask 195584  }
  0x10   : > { %479 = vst.msk [vmem:[#allocation2 + $0x40] sm:$0xff] %vm469_vm0, %v21365_v0  ;;  %480 = vst.msk [vmem:[#allocation2 + $0x48] sm:$0xff] %vm469_vm0, %v21365_v0  ;;  %s14809_s24 = smov 20   ;;  %s21435_s25 = smov 24   ;;  %vm4805_vm9 = vcmask 228352   ;;  %vm4909_vm10 = vcmask 293888  }
  0x11   : > { %481 = vst.msk [vmem:[#allocation2 + $0x50] sm:$0xff] %vm469_vm0, %v21365_v0  ;;  %483 = vst.msk [vmem:[#allocation2 + $0x60] sm:$0xff] %vm469_vm0, %v21365_v0  ;;  %s14811_s26 = smov 28   ;;  %s21437_s27 = smov 32   ;;  %vm4961_vm11 = vcmask 326656   ;;  %vm5013_vm12 = vcmask 359424  }
  0x12   : > { %484 = vst.msk [vmem:[#allocation2 + $0x68] sm:$0xff] %vm469_vm0, %v21365_v0  ;;  %485 = vst.msk [vmem:[#allocation2 + $0x70] sm:$0xff] %vm469_vm0, %v21365_v0  ;;  %s15139_s19 = scalar_lea.vmem %s21471_s0, %s11105_s16  ;;  %s14813_s28 = smov 36   ;;  %vm5065_vm13 = vcmask 392192   ;;  %vm5117_vm14 = vcmask 424960   ;;  %vm5169_vm15 = vcmask 457728  }
  0x13   : > { %487 = vst.msk [vmem:[#allocation2 + $0x80] sm:$0xff] %vm469_vm0, %v21365_v0  ;;  %488 = vst.msk [vmem:[#allocation2 + $0x88] sm:$0xff] %vm469_vm0, %v21365_v0  ;;  %v551_v1 = vld [vmem:[%s15139_s19] sm:$0xff]  ;;  %v552_v2 = vld [vmem:[%s15139_s19 + $0x8] sm:$0xff]  ;;  %s21439_s15 = smov 40   ;;  %s14815_s16 = smov 44  }
  0x14   : > { %489 = vst.msk [vmem:[#allocation2 + $0x90] sm:$0xff] %vm469_vm0, %v21365_v0  ;;  %491 = vst.msk [vmem:[#allocation2 + $0xa0] sm:$0xff] %vm469_vm0, %v21365_v0  ;;  %v553_v3 = vld [vmem:[%s15139_s19 + $0x10] sm:$0xff]  ;;  %v554_v4 = vld [vmem:[%s15139_s19 + $0x18] sm:$0xff]  ;;  %s21431_s17 = smov 48   ;;  %s21522_s18 = smov 12  }
  0x15   : > { %492 = vst.msk [vmem:[#allocation2 + $0xa8] sm:$0xff] %vm469_vm0, %v21365_v0  ;;  %493 = vst.msk [vmem:[#allocation2 + $0xb0] sm:$0xff] %vm469_vm0, %v21365_v0  ;;  %v555_v5 = vld [vmem:[%s15139_s19 + $0x20] sm:$0xff]  ;;  %v556_v6 = vld [vmem:[%s15139_s19 + $0x28] sm:$0xff] }
  0x16   : > { %495 = vst.msk [vmem:[#allocation2 + $0xc0] sm:$0xff] %vm469_vm0, %v21365_v0  ;;  %496 = vst.msk [vmem:[#allocation2 + $0xc8] sm:$0xff] %vm469_vm0, %v21365_v0  ;;  %v667_v7 = vld [vmem:[#allocation2 + $0x1] sm:$0xff]  ;;  %v668_v8 = vld [vmem:[#allocation2 + $0x9] sm:$0xff] }
  0x17   : > { %497 = vst.msk [vmem:[#allocation2 + $0xd0] sm:$0xff] %vm469_vm0, %v21365_v0  ;;  %499 = vst.msk [vmem:[#allocation2 + $0xe0] sm:$0xff] %vm469_vm0, %v21365_v0  ;;  %v15150_v9 = vld [vmem:[#allocation2 + $0x29] sm:$0xff]  ;;  %v11597_v10 = vpack.i.bf16 %v668_v8, %v667_v7  ;;  %v15157_v13 = vld [vmem:[#allocation2 + $0x21] sm:$0xff] }
  0x18   : > { %500 = vst.msk [vmem:[#allocation2 + $0xe8] sm:$0xff] %vm469_vm0, %v21365_v0  ;;  %501 = vst.msk [vmem:[#allocation2 + $0xf0] sm:$0xff] %vm469_vm0, %v21365_v0  ;;  %v557_v15 = vld [vmem:[%s15139_s19 + $0x30] sm:$0xff]  ;;  %v558_v16 = vld [vmem:[%s15139_s19 + $0x38] sm:$0xff]  ;;  %v11892_v18 = vpack.i.bf16 %v15150_v9, %v15157_v13 }
  0x19   : > { %503 = vst.msk [vmem:[#allocation2 + $0x100] sm:$0xff] %vm469_vm0, %v21365_v0  ;;  %504 = vst.msk [vmem:[#allocation2 + $0x108] sm:$0xff] %vm469_vm0, %v21365_v0  ;;  %v559_v17 = vld [vmem:[%s15139_s19 + $0x40] sm:$0xff]  ;;  %11598 = vrot.lane.b32.xlu0 %v11597_v10, %s14805_s20  ;;  %v560_v20 = vld [vmem:[%s15139_s19 + $0x48] sm:$0xff] }
  0x1a   : > { %505 = vst.msk [vmem:[#allocation2 + $0x110] sm:$0xff] %vm469_vm0, %v21365_v0  ;;  %507 = vst.msk [vmem:[#allocation2 + $0x120] sm:$0xff] %vm469_vm0, %v21365_v0  ;;  %v561_v21 = vld [vmem:[%s15139_s19 + $0x50] sm:$0xff]  ;;  %v562_v22 = vld [vmem:[%s15139_s19 + $0x58] sm:$0xff] }
  0x1b   : > { %508 = vst.msk [vmem:[#allocation2 + $0x128] sm:$0xff] %vm469_vm0, %v21365_v0  ;;  %509 = vst.msk [vmem:[#allocation2 + $0x130] sm:$0xff] %vm469_vm0, %v21365_v0  ;;  %v563_v23 = vld [vmem:[%s15139_s19 + $0x60] sm:$0xff]  ;;  %v564_v24 = vld [vmem:[%s15139_s19 + $0x68] sm:$0xff] }
  0x1c   : > { %511 = vst.msk [vmem:[#allocation2 + $0x140] sm:$0xff] %vm469_vm0, %v21365_v0  ;;  %512 = vst.msk [vmem:[#allocation2 + $0x148] sm:$0xff] %vm469_vm0, %v21365_v0  ;;  %v565_v25 = vld [vmem:[%s15139_s19 + $0x70] sm:$0xff]  ;;  %v566_v26 = vld [vmem:[%s15139_s19 + $0x78] sm:$0xff] }
  0x1d   : > { %513 = vst.msk [vmem:[#allocation2 + $0x150] sm:$0xff] %vm469_vm0, %v21365_v0  ;;  %515 = vst.msk [vmem:[#allocation2 + $0x160] sm:$0xff] %vm469_vm0, %v21365_v0  ;;  %v567_v27 = vld [vmem:[%s15139_s19 + $0x80] sm:$0xff]  ;;  %v568_v28 = vld [vmem:[%s15139_s19 + $0x88] sm:$0xff] }
  0x1e   : > { %516 = vst.msk [vmem:[#allocation2 + $0x168] sm:$0xff] %vm469_vm0, %v21365_v0  ;;  %517 = vst.msk [vmem:[#allocation2 + $0x170] sm:$0xff] %vm469_vm0, %v21365_v0  ;;  %v569_v41 = vld [vmem:[%s15139_s19 + $0x90] sm:$0xff]  ;;  %v570_v42 = vld [vmem:[%s15139_s19 + $0x98] sm:$0xff] }
  0x1f   : > { %519 = vst.msk [vmem:[#allocation2 + $0x180] sm:$0xff] %vm469_vm0, %v21365_v0  ;;  %520 = vst.msk [vmem:[#allocation2 + $0x188] sm:$0xff] %vm469_vm0, %v21365_v0  ;;  %v571_v43 = vld [vmem:[%s15139_s19 + $0xa0] sm:$0xff]  ;;  %v572_v55 = vld [vmem:[%s15139_s19 + $0xa8] sm:$0xff] }
  0x20   : > { %521 = vst.msk [vmem:[#allocation2 + $0x190] sm:$0xff] %vm469_vm0, %v21365_v0  ;;  %523 = vst.msk [vmem:[#allocation2 + $0x1a0] sm:$0xff] %vm469_vm0, %v21365_v0  ;;  %v573_v56 = vld [vmem:[%s15139_s19 + $0xb0] sm:$0xff]  ;;  %v574_v57 = vld [vmem:[%s15139_s19 + $0xb8] sm:$0xff] }
  0x21   : > { %524 = vst.msk [vmem:[#allocation2 + $0x1a8] sm:$0xff] %vm469_vm0, %v21365_v0  ;;  %525 = vst.msk [vmem:[#allocation2 + $0x1b0] sm:$0xff] %vm469_vm0, %v21365_v0  ;;  %v575_v61 = vld [vmem:[%s15139_s19 + $0xc0] sm:$0xff]  ;;  %v576_v62 = vld [vmem:[%s15139_s19 + $0xc8] sm:$0xff] }
  0x22   : > { %527 = vst.msk [vmem:[#allocation2 + $0x1c0] sm:$0xff] %vm469_vm0, %v21365_v0  ;;  %528 = vst.msk [vmem:[#allocation2 + $0x1c8] sm:$0xff] %vm469_vm0, %v21365_v0  ;;  %v15233_v10 = vld [vmem:[#allocation2 + $0x22] sm:$0xff] }
  0x23   : > { %529 = vst.msk [vmem:[#allocation2 + $0x1d0] sm:$0xff] %vm469_vm0, %v21365_v0  ;;  %531 = vst.msk [vmem:[#allocation2 + $0x1e0] sm:$0xff] %vm469_vm0, %v21365_v0 }
  0x24   : > { %532 = vst.msk [vmem:[#allocation2 + $0x1e8] sm:$0xff] %vm469_vm0, %v21365_v0  ;;  %533 = vst.msk [vmem:[#allocation2 + $0x1f0] sm:$0xff] %vm469_vm0, %v21365_v0 }
  0x25   : > { %535 = vst.msk [vmem:[#allocation2 + $0x200] sm:$0xff] %vm469_vm0, %v21365_v0  ;;  %536 = vst.msk [vmem:[#allocation2 + $0x208] sm:$0xff] %vm469_vm0, %v21365_v0 }
  0x26   : > { %537 = vst.msk [vmem:[#allocation2 + $0x210] sm:$0xff] %vm469_vm0, %v21365_v0  ;;  %539 = vst.msk [vmem:[#allocation2 + $0x220] sm:$0xff] %vm469_vm0, %v21365_v0 }
  0x27   : > { %540 = vst.msk [vmem:[#allocation2 + $0x228] sm:$0xff] %vm469_vm0, %v21365_v0  ;;  %541 = vst.msk [vmem:[#allocation2 + $0x230] sm:$0xff] %vm469_vm0, %v21365_v0 }
  0x28   : > { %543 = vst.msk [vmem:[#allocation2 + $0x240] sm:$0xff] %vm469_vm0, %v21365_v0  ;;  %544 = vst.msk [vmem:[#allocation2 + $0x248] sm:$0xff] %vm469_vm0, %v21365_v0 }
  0x29   : > { %545 = vst.msk [vmem:[#allocation2 + $0x250] sm:$0xff] %vm469_vm0, %v21365_v0  ;;  %547 = vst.msk [vmem:[#allocation2 + $0x260] sm:$0xff] %vm469_vm0, %v21365_v0 }
  0x2a   : > { %548 = vst.msk [vmem:[#allocation2 + $0x268] sm:$0xff] %vm469_vm0, %v21365_v0  ;;  %549 = vst.msk [vmem:[#allocation2 + $0x270] sm:$0xff] %vm469_vm0, %v21365_v0 }
  0x2b   : > { %478 = vst.msk [vmem:[#allocation2 + $0x38] sm:$0x7] %vm473_vm1, %v21365_v0  ;;  %474 = vst.msk [vmem:[#allocation2 + $0x18] sm:$0x7] %vm473_vm1, %v21365_v0 }
  0x2c   : > { %482 = vst.msk [vmem:[#allocation2 + $0x58] sm:$0x7] %vm473_vm1, %v21365_v0  ;;  %486 = vst.msk [vmem:[#allocation2 + $0x78] sm:$0x7] %vm473_vm1, %v21365_v0 }
  0x2d   : > { %490 = vst.msk [vmem:[#allocation2 + $0x98] sm:$0x7] %vm473_vm1, %v21365_v0  ;;  %494 = vst.msk [vmem:[#allocation2 + $0xb8] sm:$0x7] %vm473_vm1, %v21365_v0 }
  0x2e   : > { %498 = vst.msk [vmem:[#allocation2 + $0xd8] sm:$0x7] %vm473_vm1, %v21365_v0  ;;  %502 = vst.msk [vmem:[#allocation2 + $0xf8] sm:$0x7] %vm473_vm1, %v21365_v0 }
  0x2f   : > { %506 = vst.msk [vmem:[#allocation2 + $0x118] sm:$0x7] %vm473_vm1, %v21365_v0  ;;  %510 = vst.msk [vmem:[#allocation2 + $0x138] sm:$0x7] %vm473_vm1, %v21365_v0 }
  0x30   : > { %514 = vst.msk [vmem:[#allocation2 + $0x158] sm:$0x7] %vm473_vm1, %v21365_v0  ;;  %518 = vst.msk [vmem:[#allocation2 + $0x178] sm:$0x7] %vm473_vm1, %v21365_v0 }
  0x31   : > { %522 = vst.msk [vmem:[#allocation2 + $0x198] sm:$0x7] %vm473_vm1, %v21365_v0  ;;  %526 = vst.msk [vmem:[#allocation2 + $0x1b8] sm:$0x7] %vm473_vm1, %v21365_v0 }
  0x32   : > { %530 = vst.msk [vmem:[#allocation2 + $0x1d8] sm:$0x7] %vm473_vm1, %v21365_v0  ;;  %534 = vst.msk [vmem:[#allocation2 + $0x1f8] sm:$0x7] %vm473_vm1, %v21365_v0  ;;  %v15155_v11 = vld [vmem:[#allocation2 + $0x31] sm:$0xff] }
  0x33   : > { %538 = vst.msk [vmem:[#allocation2 + $0x218] sm:$0x7] %vm473_vm1, %v21365_v0  ;;  %542 = vst.msk [vmem:[#allocation2 + $0x238] sm:$0x7] %vm473_vm1, %v21365_v0  ;;  %v669_v12 = vld [vmem:[#allocation2 + $0x11] sm:$0xff]  ;;  %v11607_v14 = vpack.i.bf16 %v15155_v11, %v15150_v9 }
  0x34   : > { %546 = vst.msk [vmem:[#allocation2 + $0x258] sm:$0x7] %vm473_vm1, %v21365_v0  ;;  %550 = vst.msk [vmem:[#allocation2 + $0x278] sm:$0x7] %vm473_vm1, %v21365_v0  ;;  %v11602_v19 = vpack.i.bf16 %v15157_v13, %v669_v12  ;;  %v15235_v12 = vld [vmem:[#allocation2 + $0x2a] sm:$0xff]  ;;  %vm5221_vm1 = vcmask 490496  }
  0x35   : > { %6007 = vst.msk [vmem:[#allocation3] sm:$0xff] %vm4545_vm2, %v21365_v0  ;;  %6008 = vst.msk [vmem:[#allocation3 + $0x8] sm:$0xff] %vm4545_vm2, %v21365_v0  ;;  %11608 = vrot.lane.b32.xlu1 %v11607_v14, %s14805_s20 }
  0x36   : > { %6011 = vst.msk [vmem:[#allocation3 + $0x18] sm:$0xff] %vm4545_vm2, %v21365_v0  ;;  %6012 = vst.msk [vmem:[#allocation3 + $0x20] sm:$0xff] %vm4545_vm2, %v21365_v0  ;;  %11603 = vrot.lane.b32.xlu0 %v11602_v19, %s14805_s20 }
  0x37   : > { %6014 = vst.msk [vmem:[#allocation3 + $0x30] sm:$0xff] %vm4545_vm2, %v21365_v0  ;;  %6015 = vst.msk [vmem:[#allocation3 + $0x38] sm:$0xff] %vm4545_vm2, %v21365_v0 }
  0x38   : > { %6017 = vst.msk [vmem:[#allocation3 + $0x48] sm:$0xff] %vm4545_vm2, %v21365_v0  ;;  %6018 = vst.msk [vmem:[#allocation3 + $0x50] sm:$0xff] %vm4545_vm2, %v21365_v0 }
  0x39   : > { %6020 = vst.msk [vmem:[#allocation3 + $0x60] sm:$0xff] %vm4545_vm2, %v21365_v0  ;;  %6021 = vst.msk [vmem:[#allocation3 + $0x68] sm:$0xff] %vm4545_vm2, %v21365_v0 }
  0x3a   : > { %6023 = vst.msk [vmem:[#allocation3 + $0x78] sm:$0xff] %vm4545_vm2, %v21365_v0  ;;  %6024 = vst.msk [vmem:[#allocation3 + $0x80] sm:$0xff] %vm4545_vm2, %v21365_v0 }
  0x3b   : > { %6026 = vst.msk [vmem:[#allocation3 + $0x90] sm:$0xff] %vm4545_vm2, %v21365_v0  ;;  %6027 = vst.msk [vmem:[#allocation3 + $0x98] sm:$0xff] %vm4545_vm2, %v21365_v0 }
  0x3c   : > { %6029 = vst.msk [vmem:[#allocation3 + $0xa8] sm:$0xff] %vm4545_vm2, %v21365_v0  ;;  %6030 = vst.msk [vmem:[#allocation3 + $0xb0] sm:$0xff] %vm4545_vm2, %v21365_v0 }
  0x3d   : > { %6032 = vst.msk [vmem:[#allocation3 + $0xc0] sm:$0xff] %vm4545_vm2, %v21365_v0  ;;  %6033 = vst.msk [vmem:[#allocation3 + $0xc8] sm:$0xff] %vm4545_vm2, %v21365_v0 }
  0x3e   : > { %6035 = vst.msk [vmem:[#allocation3 + $0xd8] sm:$0xff] %vm4545_vm2, %v21365_v0  ;;  %6036 = vst.msk [vmem:[#allocation3 + $0xe0] sm:$0xff] %vm4545_vm2, %v21365_v0 }
  0x3f   : > { %6038 = vst.msk [vmem:[#allocation3 + $0xf0] sm:$0xff] %vm4545_vm2, %v21365_v0  ;;  %6039 = vst.msk [vmem:[#allocation3 + $0xf8] sm:$0xff] %vm4545_vm2, %v21365_v0 }
  0x40   : > { %6041 = vst.msk [vmem:[#allocation3 + $0x108] sm:$0xff] %vm4545_vm2, %v21365_v0  ;;  %6042 = vst.msk [vmem:[#allocation3 + $0x110] sm:$0xff] %vm4545_vm2, %v21365_v0 }
  0x41   : > { %6044 = vst.msk [vmem:[#allocation3 + $0x120] sm:$0xff] %vm4545_vm2, %v21365_v0  ;;  %6045 = vst.msk [vmem:[#allocation3 + $0x128] sm:$0xff] %vm4545_vm2, %v21365_v0 }
  0x42   : > { %584 = vst.msk [vmem:[#allocation2 + $0x42] sm:$0xff] %vm469_vm0, %v551_v1  ;;  %585 = vst.msk [vmem:[#allocation2 + $0x4a] sm:$0xff] %vm469_vm0, %v552_v2  ;;  %v577_v1 = vld [vmem:[%s15139_s19 + $0xd0] sm:$0xff]  ;;  %v578_v2 = vld [vmem:[%s15139_s19 + $0xd8] sm:$0xff] }
  0x43   : > { %586 = vst.msk [vmem:[#allocation2 + $0x62] sm:$0xff] %vm469_vm0, %v553_v3  ;;  %587 = vst.msk [vmem:[#allocation2 + $0x6a] sm:$0xff] %vm469_vm0, %v554_v4  ;;  %v579_v3 = vld [vmem:[%s15139_s19 + $0xe0] sm:$0xff] }
  0x44   : > { %588 = vst.msk [vmem:[#allocation2 + $0x82] sm:$0xff] %vm469_vm0, %v555_v5  ;;  %589 = vst.msk [vmem:[#allocation2 + $0x8a] sm:$0xff] %vm469_vm0, %v556_v6  ;;  %v580_v6 = vld [vmem:[%s15139_s19 + $0xe8] sm:$0xff] }
  0x45   : > { %590 = vst.msk [vmem:[#allocation2 + $0xa2] sm:$0xff] %vm469_vm0, %v557_v15  ;;  %591 = vst.msk [vmem:[#allocation2 + $0xaa] sm:$0xff] %vm469_vm0, %v558_v16  ;;  %v15237_v15 = vld [vmem:[#allocation2 + $0x32] sm:$0xff] }
  0x46   : > { %592 = vst.msk [vmem:[#allocation2 + $0xc2] sm:$0xff] %vm469_vm0, %v559_v17  ;;  %593 = vst.msk [vmem:[#allocation2 + $0xca] sm:$0xff] %vm469_vm0, %v560_v20  ;;  %v11902_v17 = vpack.i.bf16 %v15235_v12, %v15233_v10 }
  0x47   : > { %594 = vst.msk [vmem:[#allocation2 + $0xe2] sm:$0xff] %vm469_vm0, %v561_v21  ;;  %595 = vst.msk [vmem:[#allocation2 + $0xea] sm:$0xff] %vm469_vm0, %v562_v22 }
  0x48   : > { %596 = vst.msk [vmem:[#allocation2 + $0x102] sm:$0xff] %vm469_vm0, %v563_v23  ;;  %597 = vst.msk [vmem:[#allocation2 + $0x10a] sm:$0xff] %vm469_vm0, %v564_v24 }
  0x49   : > { %598 = vst.msk [vmem:[#allocation2 + $0x122] sm:$0xff] %vm469_vm0, %v565_v25  ;;  %v15187_v29 = vld [vmem:[#allocation2 + $0x41] sm:$0xff]  ;;  %v674_v30 = vld [vmem:[#allocation2 + $0x49] sm:$0xff]  ;;  %v675_v31 = vld [vmem:[#allocation2 + $0x51] sm:$0xff] }
  0x4a   : > { %599 = vst.msk [vmem:[#allocation2 + $0x12a] sm:$0xff] %vm469_vm0, %v566_v26  ;;  %600 = vst.msk [vmem:[#allocation2 + $0x142] sm:$0xff] %vm469_vm0, %v567_v27  ;;  %v15194_v32 = vpack.i.bf16 %v674_v30, %v15187_v29  ;;  %v676_v33 = vld [vmem:[#allocation2 + $0x61] sm:$0xff]  ;;  %v677_v34 = vld [vmem:[#allocation2 + $0x69] sm:$0xff]  ;;  %v11897_v36 = vpack.i.bf16 %v15187_v29, %v15155_v11 }
  0x4b   : > { %601 = vst.msk [vmem:[#allocation2 + $0x14a] sm:$0xff] %vm469_vm0, %v568_v28  ;;  %v678_v35 = vld [vmem:[#allocation2 + $0x71] sm:$0xff]  ;;  %v15198_v37 = vpack.i.bf16 %v676_v33, %v675_v31  ;;  %v679_v38 = vld [vmem:[#allocation2 + $0x81] sm:$0xff]  ;;  %v680_v39 = vld [vmem:[#allocation2 + $0x89] sm:$0xff] }
  0x4c   : > { %11613 = vrot.lane.b32.xlu1 %v15194_v32, %s14805_s20  ;;  %v11622_v40 = vpack.i.bf16 %v678_v35, %v677_v34  ;;  %v681_v44 = vld [vmem:[#allocation2 + $0x91] sm:$0xff]  ;;  %v682_v45 = vld [vmem:[#allocation2 + $0xa1] sm:$0xff]  ;;  %602 = vst.msk [vmem:[#allocation2 + $0x162] sm:$0xff] %vm469_vm0, %v569_v41  ;;  %603 = vst.msk [vmem:[#allocation2 + $0x16a] sm:$0xff] %vm469_vm0, %v570_v42  ;;  %v11627_v46 = vpack.i.bf16 %v680_v39, %v679_v38 }
  0x4d   : > { %604 = vst.msk [vmem:[#allocation2 + $0x182] sm:$0xff] %vm469_vm0, %v571_v43  ;;  %11618 = vrot.lane.b32.xlu0 %v15198_v37, %s14805_s20  ;;  %v683_v47 = vld [vmem:[#allocation2 + $0xa9] sm:$0xff]  ;;  %v684_v48 = vld [vmem:[#allocation2 + $0xb1] sm:$0xff]  ;;  %v11632_v49 = vpack.i.bf16 %v682_v45, %v681_v44  ;;  %v685_v50 = vld [vmem:[#allocation2 + $0xc1] sm:$0xff] }
  0x4e   : > { %v686_v51 = vld [vmem:[#allocation2 + $0xc9] sm:$0xff]  ;;  %v11637_v52 = vpack.i.bf16 %v684_v48, %v683_v47  ;;  %v687_v53 = vld [vmem:[#allocation2 + $0xd1] sm:$0xff]  ;;  %v688_v54 = vld [vmem:[#allocation2 + $0xe1] sm:$0xff]  ;;  %605 = vst.msk [vmem:[#allocation2 + $0x18a] sm:$0xff] %vm469_vm0, %v572_v55 }
  0x4f   : > { %v11642_v58 = vpack.i.bf16 %v686_v51, %v685_v50  ;;  %v689_v59 = vld [vmem:[#allocation2 + $0xe9] sm:$0xff]  ;;  %606 = vst.msk [vmem:[#allocation2 + $0x1a2] sm:$0xff] %vm469_vm0, %v573_v56  ;;  %607 = vst.msk [vmem:[#allocation2 + $0x1aa] sm:$0xff] %vm469_vm0, %v574_v57  ;;  %v690_v60 = vld [vmem:[#allocation2 + $0xf1] sm:$0xff]  ;;  %v11647_v63 = vpack.i.bf16 %v688_v54, %v687_v53 }
  0x50   : > { %11623 = vrot.lane.b32.xlu1 %v11622_v40, %s14805_s20  ;;  %608 = vst.msk [vmem:[#allocation2 + $0x1c2] sm:$0xff] %vm469_vm0, %v575_v61  ;;  %609 = vst.msk [vmem:[#allocation2 + $0x1ca] sm:$0xff] %vm469_vm0, %v576_v62  ;;  %v691_v4 = vld [vmem:[#allocation2 + $0x101] sm:$0xff]  ;;  %v692_v5 = vld [vmem:[#allocation2 + $0x109] sm:$0xff]  ;;  %v11652_v7 = vpack.i.bf16 %v690_v60, %v689_v59 }
  0x51   : > { %11628 = vrot.lane.b32.xlu0 %v11627_v46, %s14805_s20  ;;  %610 = vst.msk [vmem:[#allocation2 + $0x1e2] sm:$0xff] %vm469_vm0, %v577_v1  ;;  %611 = vst.msk [vmem:[#allocation2 + $0x1ea] sm:$0xff] %vm469_vm0, %v578_v2  ;;  %v693_v8 = vld [vmem:[#allocation2 + $0x111] sm:$0xff]  ;;  %v694_v14 = vld [vmem:[#allocation2 + $0x121] sm:$0xff]  ;;  %v11657_v19 = vpack.i.bf16 %v692_v5, %v691_v4 }
  0x52   : > { %612 = vst.msk [vmem:[#allocation2 + $0x202] sm:$0xff] %vm469_vm0, %v579_v3  ;;  %613 = vst.msk [vmem:[#allocation2 + $0x20a] sm:$0xff] %vm469_vm0, %v580_v6  ;;  %v15239_v16 = vld [vmem:[#allocation2 + $0x42] sm:$0xff]  ;;  %v696_v22 = vld [vmem:[#allocation2 + $0x131] sm:$0xff]  ;;  %v11662_v23 = vpack.i.bf16 %v694_v14, %v693_v8 }
  0x53   : > { %v11907_v20 = vpack.i.bf16 %v15239_v16, %v15237_v15  ;;  %v695_v21 = vld [vmem:[#allocation2 + $0x129] sm:$0xff]  ;;  %v697_v24 = vld [vmem:[#allocation2 + $0x141] sm:$0xff]  ;;  %v699_v27 = vld [vmem:[#allocation2 + $0x151] sm:$0xff]  ;;  %8226 = vst.msk [vmem:[#allocation4] sm:$0xff] %vm4649_vm3, %v21365_v0 }
  0x54   : > { %11633 = vrot.lane.b32.xlu1 %v11632_v49, %s14805_s20  ;;  %v698_v25 = vld [vmem:[#allocation2 + $0x149] sm:$0xff]  ;;  %v11667_v26 = vpack.i.bf16 %v696_v22, %v695_v21  ;;  %v700_v28 = vld [vmem:[#allocation2 + $0x161] sm:$0xff]  ;;  %v702_v33 = vld [vmem:[#allocation2 + $0x171] sm:$0xff]  ;;  %v11732_v21 = vpack.i.bf16 %v15237_v15, %v15235_v12  ;;  %8229 = vst.msk [vmem:[#allocation4 + $0x10] sm:$0xff] %vm4649_vm3, %v21365_v0 }
  0x55   : > { %11638 = vrot.lane.b32.xlu0 %v11637_v52, %s14805_s20  ;;  %v11672_v30 = vpack.i.bf16 %v698_v25, %v697_v24  ;;  %v701_v31 = vld [vmem:[#allocation2 + $0x169] sm:$0xff]  ;;  %v11677_v34 = vpack.i.bf16 %v700_v28, %v699_v27  ;;  %v703_v35 = vld [vmem:[#allocation2 + $0x181] sm:$0xff]  ;;  %v705_v41 = vld [vmem:[#allocation2 + $0x191] sm:$0xff]  ;;  %8231 = vst.msk [vmem:[#allocation4 + $0x20] sm:$0xff] %vm4649_vm3, %v21365_v0 }
  0x56   : > { %v704_v38 = vld [vmem:[#allocation2 + $0x189] sm:$0xff]  ;;  %v11682_v39 = vpack.i.bf16 %v702_v33, %v701_v31  ;;  %v706_v42 = vld [vmem:[#allocation2 + $0x1a1] sm:$0xff]  ;;  %v15253_v43 = vld [vmem:[#allocation2 + $0x52] sm:$0xff]  ;;  %8233 = vst.msk [vmem:[#allocation4 + $0x30] sm:$0xff] %vm4649_vm3, %v21365_v0 }
  0x57   : > { %v15251_v40 = vld [vmem:[#allocation2 + $0x4a] sm:$0xff]  ;;  %v11687_v44 = vpack.i.bf16 %v704_v38, %v703_v35  ;;  %v11692_v48 = vpack.i.bf16 %v706_v42, %v705_v41  ;;  %v727_v49 = vld [vmem:[#allocation2 + $0x62] sm:$0xff]  ;;  %v15264_v61 = vld [vmem:[#allocation2 + $0x72] sm:$0xff]  ;;  %8235 = vst.msk [vmem:[#allocation4 + $0x40] sm:$0xff] %vm4649_vm3, %v21365_v0 }
  0x58   : > { %11643 = vrot.lane.b32.xlu1 %v11642_v58, %s14805_s20  ;;  %v11997_v45 = vpack.i.bf16 %v15253_v43, %v15251_v40  ;;  %v707_v46 = vld [vmem:[#allocation2 + $0x1a9] sm:$0xff]  ;;  %v708_v47 = vld [vmem:[#allocation2 + $0x1b1] sm:$0xff]  ;;  %v709_v50 = vld [vmem:[#allocation2 + $0x1c1] sm:$0xff]  ;;  %v15282_v22 = vpack.i.bf16 %v15251_v40, %v15239_v16  ;;  %8237 = vst.msk [vmem:[#allocation4 + $0x50] sm:$0xff] %vm4649_vm3, %v21365_v0 }
  0x59   : > { %11648 = vrot.lane.b32.xlu0 %v11647_v63, %s14805_s20  ;;  %v710_v51 = vld [vmem:[#allocation2 + $0x1c9] sm:$0xff]  ;;  %v11697_v53 = vpack.i.bf16 %v708_v47, %v707_v46  ;;  %v711_v55 = vld [vmem:[#allocation2 + $0x1d1] sm:$0xff]  ;;  %v712_v56 = vld [vmem:[#allocation2 + $0x1e1] sm:$0xff]  ;;  %8239 = vst.msk [vmem:[#allocation4 + $0x60] sm:$0xff] %vm4649_vm3, %v21365_v0 }
  0x5a   : > { %v728_v52 = vld [vmem:[#allocation2 + $0x6a] sm:$0xff]  ;;  %v11702_v57 = vpack.i.bf16 %v710_v51, %v709_v50  ;;  %v11707_v60 = vpack.i.bf16 %v712_v56, %v711_v55  ;;  %v715_v62 = vld [vmem:[#allocation2 + $0x201] sm:$0xff]  ;;  %v720_v8 = vld [vmem:[#allocation2 + $0x12] sm:$0xff]  ;;  %8241 = vst.msk [vmem:[#allocation4 + $0x70] sm:$0xff] %vm4649_vm3, %v21365_v0 }
  0x5b   : > { %v15260_v54 = vpack.i.bf16 %v728_v52, %v727_v49  ;;  %v713_v58 = vld [vmem:[#allocation2 + $0x1e9] sm:$0xff]  ;;  %v714_v59 = vld [vmem:[#allocation2 + $0x1f1] sm:$0xff]  ;;  %v11747_v25 = vpack.i.bf16 %v15264_v61, %v728_v52  ;;  %8243 = vst.msk [vmem:[#allocation4 + $0x80] sm:$0xff] %vm4649_vm3, %v21365_v0  ;;  %v625_v29 = vld [vmem:[#allocation2 + $0x60] sm:$0xff] }
  0x5c   : > { %11653 = vrot.lane.b32.xlu1 %v11652_v7, %s14805_s20  ;;  %v716_v63 = vld [vmem:[#allocation2 + $0x209] sm:$0xff]  ;;  %v11712_v2 = vpack.i.bf16 %v714_v59, %v713_v58  ;;  %v717_v7 = vld [vmem:[#allocation2 + $0x211] sm:$0xff]  ;;  %9070 = vst.msk [vmem:[#allocation5] sm:$0xff] %vm4857_vm4, %v21365_v0  ;;  %9073 = vst.msk [vmem:[#allocation5 + $0x10] sm:$0xff] %vm4857_vm4, %v21365_v0 }
  0x5d   : > { %11658 = vrot.lane.b32.xlu0 %v11657_v19, %s14805_s20  ;;  %v15266_v1 = vld [vmem:[#allocation2 + $0x82] sm:$0xff]  ;;  %v11717_v4 = vpack.i.bf16 %v716_v63, %v715_v62  ;;  %v719_v6 = vld [vmem:[#allocation2 + $0xa] sm:$0xff]  ;;  %v11727_v19 = vpack.i.bf16 %v15233_v10, %v720_v8  ;;  %v735_v31 = vld [vmem:[#allocation2 + $0xb2] sm:$0xff]  ;;  %9075 = vst.msk [vmem:[#allocation5 + $0x20] sm:$0xff] %vm4857_vm4, %v21365_v0 }
  0x5e   : > { %v12022_v3 = vpack.i.bf16 %v15266_v1, %v15264_v61  ;;  %v718_v5 = vld [vmem:[#allocation2 + $0x2] sm:$0xff]  ;;  %v731_v24 = vld [vmem:[#allocation2 + $0x8a] sm:$0xff]  ;;  %v738_v38 = vld [vmem:[#allocation2 + $0xd2] sm:$0xff]  ;;  %9077 = vst.msk [vmem:[#allocation5 + $0x30] sm:$0xff] %vm4857_vm4, %v21365_v0 }
  0x5f   : > { %v11722_v14 = vpack.i.bf16 %v719_v6, %v718_v5  ;;  %v733_v27 = vld [vmem:[#allocation2 + $0xa2] sm:$0xff]  ;;  %v11752_v28 = vpack.i.bf16 %v731_v24, %v15266_v1  ;;  %v737_v35 = vld [vmem:[#allocation2 + $0xca] sm:$0xff]  ;;  %v744_v50 = vld [vmem:[#allocation2 + $0x112] sm:$0xff]  ;;  %9079 = vst.msk [vmem:[#allocation5 + $0x40] sm:$0xff] %vm4857_vm4, %v21365_v0 }
  0x60   : > { %11663 = vrot.lane.b32.xlu1 %v11662_v23, %s14805_s20  ;;  %v15286_v23 = vpack.i.bf16 %v727_v49, %v15253_v43  ;;  %v739_v41 = vld [vmem:[#allocation2 + $0xe2] sm:$0xff]  ;;  %v740_v42 = vld [vmem:[#allocation2 + $0xea] sm:$0xff]  ;;  %v747_v55 = vld [vmem:[#allocation2 + $0x132] sm:$0xff]  ;;  %9081 = vst.msk [vmem:[#allocation5 + $0x50] sm:$0xff] %vm4857_vm4, %v21365_v0 }
  0x61   : > { %11668 = vrot.lane.b32.xlu0 %v11667_v26, %s14805_s20  ;;  %v732_v26 = vld [vmem:[#allocation2 + $0x92] sm:$0xff]  ;;  %v742_v47 = vld [vmem:[#allocation2 + $0x102] sm:$0xff]  ;;  %v11772_v49 = vpack.i.bf16 %v739_v41, %v738_v38  ;;  %v749_v58 = vld [vmem:[#allocation2 + $0x14a] sm:$0xff]  ;;  %9083 = vst.msk [vmem:[#allocation5 + $0x60] sm:$0xff] %vm4857_vm4, %v21365_v0 }
  0x62   : > { %v11757_v33 = vpack.i.bf16 %v733_v27, %v732_v26  ;;  %v745_v51 = vld [vmem:[#allocation2 + $0x122] sm:$0xff]  ;;  %v758_v24 = vld [vmem:[#allocation2 + $0x1aa] sm:$0xff]  ;;  %v765_v38 = vld [vmem:[#allocation2 + $0x1f2] sm:$0xff]  ;;  %9781 = vst.msk [vmem:[#allocation6] sm:$0xff] %vm5331_vm5, %v21365_v0 }
  0x63   : > { %v11787_v59 = vpack.i.bf16 %v745_v51, %v744_v50  ;;  %v751_v62 = vld [vmem:[#allocation2 + $0x162] sm:$0xff]  ;;  %v770_v50 = vld [vmem:[#allocation2 + $0xb] sm:$0xff]  ;;  %9784 = vst.msk [vmem:[#allocation6 + $0x10] sm:$0xff] %vm5331_vm5, %v21365_v0  ;;  %9786 = vst.msk [vmem:[#allocation6 + $0x20] sm:$0xff] %vm5331_vm5, %v21365_v0 }
  0x64   : > { %11673 = vrot.lane.b32.xlu1 %v11672_v30, %s14805_s20  ;;  %v734_v30 = vld [vmem:[#allocation2 + $0xaa] sm:$0xff]  ;;  %v754_v6 = vld [vmem:[#allocation2 + $0x182] sm:$0xff]  ;;  %9788 = vst.msk [vmem:[#allocation6 + $0x30] sm:$0xff] %vm5331_vm5, %v21365_v0  ;;  %9790 = vst.msk [vmem:[#allocation6 + $0x40] sm:$0xff] %vm5331_vm5, %v21365_v0 }
  0x65   : > { %11678 = vrot.lane.b32.xlu0 %v11677_v34, %s14805_s20  ;;  %v736_v34 = vld [vmem:[#allocation2 + $0xc2] sm:$0xff]  ;;  %9792 = vst.msk [vmem:[#allocation6 + $0x50] sm:$0xff] %vm5331_vm5, %v21365_v0  ;;  %9794 = vst.msk [vmem:[#allocation6 + $0x60] sm:$0xff] %vm5331_vm5, %v21365_v0 }
  0x66   : > { %v11767_v46 = vpack.i.bf16 %v737_v35, %v736_v34  ;;  %v760_v27 = vld [vmem:[#allocation2 + $0x1c2] sm:$0xff]  ;;  %v764_v35 = vld [vmem:[#allocation2 + $0x1ea] sm:$0xff]  ;;  %9796 = vst.msk [vmem:[#allocation6 + $0x70] sm:$0xff] %vm5331_vm5, %v21365_v0 }
  0x67   : > { %v763_v34 = vld [vmem:[#allocation2 + $0x1e2] sm:$0xff] }
  0x68   : > { %11683 = vrot.lane.b32.xlu1 %v11682_v39, %s14805_s20  ;;  %v11762_v39 = vpack.i.bf16 %v735_v31, %v734_v30  ;;  %v762_v31 = vld [vmem:[#allocation2 + $0x1d2] sm:$0xff]  ;;  %v766_v41 = vld [vmem:[#allocation2 + $0x202] sm:$0xff] }
  0x69   : > { %11688 = vrot.lane.b32.xlu0 %v11687_v44, %s14805_s20  ;;  %v741_v44 = vld [vmem:[#allocation2 + $0xf2] sm:$0xff]  ;;  %v14655_v43 = vld [vmem:[%s21345_s1] sm:$0xff]   ;;  %v629_v1 = vld [vmem:[#allocation2 + $0x88] sm:$0xff] }
  0x6a   : > { %v11777_v52 = vpack.i.bf16 %v741_v44, %v740_v42  ;;  %v767_v42 = vld [vmem:[#allocation2 + $0x20a] sm:$0xff]  ;;  %v11832_v44 = vpack.i.bf16 %v763_v34, %v762_v31 }
  0x6b   : > { %v11842_v51 = vpack.i.bf16 %v767_v42, %v766_v41  ;;  %v623_v34 = vld [vmem:[#allocation2 + $0x48] sm:$0xff] }
  0x6c   : > { %11693 = vrot.lane.b32.xlu1 %v11692_v48, %s14805_s20  ;;  %v743_v48 = vld [vmem:[#allocation2 + $0x10a] sm:$0xff] }
  0x6d   : > { %11698 = vrot.lane.b32.xlu0 %v11697_v53, %s14805_s20  ;;  %v746_v53 = vld [vmem:[#allocation2 + $0x12a] sm:$0xff]  ;;  %v11782_v56 = vpack.i.bf16 %v743_v48, %v742_v47  ;;  %v6107_v47 = vld [vmem:[#allocation3 + $0x1] sm:$0xff]  ;;  %v11837_v48 = vpack.i.bf16 %v765_v38, %v764_v35 }
  0x6e   : > { %v11792_v63 = vpack.i.bf16 %v747_v55, %v746_v53  ;;  %v15312_v53 = vld [vmem:[#allocation2 + $0x23] sm:$0xff] }
  0x6f   : > { %v1288_v0 = vld [vmem:[#allocation2 + $0xa9] sm:$0xff] }
  0x70   : > { %11703 = vrot.lane.b32.xlu1 %v11702_v57, %s14805_s20  ;;  %v748_v57 = vld [vmem:[#allocation2 + $0x142] sm:$0xff] }
  0x71   : > { %11708 = vrot.lane.b32.xlu0 %v11707_v60, %s14805_s20  ;;  %v750_v60 = vld [vmem:[#allocation2 + $0x152] sm:$0xff]  ;;  %v11797_v5 = vpack.i.bf16 %v749_v58, %v748_v57 }
  0x72   : > { %v11802_v8 = vpack.i.bf16 %v751_v62, %v750_v60  ;;  %v15317_v57 = vld [vmem:[#allocation2 + $0x33] sm:$0xff]  ;;  %v15322_v60 = vld [vmem:[#allocation2 + $0x4b] sm:$0xff] }
  0x74   : > { %11713 = vrot.lane.b32.xlu1 %v11712_v2, %s14805_s20  ;;  %v752_v2 = vld [vmem:[#allocation2 + $0x16a] sm:$0xff] }
  0x75   : > { %11718 = vrot.lane.b32.xlu0 %v11717_v4, %s14805_s20  ;;  %v753_v4 = vld [vmem:[#allocation2 + $0x172] sm:$0xff] }
  0x78   : > { %1585 = vrot.lane.b32.xlu1 %v717_v7, %s14805_s20  ;;  %v755_v7 = vld [vmem:[#allocation2 + $0x18a] sm:$0xff]  ;;  %s21506_s20 = smov 16  }
  0x79   : > { %11723 = vrot.lane.b32.xlu0 %v11722_v14, %s21359_s21  ;;  %v756_v14 = vld [vmem:[#allocation2 + $0x192] sm:$0xff]  ;;  %v11812_v26 = vpack.i.bf16 %v755_v7, %v754_v6 }
  0x7a   : > { %v15353_v6 = vld [vmem:[#allocation2 + $0x73] sm:$0xff] }
  0x7c   : > { %11728 = vrot.lane.b32.xlu1 %v11727_v19, %s21359_s21  ;;  %v757_v19 = vld [vmem:[#allocation2 + $0x1a2] sm:$0xff] }
  0x7d   : > { %11733 = vrot.lane.b32.xlu0 %v11732_v21, %s21359_s21  ;;  %v11807_v21 = vpack.i.bf16 %v753_v4, %v752_v2  ;;  %v11817_v30 = vpack.i.bf16 %v757_v19, %v756_v14  ;;  %v15328_v2 = vld [vmem:[#allocation2 + $0x63] sm:$0xff]  ;;  %v621_v19 = vld [vmem:[#allocation2 + $0x30] sm:$0xff] }
  0x80   : > { %11738 = vrot.lane.b32.xlu1 %v15282_v22, %s21359_s21 }
  0x81   : > { %11743 = vrot.lane.b32.xlu0 %v15286_v23, %s21359_s21 }
  0x84   : > { %11748 = vrot.lane.b32.xlu1 %v11747_v25, %s21359_s21  ;;  %v759_v25 = vld [vmem:[#allocation2 + $0x1b2] sm:$0xff] }
  0x85   : > { %11753 = vrot.lane.b32.xlu0 %v11752_v28, %s21359_s21  ;;  %v761_v28 = vld [vmem:[#allocation2 + $0x1ca] sm:$0xff] }
  0x88   : > { %11758 = vrot.lane.b32.xlu1 %v11757_v33, %s21359_s21  ;;  %v11822_v33 = vpack.i.bf16 %v759_v25, %v758_v24  ;;  %v824_v25 = vld [vmem:[#allocation2 + $0x40] sm:$0xff] }
  0x89   : > { %11763 = vrot.lane.b32.xlu0 %v11762_v39, %s21359_s21  ;;  %v11827_v39 = vpack.i.bf16 %v761_v28, %v760_v27  ;;  %v11887_v28 = vpack.i.bf16 %v824_v25, %v621_v19  ;;  %v11922_v12 = vpack.i.bf16 %v623_v34, %v824_v25  ;;  %v14653_v19 = vld [vmem:[%s21345_s1 + $0x10] sm:$0xff]  }
  0x8b   : > { %v15376_v27 = vpop.permute.xlu0 %11598 }
  0x8c   : > { %11768 = vrot.lane.b32.xlu1 %v11767_v46, %s21359_s21  ;;  %v768_v46 = vld [vmem:[#allocation2 + $0x212] sm:$0xff] }
  0x8d   : > { %11773 = vrot.lane.b32.xlu0 %v11772_v49, %s21359_s21  ;;  %v769_v49 = vld [vmem:[#allocation2 + $0x3] sm:$0xff]  ;;  %v11847_v55 = vpack.i.bf16 %v6107_v47, %v768_v46 }
  0x8e   : > { %v11852_v58 = vpack.i.bf16 %v770_v50, %v769_v49  ;;  %v15470_v49 = vld [vmem:[#allocation2 + $0x70] sm:$0xff]  ;;  %v15472_v50 = vld [vmem:[#allocation2 + $0x80] sm:$0xff] }
  0x90   : > { %11778 = vrot.lane.b32.xlu1 %v11777_v52, %s21359_s21  ;;  %v771_v52 = vld [vmem:[#allocation2 + $0x13] sm:$0xff] }
  0x91   : > { %11783 = vrot.lane.b32.xlu0 %v11782_v56, %s21359_s21  ;;  %v15315_v56 = vld [vmem:[#allocation2 + $0x2b] sm:$0xff]  ;;  %v11857_v62 = vpack.i.bf16 %v15312_v53, %v771_v52 }
  0x92   : > { %v11862_v4 = vpack.i.bf16 %v15317_v57, %v15315_v56 }
  0x94   : > { %11788 = vrot.lane.b32.xlu1 %v11787_v59, %s21359_s21  ;;  %v15320_v59 = vld [vmem:[#allocation2 + $0x43] sm:$0xff] }
  0x95   : > { %11793 = vrot.lane.b32.xlu0 %v11792_v63, %s21359_s21  ;;  %v15326_v63 = vld [vmem:[#allocation2 + $0x53] sm:$0xff]  ;;  %v15358_v7 = vpack.i.bf16 %v15322_v60, %v15320_v59  ;;  %v11917_v11 = vpack.i.bf16 %v15320_v59, %v15317_v57  ;;  %v15484_v57 = vpack.i.bf16 %v15472_v50, %v15470_v49 }
  0x96   : > { %v15363_v14 = vpack.i.bf16 %v15328_v2, %v15326_v63  ;;  %v12017_v40 = vpack.i.bf16 %v15326_v63, %v15322_v60 }
  0x98   : > { %11798 = vrot.lane.b32.xlu1 %v11797_v5, %s21359_s21  ;;  %v15351_v5 = vld [vmem:[#allocation2 + $0x6b] sm:$0xff] }
  0x99   : > { %11803 = vrot.lane.b32.xlu0 %v11802_v8, %s21359_s21  ;;  %v620_v8 = vld [vmem:[#allocation2 + $0x28] sm:$0xff]  ;;  %v15371_v24 = vpack.i.bf16 %v15353_v6, %v15351_v5  ;;  %v12027_v63 = vpack.i.bf16 %v15351_v5, %v15328_v2  ;;  %v12047_v5 = vpack.i.bf16 %v629_v1, %v15472_v50 }
  0x9c   : > { %11808 = vrot.lane.b32.xlu1 %v11807_v21, %s21359_s21  ;;  %v15365_v21 = vld [vmem:[#allocation2 + $0x20] sm:$0xff] }
  0x9d   : > { %11813 = vrot.lane.b32.xlu0 %v11812_v26, %s21359_s21  ;;  %v11882_v26 = vpack.i.bf16 %v620_v8, %v15365_v21  ;;  %v15499_v8 = vld [vmem:[#allocation2 + $0x81] sm:$0xff] }
  0xa0   : > { %11818 = vrot.lane.b32.xlu1 %v11817_v30, %s21359_s21 }
  0xa1   : > { %11823 = vrot.lane.b32.xlu0 %v11822_v33, %s21359_s21 }
  0xa4   : > { %11828 = vrot.lane.b32.xlu1 %v11827_v39, %s21359_s21 }
  0xa5   : > { %11833 = vrot.lane.b32.xlu0 %v11832_v44, %s21359_s21 }
  0xa7   : > { %v15380_v30 = vpop.permute.xlu1 %11608 }
  0xa8   : > { %11838 = vrot.lane.b32.xlu1 %v11837_v48, %s21359_s21  ;;  %v15383_v31 = vpop.permute.xlu0 %11603  ;;  %v877_v48 = vld [vmem:[#allocation2 + $0x51] sm:$0xff] }
  0xa9   : > { %11843 = vrot.lane.b32.xlu0 %v11842_v51, %s21359_s21  ;;  %v1281_v51 = vld [vmem:[#allocation2 + $0x61] sm:$0xff] }
  0xac   : > { %11848 = vrot.lane.b32.xlu1 %v11847_v55, %s21359_s21  ;;  %v15477_v55 = vld [vmem:[#allocation2 + $0x69] sm:$0xff]  ;;  %s14817_s21 = smov 52  }
  0xad   : > { %11853 = vrot.lane.b32.xlu0 %v11852_v58, %s21361_s22  ;;  %v11987_v59 = vpack.i.bf16 %v15477_v55, %v1281_v51  ;;  %v1134_v51 = vld [vmem:[#allocation2 + $0x8a] sm:$0xff] }
  0xb0   : > { %11858 = vrot.lane.b32.xlu1 %v11857_v62, %s21361_s22  ;;  %v14652_v62 = vld [vmem:[%s21345_s1 + $0x18] sm:$0xff]  }
  0xb1   : > { %11863 = vrot.lane.b32.xlu0 %v11862_v4, %s21361_s22  ;;  %11453 = vmatprep.subr.bf16.mxu0 %v14652_v62 }
  0xb2   : > { %11454 = vmatpush3.bf16.msra.mxu0 %v14652_v62 }
  0xb3   : > { %11455 = vmatprep.subr.bf16.mxu0 %v14653_v19 }
  0xb4   : > { %11868 = vrot.lane.b32.xlu1 %v15358_v7, %s21361_s22 }
  0xb5   : > { %11873 = vrot.lane.b32.xlu0 %v15363_v14, %s21361_s22 }
  0xb6   : > { %11456 = vmatpush3.bf16.msra.mxu0 %v14653_v19 }
  0xb8   : > { %11878 = vrot.lane.b32.xlu1 %v15371_v24, %s21361_s22  ;;  %s14819_s22 = smov 60  }
  0xb9   : > { %11883 = vrot.lane.b32.xlu0 %v11882_v26, %s21363_s23 }
  0xbc   : > { %11888 = vrot.lane.b32.xlu1 %v11887_v28, %s21363_s23 }
  0xbd   : > { %11893 = vrot.lane.b32.xlu0 %v11892_v18, %s14809_s24  ;;  %v11912_v18 = vpack.i.bf16 %v15315_v56, %v15312_v53 }
  0xbe   : > { %v15390_v33 = vpop.permute.xlu1 %11613 }
  0xbf   : > { %v15406_v9 = vpop.permute.xlu0 %11618 }
  0xc0   : > { %21472 = vst [vmem:[#allocation7_spill] sm:$0xff] %v15406_v9  ;;  %11898 = vrot.lane.b32.xlu1 %v11897_v36, %s14809_s24  ;;  %v624_v36 = vld [vmem:[#allocation2 + $0x50] sm:$0xff] }
  0xc1   : > { %11903 = vrot.lane.b32.xlu0 %v11902_v17, %s21435_s25  ;;  %v11927_v38 = vpack.i.bf16 %v625_v29, %v624_v36  ;;  %v11957_v44 = vpack.i.bf16 %v624_v36, %v623_v34  ;;  %v15567_v36 = vld [vmem:[#allocation2 + $0x83] sm:$0xff] }
  0xc2   : > { %v15416_v13 = vpop.permute.xlu1 %11623  ;;  %v12042_v61 = vpack.i.bf16 %v15567_v36, %v15353_v6 }
  0xc3   : > { %21473 = vst [vmem:[#allocation8_spill] sm:$0xff] %v15416_v13  ;;  %v15420_v35 = vpop.permute.xlu0 %11628 }
  0xc4   : > { %21474 = vst [vmem:[#allocation9_spill] sm:$0xff] %v15420_v35  ;;  %11908 = vrot.lane.b32.xlu1 %v11907_v20, %s21435_s25 }
  0xc5   : > { %11913 = vrot.lane.b32.xlu0 %v11912_v18, %s14811_s26  ;;  %v14654_v18 = vld [vmem:[%s21345_s1 + $0x8] sm:$0xff]  }
  0xc6   : > { %v15429_v10 = vpop.permute.xlu1 %11633  ;;  %11457 = vmatprep.subr.bf16.mxu0 %v14654_v18 }
  0xc7   : > { %21475 = vst [vmem:[#allocation10_spill] sm:$0xff] %v15429_v10  ;;  %v15431_v17 = vpop.permute.xlu0 %11638  ;;  %11458 = vmatpush3.bf16.msra.mxu0 %v14654_v18  ;;  %v15771_v10 = vld [vmem:[#allocation2 + $0xe0] sm:$0xff] }
  0xc8   : > { %21476 = vst [vmem:[#allocation11_spill] sm:$0xff] %v15431_v17  ;;  %11918 = vrot.lane.b32.xlu1 %v11917_v11, %s14811_s26  ;;  %11459 = vmatprep.subr.bf16.mxu0 %v14655_v43  ;;  %v1392_v17 = vld [vmem:[#allocation2 + $0xc3] sm:$0xff] }
  0xc9   : > { %11923 = vrot.lane.b32.xlu0 %v11922_v12, %s21437_s27 }
  0xca   : > { %v15435_v15 = vpop.permute.xlu1 %11643 }
  0xcb   : > { %21477 = vst [vmem:[#allocation12_spill] sm:$0xff] %v15435_v15  ;;  %v15437_v16 = vpop.permute.xlu0 %11648  ;;  %11460 = vmatpush3.bf16.msra.mxu0 %v14655_v43  ;;  %v15765_v15 = vld [vmem:[#allocation2 + $0xca] sm:$0xff] }
  0xcc   : > { %21478 = vst [vmem:[#allocation13_spill] sm:$0xff] %v15437_v16  ;;  %11928 = vrot.lane.b32.xlu1 %v11927_v38, %s21437_s27  ;;  %v1083_v38 = vld [vmem:[#allocation2 + $0x89] sm:$0xff] }
  0xcd   : > { %11933 = vrot.lane.b32.xlu0 %v15194_v32, %s14813_s28  ;;  %v15456_v32 = vld [vmem:[#allocation2 + $0x68] sm:$0xff]  ;;  %v12057_v6 = vpack.i.bf16 %v1083_v38, %v15499_v8  ;;  %v618_v16 = vld [vmem:[#allocation2 + $0x10] sm:$0xff] }
  0xce   : > { %v15442_v20 = vpop.permute.xlu1 %11653  ;;  %v12037_v12 = vpack.i.bf16 %v15470_v49, %v15456_v32  ;;  %v1133_v49 = vld [vmem:[#allocation2 + $0x82] sm:$0xff] }
  0xcf   : > { %21479 = vst [vmem:[#allocation14_spill] sm:$0xff] %v15442_v20  ;;  %v15444_v39 = vpop.permute.xlu0 %11658  ;;  %v616_v20 = vld [vmem:[#allocation2] sm:$0xff] }
  0xd0   : > { %21480 = vst [vmem:[#allocation15_spill] sm:$0xff] %v15444_v39  ;;  %11938 = vrot.lane.b32.xlu1 %v15198_v37, %s14813_s28  ;;  %v876_v37 = vld [vmem:[#allocation2 + $0x49] sm:$0xff] }
  0xd1   : > { %11943 = vrot.lane.b32.xlu0 %v15282_v22, %s21439_s15  ;;  %v11967_v22 = vpack.i.bf16 %v15456_v32, %v625_v29  ;;  %v11977_v53 = vpack.i.bf16 %v877_v48, %v876_v37  ;;  %v1131_v37 = vld [vmem:[#allocation2 + $0x6a] sm:$0xff] }
  0xd2   : > { %v15450_v41 = vpop.permute.xlu1 %11663 }
  0xd3   : > { %21481 = vst [vmem:[#allocation16_spill] sm:$0xff] %v15450_v41  ;;  %v15452_v42 = vpop.permute.xlu0 %11668  ;;  %v11601_v41 = vunpack.i.h.bf16 %v15376_v27 }
  0xd4   : > { %21482 = vst [vmem:[#allocation17_spill] sm:$0xff] %v15452_v42  ;;  %11948 = vrot.lane.b32.xlu1 %v15286_v23, %s21439_s15  ;;  %v15747_v42 = vld [vmem:[#allocation2 + $0xc2] sm:$0xff] }
  0xd5   : > { %11953 = vrot.lane.b32.xlu0 %v15358_v7, %s14815_s16  ;;  %v15497_v7 = vld [vmem:[#allocation2 + $0x71] sm:$0xff] }
  0xd6   : > { %v15460_v46 = vpop.permute.xlu1 %11673  ;;  %v15512_v26 = vpack.i.bf16 %v15499_v8, %v15497_v7  ;;  %v12052_v32 = vpack.i.bf16 %v15497_v7, %v15477_v55  ;;  %v12067_v55 = vpack.i.bf16 %v1134_v51, %v1133_v49  ;;  %v1185_v7 = vld [vmem:[#allocation2 + $0x8b] sm:$0xff] }
  0xd7   : > { %21483 = vst [vmem:[#allocation18_spill] sm:$0xff] %v15460_v46  ;;  %v15462_v47 = vpop.permute.xlu0 %11678  ;;  %v15609_v18 = vpack.i.bf16 %v1185_v7, %v15567_v36 }
  0xd8   : > { %21484 = vst [vmem:[#allocation19_spill] sm:$0xff] %v15462_v47  ;;  %11958 = vrot.lane.b32.xlu1 %v11957_v44, %s21363_s23 }
  0xd9   : > { %11963 = vrot.lane.b32.xlu0 %v15363_v14, %s14815_s16 }
  0xda   : > { %v15468_v23 = vpop.permute.xlu1 %11683 }
  0xdb   : > { %21485 = vst [vmem:[#allocation20_spill] sm:$0xff] %v15468_v23  ;;  %v15474_v52 = vpop.permute.xlu0 %11688  ;;  %v1138_v23 = vld [vmem:[#allocation2 + $0xb2] sm:$0xff] }
  0xdc   : > { %21486 = vst [vmem:[#allocation21_spill] sm:$0xff] %v15474_v52  ;;  %11968 = vrot.lane.b32.xlu1 %v11967_v22, %s21431_s17 }
  0xdd   : > { %11973 = vrot.lane.b32.xlu0 %v11967_v22, %s21363_s23  ;;  %s21429_s23 = smov 56   ;;  %v1132_v22 = vld [vmem:[#allocation2 + $0x72] sm:$0xff] }
  0xde   : > { %v15480_v56 = vpop.permute.xlu1 %11693 }
  0xdf   : > { %21487 = vst [vmem:[#allocation22_spill] sm:$0xff] %v15480_v56  ;;  %v15486_v58 = vpop.permute.xlu0 %11698  ;;  %v1087_v56 = vld [vmem:[#allocation2 + $0xb1] sm:$0xff] }
  0xe0   : > { %21488 = vst [vmem:[#allocation23_spill] sm:$0xff] %v15486_v58  ;;  %11978 = vrot.lane.b32.xlu1 %v11977_v53, %s14809_s24  ;;  %v12062_v53 = vpack.i.bf16 %v1132_v22, %v1131_v37  ;;  %v1389_v58 = vld [vmem:[#allocation2 + $0xa3] sm:$0xff] }
  0xe1   : > { %11983 = vrot.lane.b32.xlu0 %v15484_v57, %s21431_s17 }
  0xe2   : > { %v15495_v4 = vpop.permute.xlu1 %11703 }
  0xe3   : > { %21489 = vst [vmem:[#allocation24_spill] sm:$0xff] %v15495_v4  ;;  %v15501_v14 = vpop.permute.xlu0 %11708  ;;  %v1338_v4 = vld [vmem:[#allocation2 + $0xa2] sm:$0xff] }
  0xe4   : > { %21490 = vst [vmem:[#allocation25_spill] sm:$0xff] %v15501_v14  ;;  %11988 = vrot.lane.b32.xlu1 %v11987_v59, %s14817_s21 }
  0xe5   : > { %11993 = vrot.lane.b32.xlu0 %v11987_v59, %s14809_s24 }
  0xe6   : > { %v15508_v25 = vpop.permute.xlu1 %11713 }
  0xe7   : > { %21491 = vst [vmem:[#allocation26_spill] sm:$0xff] %v15508_v25  ;;  %v15514_v28 = vpop.permute.xlu0 %11718 }
  0xe8   : > { %21492 = vst [vmem:[#allocation27_spill] sm:$0xff] %v15514_v28  ;;  %11998 = vrot.lane.b32.xlu1 %v11997_v45, %s21435_s25 }
  0xe9   : > { %12003 = vrot.lane.b32.xlu0 %v15512_v26, %s14817_s21 }
  0xea   : > { %v15525_v34 = vpop.permute.xlu1 %1585 }
  0xeb   : > { %21493 = vst [vmem:[#allocation28_spill] sm:$0xff] %v15525_v34  ;;  %v15527_v11 = vpop.permute.xlu0 %11723  ;;  %v1337_v34 = vld [vmem:[#allocation2 + $0x92] sm:$0xff] }
  0xec   : > { %12008 = vrot.lane.b32.xlu1 %v15260_v54, %s21429_s23 }
  0xed   : > { %12013 = vrot.lane.b32.xlu0 %v15260_v54, %s21435_s25 }
  0xee   : > { %v15554_v45 = vpop.permute.xlu1 %11728 }
  0xef   : > { %v15556_v60 = vpop.permute.xlu0 %11733 }
  0xf0   : > { %12018 = vrot.lane.b32.xlu1 %v12017_v40, %s14811_s26  ;;  %v630_v40 = vld [vmem:[#allocation2 + $0x90] sm:$0xff] }
  0xf1   : > { %12023 = vrot.lane.b32.xlu0 %v12022_v3, %s21429_s23 }
  0xf2   : > { %v15565_v29 = vpop.permute.xlu1 %11738 }
  0xf3   : > { %21494 = vst [vmem:[#allocation29_spill] sm:$0xff] %v15565_v29  ;;  %v15569_v54 = vpop.permute.xlu0 %11743 }
  0xf4   : > { %21495 = vst [vmem:[#allocation30_spill] sm:$0xff] %v15569_v54  ;;  %12028 = vrot.lane.b32.xlu1 %v12027_v63, %s14819_s22 }
  0xf5   : > { %12033 = vrot.lane.b32.xlu0 %v12027_v63, %s14811_s26  ;;  %v12087_v63 = vpack.i.bf16 %v630_v40, %v629_v1 }
  0xf6   : > { %v15575_v2 = vpop.permute.xlu1 %11748 }
  0xf7   : > { %21496 = vst [vmem:[#allocation31_spill] sm:$0xff] %v15575_v2  ;;  %v15579_v3 = vpop.permute.xlu0 %11753 }
  0xf8   : > { %21497 = vst [vmem:[#allocation32_spill] sm:$0xff] %v15579_v3  ;;  %12038 = vrot.lane.b32.xlu1 %v12037_v12, %s21437_s27  ;;  %v15769_v3 = vld [vmem:[#allocation2 + $0xd3] sm:$0xff] }
  0xf9   : > { %12043 = vrot.lane.b32.xlu0 %v12042_v61, %s14819_s22 }
  0xfa   : > { %v15584_v44 = vpop.permute.xlu1 %11758 }
  0xfb   : > { %21498 = vst [vmem:[#allocation33_spill] sm:$0xff] %v15584_v44  ;;  %v15588_v48 = vpop.permute.xlu0 %11763  ;;  %v1393_v44 = vld [vmem:[#allocation2 + $0xcb] sm:$0xff] }
  0xfc   : > { %21499 = vst [vmem:[#allocation34_spill] sm:$0xff] %v15588_v48  ;;  %12048 = vrot.lane.b32.xlu1 %v12047_v5, %s21437_s27  ;;  %v632_v5 = vld [vmem:[#allocation2 + $0xa8] sm:$0xff] }
  0xfd   : > { %12053 = vrot.lane.b32.xlu0 %v12052_v32, %s14813_s28  ;;  %v1286_v32 = vld [vmem:[#allocation2 + $0x91] sm:$0xff] }
  0xfe   : > { %v15593_v50 = vpop.permute.xlu1 %11768 }
  0xff   : > { %21500 = vst [vmem:[#allocation35_spill] sm:$0xff] %v15593_v50  ;;  %v15595_v59 = vpop.permute.xlu0 %11773  ;;  %v11605_v50 = vunpack.i.l.bf16 %v15383_v31 }
 0x100   : > { %21501 = vst [vmem:[#allocation36_spill] sm:$0xff] %v15595_v59  ;;  %12058 = vrot.lane.b32.xlu1 %v12057_v6, %s14813_s28  ;;  %v617_v59 = vld [vmem:[#allocation2 + $0x8] sm:$0xff] }
 0x101   : > { %12063 = vrot.lane.b32.xlu0 %v12062_v53, %s21439_s15  ;;  %v4495_v35 = vsel %vm469_vm0, %v617_v59, %v11601_v41  ;;  %v15788_v41 = vld [vmem:[#allocation2 + $0xe1] sm:$0xff]  ;;  %v11725_v59 = vunpack.i.l.bf16 %v15527_v11 }
 0x102   : > { %v15599_v62 = vpop.permute.xlu1 %11778 }
 0x103   : > { %21502 = vst [vmem:[#allocation37_spill] sm:$0xff] %v15599_v62  ;;  %v15601_v19 = vpop.permute.xlu0 %11783 }
 0x104   : > { %21503 = vst [vmem:[#allocation38_spill] sm:$0xff] %v15601_v19  ;;  %12068 = vrot.lane.b32.xlu1 %v12067_v55, %s21439_s15  ;;  %v1287_v55 = vld [vmem:[#allocation2 + $0xa1] sm:$0xff] }
 0x105   : > { %12073 = vrot.lane.b32.xlu0 %v15371_v24, %s14815_s16  ;;  %v631_v24 = vld [vmem:[#allocation2 + $0xa0] sm:$0xff]  ;;  %v15638_v14 = vpack.i.bf16 %v1288_v0, %v1287_v55 }
 0x106   : > { %v15606_v8 = vpop.permute.xlu1 %11788  ;;  %v12102_v6 = vpack.i.bf16 %v632_v5, %v631_v24 }
 0x107   : > { %21504 = vst [vmem:[#allocation39_spill] sm:$0xff] %v15606_v8  ;;  %v15611_v43 = vpop.permute.xlu0 %11793  ;;  %v15740_v8 = vld [vmem:[#allocation2 + $0xc9] sm:$0xff] }
 0x108   : > { %21505 = vst [vmem:[#allocation40_spill] sm:$0xff] %v15611_v43  ;;  %12078 = vrot.lane.b32.xlu1 %v15484_v57, %s21506_s20  ;;  %v12107_v57 = vpack.i.bf16 %v1286_v32, %v1083_v38  ;;  %v12127_v38 = vpack.i.bf16 %v1337_v34, %v1134_v51 }
 0x109   : > { %12083 = vrot.lane.b32.xlu0 %v15609_v18, %s14815_s16 }
 0x10a   : > { %v15617_v12 = vpop.permute.xlu1 %11798 }
 0x10b   : > { %21507 = vst [vmem:[#allocation41_spill] sm:$0xff] %v15617_v12  ;;  %v15619_v61 = vpop.permute.xlu0 %11803 }
 0x10c   : > { %21508 = vst [vmem:[#allocation42_spill] sm:$0xff] %v15619_v61  ;;  %12088 = vrot.lane.b32.xlu1 %v12087_v63, %s21431_s17  ;;  %v12182_v61 = vpack.i.bf16 %v1338_v4, %v1337_v34  ;;  %v1189_v34 = vld [vmem:[#allocation2 + $0xb3] sm:$0xff] }
 0x10d   : > { %12093 = vrot.lane.b32.xlu0 %v12087_v63, %s21506_s20  ;;  %v12117_v63 = vpack.i.bf16 %v1133_v49, %v1132_v22  ;;  %v1339_v22 = vld [vmem:[#allocation2 + $0xaa] sm:$0xff]  ;;  %v12277_v2 = vpack.i.bf16 %v1392_v17, %v1189_v34 }
 0x10e   : > { %v15623_v37 = vpop.permute.xlu1 %11808  ;;  %v15654_v51 = vpack.i.bf16 %v1339_v22, %v1338_v4 }
 0x10f   : > { %21509 = vst [vmem:[#allocation43_spill] sm:$0xff] %v15623_v37  ;;  %v15625_v53 = vpop.permute.xlu0 %11813  ;;  %v12172_v37 = vpack.i.bf16 %v1287_v55, %v1286_v32  ;;  %v12192_v32 = vpack.i.bf16 %v1138_v23, %v1339_v22  ;;  %v15700_v22 = vld [vmem:[#allocation2 + $0xc0] sm:$0xff] }
 0x110   : > { %21510 = vst [vmem:[#allocation44_spill] sm:$0xff] %v15625_v53  ;;  %12098 = vrot.lane.b32.xlu1 %v15512_v26, %s14809_s24 }
 0x111   : > { %12103 = vrot.lane.b32.xlu0 %v12102_v6, %s21431_s17  ;;  %v982_v6 = vld [vmem:[#allocation2 + $0x73] sm:$0xff] }
 0x112   : > { %v15630_v1 = vpop.permute.xlu1 %11818 }
 0x113   : > { %21511 = vst [vmem:[#allocation45_spill] sm:$0xff] %v15630_v1  ;;  %v15632_v28 = vpop.permute.xlu0 %11823  ;;  %v1390_v1 = vld [vmem:[#allocation2 + $0xab] sm:$0xff] }
 0x114   : > { %21512 = vst [vmem:[#allocation46_spill] sm:$0xff] %v15632_v28  ;;  %12108 = vrot.lane.b32.xlu1 %v12107_v57, %s14817_s21 }
 0x115   : > { %12113 = vrot.lane.b32.xlu0 %v12107_v57, %s14809_s24  ;;  %v12137_v57 = vpack.i.bf16 %v15567_v36, %v982_v6 }
 0x116   : > { %v15636_v25 = vpop.permute.xlu1 %11828 }
 0x117   : > { %21513 = vst [vmem:[#allocation47_spill] sm:$0xff] %v15636_v25  ;;  %v15640_v26 = vpop.permute.xlu0 %11833  ;;  %v1388_v25 = vld [vmem:[#allocation2 + $0x93] sm:$0xff] }
 0x118   : > { %21514 = vst [vmem:[#allocation48_spill] sm:$0xff] %v15640_v26  ;;  %12118 = vrot.lane.b32.xlu1 %v12117_v63, %s21435_s25 }
 0x119   : > { %12123 = vrot.lane.b32.xlu0 %v15638_v14, %s14817_s21 }
 0x11a   : > { %v15645_v28 = vpop.permute.xlu1 %11838 }
 0x11b   : > { %21515 = vst [vmem:[#allocation49_spill] sm:$0xff] %v15645_v28  ;;  %v15647_v49 = vpop.permute.xlu0 %11843  ;;  %v12147_v28 = vpack.i.bf16 %v1388_v25, %v1185_v7 }
 0x11c   : > { %21516 = vst [vmem:[#allocation50_spill] sm:$0xff] %v15647_v49  ;;  %12128 = vrot.lane.b32.xlu1 %v12127_v38, %s21429_s23 }
 0x11d   : > { %12133 = vrot.lane.b32.xlu0 %v12127_v38, %s21435_s25  ;;  %v12157_v38 = vpack.i.bf16 %v631_v24, %v630_v40 }
 0x11e   : > { %v15652_v26 = vpop.permute.xlu1 %11848 }
 0x11f   : > { %21517 = vst [vmem:[#allocation51_spill] sm:$0xff] %v15652_v26  ;;  %v15656_v63 = vpop.permute.xlu0 %11853  ;;  %v15669_v26 = vpack.i.bf16 %v1390_v1, %v1389_v58 }
 0x120   : > { %12138 = vrot.lane.b32.xlu1 %v12137_v57, %s14811_s26  ;;  %v633_v57 = vld [vmem:[#allocation2 + $0xb0] sm:$0xff]  ;;  %v11855_v54 = vunpack.i.l.bf16 %v15656_v63  ;;  %v11856_v13 = vunpack.i.h.bf16 %v15656_v63 }
 0x121   : > { %12143 = vrot.lane.b32.xlu0 %v15654_v51, %s21429_s23  ;;  %v12167_v53 = vpack.i.bf16 %v633_v57, %v632_v5 }
 0x122   : > { %v15661_v49 = vpop.permute.xlu1 %11858 }
 0x123   : > { %v15663_v36 = vpop.permute.xlu0 %11863  ;;  %v11860_v9 = vunpack.i.l.bf16 %v15661_v49 }
 0x124   : > { %21518 = vst [vmem:[#allocation52_spill] sm:$0xff] %v15663_v36  ;;  %12148 = vrot.lane.b32.xlu1 %v12147_v28, %s14819_s22 }
 0x125   : > { %12153 = vrot.lane.b32.xlu0 %v12147_v28, %s14811_s26  ;;  %v12177_v28 = vpack.i.bf16 %v1087_v56, %v1288_v0  ;;  %v12197_v0 = vpack.i.bf16 %v1389_v58, %v1388_v25  ;;  %v15705_v58 = vpack.i.bf16 %v1189_v34, %v1390_v1  ;;  %v15722_v1 = vld [vmem:[#allocation2 + $0xc1] sm:$0xff] }
 0x126   : > { %v15667_v6 = vpop.permute.xlu1 %11868  ;;  %v12237_v43 = vpack.i.bf16 %v15722_v1, %v1087_v56  ;;  %v11606_v56 = vunpack.i.h.bf16 %v15383_v31  ;;  %v15800_v34 = vld [vmem:[#allocation2 + $0xe2] sm:$0xff] }
 0x127   : > { %21519 = vst [vmem:[#allocation53_spill] sm:$0xff] %v15667_v6  ;;  %v15671_v7 = vpop.permute.xlu0 %11873 }
 0x128   : > { %21520 = vst [vmem:[#allocation54_spill] sm:$0xff] %v15671_v7  ;;  %12158 = vrot.lane.b32.xlu1 %v12157_v38, %s21437_s27 }
 0x129   : > { %12163 = vrot.lane.b32.xlu0 %v15669_v26, %s14819_s22 }
 0x12a   : > { %v15676_v52 = vpop.permute.xlu1 %11878 }
 0x12b   : > { %21521 = vst [vmem:[#allocation55_spill] sm:$0xff] %v15676_v52  ;;  %v15678_v40 = vpop.permute.xlu0 %11883  ;;  %v4497_v52 = vsel %vm469_vm0, %v15365_v21, %v11606_v56  ;;  %v11726_v21 = vunpack.i.h.bf16 %v15527_v11  ;;  %v11731_v56 = vunpack.i.h.bf16 %v15554_v45  ;;  %v15820_v11 = vpack.i.bf16 %v1393_v44, %v1392_v17 }
 0x12c   : > { %12168 = vrot.lane.b32.xlu1 %v12167_v53, %s21437_s27  ;;  %v834_v53 = vld [vmem:[#allocation2 + $0xa8] sm:$0xff]  ;;  %v11885_v6 = vunpack.i.l.bf16 %v15678_v40 }
 0x12d   : > { %12173 = vrot.lane.b32.xlu0 %v12172_v37, %s14813_s28  ;;  %v833_v37 = vld [vmem:[#allocation2 + $0xa0] sm:$0xff]  ;;  %v4547_v36 = vsel %vm4545_vm2, %v4495_v35, %v11726_v21 }
 0x12e   : > { %v15682_v24 = vpop.permute.xlu1 %11888  ;;  %v4599_v35 = vsel %vm4597_vm6, %v4547_v36, %v11856_v13 }
 0x12f   : > { %v15684_v38 = vpop.permute.xlu0 %11893 }
 0x130   : > { %12178 = vrot.lane.b32.xlu1 %v12177_v28, %s14813_s28  ;;  %v1238_v28 = vld [vmem:[#allocation2 + $0xb0] sm:$0xff]  ;;  %v11895_v21 = vunpack.i.l.bf16 %v15684_v38 }
 0x131   : > { %12183 = vrot.lane.b32.xlu0 %v12182_v61, %s21439_s15  ;;  %v12207_v61 = vpack.i.bf16 %v834_v53, %v833_v37  ;;  %v15715_v37 = vld [vmem:[#allocation2 + $0xc8] sm:$0xff]  ;;  %v15717_v53 = vld [vmem:[#allocation2 + $0xd0] sm:$0xff] }
 0x132   : > { %v15688_v5 = vpop.permute.xlu1 %11898 }
 0x133   : > { %v15690_v55 = vpop.permute.xlu0 %11903 }
 0x134   : > { %12188 = vrot.lane.b32.xlu1 %v15609_v18, %s21522_s18  ;;  %v12217_v18 = vpack.i.bf16 %v15700_v22, %v1238_v28  ;;  %v15729_v28 = vpack.i.bf16 %v15717_v53, %v15715_v37  ;;  %v11906_v36 = vunpack.i.h.bf16 %v15690_v55 }
 0x135   : > { %12193 = vrot.lane.b32.xlu0 %v12192_v32, %s21439_s15 }
 0x136   : > { %v15695_v4 = vpop.permute.xlu1 %11908 }
 0x137   : > { %v15697_v57 = vpop.permute.xlu0 %11913 }
 0x138   : > { %12198 = vrot.lane.b32.xlu1 %v12197_v0, %s14815_s16 }
 0x139   : > { %12203 = vrot.lane.b32.xlu0 %v12197_v0, %s21522_s18 }
 0x13a   : > { %v15703_v47 = vpop.permute.xlu1 %11918 }
 0x13b   : > { %v15707_v25 = vpop.permute.xlu0 %11923 }
 0x13c   : > { %12208 = vrot.lane.b32.xlu1 %v12207_v61, %s21506_s20 }
 0x13d   : > { %12213 = vrot.lane.b32.xlu0 %v15705_v58, %s14815_s16 }
 0x13e   : > { %v15713_v32 = vpop.permute.xlu1 %11928 }
 0x13f   : > { %v15719_v0 = vpop.permute.xlu0 %11933 }
 0x140   : > { %12218 = vrot.lane.b32.xlu1 %v12217_v18, %s21431_s17 }
 0x141   : > { %12223 = vrot.lane.b32.xlu0 %v12217_v18, %s21506_s20  ;;  %v15742_v18 = vld [vmem:[#allocation2 + $0xd1] sm:$0xff] }
 0x142   : > { %v15725_v61 = vpop.permute.xlu1 %11938  ;;  %v15757_v62 = vpack.i.bf16 %v15742_v18, %v15740_v8 }
 0x143   : > { %v15731_v12 = vpop.permute.xlu0 %11943 }
 0x144   : > { %12228 = vrot.lane.b32.xlu1 %v15638_v14, %s14809_s24  ;;  %v11600_v14 = vunpack.i.l.bf16 %v15376_v27  ;;  %v12257_v27 = vpack.i.bf16 %v15747_v42, %v1138_v23 }
 0x145   : > { %12233 = vrot.lane.b32.xlu0 %v15729_v28, %s21431_s17 }
 0x146   : > { %v15738_v46 = vpop.permute.xlu1 %11948  ;;  %v4494_v31 = vsel %vm469_vm0, %v616_v20, %v11600_v14  ;;  %v11730_v20 = vunpack.i.l.bf16 %v15554_v45 }
 0x147   : > { %v15744_v19 = vpop.permute.xlu0 %11953 }
 0x148   : > { %12238 = vrot.lane.b32.xlu1 %v12237_v43, %s14817_s21 }
 0x149   : > { %12243 = vrot.lane.b32.xlu0 %v12237_v43, %s14809_s24  ;;  %v15767_v43 = vld [vmem:[#allocation2 + $0xd2] sm:$0xff] }
 0x14a   : > { %v15753_v39 = vpop.permute.xlu1 %11958  ;;  %v15784_v7 = vpack.i.bf16 %v15767_v43, %v15765_v15  ;;  %v12322_v63 = vpack.i.bf16 %v15800_v34, %v15767_v43 }
 0x14b   : > { %21523 = vst [vmem:[#allocation56_spill] sm:$0xff] %v15753_v39  ;;  %v15760_v48 = vpop.permute.xlu0 %11963  ;;  %v11861_v39 = vunpack.i.h.bf16 %v15661_v49  ;;  %v4549_v49 = vsel %vm4545_vm2, %v4497_v52, %v11731_v56  ;;  %v11916_v56 = vunpack.i.h.bf16 %v15697_v57 }
 0x14c   : > { %12248 = vrot.lane.b32.xlu1 %v15654_v51, %s21435_s25  ;;  %v4496_v51 = vsel %vm469_vm0, %v618_v16, %v11605_v50  ;;  %v15796_v16 = vpack.i.bf16 %v15769_v3, %v1393_v44  ;;  %v11891_v44 = vunpack.i.h.bf16 %v15682_v24 }
 0x14d   : > { %12253 = vrot.lane.b32.xlu0 %v15757_v62, %s14817_s21  ;;  %v4548_v45 = vsel %vm4545_vm2, %v4496_v51, %v11730_v20  ;;  %v4601_v52 = vsel %vm4597_vm6, %v4549_v49, %v11861_v39  ;;  %v11921_v49 = vunpack.i.h.bf16 %v15703_v47 }
 0x14e   : > { %v15779_v23 = vpop.permute.xlu1 %11968  ;;  %v4653_v39 = vsel %vm4649_vm3, %v4601_v52, %v11891_v44 }
 0x14f   : > { %v15792_v14 = vpop.permute.xlu0 %11973 }
 0x150   : > { %21524 = vst [vmem:[#allocation57_spill] sm:$0xff] %v15792_v14  ;;  %12258 = vrot.lane.b32.xlu1 %v12257_v27, %s21429_s23  ;;  %v11890_v14 = vunpack.i.l.bf16 %v15682_v24  ;;  %v11900_v24 = vunpack.i.l.bf16 %v15688_v5 }
 0x151   : > { %12263 = vrot.lane.b32.xlu0 %v12257_v27, %s21435_s25  ;;  %v4546_v27 = vsel %vm4545_vm2, %v4494_v31, %v11725_v59  ;;  %v4600_v31 = vsel %vm4597_vm6, %v4548_v45, %v11860_v9  ;;  %v11910_v59 = vunpack.i.l.bf16 %v15695_v4 }
 0x152   : > { %v15810_v50 = vpop.permute.xlu1 %11978  ;;  %v4598_v17 = vsel %vm4597_vm6, %v4546_v27, %v11855_v54  ;;  %v11901_v54 = vunpack.i.h.bf16 %v15688_v5  ;;  %v4652_v13 = vsel %vm4649_vm3, %v4600_v31, %v11890_v14  ;;  %v11915_v5 = vunpack.i.l.bf16 %v15697_v57 }
 0x153   : > { %21525 = vst [vmem:[#allocation58_spill] sm:$0xff] %v15810_v50  ;;  %v11886_v50 = vunpack.i.h.bf16 %v15678_v40  ;;  %v15826_v29 = vpop.permute.xlu0 %11983  ;;  %v11896_v40 = vunpack.i.h.bf16 %v15684_v38  ;;  %v4650_v51 = vsel %vm4649_vm3, %v4598_v17, %v11885_v6  ;;  %v11905_v38 = vunpack.i.l.bf16 %v15690_v55 }
 0x154   : > { %12268 = vrot.lane.b32.xlu1 %v15669_v26, %s14811_s26  ;;  %v11911_v6 = vunpack.i.h.bf16 %v15695_v4  ;;  %v11920_v55 = vunpack.i.l.bf16 %v15703_v47  ;;  %v4704_v27 = vsel %vm4701_vm7, %v4652_v13, %v11900_v24  ;;  %v4705_v4 = vsel %vm4701_vm7, %v4653_v39, %v11901_v54 }
 0x155   : > { %12273 = vrot.lane.b32.xlu0 %v15784_v7, %s21429_s23  ;;  %v4651_v9 = vsel %vm4649_vm3, %v4599_v35, %v11886_v50  ;;  %v4702_v50 = vsel %vm4701_vm7, %v4650_v51, %v11895_v21  ;;  %v11926_v17 = vunpack.i.h.bf16 %v15707_v25  ;;  %v11925_v35 = vunpack.i.l.bf16 %v15707_v25 }
 0x156   : > { %v15840_v26 = vpop.permute.xlu1 %11988  ;;  %v4703_v14 = vsel %vm4701_vm7, %v4651_v9, %v11896_v40  ;;  %v4754_v44 = vsel %vm4753_vm8, %v4702_v50, %v11905_v38  ;;  %v11930_v31 = vunpack.i.l.bf16 %v15713_v32  ;;  %v21526_v40 = vpack.i.bf16 %v15715_v37, %v15700_v22 }
 0x157   : > { %v15850_v20 = vpop.permute.xlu0 %11993  ;;  %v4755_v57 = vsel %vm4753_vm8, %v4703_v14, %v11906_v36  ;;  %v4756_v47 = vsel %vm4753_vm8, %v4704_v27, %v11910_v59  ;;  %v4757_v21 = vsel %vm4753_vm8, %v4705_v4, %v11911_v6  ;;  %v4806_v52 = vsel %vm4805_vm9, %v4754_v44, %v11915_v5 }
 0x158   : > { %12278 = vrot.lane.b32.xlu1 %v12277_v2, %s14819_s22  ;;  %v11931_v51 = vunpack.i.h.bf16 %v15713_v32  ;;  %v4807_v25 = vsel %vm4805_vm9, %v4755_v57, %v11916_v56  ;;  %v4808_v54 = vsel %vm4805_vm9, %v4756_v47, %v11920_v55  ;;  %v11936_v24 = vunpack.i.h.bf16 %v15719_v0 }
 0x159   : > { %12283 = vrot.lane.b32.xlu0 %v12277_v2, %s14811_s26  ;;  %v11935_v9 = vunpack.i.l.bf16 %v15719_v0  ;;  %v4809_v37 = vsel %vm4805_vm9, %v4757_v21, %v11921_v49  ;;  %v4859_v13 = vsel %vm4857_vm4, %v4807_v25, %v11926_v17  ;;  %v11941_v32 = vunpack.i.h.bf16 %v15725_v61 }
 0x15a   : > { %v15862_v45 = vpop.permute.xlu1 %11998  ;;  %v11940_v36 = vunpack.i.l.bf16 %v15725_v61  ;;  %v4858_v38 = vsel %vm4857_vm4, %v4806_v52, %v11925_v35  ;;  %v4860_v39 = vsel %vm4857_vm4, %v4808_v54, %v11930_v31  ;;  %v11946_v6 = vunpack.i.h.bf16 %v15731_v12 }
 0x15b   : > { %v15872_v2 = vpop.permute.xlu0 %12003  ;;  %v11945_v0 = vunpack.i.l.bf16 %v15731_v12  ;;  %v21527_v5 = vpack.i.bf16 %v15771_v10, %v15717_v53  ;;  %v4861_v50 = vsel %vm4857_vm4, %v4809_v37, %v11931_v51  ;;  %v11950_v14 = vunpack.i.l.bf16 %v15738_v46 }
 0x15c   : > { %12288 = vrot.lane.b32.xlu1 %v21526_v40, %s21437_s27  ;;  %v11956_v61 = vunpack.i.h.bf16 %v15744_v19  ;;  %v11955_v56 = vunpack.i.l.bf16 %v15744_v19  ;;  %v4910_v55 = vsel %vm4909_vm10, %v4858_v38, %v11935_v9  ;;  %v4911_v27 = vsel %vm4909_vm10, %v4859_v13, %v11936_v24 }
 0x15d   : > { %12293 = vrot.lane.b32.xlu0 %v15796_v16, %s14819_s22  ;;  %v11971_v12 = vunpack.i.h.bf16 %v15779_v23  ;;  %v11970_v4 = vunpack.i.l.bf16 %v15779_v23  ;;  %v21528_v53 = vpack.i.bf16 %v15740_v8, %v15722_v1  ;;  %v4912_v17 = vsel %vm4909_vm10, %v4860_v39, %v11940_v36 }
 0x15e   : > { %v12009_v22 = vpop.permute.xlu1 %12008  ;;  %v4913_v44 = vsel %vm4909_vm10, %v4861_v50, %v11941_v32  ;;  %v11991_v19 = vunpack.i.h.bf16 %v15840_v26  ;;  %v11990_v57 = vunpack.i.l.bf16 %v15840_v26  ;;  %v4962_v35 = vsel %vm4961_vm11, %v4910_v55, %v11945_v0 }
 0x15f   : > { %v15896_v59 = vpop.permute.xlu0 %12013  ;;  %v4963_v31 = vsel %vm4961_vm11, %v4911_v27, %v11946_v6  ;;  %v12011_v23 = vunpack.i.h.bf16 %v12009_v22  ;;  %v12010_v40 = vunpack.i.l.bf16 %v12009_v22  ;;  %v21529_v8 = vpack.i.bf16 %v15788_v41, %v15742_v18 }
 0x160   : > { %12298 = vrot.lane.b32.xlu1 %v21527_v5, %s21437_s27  ;;  %v11951_v1 = vunpack.i.h.bf16 %v15738_v46  ;;  %v4964_v21 = vsel %vm4961_vm11, %v4912_v17, %v11950_v14  ;;  %v5014_v52 = vsel %vm5013_vm12, %v4962_v35, %v11955_v56  ;;  %v5015_v26 = vsel %vm5013_vm12, %v4963_v31, %v11956_v61  ;;  %v15961_v56 = vld [vmem:[#allocation2 + $0xe3] sm:$0xff] }
 0x161   : > { %12303 = vrot.lane.b32.xlu0 %v21528_v53, %s14813_s28  ;;  %v11966_v51 = vunpack.i.h.bf16 %v15760_v48  ;;  %v11965_v25 = vunpack.i.l.bf16 %v15760_v48  ;;  %v5067_v54 = vsel %vm5065_vm13, %v5015_v26, %v11971_v12  ;;  %v5066_v24 = vsel %vm5065_vm13, %v5014_v52, %v11970_v4  ;;  %v15970_v17 = vld [vmem:[#allocation2 + $0xe8] sm:$0xff] }
 0x162   : > { %v15914_v49 = vpop.permute.xlu1 %12018  ;;  %v21530_v18 = vpack.i.bf16 %v15765_v15, %v15747_v42  ;;  %v5118_v37 = vsel %vm5117_vm14, %v5066_v24, %v11990_v57  ;;  %v5119_v13 = vsel %vm5117_vm14, %v5067_v54, %v11991_v19  ;;  %v11986_v32 = vunpack.i.h.bf16 %v15826_v29 }
 0x163   : > { %v12024_v47 = vpop.permute.xlu0 %12023  ;;  %v11985_v48 = vunpack.i.l.bf16 %v15826_v29  ;;  %v5170_v38 = vsel %vm5169_vm15, %v5118_v37, %v12010_v40  ;;  %v5171_v15 = vsel %vm5169_vm15, %v5119_v13, %v12011_v23  ;;  %v12006_v42 = vunpack.i.h.bf16 %v15872_v2  ;;  %v21531_v13 = vld [vmem:[#allocation29_spill] sm:$0xff] }
 0x164   : > { %12308 = vrot.lane.b32.xlu1 %v21529_v8, %s14813_s28  ;;  %v12005_v39 = vunpack.i.l.bf16 %v15872_v2  ;;  %v4965_v5 = vsel %vm4961_vm11, %v4913_v44, %v11951_v1  ;;  %v12026_v29 = vunpack.i.h.bf16 %v12024_v47  ;;  %v12025_v50 = vunpack.i.l.bf16 %v12024_v47  ;;  %v15997_v1 = vld [vmem:[#allocation2 + $0x100] sm:$0xff] }
 0x165   : > { %12313 = vrot.lane.b32.xlu0 %v21530_v18, %s21439_s15  ;;  %v5016_v61 = vsel %vm5013_vm12, %v4964_v21, %v11965_v25  ;;  %v5017_v2 = vsel %vm5013_vm12, %v4965_v5, %v11966_v51  ;;  %v15980_v35 = vpack.i.bf16 %v15961_v56, %v15769_v3  ;;  %v12347_v8 = vpack.i.bf16 %v15970_v17, %v15771_v10  ;;  %v15995_v3 = vld [vmem:[#allocation2 + $0xf0] sm:$0xff]  ;;  %v14778_v5 = vld [vmem:[#allocation2 + $0x40] sm:$0xff] }
 0x166   : > { %v12029_v46 = vpop.permute.xlu1 %12028  ;;  %v5068_v55 = vsel %vm5065_vm13, %v5016_v61, %v11985_v48  ;;  %v5069_v27 = vsel %vm5065_vm13, %v5017_v2, %v11986_v32  ;;  %v16009_v52 = vpack.i.bf16 %v15997_v1, %v15995_v3  ;;  %v11611_v54 = vunpack.i.h.bf16 %v15380_v30  ;;  %v16036_v48 = vld [vmem:[#allocation2 + $0xea] sm:$0xff] }
 0x167   : > { %v12031_v9 = vunpack.i.h.bf16 %v12029_v46  ;;  %v12030_v22 = vunpack.i.l.bf16 %v12029_v46  ;;  %v15942_v36 = vpop.permute.xlu0 %12033  ;;  %v5120_v43 = vsel %vm5117_vm14, %v5068_v55, %v12005_v39  ;;  %v11610_v24 = vunpack.i.l.bf16 %v15380_v30  ;;  %v16024_v46 = vld [vmem:[#allocation2 + $0xf1] sm:$0xff] }
 0x168   : > { %12318 = vrot.lane.b32.xlu1 %v15705_v58, %s21522_s18  ;;  %v5172_v44 = vsel %vm5169_vm15, %v5120_v43, %v12025_v50  ;;  %v11615_v18 = vunpack.i.l.bf16 %v15390_v33  ;;  %v11741_v32 = vunpack.i.h.bf16 %v21531_v13  ;;  %v11740_v30 = vunpack.i.l.bf16 %v21531_v13  ;;  %v16052_v50 = vld [vmem:[#allocation2 + $0xeb] sm:$0xff]  ;;  %v16063_v43 = vld [vmem:[#allocation2 + $0xf3] sm:$0xff] }
 0x169   : > { %v5222_v6 = vsel %vm5221_vm1, %v5170_v38, %v12030_v22  ;;  %v5223_v0 = vsel %vm5221_vm1, %v5171_v15, %v12031_v9  ;;  %12323 = vrot.lane.b32.xlu0 %v12322_v63, %s21439_s15  ;;  %v5121_v63 = vsel %vm5117_vm14, %v5069_v27, %v12006_v42  ;;  %v16026_v9 = vld [vmem:[#allocation2 + $0x101] sm:$0xff]  ;;  %v11736_v22 = vunpack.i.h.bf16 %v15556_v60  ;;  %v16045_v15 = vld [vmem:[#allocation2 + $0xf2] sm:$0xff] }
 0x16a   : > { %v15957_v58 = vpop.permute.xlu1 %12038  ;;  %v5273_v14 = vpack.c.bf16 %v5223_v0, %v5222_v6  ;;  %v5173_v19 = vsel %vm5169_vm15, %v5121_v63, %v12026_v29  ;;  %v14776_v42 = vld [vmem:[#allocation2 + $0x30] sm:$0xff]  ;;  %v14777_v6 = vld [vmem:[#allocation2 + $0x28] sm:$0xff]  ;;  %v4500_v29 = vsel %vm469_vm0, %v14778_v5, %v11615_v18 }
 0x16b   : > { %v12044_v12 = vpop.permute.xlu0 %12043  ;;  %v4499_v39 = vsel %vm469_vm0, %v14776_v42, %v11611_v54  ;;  %v4498_v0 = vsel %vm469_vm0, %v14777_v6, %v11610_v24  ;;  %v16065_v63 = vld [vmem:[#allocation2 + $0x103] sm:$0xff]  ;;  %v12407_v54 = vpack.i.bf16 %v16052_v50, %v15961_v56  ;;  %v12417_v24 = vpack.i.bf16 %v15995_v3, %v15970_v17 }
 0x16c   : > { %12328 = vrot.lane.b32.xlu1 %v15820_v11, %s14815_s16  ;;  %11461 = vmatprep.mubr.msk.bf16.mxu0 %vm5331_vm5, %v5273_v14  ;;  %v12046_v4 = vunpack.i.h.bf16 %v12044_v12  ;;  %v12045_v53 = vunpack.i.l.bf16 %v12044_v12  ;;  %v14779_v14 = vld [vmem:[#allocation2 + $0x48] sm:$0xff]  ;;  %v4551_v2 = vsel %vm4545_vm2, %v4499_v39, %v11736_v22  ;;  %v12387_v12 = vpack.i.bf16 %v16036_v48, %v15800_v34  ;;  %v21534_v22 = vld [vmem:[#allocation56_spill] sm:$0xff] }
 0x16d   : > { %12333 = vrot.lane.b32.xlu0 %v15820_v11, %s21522_s18  ;;  %v16088_v18 = vld [vmem:[#allocation2 + $0x10a] sm:$0xff]  ;;  %v16094_v13 = vpack.i.bf16 %v16065_v63, %v16063_v43 }
 0x16e   : > { %v15976_v57 = vpop.permute.xlu1 %12048  ;;  %v5224_v31 = vsel %vm5221_vm1, %v5172_v44, %v12045_v53  ;;  %v5225_v23 = vsel %vm5221_vm1, %v5173_v19, %v12046_v4  ;;  %v16067_v4 = vld [vmem:[#allocation2 + $0x108] sm:$0xff]  ;;  %v4552_v53 = vsel %vm4545_vm2, %v4500_v29, %v11740_v30  ;;  %v21532_v19 = vld [vmem:[#allocation52_spill] sm:$0xff]  ;;  %v11960_v30 = vunpack.i.l.bf16 %v21534_v22 }
 0x16f   : > { %v15984_v40 = vpop.permute.xlu0 %12053  ;;  %v5274_v47 = vpack.c.bf16 %v5225_v23, %v5224_v31  ;;  %v11865_v31 = vunpack.i.l.bf16 %v21532_v19  ;;  %v11866_v34 = vunpack.i.h.bf16 %v21532_v19  ;;  %v21535_v42 = vld [vmem:[#allocation57_spill] sm:$0xff] }
 0x170   : > { %12338 = vrot.lane.b32.xlu1 %v15729_v28, %s21506_s20  ;;  %v16002_v28 = vld [vmem:[#allocation2 + $0xe9] sm:$0xff]  ;;  %v11975_v56 = vunpack.i.l.bf16 %v21535_v42  ;;  %v11976_v29 = vunpack.i.h.bf16 %v21535_v42  ;;  %v11996_v42 = vunpack.i.h.bf16 %v15850_v20 }
 0x171   : > { %12343 = vrot.lane.b32.xlu0 %v15980_v35, %s14815_s16  ;;  %11462 = vmatmul.mubr.msk.bf16.vlgmr.msra.gmra.mxu0 %vm5331_vm5, %v5274_v47  ;;  %v12367_v51 = vpack.i.bf16 %v16002_v28, %v15788_v41  ;;  %v11735_v41 = vunpack.i.l.bf16 %v15556_v60  ;;  %v16047_v60 = vld [vmem:[#allocation2 + $0x102] sm:$0xff]  ;;  %v4603_v19 = vsel %vm4597_vm6, %v4551_v2, %v11866_v34  ;;  %v12001_v34 = vunpack.i.h.bf16 %v15862_v45 }
 0x172   : > { %v15992_v11 = vpop.permute.xlu1 %12058  ;;  %v16074_v23 = vpack.i.bf16 %v16047_v60, %v16045_v15  ;;  %v21533_v47 = vld [vmem:[#allocation53_spill] sm:$0xff] }
 0x173   : > { %v15999_v21 = vpop.permute.xlu0 %12063  ;;  %v4550_v55 = vsel %vm4545_vm2, %v4498_v0, %v11735_v41  ;;  %v11961_v41 = vunpack.i.h.bf16 %v21534_v22  ;;  %v21536_v22 = vld [vmem:[#allocation58_spill] sm:$0xff] }
 0x174   : > { %12348 = vrot.lane.b32.xlu1 %v12347_v8, %s21431_s17  ;;  %v4602_v5 = vsel %vm4597_vm6, %v4550_v55, %v11865_v31  ;;  %v11980_v6 = vunpack.i.l.bf16 %v21536_v22 }
 0x175   : > { %12353 = vrot.lane.b32.xlu0 %v12347_v8, %s21506_s20  ;;  %v11870_v8 = vunpack.i.l.bf16 %v21533_v47  ;;  %v4655_v31 = vsel %vm4649_vm3, %v4603_v19, %v11961_v41  ;;  %v4654_v2 = vsel %vm4649_vm3, %v4602_v5, %v11960_v30  ;;  %v12040_v19 = vunpack.i.l.bf16 %v15957_v58 }
 0x176   : > { %v16005_v10 = vpop.permute.xlu1 %12068  ;;  %v4706_v41 = vsel %vm4701_vm7, %v4654_v2, %v11980_v6 }
 0x177   : > { %v16011_v26 = vpop.permute.xlu0 %12073 }
 0x178   : > { %12358 = vrot.lane.b32.xlu1 %v15757_v62, %s14809_s24  ;;  %v11616_v62 = vunpack.i.h.bf16 %v15390_v33  ;;  %v16043_v33 = vpack.i.bf16 %v16026_v9, %v16024_v46 }
 0x179   : > { %12363 = vrot.lane.b32.xlu0 %v16009_v52, %s21431_s17 }
 0x17a   : > { %v16019_v25 = vpop.permute.xlu1 %12078  ;;  %v4501_v61 = vsel %vm469_vm0, %v14779_v14, %v11616_v62  ;;  %v11871_v62 = vunpack.i.h.bf16 %v21533_v47  ;;  %v12442_v14 = vpack.i.bf16 %v16045_v15, %v16036_v48  ;;  %v4604_v47 = vsel %vm4597_vm6, %v4552_v53, %v11870_v8 }
 0x17b   : > { %v16031_v37 = vpop.permute.xlu0 %12083  ;;  %v4553_v44 = vsel %vm4545_vm2, %v4501_v61, %v11741_v32  ;;  %v11981_v32 = vunpack.i.h.bf16 %v21536_v22  ;;  %v11995_v61 = vunpack.i.l.bf16 %v15850_v20  ;;  %v4656_v53 = vsel %vm4649_vm3, %v4604_v47, %v11975_v56 }
 0x17c   : > { %12368 = vrot.lane.b32.xlu1 %v12367_v51, %s14817_s21  ;;  %v4605_v55 = vsel %vm4597_vm6, %v4553_v44, %v11871_v62  ;;  %v12000_v8 = vunpack.i.l.bf16 %v15862_v45  ;;  %v12016_v44 = vunpack.i.h.bf16 %v15896_v59  ;;  %v12015_v62 = vunpack.i.l.bf16 %v15896_v59 }
 0x17d   : > { %12373 = vrot.lane.b32.xlu0 %v12367_v51, %s14809_s24  ;;  %v12020_v20 = vunpack.i.l.bf16 %v15914_v49  ;;  %v4707_v30 = vsel %vm4701_vm7, %v4655_v31, %v11981_v32  ;;  %v12021_v56 = vunpack.i.h.bf16 %v15914_v49  ;;  %v12035_v45 = vunpack.i.l.bf16 %v15942_v36 }
 0x17e   : > { %v16039_v38 = vpop.permute.xlu1 %12088  ;;  %v4708_v5 = vsel %vm4701_vm7, %v4656_v53, %v11995_v61  ;;  %v12036_v59 = vunpack.i.h.bf16 %v15942_v36  ;;  %v4758_v6 = vsel %vm4753_vm8, %v4706_v41, %v12000_v8  ;;  %v4759_v32 = vsel %vm4753_vm8, %v4707_v30, %v12001_v34 }
 0x17f   : > { %v16057_v27 = vpop.permute.xlu0 %12093  ;;  %v12041_v49 = vunpack.i.h.bf16 %v15957_v58  ;;  %v12050_v47 = vunpack.i.l.bf16 %v15976_v57  ;;  %v4760_v61 = vsel %vm4753_vm8, %v4708_v5, %v12015_v62  ;;  %v4810_v36 = vsel %vm4805_vm9, %v4758_v6, %v12020_v20 }
 0x180   : > { %12378 = vrot.lane.b32.xlu1 %v15784_v7, %s21435_s25  ;;  %v16076_v7 = vld [vmem:[#allocation2 + $0x109] sm:$0xff]  ;;  %v4811_v2 = vsel %vm4805_vm9, %v4759_v32, %v12021_v56  ;;  %v4812_v53 = vsel %vm4805_vm9, %v4760_v61, %v12035_v45  ;;  %v12056_v58 = vunpack.i.h.bf16 %v15984_v40  ;;  %v12055_v34 = vunpack.i.l.bf16 %v15984_v40 }
 0x181   : > { %12383 = vrot.lane.b32.xlu0 %v16043_v33, %s14817_s21  ;;  %v4862_v62 = vsel %vm4857_vm4, %v4810_v36, %v12040_v19  ;;  %v12060_v20 = vunpack.i.l.bf16 %v15992_v11  ;;  %v4864_v41 = vsel %vm4857_vm4, %v4812_v53, %v12050_v47  ;;  %v12066_v30 = vunpack.i.h.bf16 %v15999_v21 }
 0x182   : > { %v16082_v51 = vpop.permute.xlu1 %12098  ;;  %v12065_v56 = vunpack.i.l.bf16 %v15999_v21  ;;  %v12070_v45 = vunpack.i.l.bf16 %v16005_v10  ;;  %v12075_v5 = vunpack.i.l.bf16 %v16011_v26  ;;  %v12091_v21 = vunpack.i.h.bf16 %v16039_v38 }
 0x183   : > { %v16100_v39 = vpop.permute.xlu0 %12103  ;;  %v12090_v19 = vunpack.i.l.bf16 %v16039_v38  ;;  %v4916_v3 = vsel %vm4909_vm10, %v4864_v41, %v12060_v20  ;;  %v12071_v36 = vunpack.i.h.bf16 %v16005_v10  ;;  %v12086_v53 = vunpack.i.h.bf16 %v16031_v37 }
 0x184   : > { %12388 = vrot.lane.b32.xlu1 %v12387_v12, %s21429_s23  ;;  %v12457_v48 = vpack.i.bf16 %v16063_v43, %v16052_v50  ;;  %v16256_v43 = vld [vmem:[#allocation2 + $0x10b] sm:$0xff] }
 0x185   : > { %12393 = vrot.lane.b32.xlu0 %v12387_v12, %s21435_s25  ;;  %v4657_v12 = vsel %vm4649_vm3, %v4605_v55, %v11976_v29 }
 0x186   : > { %v16118_v0 = vpop.permute.xlu1 %12108  ;;  %v4709_v29 = vsel %vm4701_vm7, %v4657_v12, %v11996_v42  ;;  %v12051_v42 = vunpack.i.h.bf16 %v15976_v57  ;;  %v4863_v57 = vsel %vm4857_vm4, %v4811_v2, %v12041_v49 }
 0x187   : > { %v16128_v22 = vpop.permute.xlu0 %12113  ;;  %v4761_v31 = vsel %vm4753_vm8, %v4709_v29, %v12016_v44  ;;  %v12061_v44 = vunpack.i.h.bf16 %v15992_v11  ;;  %v12076_v11 = vunpack.i.h.bf16 %v16011_v26  ;;  %v4914_v29 = vsel %vm4909_vm10, %v4862_v62, %v12055_v34 }
 0x188   : > { %12398 = vrot.lane.b32.xlu1 %v15796_v16, %s14811_s26  ;;  %v4813_v12 = vsel %vm4805_vm9, %v4761_v31, %v12036_v59  ;;  %v4915_v59 = vsel %vm4909_vm10, %v4863_v57, %v12056_v58  ;;  %v12111_v6 = vunpack.i.h.bf16 %v16118_v0  ;;  %v12110_v26 = vunpack.i.l.bf16 %v16118_v0 }
 0x189   : > { %12403 = vrot.lane.b32.xlu0 %v16074_v23, %s21429_s23  ;;  %v4966_v32 = vsel %vm4961_vm11, %v4914_v29, %v12065_v56  ;;  %v4967_v49 = vsel %vm4961_vm11, %v4915_v59, %v12066_v30  ;;  %v21537_v31 = vpack.i.bf16 %v16067_v4, %v15997_v1  ;;  %v12085_v58 = vunpack.i.l.bf16 %v16031_v37 }
 0x18a   : > { %v16142_v16 = vpop.permute.xlu1 %12118  ;;  %v5018_v2 = vsel %vm5013_vm12, %v4966_v32, %v12075_v5  ;;  %v5019_v0 = vsel %vm5013_vm12, %v4967_v49, %v12076_v11  ;;  %v21538_v1 = vpack.i.bf16 %v16024_v46, %v16002_v28  ;;  %v12106_v57 = vunpack.i.h.bf16 %v16100_v39 }
 0x18b   : > { %v16152_v55 = vpop.permute.xlu0 %12123  ;;  %v5070_v34 = vsel %vm5065_vm13, %v5018_v2, %v12090_v19  ;;  %v12105_v37 = vunpack.i.l.bf16 %v16100_v39  ;;  %v21539_v28 = vpack.i.bf16 %v16076_v7, %v16026_v9 }
 0x18c   : > { %12408 = vrot.lane.b32.xlu1 %v12407_v54, %s14819_s22  ;;  %v12126_v46 = vunpack.i.h.bf16 %v16152_v55 }
 0x18d   : > { %12413 = vrot.lane.b32.xlu0 %v12407_v54, %s14811_s26  ;;  %v4865_v54 = vsel %vm4857_vm4, %v4813_v12, %v12051_v42  ;;  %v4968_v42 = vsel %vm4961_vm11, %v4916_v3, %v12070_v45  ;;  %v5122_v12 = vsel %vm5117_vm14, %v5070_v34, %v12110_v26  ;;  %v16283_v34 = vld [vmem:[#allocation2 + $0x128] sm:$0xff] }
 0x18e   : > { %v12129_v8 = vpop.permute.xlu1 %12128 }
 0x18f   : > { %v16172_v40 = vpop.permute.xlu0 %12133  ;;  %v12131_v47 = vunpack.i.h.bf16 %v12129_v8  ;;  %v12130_v61 = vunpack.i.l.bf16 %v12129_v8  ;;  %v5071_v8 = vsel %vm5065_vm13, %v5019_v0, %v12091_v21  ;;  %v5020_v21 = vsel %vm5013_vm12, %v4968_v42, %v12085_v58  ;;  %v16281_v58 = vld [vmem:[#allocation2 + $0x120] sm:$0xff] }
 0x190   : > { %12418 = vrot.lane.b32.xlu1 %v12417_v24, %s21437_s27  ;;  %v4917_v24 = vsel %vm4909_vm10, %v4865_v54, %v12061_v44  ;;  %v5123_v62 = vsel %vm5117_vm14, %v5071_v8, %v12111_v6  ;;  %v12125_v54 = vunpack.i.l.bf16 %v16152_v55  ;;  %v5072_v19 = vsel %vm5065_vm13, %v5020_v21, %v12105_v37 }
 0x191   : > { %12423 = vrot.lane.b32.xlu0 %v16094_v13, %s14819_s22  ;;  %v5174_v41 = vsel %vm5169_vm15, %v5122_v12, %v12130_v61  ;;  %v5175_v30 = vsel %vm5169_vm15, %v5123_v62, %v12131_v47  ;;  %v4969_v39 = vsel %vm4961_vm11, %v4917_v24, %v12071_v36  ;;  %v21540_v47 = vpack.i.bf16 %v16088_v18, %v16047_v60  ;;  %v16261_v36 = vld [vmem:[#allocation2 + $0x110] sm:$0xff]  ;;  %v16307_v62 = vld [vmem:[#allocation2 + $0x121] sm:$0xff] }
 0x192   : > { %v16188_v17 = vpop.permute.xlu1 %12138  ;;  %v5021_v55 = vsel %vm5013_vm12, %v4969_v39, %v12086_v53  ;;  %v5124_v15 = vsel %vm5117_vm14, %v5072_v19, %v12125_v54  ;;  %v16269_v60 = vpack.i.bf16 %v16256_v43, %v16065_v63  ;;  %v12477_v0 = vpack.i.bf16 %v16261_v36, %v16067_v4  ;;  %v16288_v63 = vld [vmem:[#allocation2 + $0x111] sm:$0xff] }
 0x193   : > { %v12144_v38 = vpop.permute.xlu0 %12143  ;;  %v5073_v3 = vsel %vm5065_vm13, %v5021_v55, %v12106_v57  ;;  %v16295_v4 = vpack.i.bf16 %v16283_v34, %v16281_v58  ;;  %v16321_v39 = vld [vmem:[#allocation2 + $0x112] sm:$0xff] }
 0x194   : > { %12428 = vrot.lane.b32.xlu1 %v21537_v31, %s21437_s27  ;;  %v12146_v5 = vunpack.i.h.bf16 %v12144_v38  ;;  %v12145_v29 = vunpack.i.l.bf16 %v12144_v38 }
 0x195   : > { %12433 = vrot.lane.b32.xlu0 %v21538_v1, %s14813_s28 }
 0x196   : > { %v12149_v10 = vpop.permute.xlu1 %12148  ;;  %v5176_v32 = vsel %vm5169_vm15, %v5124_v15, %v12145_v29  ;;  %v21545_v29 = vld [vmem:[#allocation54_spill] sm:$0xff]  ;;  %v14780_v15 = vld [vmem:[#allocation2 + $0x60] sm:$0xff] }
 0x197   : > { %v12151_v44 = vunpack.i.h.bf16 %v12149_v10  ;;  %v12150_v20 = vunpack.i.l.bf16 %v12149_v10  ;;  %v16218_v56 = vpop.permute.xlu0 %12153  ;;  %v12497_v10 = vpack.i.bf16 %v16288_v63, %v16076_v7  ;;  %v21543_v7 = vld [vmem:[#allocation30_spill] sm:$0xff]  ;;  %v11875_v21 = vunpack.i.l.bf16 %v21545_v29 }
 0x198   : > { %12438 = vrot.lane.b32.xlu1 %v21539_v28, %s14813_s28  ;;  %v11745_v54 = vunpack.i.l.bf16 %v21543_v7 }
 0x199   : > { %v5226_v45 = vsel %vm5221_vm1, %v5174_v41, %v12150_v20  ;;  %v5227_v11 = vsel %vm5221_vm1, %v5175_v30, %v12151_v44  ;;  %12443 = vrot.lane.b32.xlu0 %v12442_v14, %s21439_s15  ;;  %v5125_v14 = vsel %vm5117_vm14, %v5073_v3, %v12126_v46  ;;  %v16309_v44 = vld [vmem:[#allocation2 + $0x129] sm:$0xff]  ;;  %v21541_v20 = vld [vmem:[#allocation7_spill] sm:$0xff]  ;;  %v21542_v41 = vld [vmem:[#allocation8_spill] sm:$0xff]  ;;  %v11746_v46 = vunpack.i.h.bf16 %v21543_v7 }
 0x19a   : > { %v16233_v59 = vpop.permute.xlu1 %12158  ;;  %v5275_v9 = vpack.c.bf16 %v5227_v11, %v5226_v45  ;;  %v5177_v49 = vsel %vm5169_vm15, %v5125_v14, %v12146_v5  ;;  %v11621_v57 = vunpack.i.h.bf16 %v21541_v20  ;;  %v11620_v37 = vunpack.i.l.bf16 %v21541_v20  ;;  %v21544_v45 = vld [vmem:[#allocation31_spill] sm:$0xff] }
 0x19b   : > { %v12164_v6 = vpop.permute.xlu0 %12163  ;;  %v11626_v30 = vunpack.i.h.bf16 %v21542_v41  ;;  %v11751_v11 = vunpack.i.h.bf16 %v21544_v45  ;;  %v11750_v5 = vunpack.i.l.bf16 %v21544_v45  ;;  %v16331_v19 = vpack.i.bf16 %v16309_v44, %v16307_v62  ;;  %v21546_v3 = vld [vmem:[#allocation55_spill] sm:$0xff] }
 0x19c   : > { %12448 = vrot.lane.b32.xlu1 %v15980_v35, %s21522_s18  ;;  %11465 = vmatprep.mubr.msk.bf16.mxu0 %vm5331_vm5, %v5275_v9  ;;  %v12166_v24 = vunpack.i.h.bf16 %v12164_v6  ;;  %v12165_v26 = vunpack.i.l.bf16 %v12164_v6  ;;  %v11876_v9 = vunpack.i.h.bf16 %v21545_v29  ;;  %v11881_v6 = vunpack.i.h.bf16 %v21546_v3 }
 0x19d   : > { %12453 = vrot.lane.b32.xlu0 %v21540_v47, %s21439_s15  ;;  %v4503_v14 = vsel %vm469_vm0, %v14780_v15, %v11621_v57  ;;  %v16343_v47 = vld [vmem:[#allocation2 + $0x122] sm:$0xff] }
 0x19e   : > { %v16252_v35 = vpop.permute.xlu1 %12168  ;;  %v5228_v61 = vsel %vm5221_vm1, %v5176_v32, %v12165_v26  ;;  %v5229_v50 = vsel %vm5221_vm1, %v5177_v49, %v12166_v24  ;;  %v14781_v24 = vld [vmem:[#allocation2 + $0x50] sm:$0xff]  ;;  %v12517_v49 = vpack.i.bf16 %v16321_v39, %v16088_v18  ;;  %v4555_v57 = vsel %vm4545_vm2, %v4503_v14, %v11746_v46 }
 0x19f   : > { %v16258_v38 = vpop.permute.xlu0 %12173  ;;  %v5276_v31 = vpack.c.bf16 %v5229_v50, %v5228_v61  ;;  %v4502_v26 = vsel %vm469_vm0, %v14781_v24, %v11620_v37  ;;  %v16345_v61 = vld [vmem:[#allocation2 + $0x12a] sm:$0xff]  ;;  %v16351_v37 = vld [vmem:[#allocation2 + $0x113] sm:$0xff]  ;;  %v4607_v7 = vsel %vm4597_vm6, %v4555_v57, %v11876_v9  ;;  %v12096_v24 = vunpack.i.h.bf16 %v16057_v27 }
 0x1a0   : > { %12458 = vrot.lane.b32.xlu1 %v12457_v48, %s14815_s16  ;;  %v14782_v50 = vld [vmem:[#allocation2 + $0x70] sm:$0xff]  ;;  %v4554_v20 = vsel %vm4545_vm2, %v4502_v26, %v11745_v54  ;;  %v16372_v29 = vpack.i.bf16 %v16345_v61, %v16343_v47  ;;  %v12140_v57 = vunpack.i.l.bf16 %v16188_v17 }
 0x1a1   : > { %12463 = vrot.lane.b32.xlu0 %v12457_v48, %s21522_s18  ;;  %11466 = vmatmul.mubr.msk.bf16.gmra.mxu0 %vm5331_vm5, %v5276_v31  ;;  %v11880_v48 = vunpack.i.l.bf16 %v21546_v3  ;;  %v4505_v31 = vsel %vm469_vm0, %v14782_v50, %v11626_v30  ;;  %v16363_v54 = vld [vmem:[#allocation2 + $0x12b] sm:$0xff]  ;;  %v12095_v3 = vunpack.i.l.bf16 %v16057_v27  ;;  %v12562_v50 = vpack.i.bf16 %v16307_v62, %v16288_v63 }
 0x1a2   : > { %v16264_v42 = vpop.permute.xlu1 %12178  ;;  %v4557_v18 = vsel %vm4545_vm2, %v4505_v31, %v11751_v11  ;;  %v16365_v46 = vld [vmem:[#allocation2 + $0x130] sm:$0xff]  ;;  %v12081_v11 = vunpack.i.h.bf16 %v16019_v25  ;;  %v12101_v31 = vunpack.i.h.bf16 %v16082_v51 }
 0x1a3   : > { %v16271_v2 = vpop.permute.xlu0 %12183  ;;  %v16374_v9 = vld [vmem:[#allocation2 + $0x131] sm:$0xff] }
 0x1a4   : > { %12468 = vrot.lane.b32.xlu1 %v16009_v52, %s21506_s20  ;;  %v16385_v14 = vld [vmem:[#allocation2 + $0x132] sm:$0xff]  ;;  %v21547_v63 = vpack.i.bf16 %v16374_v9, %v16309_v44 }
 0x1a5   : > { %12473 = vrot.lane.b32.xlu0 %v16269_v60, %s14815_s16 }
 0x1a6   : > { %v16279_v53 = vpop.permute.xlu1 %12188 }
 0x1a7   : > { %v16285_v8 = vpop.permute.xlu0 %12193 }
 0x1a8   : > { %12478 = vrot.lane.b32.xlu1 %v12477_v0, %s21431_s17 }
 0x1a9   : > { %12483 = vrot.lane.b32.xlu0 %v12477_v0, %s21506_s20  ;;  %v14783_v0 = vld [vmem:[#allocation2 + $0x68] sm:$0xff] }
 0x1aa   : > { %v16291_v52 = vpop.permute.xlu1 %12198 }
 0x1ab   : > { %v16297_v1 = vpop.permute.xlu0 %12203 }
 0x1ac   : > { %12488 = vrot.lane.b32.xlu1 %v16043_v33, %s14809_s24  ;;  %v11625_v33 = vunpack.i.l.bf16 %v21542_v41  ;;  %v4606_v41 = vsel %vm4597_vm6, %v4554_v20, %v11875_v21  ;;  %v12080_v21 = vunpack.i.l.bf16 %v16019_v25  ;;  %v12557_v25 = vpack.i.bf16 %v16365_v46, %v16283_v34 }
 0x1ad   : > { %12493 = vrot.lane.b32.xlu0 %v16295_v4, %s21431_s17  ;;  %v12115_v20 = vunpack.i.l.bf16 %v16128_v22 }
 0x1ae   : > { %v16305_v12 = vpop.permute.xlu1 %12208 }
 0x1af   : > { %v16314_v28 = vpop.permute.xlu0 %12213 }
 0x1b0   : > { %12498 = vrot.lane.b32.xlu1 %v12497_v10, %s14817_s21 }
 0x1b1   : > { %12503 = vrot.lane.b32.xlu0 %v12497_v10, %s14809_s24  ;;  %v4504_v10 = vsel %vm469_vm0, %v14783_v0, %v11625_v33  ;;  %v16361_v33 = vld [vmem:[#allocation2 + $0x123] sm:$0xff]  ;;  %v4659_v0 = vsel %vm4649_vm3, %v4607_v7, %v12081_v11  ;;  %v12135_v11 = vunpack.i.l.bf16 %v16172_v40 }
 0x1b2   : > { %v16327_v55 = vpop.permute.xlu1 %12218  ;;  %v16390_v26 = vpack.i.bf16 %v16363_v54, %v16361_v33 }
 0x1b3   : > { %v16337_v32 = vpop.permute.xlu0 %12223 }
 0x1b4   : > { %12508 = vrot.lane.b32.xlu1 %v16074_v23, %s21435_s25  ;;  %v4556_v23 = vsel %vm4545_vm2, %v4504_v10, %v11750_v5  ;;  %v4609_v5 = vsel %vm4597_vm6, %v4557_v18, %v11881_v6  ;;  %v12547_v6 = vpack.i.bf16 %v16281_v58, %v16261_v36  ;;  %v12572_v58 = vpack.i.bf16 %v16343_v47, %v16321_v39 }
 0x1b5   : > { %12513 = vrot.lane.b32.xlu0 %v16331_v19, %s14817_s21  ;;  %v4608_v45 = vsel %vm4597_vm6, %v4556_v23, %v11880_v48  ;;  %v12537_v48 = vpack.i.bf16 %v16351_v37, %v16256_v43  ;;  %v12100_v43 = vunpack.i.l.bf16 %v16082_v51  ;;  %v12116_v10 = vunpack.i.h.bf16 %v16128_v22 }
 0x1b6   : > { %v16359_v30 = vpop.permute.xlu1 %12228  ;;  %v4658_v51 = vsel %vm4649_vm3, %v4606_v41, %v12080_v21  ;;  %v12121_v23 = vunpack.i.h.bf16 %v16142_v16  ;;  %v12120_v18 = vunpack.i.l.bf16 %v16142_v16  ;;  %v4661_v7 = vsel %vm4649_vm3, %v4609_v5, %v12096_v24 }
 0x1b7   : > { %v16378_v15 = vpop.permute.xlu0 %12233  ;;  %v12136_v22 = vunpack.i.h.bf16 %v16172_v40  ;;  %v4710_v41 = vsel %vm4701_vm7, %v4658_v51, %v12100_v43  ;;  %v12141_v21 = vunpack.i.h.bf16 %v16188_v17  ;;  %v12155_v16 = vunpack.i.l.bf16 %v16218_v56 }
 0x1b8   : > { %12518 = vrot.lane.b32.xlu1 %v12517_v49, %s21429_s23  ;;  %v12156_v40 = vunpack.i.h.bf16 %v16218_v56  ;;  %v12160_v24 = vunpack.i.l.bf16 %v16233_v59  ;;  %v4762_v43 = vsel %vm4753_vm8, %v4710_v41, %v12120_v18  ;;  %v12161_v17 = vunpack.i.h.bf16 %v16233_v59 }
 0x1b9   : > { %12523 = vrot.lane.b32.xlu0 %v12517_v49, %s21435_s25  ;;  %v4660_v49 = vsel %vm4649_vm3, %v4608_v45, %v12095_v3  ;;  %v4711_v45 = vsel %vm4701_vm7, %v4659_v0, %v12101_v31  ;;  %v4713_v3 = vsel %vm4701_vm7, %v4661_v7, %v12116_v10  ;;  %v12170_v0 = vunpack.i.l.bf16 %v16252_v35 }
 0x1ba   : > { %v16399_v36 = vpop.permute.xlu1 %12238  ;;  %v4712_v5 = vsel %vm4701_vm7, %v4660_v49, %v12115_v20  ;;  %v4763_v31 = vsel %vm4753_vm8, %v4711_v45, %v12121_v23  ;;  %v4765_v10 = vsel %vm4753_vm8, %v4713_v3, %v12136_v22  ;;  %v4814_v56 = vsel %vm4805_vm9, %v4762_v43, %v12140_v57 }
 0x1bb   : > { %v16414_v27 = vpop.permute.xlu0 %12243  ;;  %v4764_v20 = vsel %vm4753_vm8, %v4712_v5, %v12135_v11  ;;  %v12171_v49 = vunpack.i.h.bf16 %v16252_v35  ;;  %v4815_v18 = vsel %vm4805_vm9, %v4763_v31, %v12141_v21  ;;  %v12176_v59 = vunpack.i.h.bf16 %v16258_v38 }
 0x1bc   : > { %12528 = vrot.lane.b32.xlu1 %v16094_v13, %s14811_s26  ;;  %v4816_v23 = vsel %vm4805_vm9, %v4764_v20, %v12155_v16  ;;  %v12175_v7 = vunpack.i.l.bf16 %v16258_v38  ;;  %v4817_v45 = vsel %vm4805_vm9, %v4765_v10, %v12156_v40  ;;  %v4866_v11 = vsel %vm4857_vm4, %v4814_v56, %v12160_v24 }
 0x1bd   : > { %12533 = vrot.lane.b32.xlu0 %v16372_v29, %s21429_s23  ;;  %v12181_v22 = vunpack.i.h.bf16 %v16264_v42  ;;  %v12180_v57 = vunpack.i.l.bf16 %v16264_v42  ;;  %v4867_v35 = vsel %vm4857_vm4, %v4815_v18, %v12161_v17  ;;  %v4868_v21 = vsel %vm4857_vm4, %v4816_v23, %v12170_v0 }
 0x1be   : > { %v16428_v13 = vpop.permute.xlu1 %12248  ;;  %v12186_v16 = vunpack.i.h.bf16 %v16271_v2  ;;  %v12185_v5 = vunpack.i.l.bf16 %v16271_v2  ;;  %v12195_v3 = vunpack.i.l.bf16 %v16285_v8  ;;  %v12201_v40 = vunpack.i.h.bf16 %v16291_v52 }
 0x1bf   : > { %v16438_v51 = vpop.permute.xlu0 %12253  ;;  %v12200_v42 = vunpack.i.l.bf16 %v16291_v52  ;;  %v4918_v24 = vsel %vm4909_vm10, %v4866_v11, %v12175_v7  ;;  %v4919_v43 = vsel %vm4909_vm10, %v4867_v35, %v12176_v59  ;;  %v12221_v31 = vunpack.i.h.bf16 %v16327_v55 }
 0x1c0   : > { %12538 = vrot.lane.b32.xlu1 %v12537_v48, %s14819_s22  ;;  %v12220_v2 = vunpack.i.l.bf16 %v16327_v55  ;;  %v4920_v17 = vsel %vm4909_vm10, %v4868_v21, %v12180_v57  ;;  %v12241_v20 = vunpack.i.h.bf16 %v16399_v36  ;;  %v12240_v52 = vunpack.i.l.bf16 %v16399_v36 }
 0x1c1   : > { %12543 = vrot.lane.b32.xlu0 %v12537_v48, %s14811_s26  ;;  %v4869_v48 = vsel %vm4857_vm4, %v4817_v45, %v12171_v49  ;;  %v4970_v10 = vsel %vm4961_vm11, %v4918_v24, %v12185_v5  ;;  %v4971_v56 = vsel %vm4961_vm11, %v4919_v43, %v12186_v16  ;;  %v12196_v23 = vunpack.i.h.bf16 %v16285_v8 }
 0x1c2   : > { %v12259_v41 = vpop.permute.xlu1 %12258  ;;  %v4921_v0 = vsel %vm4909_vm10, %v4869_v48, %v12181_v22  ;;  %v4972_v59 = vsel %vm4961_vm11, %v4920_v17, %v12195_v3  ;;  %v5022_v7 = vsel %vm5013_vm12, %v4970_v10, %v12200_v42  ;;  %v5023_v36 = vsel %vm5013_vm12, %v4971_v56, %v12201_v40 }
 0x1c3   : > { %v16458_v38 = vpop.permute.xlu0 %12263  ;;  %v12261_v49 = vunpack.i.h.bf16 %v12259_v41  ;;  %v12260_v18 = vunpack.i.l.bf16 %v12259_v41  ;;  %v12216_v45 = vunpack.i.h.bf16 %v16314_v28  ;;  %v12215_v11 = vunpack.i.l.bf16 %v16314_v28 }
 0x1c4   : > { %12548 = vrot.lane.b32.xlu1 %v12547_v6, %s21437_s27  ;;  %v5074_v41 = vsel %vm5065_vm13, %v5022_v7, %v12220_v2  ;;  %v5075_v22 = vsel %vm5065_vm13, %v5023_v36, %v12221_v31  ;;  %v12236_v21 = vunpack.i.h.bf16 %v16378_v15  ;;  %v12235_v28 = vunpack.i.l.bf16 %v16378_v15 }
 0x1c5   : > { %12553 = vrot.lane.b32.xlu0 %v16390_v26, %s14819_s22  ;;  %v5126_v8 = vsel %vm5117_vm14, %v5074_v41, %v12240_v52  ;;  %v12256_v62 = vunpack.i.h.bf16 %v16438_v51  ;;  %v4973_v15 = vsel %vm4961_vm11, %v4921_v0, %v12196_v23  ;;  %v5024_v31 = vsel %vm5013_vm12, %v4972_v59, %v12215_v11  ;;  %v16544_v59 = vld [vmem:[#allocation2 + $0x140] sm:$0xff]  ;;  %v16564_v41 = vld [vmem:[#allocation2 + $0x148] sm:$0xff] }
 0x1c6   : > { %v16471_v6 = vpop.permute.xlu1 %12268  ;;  %v5178_v16 = vsel %vm5169_vm15, %v5126_v8, %v12260_v18  ;;  %v5076_v2 = vsel %vm5065_vm13, %v5024_v31, %v12235_v28  ;;  %v12587_v39 = vpack.i.bf16 %v16361_v33, %v16351_v37  ;;  %v16539_v33 = vld [vmem:[#allocation2 + $0x133] sm:$0xff] }
 0x1c7   : > { %v12274_v55 = vpop.permute.xlu0 %12273 }
 0x1c8   : > { %12558 = vrot.lane.b32.xlu1 %v12557_v25, %s21437_s27  ;;  %v5127_v25 = vsel %vm5117_vm14, %v5075_v22, %v12241_v20  ;;  %v12276_v42 = vunpack.i.h.bf16 %v12274_v55  ;;  %v12275_v24 = vunpack.i.l.bf16 %v12274_v55  ;;  %v16566_v22 = vld [vmem:[#allocation2 + $0x150] sm:$0xff] }
 0x1c9   : > { %12563 = vrot.lane.b32.xlu0 %v12562_v50, %s14813_s28  ;;  %v5179_v5 = vsel %vm5169_vm15, %v5127_v25, %v12261_v49  ;;  %v12255_v50 = vunpack.i.l.bf16 %v16438_v51  ;;  %v5025_v51 = vsel %vm5013_vm12, %v4973_v15, %v12216_v45  ;;  %v21548_v49 = vpack.i.bf16 %v16385_v14, %v16345_v61  ;;  %v21552_v15 = vld [vmem:[#allocation33_spill] sm:$0xff] }
 0x1ca   : > { %v12279_v34 = vpop.permute.xlu1 %12278  ;;  %v5077_v17 = vsel %vm5065_vm13, %v5025_v51, %v12236_v21  ;;  %v16552_v61 = vpack.i.bf16 %v16539_v33, %v16363_v54  ;;  %v12607_v45 = vpack.i.bf16 %v16544_v59, %v16365_v46  ;;  %v16571_v54 = vld [vmem:[#allocation2 + $0x141] sm:$0xff]  ;;  %v16578_v46 = vpack.i.bf16 %v16566_v22, %v16564_v41 }
 0x1cb   : > { %v12281_v57 = vunpack.i.h.bf16 %v12279_v34  ;;  %v12280_v35 = vunpack.i.l.bf16 %v12279_v34  ;;  %v16501_v48 = vpop.permute.xlu0 %12283  ;;  %v5128_v47 = vsel %vm5117_vm14, %v5076_v2, %v12255_v50  ;;  %v12627_v25 = vpack.i.bf16 %v16571_v54, %v16374_v9  ;;  %v21551_v50 = vld [vmem:[#allocation32_spill] sm:$0xff]  ;;  %v16614_v2 = vld [vmem:[#allocation2 + $0x14a] sm:$0xff] }
 0x1cc   : > { %12568 = vrot.lane.b32.xlu1 %v21547_v63, %s14813_s28  ;;  %v5180_v10 = vsel %vm5169_vm15, %v5128_v47, %v12275_v24  ;;  %v16593_v63 = vld [vmem:[#allocation2 + $0x149] sm:$0xff]  ;;  %v11755_v9 = vunpack.i.l.bf16 %v21551_v50  ;;  %v11760_v24 = vunpack.i.l.bf16 %v21552_v15  ;;  %v14785_v47 = vld [vmem:[#allocation2 + $0x80] sm:$0xff] }
 0x1cd   : > { %v5230_v3 = vsel %vm5221_vm1, %v5178_v16, %v12280_v35  ;;  %v5231_v40 = vsel %vm5221_vm1, %v5179_v5, %v12281_v57  ;;  %12573 = vrot.lane.b32.xlu0 %v12572_v58, %s21439_s15  ;;  %v5129_v58 = vsel %vm5117_vm14, %v5077_v17, %v12256_v62  ;;  %v21549_v35 = vld [vmem:[#allocation9_spill] sm:$0xff]  ;;  %v21550_v16 = vld [vmem:[#allocation10_spill] sm:$0xff] }
 0x1ce   : > { %v16516_v43 = vpop.permute.xlu1 %12288  ;;  %v5277_v44 = vpack.c.bf16 %v5231_v40, %v5230_v3  ;;  %v5181_v56 = vsel %vm5169_vm15, %v5129_v58, %v12276_v42  ;;  %v11631_v21 = vunpack.i.h.bf16 %v21549_v35  ;;  %v11630_v28 = vunpack.i.l.bf16 %v21549_v35  ;;  %v16595_v62 = vld [vmem:[#allocation2 + $0x151] sm:$0xff] }
 0x1cf   : > { %v12294_v20 = vpop.permute.xlu0 %12293  ;;  %v11636_v5 = vunpack.i.h.bf16 %v21550_v16  ;;  %v11756_v3 = vunpack.i.h.bf16 %v21551_v50  ;;  %v11761_v42 = vunpack.i.h.bf16 %v21552_v15  ;;  %v16612_v51 = vpack.i.bf16 %v16595_v62, %v16593_v63  ;;  %v16616_v17 = vld [vmem:[#allocation2 + $0x152] sm:$0xff] }
 0x1d0   : > { %12578 = vrot.lane.b32.xlu1 %v16269_v60, %s21522_s18  ;;  %11469 = vmatprep.mubr.msk.bf16.mxu0 %vm5331_vm5, %v5277_v44  ;;  %v12296_v0 = vunpack.i.h.bf16 %v12294_v20  ;;  %v12295_v52 = vunpack.i.l.bf16 %v12294_v20  ;;  %v16605_v44 = vld [vmem:[#allocation2 + $0x142] sm:$0xff]  ;;  %v4506_v58 = vsel %vm469_vm0, %v14785_v47, %v11630_v28  ;;  %v16634_v35 = vld [vmem:[#allocation2 + $0x153] sm:$0xff]  ;;  %v12205_v50 = vunpack.i.l.bf16 %v16297_v1 }
 0x1d1   : > { %12583 = vrot.lane.b32.xlu0 %v21548_v49, %s21439_s15  ;;  %v14784_v20 = vld [vmem:[#allocation2 + $0x88] sm:$0xff]  ;;  %v12211_v47 = vunpack.i.h.bf16 %v16305_v12 }
 0x1d2   : > { %v16535_v60 = vpop.permute.xlu1 %12298  ;;  %v5232_v18 = vsel %vm5221_vm1, %v5180_v10, %v12295_v52  ;;  %v5233_v37 = vsel %vm5221_vm1, %v5181_v56, %v12296_v0  ;;  %v14786_v0 = vld [vmem:[#allocation2 + $0xa0] sm:$0xff]  ;;  %v14787_v56 = vld [vmem:[#allocation2 + $0x90] sm:$0xff] }
 0x1d3   : > { %v16541_v55 = vpop.permute.xlu0 %12303  ;;  %v5278_v23 = vpack.c.bf16 %v5233_v37, %v5232_v18  ;;  %v4509_v52 = vsel %vm469_vm0, %v14786_v0, %v11636_v5  ;;  %v16621_v10 = vld [vmem:[#allocation2 + $0x143] sm:$0xff]  ;;  %v4558_v18 = vsel %vm4545_vm2, %v4506_v58, %v11755_v9  ;;  %v12191_v5 = vunpack.i.h.bf16 %v16279_v53 }
 0x1d4   : > { %12588 = vrot.lane.b32.xlu1 %v12587_v39, %s14815_s16  ;;  %v12667_v9 = vpack.i.bf16 %v16621_v10, %v16539_v33  ;;  %v12225_v33 = vunpack.i.l.bf16 %v16337_v32 }
 0x1d5   : > { %12593 = vrot.lane.b32.xlu0 %v12587_v39, %s21522_s18  ;;  %11470 = vmatmul.mubr.msk.bf16.gmra.mxu0 %vm5331_vm5, %v5278_v23  ;;  %v4507_v39 = vsel %vm469_vm0, %v14784_v20, %v11631_v21  ;;  %v16636_v21 = vld [vmem:[#allocation2 + $0x160] sm:$0xff]  ;;  %v12210_v20 = vunpack.i.l.bf16 %v16305_v12  ;;  %v12245_v12 = vunpack.i.l.bf16 %v16414_v27 }
 0x1d6   : > { %v16547_v7 = vpop.permute.xlu1 %12308  ;;  %v4559_v37 = vsel %vm4545_vm2, %v4507_v39, %v11756_v3 }
 0x1d7   : > { %v16554_v36 = vpop.permute.xlu0 %12313 }
 0x1d8   : > { %12598 = vrot.lane.b32.xlu1 %v16295_v4, %s21506_s20 }
 0x1d9   : > { %12603 = vrot.lane.b32.xlu0 %v16552_v61, %s14815_s16 }
 0x1da   : > { %v16562_v11 = vpop.permute.xlu1 %12318 }
 0x1db   : > { %v16568_v34 = vpop.permute.xlu0 %12323 }
 0x1dc   : > { %12608 = vrot.lane.b32.xlu1 %v12607_v45, %s21431_s17 }
 0x1dd   : > { %12613 = vrot.lane.b32.xlu0 %v12607_v45, %s21506_s20  ;;  %v12647_v45 = vpack.i.bf16 %v16605_v44, %v16385_v14  ;;  %v12190_v14 = vunpack.i.l.bf16 %v16279_v53 }
 0x1de   : > { %v16574_v4 = vpop.permute.xlu1 %12328 }
 0x1df   : > { %v16580_v8 = vpop.permute.xlu0 %12333  ;;  %v4610_v39 = vsel %vm4597_vm6, %v4558_v18, %v12190_v14  ;;  %v12251_v14 = vunpack.i.h.bf16 %v16428_v13 }
 0x1e0   : > { %12618 = vrot.lane.b32.xlu1 %v16331_v19, %s14809_s24  ;;  %v11635_v19 = vunpack.i.l.bf16 %v21550_v16  ;;  %v4561_v16 = vsel %vm4545_vm2, %v4509_v52, %v11761_v42  ;;  %v16657_v42 = vld [vmem:[#allocation2 + $0x162] sm:$0xff]  ;;  %v4611_v52 = vsel %vm4597_vm6, %v4559_v37, %v12191_v5  ;;  %v4662_v37 = vsel %vm4649_vm3, %v4610_v39, %v12210_v20 }
 0x1e1   : > { %12623 = vrot.lane.b32.xlu0 %v16578_v46, %s21431_s17  ;;  %v12246_v5 = vunpack.i.h.bf16 %v16414_v27  ;;  %v4663_v18 = vsel %vm4649_vm3, %v4611_v52, %v12211_v47  ;;  %v12270_v27 = vunpack.i.l.bf16 %v16471_v6  ;;  %v12271_v39 = vunpack.i.h.bf16 %v16471_v6 }
 0x1e2   : > { %v16588_v57 = vpop.permute.xlu1 %12338  ;;  %v4508_v49 = vsel %vm469_vm0, %v14787_v56, %v11635_v19  ;;  %v16643_v19 = vpack.i.bf16 %v16616_v17, %v16614_v2  ;;  %v12226_v56 = vunpack.i.h.bf16 %v16337_v32  ;;  %v12290_v52 = vunpack.i.l.bf16 %v16516_v43 }
 0x1e3   : > { %v16600_v40 = vpop.permute.xlu0 %12343  ;;  %v4560_v28 = vsel %vm4545_vm2, %v4508_v49, %v11760_v24  ;;  %v12206_v24 = vunpack.i.h.bf16 %v16297_v1  ;;  %v12702_v49 = vpack.i.bf16 %v16614_v2, %v16605_v44  ;;  %v12230_v1 = vunpack.i.l.bf16 %v16359_v30 }
 0x1e4   : > { %12628 = vrot.lane.b32.xlu1 %v12627_v25, %s14817_s21  ;;  %v4612_v15 = vsel %vm4597_vm6, %v4560_v28, %v12205_v50  ;;  %v12291_v6 = vunpack.i.h.bf16 %v16516_v43  ;;  %v12306_v43 = vunpack.i.h.bf16 %v16541_v55 }
 0x1e5   : > { %12633 = vrot.lane.b32.xlu0 %v12627_v25, %s14809_s24  ;;  %v16632_v25 = vld [vmem:[#allocation2 + $0x14b] sm:$0xff]  ;;  %v4613_v32 = vsel %vm4597_vm6, %v4561_v16, %v12206_v24  ;;  %v4664_v28 = vsel %vm4649_vm3, %v4612_v15, %v12225_v33  ;;  %v12266_v16 = vunpack.i.h.bf16 %v16458_v38  ;;  %v12265_v24 = vunpack.i.l.bf16 %v16458_v38 }
 0x1e6   : > { %v16608_v31 = vpop.permute.xlu1 %12348  ;;  %v16663_v53 = vpack.i.bf16 %v16634_v35, %v16632_v25  ;;  %v4714_v20 = vsel %vm4701_vm7, %v4662_v37, %v12230_v1  ;;  %v4716_v47 = vsel %vm4701_vm7, %v4664_v28, %v12245_v12  ;;  %v12286_v38 = vunpack.i.h.bf16 %v16501_v48 }
 0x1e7   : > { %v16626_v23 = vpop.permute.xlu0 %12353  ;;  %v4768_v12 = vsel %vm4753_vm8, %v4716_v47, %v12265_v24  ;;  %v12325_v47 = vunpack.i.l.bf16 %v16568_v34  ;;  %v12717_v44 = vpack.i.bf16 %v16632_v25, %v16621_v10  ;;  %v16825_v25 = vld [vmem:[#allocation2 + $0x163] sm:$0xff] }
 0x1e8   : > { %12638 = vrot.lane.b32.xlu1 %v16372_v29, %s21435_s25  ;;  %v16645_v29 = vld [vmem:[#allocation2 + $0x161] sm:$0xff] }
 0x1e9   : > { %12643 = vrot.lane.b32.xlu0 %v16612_v51, %s14817_s21 }
 0x1ea   : > { %v16651_v3 = vpop.permute.xlu1 %12358 }
 0x1eb   : > { %21553 = vst [vmem:[#allocation29_spill] sm:$0xff] %v16651_v3  ;;  %v16669_v58 = vpop.permute.xlu0 %12363  ;;  %v12231_v3 = vunpack.i.h.bf16 %v16359_v30  ;;  %v12250_v30 = vunpack.i.l.bf16 %v16428_v13  ;;  %v12285_v13 = vunpack.i.l.bf16 %v16501_v48 }
 0x1ec   : > { %12648 = vrot.lane.b32.xlu1 %v12647_v45, %s21429_s23 }
 0x1ed   : > { %12653 = vrot.lane.b32.xlu0 %v12647_v45, %s21435_s25  ;;  %v4665_v45 = vsel %vm4649_vm3, %v4613_v32, %v12226_v56  ;;  %v4715_v15 = vsel %vm4701_vm7, %v4663_v18, %v12231_v3  ;;  %v4766_v1 = vsel %vm4753_vm8, %v4714_v20, %v12250_v30  ;;  %v12300_v56 = vunpack.i.l.bf16 %v16535_v60 }
 0x1ee   : > { %v16687_v0 = vpop.permute.xlu1 %12368  ;;  %v4717_v33 = vsel %vm4701_vm7, %v4665_v45, %v12246_v5  ;;  %v4767_v3 = vsel %vm4753_vm8, %v4715_v15, %v12251_v14  ;;  %v4818_v48 = vsel %vm4805_vm9, %v4766_v1, %v12270_v27  ;;  %v12301_v5 = vunpack.i.h.bf16 %v16535_v60 }
 0x1ef   : > { %v16697_v50 = vpop.permute.xlu0 %12373  ;;  %v4769_v37 = vsel %vm4753_vm8, %v4717_v33, %v12266_v16  ;;  %v4819_v18 = vsel %vm4805_vm9, %v4767_v3, %v12271_v39  ;;  %v4820_v28 = vsel %vm4805_vm9, %v4768_v12, %v12285_v13  ;;  %v12305_v14 = vunpack.i.l.bf16 %v16541_v55 }
 0x1f0   : > { %12658 = vrot.lane.b32.xlu1 %v16390_v26, %s14811_s26  ;;  %v4821_v45 = vsel %vm4805_vm9, %v4769_v37, %v12286_v38  ;;  %v4870_v24 = vsel %vm4857_vm4, %v4818_v48, %v12290_v52  ;;  %v12311_v16 = vunpack.i.h.bf16 %v16547_v7  ;;  %v12310_v27 = vunpack.i.l.bf16 %v16547_v7 }
 0x1f1   : > { %12663 = vrot.lane.b32.xlu0 %v16643_v19, %s21429_s23  ;;  %v4871_v60 = vsel %vm4857_vm4, %v4819_v18, %v12291_v6  ;;  %v4872_v20 = vsel %vm4857_vm4, %v4820_v28, %v12300_v56  ;;  %v12316_v15 = vunpack.i.h.bf16 %v16554_v36  ;;  %v12315_v39 = vunpack.i.l.bf16 %v16554_v36 }
 0x1f2   : > { %v16711_v26 = vpop.permute.xlu1 %12378  ;;  %v4873_v13 = vsel %vm4857_vm4, %v4821_v45, %v12301_v5  ;;  %v12331_v7 = vunpack.i.h.bf16 %v16574_v4  ;;  %v12330_v33 = vunpack.i.l.bf16 %v16574_v4  ;;  %v4922_v38 = vsel %vm4909_vm10, %v4870_v24, %v12305_v14 }
 0x1f3   : > { %v16721_v32 = vpop.permute.xlu0 %12383  ;;  %v4923_v52 = vsel %vm4909_vm10, %v4871_v60, %v12306_v43  ;;  %v12351_v36 = vunpack.i.h.bf16 %v16608_v31  ;;  %v12350_v1 = vunpack.i.l.bf16 %v16608_v31  ;;  %v4925_v3 = vsel %vm4909_vm10, %v4873_v13, %v12311_v16 }
 0x1f4   : > { %12668 = vrot.lane.b32.xlu1 %v12667_v9, %s14819_s22  ;;  %v12371_v6 = vunpack.i.h.bf16 %v16687_v0  ;;  %v12370_v4 = vunpack.i.l.bf16 %v16687_v0  ;;  %v4974_v56 = vsel %vm4961_vm11, %v4922_v38, %v12315_v39  ;;  %v4975_v12 = vsel %vm4961_vm11, %v4923_v52, %v12316_v15 }
 0x1f5   : > { %12673 = vrot.lane.b32.xlu0 %v12667_v9, %s14811_s26  ;;  %v21554_v9 = vpack.i.bf16 %v16564_v41, %v16544_v59  ;;  %v4924_v41 = vsel %vm4909_vm10, %v4872_v20, %v12310_v27  ;;  %v21555_v5 = vpack.i.bf16 %v16636_v21, %v16566_v22  ;;  %v12326_v18 = vunpack.i.h.bf16 %v16568_v34 }
 0x1f6   : > { %v12389_v30 = vpop.permute.xlu1 %12388  ;;  %v4976_v28 = vsel %vm4961_vm11, %v4924_v41, %v12325_v47  ;;  %v5026_v43 = vsel %vm5013_vm12, %v4974_v56, %v12330_v33  ;;  %v5027_v0 = vsel %vm5013_vm12, %v4975_v12, %v12331_v7  ;;  %v12346_v14 = vunpack.i.h.bf16 %v16600_v40 }
 0x1f7   : > { %v16741_v55 = vpop.permute.xlu0 %12393  ;;  %v12391_v37 = vunpack.i.h.bf16 %v12389_v30  ;;  %v12390_v48 = vunpack.i.l.bf16 %v12389_v30  ;;  %v12345_v45 = vunpack.i.l.bf16 %v16600_v40  ;;  %v5078_v30 = vsel %vm5065_vm13, %v5026_v43, %v12350_v1 }
 0x1f8   : > { %12678 = vrot.lane.b32.xlu1 %v21554_v9, %s21437_s27  ;;  %v5079_v24 = vsel %vm5065_vm13, %v5027_v0, %v12351_v36  ;;  %v21556_v22 = vpack.i.bf16 %v16593_v63, %v16571_v54  ;;  %v5130_v16 = vsel %vm5117_vm14, %v5078_v30, %v12370_v4  ;;  %v12366_v15 = vunpack.i.h.bf16 %v16669_v58  ;;  %v16850_v30 = vld [vmem:[#allocation2 + $0x170] sm:$0xff] }
 0x1f9   : > { %12683 = vrot.lane.b32.xlu0 %v16663_v53, %s14819_s22  ;;  %v5131_v27 = vsel %vm5117_vm14, %v5079_v24, %v12371_v6  ;;  %v12365_v40 = vunpack.i.l.bf16 %v16669_v58  ;;  %v5182_v39 = vsel %vm5169_vm15, %v5130_v16, %v12390_v48  ;;  %v21557_v54 = vpack.i.bf16 %v16645_v29, %v16595_v62  ;;  %v16852_v24 = vld [vmem:[#allocation2 + $0x180] sm:$0xff] }
 0x1fa   : > { %v16757_v59 = vpop.permute.xlu1 %12398  ;;  %v5183_v9 = vsel %vm5169_vm15, %v5131_v27, %v12391_v37  ;;  %v12386_v63 = vunpack.i.h.bf16 %v16721_v32  ;;  %v12385_v47 = vunpack.i.l.bf16 %v16721_v32  ;;  %v4977_v58 = vsel %vm4961_vm11, %v4925_v3, %v12326_v18 }
 0x1fb   : > { %v12404_v31 = vpop.permute.xlu0 %12403  ;;  %v5028_v1 = vsel %vm5013_vm12, %v4976_v28, %v12345_v45  ;;  %v5029_v32 = vsel %vm5013_vm12, %v4977_v58, %v12346_v14  ;;  %v21558_v48 = vpack.i.bf16 %v16657_v42, %v16616_v17  ;;  %v16830_v28 = vld [vmem:[#allocation2 + $0x168] sm:$0xff]  ;;  %v16838_v17 = vpack.i.bf16 %v16825_v25, %v16634_v35  ;;  %v21562_v58 = vld [vmem:[#allocation35_spill] sm:$0xff] }
 0x1fc   : > { %12688 = vrot.lane.b32.xlu1 %v21555_v5, %s21437_s27  ;;  %v12406_v38 = vunpack.i.h.bf16 %v12404_v31  ;;  %v12405_v52 = vunpack.i.l.bf16 %v12404_v31  ;;  %v5080_v41 = vsel %vm5065_vm13, %v5028_v1, %v12365_v40  ;;  %v5081_v6 = vsel %vm5065_vm13, %v5029_v32, %v12366_v15  ;;  %v16857_v35 = vld [vmem:[#allocation2 + $0x169] sm:$0xff]  ;;  %v21560_v40 = vld [vmem:[#allocation12_spill] sm:$0xff] }
 0x1fd   : > { %12693 = vrot.lane.b32.xlu0 %v21556_v22, %s14813_s28  ;;  %v5132_v2 = vsel %vm5117_vm14, %v5080_v41, %v12385_v47  ;;  %v12737_v14 = vpack.i.bf16 %v16830_v28, %v16636_v21  ;;  %v16864_v21 = vpack.i.bf16 %v16852_v24, %v16850_v30  ;;  %v12757_v16 = vpack.i.bf16 %v16857_v35, %v16645_v29  ;;  %v635_v47 = vld [vmem:[#allocation2 + $0xc8] sm:$0xff]  ;;  %v21561_v29 = vld [vmem:[#allocation34_spill] sm:$0xff] }
 0x1fe   : > { %v12409_v34 = vpop.permute.xlu1 %12408  ;;  %v5184_v12 = vsel %vm5169_vm15, %v5132_v2, %v12405_v52  ;;  %v16891_v1 = vld [vmem:[#allocation2 + $0x16a] sm:$0xff] }
 0x1ff   : > { %v12411_v60 = vunpack.i.h.bf16 %v12409_v34  ;;  %v12410_v20 = vunpack.i.l.bf16 %v12409_v34  ;;  %v16787_v13 = vpop.permute.xlu0 %12413  ;;  %v14788_v2 = vld [vmem:[#allocation2 + $0xb0] sm:$0xff] }
 0x200   : > { %12698 = vrot.lane.b32.xlu1 %v21557_v54, %s14813_s28  ;;  %v16880_v54 = vld [vmem:[#allocation2 + $0x171] sm:$0xff] }
 0x201   : > { %v5234_v7 = vsel %vm5221_vm1, %v5182_v39, %v12410_v20  ;;  %v5235_v33 = vsel %vm5221_vm1, %v5183_v9, %v12411_v60  ;;  %12703 = vrot.lane.b32.xlu0 %v12702_v49, %s21439_s15  ;;  %v5133_v49 = vsel %vm5117_vm14, %v5081_v6, %v12386_v63  ;;  %v21559_v60 = vld [vmem:[#allocation11_spill] sm:$0xff]  ;;  %v11646_v39 = vunpack.i.h.bf16 %v21560_v40  ;;  %v16882_v63 = vld [vmem:[#allocation2 + $0x181] sm:$0xff] }
 0x202   : > { %v16802_v36 = vpop.permute.xlu1 %12418  ;;  %v5279_v62 = vpack.c.bf16 %v5235_v33, %v5234_v7  ;;  %v5185_v37 = vsel %vm5169_vm15, %v5133_v49, %v12406_v38  ;;  %v11641_v20 = vunpack.i.h.bf16 %v21559_v60  ;;  %v11640_v15 = vunpack.i.l.bf16 %v21559_v60  ;;  %v16900_v6 = vld [vmem:[#allocation2 + $0x172] sm:$0xff] }
 0x203   : > { %v12424_v4 = vpop.permute.xlu0 %12423  ;;  %v11645_v9 = vunpack.i.l.bf16 %v21560_v40  ;;  %v11766_v7 = vunpack.i.h.bf16 %v21561_v29  ;;  %v11765_v33 = vunpack.i.l.bf16 %v21561_v29  ;;  %v11770_v38 = vunpack.i.l.bf16 %v21562_v58  ;;  %v21564_v29 = vld [vmem:[#allocation29_spill] sm:$0xff] }
 0x204   : > { %12708 = vrot.lane.b32.xlu1 %v16552_v61, %s21522_s18  ;;  %11473 = vmatprep.mubr.msk.bf16.mxu0 %vm5331_vm5, %v5279_v62  ;;  %v12426_v3 = vunpack.i.h.bf16 %v12424_v4  ;;  %v12425_v56 = vunpack.i.l.bf16 %v12424_v4  ;;  %v11771_v62 = vunpack.i.h.bf16 %v21562_v58  ;;  %v16898_v41 = vpack.i.bf16 %v16882_v63, %v16880_v54  ;;  %v16902_v4 = vld [vmem:[#allocation2 + $0x182] sm:$0xff] }
 0x205   : > { %12713 = vrot.lane.b32.xlu0 %v21558_v48, %s21439_s15  ;;  %v4511_v49 = vsel %vm469_vm0, %v14788_v2, %v11641_v20  ;;  %v1409_v48 = vld [vmem:[#allocation2 + $0x173] sm:$0xff]  ;;  %v12777_v60 = vpack.i.bf16 %v16891_v1, %v16657_v42  ;;  %v16919_v20 = vld [vmem:[#allocation2 + $0x188] sm:$0xff]  ;;  %v12321_v40 = vunpack.i.h.bf16 %v16562_v11  ;;  %v12340_v58 = vunpack.i.l.bf16 %v16588_v57 }
 0x206   : > { %v16821_v61 = vpop.permute.xlu1 %12428  ;;  %v5236_v31 = vsel %vm5221_vm1, %v5184_v12, %v12425_v56  ;;  %v5237_v10 = vsel %vm5221_vm1, %v5185_v37, %v12426_v3  ;;  %21563 = vst [vmem:[#allocation52_spill] sm:$0xff] %v16898_v41  ;;  %v14789_v3 = vld [vmem:[#allocation2 + $0xa8] sm:$0xff]  ;;  %v4513_v12 = vsel %vm469_vm0, %v635_v47, %v11646_v39  ;;  %v16925_v39 = vpack.i.bf16 %v16902_v4, %v16900_v6 }
 0x207   : > { %v16827_v5 = vpop.permute.xlu0 %12433  ;;  %v5280_v18 = vpack.c.bf16 %v5237_v10, %v5236_v31  ;;  %v4510_v56 = vsel %vm469_vm0, %v14789_v3, %v11640_v15  ;;  %v16908_v31 = vld [vmem:[#allocation2 + $0x183] sm:$0xff]  ;;  %v4565_v15 = vsel %vm4545_vm2, %v4513_v12, %v11771_v62  ;;  %v12335_v47 = vunpack.i.l.bf16 %v16580_v8 }
 0x208   : > { %12718 = vrot.lane.b32.xlu1 %v12717_v44, %s14815_s16  ;;  %v4562_v10 = vsel %vm4545_vm2, %v4510_v56, %v11765_v33  ;;  %v16943_v33 = vld [vmem:[#allocation2 + $0x18a] sm:$0xff]  ;;  %v12341_v62 = vunpack.i.h.bf16 %v16588_v57  ;;  %v12355_v2 = vunpack.i.l.bf16 %v16626_v23  ;;  %v12356_v12 = vunpack.i.h.bf16 %v16626_v23 }
 0x209   : > { %12723 = vrot.lane.b32.xlu0 %v12717_v44, %s21522_s18  ;;  %11474 = vmatmul.mubr.msk.bf16.gmra.mxu0 %vm5331_vm5, %v5280_v18  ;;  %v1408_v44 = vld [vmem:[#allocation2 + $0x16b] sm:$0xff]  ;;  %v4563_v18 = vsel %vm4545_vm2, %v4511_v49, %v11766_v7  ;;  %v16941_v7 = vpack.i.bf16 %v16908_v31, %v1409_v48  ;;  %v12360_v3 = vunpack.i.l.bf16 %v21564_v29 }
 0x20a   : > { %v16833_v43 = vpop.permute.xlu1 %12438  ;;  %v4615_v56 = vsel %vm4597_vm6, %v4563_v18, %v12321_v40  ;;  %v16964_v57 = vpack.i.bf16 %v1409_v48, %v1408_v44  ;;  %v12376_v40 = vunpack.i.h.bf16 %v16697_v50 }
 0x20b   : > { %v16840_v0 = vpop.permute.xlu0 %12443  ;;  %v4667_v48 = vsel %vm4649_vm3, %v4615_v56, %v12341_v62  ;;  %v12430_v56 = vunpack.i.l.bf16 %v16821_v61 }
 0x20c   : > { %12728 = vrot.lane.b32.xlu1 %v16578_v46, %s21506_s20 }
 0x20d   : > { %12733 = vrot.lane.b32.xlu0 %v16838_v17, %s14815_s16 }
 0x20e   : > { %v16848_v45 = vpop.permute.xlu1 %12448 }
 0x20f   : > { %v16854_v22 = vpop.permute.xlu0 %12453 }
 0x210   : > { %12738 = vrot.lane.b32.xlu1 %v12737_v14, %s21431_s17 }
 0x211   : > { %12743 = vrot.lane.b32.xlu0 %v12737_v14, %s21506_s20 }
 0x212   : > { %v16860_v46 = vpop.permute.xlu1 %12458 }
 0x213   : > { %v16866_v34 = vpop.permute.xlu0 %12463 }
 0x214   : > { %12748 = vrot.lane.b32.xlu1 %v16612_v51, %s14809_s24  ;;  %v634_v51 = vld [vmem:[#allocation2 + $0xc0] sm:$0xff] }
 0x215   : > { %12753 = vrot.lane.b32.xlu0 %v16864_v21, %s21431_s17  ;;  %v4512_v37 = vsel %vm469_vm0, %v634_v51, %v11645_v9  ;;  %v16928_v9 = vpack.i.bf16 %v1408_v44, %v16825_v25  ;;  %v16930_v51 = vld [vmem:[#allocation2 + $0x189] sm:$0xff]  ;;  %v12336_v25 = vunpack.i.h.bf16 %v16580_v8  ;;  %v12375_v44 = vunpack.i.l.bf16 %v16697_v50 }
 0x216   : > { %v16874_v27 = vpop.permute.xlu1 %12468  ;;  %v4564_v14 = vsel %vm4545_vm2, %v4512_v37, %v11770_v38  ;;  %v12837_v37 = vpack.i.bf16 %v16943_v33, %v16902_v4  ;;  %v12400_v50 = vunpack.i.l.bf16 %v16757_v59 }
 0x217   : > { %v16887_v52 = vpop.permute.xlu0 %12473  ;;  %v4617_v18 = vsel %vm4597_vm6, %v4565_v15, %v12336_v25  ;;  %v12396_v15 = vunpack.i.h.bf16 %v16741_v55 }
 0x218   : > { %12758 = vrot.lane.b32.xlu1 %v12757_v16, %s14817_s21 }
 0x219   : > { %12763 = vrot.lane.b32.xlu0 %v12757_v16, %s14809_s24 }
 0x21a   : > { %v16894_v32 = vpop.permute.xlu1 %12478 }
 0x21b   : > { %v16913_v16 = vpop.permute.xlu0 %12483 }
 0x21c   : > { %12768 = vrot.lane.b32.xlu1 %v16643_v19, %s21435_s25  ;;  %v12320_v19 = vunpack.i.l.bf16 %v16562_v11  ;;  %v4616_v11 = vsel %vm4597_vm6, %v4564_v14, %v12335_v47  ;;  %v12381_v14 = vunpack.i.h.bf16 %v16711_v26 }
 0x21d   : > { %12773 = vrot.lane.b32.xlu0 %v16898_v41, %s14817_s21  ;;  %v12361_v41 = vunpack.i.h.bf16 %v21564_v29  ;;  %v12395_v29 = vunpack.i.l.bf16 %v16741_v55  ;;  %v12416_v55 = vunpack.i.h.bf16 %v16787_v13 }
 0x21e   : > { %v16936_v42 = vpop.permute.xlu1 %12488  ;;  %v4614_v38 = vsel %vm4597_vm6, %v4562_v10, %v12320_v19  ;;  %v4668_v10 = vsel %vm4649_vm3, %v4616_v11, %v12355_v2  ;;  %v12380_v19 = vunpack.i.l.bf16 %v16711_v26  ;;  %v12401_v11 = vunpack.i.h.bf16 %v16757_v59 }
 0x21f   : > { %v16953_v49 = vpop.permute.xlu0 %12493  ;;  %v4666_v23 = vsel %vm4649_vm3, %v4614_v38, %v12340_v58  ;;  %v4719_v58 = vsel %vm4701_vm7, %v4667_v48, %v12361_v41  ;;  %v12415_v26 = vunpack.i.l.bf16 %v16787_v13  ;;  %v4720_v38 = vsel %vm4701_vm7, %v4668_v10, %v12375_v44 }
 0x220   : > { %12778 = vrot.lane.b32.xlu1 %v12777_v60, %s21429_s23  ;;  %v4718_v25 = vsel %vm4701_vm7, %v4666_v23, %v12360_v3  ;;  %v12420_v2 = vunpack.i.l.bf16 %v16802_v36  ;;  %v4771_v41 = vsel %vm4753_vm8, %v4719_v58, %v12381_v14  ;;  %v12421_v59 = vunpack.i.h.bf16 %v16802_v36 }
 0x221   : > { %12783 = vrot.lane.b32.xlu0 %v12777_v60, %s21435_s25  ;;  %v4669_v60 = vsel %vm4649_vm3, %v4617_v18, %v12356_v12  ;;  %v4770_v3 = vsel %vm4753_vm8, %v4718_v25, %v12380_v19  ;;  %v4772_v18 = vsel %vm4753_vm8, %v4720_v38, %v12395_v29  ;;  %v4823_v44 = vsel %vm4805_vm9, %v4771_v41, %v12401_v11 }
 0x222   : > { %v16971_v8 = vpop.permute.xlu1 %12498  ;;  %v4721_v62 = vsel %vm4701_vm7, %v4669_v60, %v12376_v40  ;;  %v4822_v13 = vsel %vm4805_vm9, %v4770_v3, %v12400_v50  ;;  %v12431_v40 = vunpack.i.h.bf16 %v16821_v61  ;;  %v4824_v48 = vsel %vm4805_vm9, %v4772_v18, %v12415_v26 }
 0x223   : > { %v16981_v47 = vpop.permute.xlu0 %12503  ;;  %v4773_v23 = vsel %vm4753_vm8, %v4721_v62, %v12396_v15  ;;  %v12436_v36 = vunpack.i.h.bf16 %v16827_v5  ;;  %v12435_v10 = vunpack.i.l.bf16 %v16827_v5  ;;  %v4874_v60 = vsel %vm4857_vm4, %v4822_v13, %v12420_v2 }
 0x224   : > { %12788 = vrot.lane.b32.xlu1 %v16663_v53, %s14811_s26  ;;  %v4825_v19 = vsel %vm4805_vm9, %v4773_v23, %v12416_v55  ;;  %v12441_v15 = vunpack.i.h.bf16 %v16833_v43  ;;  %v12440_v61 = vunpack.i.l.bf16 %v16833_v43  ;;  %v4875_v29 = vsel %vm4857_vm4, %v4823_v44, %v12421_v59 }
 0x225   : > { %12793 = vrot.lane.b32.xlu0 %v16925_v39, %s21429_s23  ;;  %v4876_v50 = vsel %vm4857_vm4, %v4824_v48, %v12430_v56  ;;  %v12446_v25 = vunpack.i.h.bf16 %v16840_v0  ;;  %v12445_v5 = vunpack.i.l.bf16 %v16840_v0  ;;  %v4877_v11 = vsel %vm4857_vm4, %v4825_v19, %v12431_v40 }
 0x226   : > { %v16995_v53 = vpop.permute.xlu1 %12508  ;;  %v12455_v26 = vunpack.i.l.bf16 %v16854_v22  ;;  %v12461_v43 = vunpack.i.h.bf16 %v16860_v46  ;;  %v12460_v38 = vunpack.i.l.bf16 %v16860_v46  ;;  %v4926_v62 = vsel %vm4909_vm10, %v4874_v60, %v12435_v10 }
 0x227   : > { %v17005_v12 = vpop.permute.xlu0 %12513  ;;  %v4927_v55 = vsel %vm4909_vm10, %v4875_v29, %v12436_v36  ;;  %v12481_v0 = vunpack.i.h.bf16 %v16894_v32  ;;  %v12480_v2 = vunpack.i.l.bf16 %v16894_v32  ;;  %v4929_v3 = vsel %vm4909_vm10, %v4877_v11, %v12441_v15 }
 0x228   : > { %12798 = vrot.lane.b32.xlu1 %v16928_v9, %s14819_s22  ;;  %v12501_v41 = vunpack.i.h.bf16 %v16971_v8  ;;  %v12500_v46 = vunpack.i.l.bf16 %v16971_v8  ;;  %v4978_v59 = vsel %vm4961_vm11, %v4926_v62, %v12445_v5  ;;  %v4979_v56 = vsel %vm4961_vm11, %v4927_v55, %v12446_v25 }
 0x229   : > { %12803 = vrot.lane.b32.xlu0 %v16928_v9, %s14811_s26  ;;  %v21565_v9 = vpack.i.bf16 %v16850_v30, %v16830_v28  ;;  %v4928_v30 = vsel %vm4909_vm10, %v4876_v50, %v12440_v61  ;;  %v21566_v13 = vpack.i.bf16 %v16919_v20, %v16852_v24  ;;  %v12456_v40 = vunpack.i.h.bf16 %v16854_v22 }
 0x22a   : > { %v12519_v14 = vpop.permute.xlu1 %12518  ;;  %v4980_v44 = vsel %vm4961_vm11, %v4928_v30, %v12455_v26  ;;  %v5030_v48 = vsel %vm5013_vm12, %v4978_v59, %v12460_v38  ;;  %v5031_v8 = vsel %vm5013_vm12, %v4979_v56, %v12461_v43  ;;  %v12476_v36 = vunpack.i.h.bf16 %v16887_v52 }
 0x22b   : > { %v17027_v58 = vpop.permute.xlu0 %12523  ;;  %v12521_v18 = vunpack.i.h.bf16 %v12519_v14  ;;  %v12520_v23 = vunpack.i.l.bf16 %v12519_v14  ;;  %v12475_v10 = vunpack.i.l.bf16 %v16887_v52  ;;  %v5082_v14 = vsel %vm5065_vm13, %v5030_v48, %v12480_v2 }
 0x22c   : > { %12808 = vrot.lane.b32.xlu1 %v21565_v9, %s21437_s27  ;;  %v5083_v19 = vsel %vm5065_vm13, %v5031_v8, %v12481_v0  ;;  %v21567_v24 = vpack.i.bf16 %v16880_v54, %v16857_v35  ;;  %v5134_v60 = vsel %vm5117_vm14, %v5082_v14, %v12500_v46  ;;  %v12496_v50 = vunpack.i.h.bf16 %v16953_v49  ;;  %v17122_v8 = vld [vmem:[#allocation2 + $0x191] sm:$0xff] }
 0x22d   : > { %12813 = vrot.lane.b32.xlu0 %v16941_v7, %s14819_s22  ;;  %v5135_v15 = vsel %vm5117_vm14, %v5083_v19, %v12501_v41  ;;  %v12495_v52 = vunpack.i.l.bf16 %v16953_v49  ;;  %v5186_v25 = vsel %vm5169_vm15, %v5134_v60, %v12520_v23  ;;  %v21568_v35 = vpack.i.bf16 %v16930_v51, %v16882_v63  ;;  %v1209_v49 = vld [vmem:[#allocation2 + $0x18b] sm:$0xff]  ;;  %v17132_v19 = vld [vmem:[#allocation2 + $0x1a1] sm:$0xff] }
 0x22e   : > { %v17043_v28 = vpop.permute.xlu1 %12528  ;;  %v5187_v5 = vsel %vm5169_vm15, %v5135_v15, %v12521_v18  ;;  %v12516_v54 = vunpack.i.h.bf16 %v17005_v12  ;;  %v12515_v11 = vunpack.i.l.bf16 %v17005_v12  ;;  %v4981_v38 = vsel %vm4961_vm11, %v4929_v3, %v12456_v40  ;;  %v17092_v41 = vld [vmem:[#allocation2 + $0x190] sm:$0xff] }
 0x22f   : > { %v12534_v32 = vpop.permute.xlu0 %12533  ;;  %v21569_v0 = vpack.i.bf16 %v16900_v6, %v16891_v1  ;;  %v5032_v30 = vsel %vm5013_vm12, %v4980_v44, %v12475_v10  ;;  %v5033_v12 = vsel %vm5013_vm12, %v4981_v38, %v12476_v36  ;;  %v17102_v1 = vpack.i.bf16 %v1209_v49, %v16908_v31  ;;  %v17145_v60 = vld [vmem:[#allocation2 + $0x192] sm:$0xff] }
 0x230   : > { %12818 = vrot.lane.b32.xlu1 %v21566_v13, %s21437_s27  ;;  %v12536_v62 = vunpack.i.h.bf16 %v12534_v32  ;;  %v12535_v55 = vunpack.i.l.bf16 %v12534_v32  ;;  %v5084_v46 = vsel %vm5065_vm13, %v5032_v30, %v12495_v52  ;;  %v5085_v3 = vsel %vm5065_vm13, %v5033_v12, %v12496_v50  ;;  %v17106_v32 = vld [vmem:[#allocation2 + $0x1a0] sm:$0xff]  ;;  %v17108_v13 = vld [vmem:[#allocation2 + $0x1a8] sm:$0xff] }
 0x231   : > { %12823 = vrot.lane.b32.xlu0 %v21567_v24, %s14813_s28  ;;  %v5136_v6 = vsel %vm5117_vm14, %v5084_v46, %v12515_v11  ;;  %v5137_v56 = vsel %vm5117_vm14, %v5085_v3, %v12516_v54  ;;  %v17118_v31 = vpack.i.bf16 %v17092_v41, %v16919_v20  ;;  %v17130_v14 = vpack.i.bf16 %v17108_v13, %v17106_v32  ;;  %v17134_v20 = vld [vmem:[#allocation2 + $0x1a9] sm:$0xff]  ;;  %v637_v3 = vld [vmem:[#allocation2 + $0xe0] sm:$0xff] }
 0x232   : > { %v12539_v22 = vpop.permute.xlu1 %12538  ;;  %v5188_v40 = vsel %vm5169_vm15, %v5136_v6, %v12535_v55  ;;  %v5189_v4 = vsel %vm5169_vm15, %v5137_v56, %v12536_v62  ;;  %v17157_v50 = vld [vmem:[#allocation2 + $0x1aa] sm:$0xff]  ;;  %v17165_v52 = vpack.i.bf16 %v17145_v60, %v16943_v33  ;;  %v21576_v56 = vld [vmem:[#allocation36_spill] sm:$0xff] }
 0x233   : > { %v12541_v61 = vunpack.i.h.bf16 %v12539_v22  ;;  %v12540_v29 = vunpack.i.l.bf16 %v12539_v22  ;;  %v17073_v9 = vpop.permute.xlu0 %12543  ;;  %v17143_v22 = vpack.i.bf16 %v17122_v8, %v16930_v51  ;;  %v17177_v54 = vld [vmem:[#allocation2 + $0x1a3] sm:$0xff]  ;;  %v17179_v11 = vld [vmem:[#allocation2 + $0x1ab] sm:$0xff] }
 0x234   : > { %12828 = vrot.lane.b32.xlu1 %v21568_v35, %s14813_s28  ;;  %v17194_v38 = vpack.i.bf16 %v17179_v11, %v17177_v54  ;;  %v21574_v55 = vld [vmem:[#allocation13_spill] sm:$0xff]  ;;  %v636_v46 = vld [vmem:[#allocation2 + $0xd0] sm:$0xff] }
 0x235   : > { %v5238_v26 = vsel %vm5221_vm1, %v5186_v25, %v12540_v29  ;;  %v5239_v43 = vsel %vm5221_vm1, %v5187_v5, %v12541_v61  ;;  %12833 = vrot.lane.b32.xlu0 %v21569_v0, %s21439_s15  ;;  %v17153_v61 = vpack.i.bf16 %v17134_v20, %v17132_v19  ;;  %v17155_v29 = vld [vmem:[#allocation2 + $0x1a2] sm:$0xff]  ;;  %v17167_v25 = vld [vmem:[#allocation2 + $0x193] sm:$0xff]  ;;  %v11651_v0 = vunpack.i.h.bf16 %v21574_v55 }
 0x236   : > { %v17088_v63 = vpop.permute.xlu1 %12548  ;;  %v5281_v2 = vpack.c.bf16 %v5239_v43, %v5238_v26  ;;  %v17175_v35 = vpack.i.bf16 %v17157_v50, %v17155_v29  ;;  %v17186_v26 = vpack.i.bf16 %v17167_v25, %v1209_v49  ;;  %21572 = vst [vmem:[#allocation57_spill] sm:$0xff] %v17194_v38  ;;  %v21575_v49 = vld [vmem:[#allocation14_spill] sm:$0xff] }
 0x237   : > { %v12554_v59 = vpop.permute.xlu0 %12553  ;;  %v11656_v30 = vunpack.i.h.bf16 %v21575_v49  ;;  %v11655_v6 = vunpack.i.l.bf16 %v21575_v49 }
 0x238   : > { %12838 = vrot.lane.b32.xlu1 %v12837_v37, %s21439_s15  ;;  %11477 = vmatprep.mubr.msk.bf16.mxu0 %vm5331_vm5, %v5281_v2  ;;  %v12556_v18 = vunpack.i.h.bf16 %v12554_v59  ;;  %v12555_v23 = vunpack.i.l.bf16 %v12554_v59  ;;  %v11650_v2 = vunpack.i.l.bf16 %v21574_v55  ;;  %v639_v59 = vld [vmem:[#allocation2 + $0xf0] sm:$0xff]  ;;  %v4515_v55 = vsel %vm469_vm0, %v637_v3, %v11651_v0 }
 0x239   : > { %12843 = vrot.lane.b32.xlu0 %v16964_v57, %s14815_s16  ;;  %v4517_v49 = vsel %vm469_vm0, %v639_v59, %v11656_v30  ;;  %v17229_v0 = vld [vmem:[#allocation2 + $0x1b1] sm:$0xff]  ;;  %v12466_v59 = vunpack.i.h.bf16 %v16866_v34 }
 0x23a   : > { %v17114_v37 = vpop.permute.xlu1 %12558  ;;  %v5240_v44 = vsel %vm5221_vm1, %v5188_v40, %v12555_v23  ;;  %v5241_v48 = vsel %vm5221_vm1, %v5189_v4, %v12556_v18  ;;  %v11776_v18 = vunpack.i.h.bf16 %v21576_v56  ;;  %v11775_v23 = vunpack.i.l.bf16 %v21576_v56  ;;  %v638_v40 = vld [vmem:[#allocation2 + $0xe8] sm:$0xff]  ;;  %v17223_v56 = vld [vmem:[#allocation2 + $0x1b0] sm:$0xff] }
 0x23b   : > { %v17124_v36 = vpop.permute.xlu0 %12563  ;;  %v5282_v10 = vpack.c.bf16 %v5241_v48, %v5240_v44  ;;  %v21577_v4 = vld [vmem:[#allocation37_spill] sm:$0xff] }
 0x23c   : > { %12848 = vrot.lane.b32.xlu1 %v17102_v1, %s14815_s16  ;;  %v11781_v44 = vunpack.i.h.bf16 %v21577_v4  ;;  %v11780_v48 = vunpack.i.l.bf16 %v21577_v4  ;;  %v4516_v4 = vsel %vm469_vm0, %v638_v40, %v11655_v6  ;;  %v12470_v6 = vunpack.i.l.bf16 %v16874_v27 }
 0x23d   : > { %12853 = vrot.lane.b32.xlu0 %v17118_v31, %s21431_s17  ;;  %11478 = vmatmul.mubr.msk.bf16.gmra.mxu0 %vm5331_vm5, %v5282_v10  ;;  %v12485_v40 = vunpack.i.l.bf16 %v16913_v16 }
 0x23e   : > { %v17138_v24 = vpop.permute.xlu1 %12568  ;;  %v4569_v30 = vsel %vm4545_vm2, %v4517_v49, %v11781_v44  ;;  %v12505_v49 = vunpack.i.l.bf16 %v16981_v47 }
 0x23f   : > { %v17147_v15 = vpop.permute.xlu0 %12573 }
 0x240   : > { %12858 = vrot.lane.b32.xlu1 %v17130_v14, %s21431_s17 }
 0x241   : > { %12863 = vrot.lane.b32.xlu0 %v17143_v22, %s14817_s21 }
 0x242   : > { %v17161_v51 = vpop.permute.xlu1 %12578 }
 0x243   : > { %21570 = vst [vmem:[#allocation53_spill] sm:$0xff] %v17161_v51  ;;  %v17169_v5 = vpop.permute.xlu0 %12583  ;;  %v12451_v51 = vunpack.i.h.bf16 %v16848_v45 }
 0x244   : > { %12868 = vrot.lane.b32.xlu1 %v17153_v61, %s14817_s21 }
 0x245   : > { %12873 = vrot.lane.b32.xlu0 %v17165_v52, %s21429_s23 }
 0x246   : > { %v17183_v33 = vpop.permute.xlu1 %12588 }
 0x247   : > { %v17188_v43 = vpop.permute.xlu0 %12593 }
 0x248   : > { %21571 = vst [vmem:[#allocation56_spill] sm:$0xff] %v17188_v43  ;;  %12878 = vrot.lane.b32.xlu1 %v17175_v35, %s21429_s23 }
 0x249   : > { %12883 = vrot.lane.b32.xlu0 %v17186_v26, %s14819_s22 }
 0x24a   : > { %v17198_v62 = vpop.permute.xlu1 %12598 }
 0x24b   : > { %21573 = vst [vmem:[#allocation58_spill] sm:$0xff] %v17198_v62  ;;  %v17203_v12 = vpop.permute.xlu0 %12603 }
 0x24c   : > { %12888 = vrot.lane.b32.xlu1 %v17194_v38, %s14819_s22  ;;  %v4514_v38 = vsel %vm469_vm0, %v636_v46, %v11650_v2  ;;  %v4568_v2 = vsel %vm4545_vm2, %v4516_v4, %v11780_v48  ;;  %v12450_v46 = vunpack.i.l.bf16 %v16848_v45  ;;  %v12471_v45 = vunpack.i.h.bf16 %v16874_v27 }
 0x24d   : > { %12893 = vrot.lane.b32.xlu0 %v16838_v17, %s21522_s18  ;;  %v4566_v43 = vsel %vm4545_vm2, %v4514_v38, %v11775_v23  ;;  %v4567_v17 = vsel %vm4545_vm2, %v4515_v55, %v11776_v18  ;;  %v17239_v38 = vld [vmem:[#allocation2 + $0x1b2] sm:$0xff]  ;;  %v12942_v18 = vpack.i.bf16 %v17106_v32, %v17092_v41  ;;  %v12486_v55 = vunpack.i.h.bf16 %v16913_v16 }
 0x24e   : > { %v17214_v10 = vpop.permute.xlu1 %12608  ;;  %v4619_v48 = vsel %vm4597_vm6, %v4567_v17, %v12451_v51  ;;  %v4618_v4 = vsel %vm4597_vm6, %v4566_v43, %v12450_v46  ;;  %v12491_v23 = vunpack.i.h.bf16 %v16936_v42  ;;  %v4621_v16 = vsel %vm4597_vm6, %v4569_v30, %v12466_v59 }
 0x24f   : > { %v17219_v62 = vpop.permute.xlu0 %12613  ;;  %v4670_v17 = vsel %vm4649_vm3, %v4618_v4, %v12470_v6  ;;  %v12506_v27 = vunpack.i.h.bf16 %v16981_v47  ;;  %v4671_v43 = vsel %vm4649_vm3, %v4619_v48, %v12471_v45  ;;  %v12511_v46 = vunpack.i.h.bf16 %v16995_v53 }
 0x250   : > { %12898 = vrot.lane.b32.xlu1 %v16964_v57, %s21522_s18  ;;  %v12465_v57 = vunpack.i.l.bf16 %v16866_v34  ;;  %v21578_v34 = vld [vmem:[#allocation52_spill] sm:$0xff]  ;;  %v4673_v30 = vsel %vm4649_vm3, %v4621_v16, %v12486_v55  ;;  %v12526_v59 = vunpack.i.h.bf16 %v17027_v58  ;;  %v12525_v47 = vunpack.i.l.bf16 %v17027_v58 }
 0x251   : > { %12903 = vrot.lane.b32.xlu0 %v16864_v21, %s21506_s20  ;;  %v12490_v21 = vunpack.i.l.bf16 %v16936_v42  ;;  %v12510_v42 = vunpack.i.l.bf16 %v16995_v53  ;;  %v12530_v6 = vunpack.i.l.bf16 %v17043_v28  ;;  %v12531_v53 = vunpack.i.h.bf16 %v17043_v28 }
 0x252   : > { %v17237_v3 = vpop.permute.xlu1 %12618  ;;  %v4725_v55 = vsel %vm4701_vm7, %v4673_v30, %v12506_v27  ;;  %v12546_v58 = vunpack.i.h.bf16 %v17073_v9  ;;  %v12550_v4 = vunpack.i.l.bf16 %v17088_v63  ;;  %v12551_v16 = vunpack.i.h.bf16 %v17088_v63 }
 0x253   : > { %v17249_v44 = vpop.permute.xlu0 %12623  ;;  %v4722_v45 = vsel %vm4701_vm7, %v4670_v17, %v12490_v21  ;;  %v581_v21 = vld [vmem:[%s15139_s19 + $0xf0] sm:$0xff]  ;;  %v4777_v27 = vsel %vm4753_vm8, %v4725_v55, %v12526_v59  ;;  %v21579_v41 = vpack.i.bf16 %v17223_v56, %v17108_v13  ;;  %v12586_v32 = vunpack.i.h.bf16 %v17169_v5 }
 0x254   : > { %12908 = vrot.lane.b32.xlu1 %v17118_v31, %s21506_s20  ;;  %v4620_v31 = vsel %vm4597_vm6, %v4568_v2, %v12465_v57  ;;  %614 = vst.msk [vmem:[#allocation2 + $0x222] sm:$0xff] %vm469_vm0, %v581_v21  ;;  %v4829_v30 = vsel %vm4805_vm9, %v4777_v27, %v12546_v58  ;;  %v21580_v13 = vpack.i.bf16 %v17132_v19, %v17122_v8 }
 0x255   : > { %12913 = vrot.lane.b32.xlu0 %v21578_v34, %s14809_s24  ;;  %v4672_v2 = vsel %vm4649_vm3, %v4620_v31, %v12485_v40  ;;  %v4723_v40 = vsel %vm4701_vm7, %v4671_v43, %v12491_v23  ;;  %v12545_v34 = vunpack.i.l.bf16 %v17073_v9  ;;  %v582_v31 = vld [vmem:[%s15139_s19 + $0xf8] sm:$0xff]  ;;  %v4774_v23 = vsel %vm4753_vm8, %v4722_v45, %v12510_v42  ;;  %s21653_s19 = smov 32  }
 0x256   : > { %v17269_v51 = vpop.permute.xlu1 %12628  ;;  %v4724_v48 = vsel %vm4701_vm7, %v4672_v2, %v12505_v49  ;;  %v4775_v28 = vsel %vm4753_vm8, %v4723_v40, %v12511_v46  ;;  %615 = vst.msk [vmem:[#allocation2 + $0x22a] sm:$0xff] %vm469_vm0, %v582_v31  ;;  %v4826_v49 = vsel %vm4805_vm9, %v4774_v23, %v12530_v6  ;;  %v12561_v43 = vunpack.i.h.bf16 %v17114_v37 }
 0x257   : > { %v17279_v57 = vpop.permute.xlu0 %12633  ;;  %v4776_v9 = vsel %vm4753_vm8, %v4724_v48, %v12525_v47  ;;  %v4827_v63 = vsel %vm4805_vm9, %v4775_v28, %v12531_v53  ;;  %v12566_v46 = vunpack.i.h.bf16 %v17124_v36  ;;  %v4878_v59 = vsel %vm4857_vm4, %v4826_v49, %v12550_v4 }
 0x258   : > { %12918 = vrot.lane.b32.xlu1 %v17143_v22, %s14809_s24  ;;  %v4828_v2 = vsel %vm4805_vm9, %v4776_v9, %v12545_v34  ;;  %v12571_v47 = vunpack.i.h.bf16 %v17138_v24  ;;  %v4879_v6 = vsel %vm4857_vm4, %v4827_v63, %v12551_v16  ;;  %v12576_v40 = vunpack.i.h.bf16 %v17147_v15 }
 0x259   : > { %12923 = vrot.lane.b32.xlu0 %v16925_v39, %s21435_s25  ;;  %v12560_v39 = vunpack.i.l.bf16 %v17114_v37  ;;  %v12570_v37 = vunpack.i.l.bf16 %v17138_v24  ;;  %v12585_v34 = vunpack.i.l.bf16 %v17169_v5  ;;  %v12591_v48 = vunpack.i.h.bf16 %v17183_v33 }
 0x25a   : > { %v17293_v22 = vpop.permute.xlu1 %12638  ;;  %v12590_v24 = vunpack.i.l.bf16 %v17183_v33  ;;  %v4931_v58 = vsel %vm4909_vm10, %v4879_v6, %v12566_v46  ;;  %v12611_v4 = vunpack.i.h.bf16 %v17214_v10  ;;  %v12631_v33 = vunpack.i.h.bf16 %v17269_v51 }
 0x25b   : > { %v17305_v17 = vpop.permute.xlu0 %12643  ;;  %v4880_v45 = vsel %vm4857_vm4, %v4828_v2, %v12560_v39  ;;  %v12630_v23 = vunpack.i.l.bf16 %v17269_v51  ;;  %v4983_v16 = vsel %vm4961_vm11, %v4931_v58, %v12576_v40  ;;  %v12606_v49 = vunpack.i.h.bf16 %v17203_v12 }
 0x25c   : > { %12928 = vrot.lane.b32.xlu1 %v17165_v52, %s21435_s25  ;;  %v12565_v52 = vunpack.i.l.bf16 %v17124_v36  ;;  %v12575_v36 = vunpack.i.l.bf16 %v17147_v15  ;;  %v12610_v15 = vunpack.i.l.bf16 %v17214_v10  ;;  %v4932_v21 = vsel %vm4909_vm10, %v4880_v45, %v12570_v37 }
 0x25d   : > { %12933 = vrot.lane.b32.xlu0 %v16941_v7, %s14811_s26  ;;  %v4881_v7 = vsel %vm4857_vm4, %v4829_v30, %v12561_v43  ;;  %v5035_v51 = vsel %vm5013_vm12, %v4983_v16, %v12591_v48  ;;  %v12605_v43 = vunpack.i.l.bf16 %v17203_v12  ;;  %v12625_v12 = vunpack.i.l.bf16 %v17249_v44 }
 0x25e   : > { %v12649_v42 = vpop.permute.xlu1 %12648  ;;  %v4930_v55 = vsel %vm4909_vm10, %v4878_v59, %v12565_v52  ;;  %v4933_v31 = vsel %vm4909_vm10, %v4881_v7, %v12571_v47  ;;  %v5087_v2 = vsel %vm5065_vm13, %v5035_v51, %v12611_v4  ;;  %v12626_v59 = vunpack.i.h.bf16 %v17249_v44 }
 0x25f   : > { %v17329_v53 = vpop.permute.xlu0 %12653  ;;  %v4982_v28 = vsel %vm4961_vm11, %v4930_v55, %v12575_v36  ;;  %v12651_v10 = vunpack.i.h.bf16 %v12649_v42  ;;  %v12650_v39 = vunpack.i.l.bf16 %v12649_v42  ;;  %v5139_v52 = vsel %vm5117_vm14, %v5087_v2, %v12631_v33 }
 0x260   : > { %12938 = vrot.lane.b32.xlu1 %v17186_v26, %s14811_s26  ;;  %v5034_v27 = vsel %vm5013_vm12, %v4982_v28, %v12590_v24  ;;  %v21581_v8 = vpack.i.bf16 %v17229_v0, %v17134_v20  ;;  %v12646_v19 = vunpack.i.h.bf16 %v17305_v17  ;;  %v12645_v45 = vunpack.i.l.bf16 %v17305_v17 }
 0x261   : > { %12943 = vrot.lane.b32.xlu0 %v12942_v18, %s21437_s27  ;;  %v4984_v18 = vsel %vm4961_vm11, %v4932_v21, %v12585_v34  ;;  %v5086_v63 = vsel %vm5065_vm13, %v5034_v27, %v12610_v15  ;;  %v5191_v37 = vsel %vm5169_vm15, %v5139_v52, %v12651_v10  ;;  %v4985_v44 = vsel %vm4961_vm11, %v4933_v31, %v12586_v32  ;;  %v640_v52 = vld [vmem:[#allocation2 + $0x100] sm:$0xff] }
 0x262   : > { %v17345_v26 = vpop.permute.xlu1 %12658  ;;  %v5138_v46 = vsel %vm5117_vm14, %v5086_v63, %v12630_v23  ;;  %v21582_v48 = vpack.i.bf16 %v17155_v29, %v17145_v60  ;;  %v5036_v55 = vsel %vm5013_vm12, %v4984_v18, %v12605_v43  ;;  %v5037_v17 = vsel %vm5013_vm12, %v4985_v44, %v12606_v49  ;;  %v17438_v49 = vld [vmem:[#allocation2 + $0x1c8] sm:$0xff]  ;;  %v17440_v43 = vld [vmem:[#allocation2 + $0x1d0] sm:$0xff] }
 0x263   : > { %v12664_v9 = vpop.permute.xlu0 %12663  ;;  %v5190_v47 = vsel %vm5169_vm15, %v5138_v46, %v12650_v39  ;;  %v5088_v58 = vsel %vm5065_vm13, %v5036_v55, %v12625_v12  ;;  %v5089_v4 = vsel %vm5065_vm13, %v5037_v17, %v12626_v59  ;;  %v12977_v60 = vpack.i.bf16 %v17177_v54, %v17167_v25  ;;  %v17413_v54 = vld [vmem:[#allocation2 + $0x1b3] sm:$0xff]  ;;  %v21586_v12 = vld [vmem:[#allocation16_spill] sm:$0xff] }
 0x264   : > { %12948 = vrot.lane.b32.xlu1 %v21579_v41, %s21437_s27  ;;  %v12666_v7 = vunpack.i.h.bf16 %v12664_v9  ;;  %v12665_v34 = vunpack.i.l.bf16 %v12664_v9  ;;  %v5140_v29 = vsel %vm5117_vm14, %v5088_v58, %v12645_v45  ;;  %v5141_v21 = vsel %vm5117_vm14, %v5089_v4, %v12646_v19  ;;  %v17418_v41 = vld [vmem:[#allocation2 + $0x1c0] sm:$0xff]  ;;  %v642_v59 = vld [vmem:[#allocation2 + $0x110] sm:$0xff]  ;;  %v21587_v19 = vld [vmem:[#allocation17_spill] sm:$0xff] }
 0x265   : > { %12953 = vrot.lane.b32.xlu0 %v21580_v13, %s14813_s28  ;;  %v21583_v16 = vpack.i.bf16 %v17239_v38, %v17157_v50  ;;  %v17426_v50 = vpack.i.bf16 %v17413_v54, %v17179_v11  ;;  %v12997_v27 = vpack.i.bf16 %v17418_v41, %v17223_v56  ;;  %v17445_v11 = vld [vmem:[#allocation2 + $0x1c1] sm:$0xff]  ;;  %v17452_v56 = vpack.i.bf16 %v17440_v43, %v17438_v49  ;;  %v21588_v44 = vld [vmem:[#allocation38_spill] sm:$0xff] }
 0x266   : > { %v12669_v5 = vpop.permute.xlu1 %12668  ;;  %v5192_v23 = vsel %vm5169_vm15, %v5140_v29, %v12665_v34  ;;  %v5193_v28 = vsel %vm5169_vm15, %v5141_v21, %v12666_v7  ;;  %v13017_v13 = vpack.i.bf16 %v17445_v11, %v17229_v0  ;;  %v11671_v45 = vunpack.i.h.bf16 %v21587_v19  ;;  %v17469_v0 = vld [vmem:[#allocation2 + $0x1c9] sm:$0xff] }
 0x267   : > { %v12671_v42 = vunpack.i.h.bf16 %v12669_v5  ;;  %v12670_v30 = vunpack.i.l.bf16 %v12669_v5  ;;  %v17375_v6 = vpop.permute.xlu0 %12673  ;;  %21584 = vst [vmem:[#allocation7_spill] sm:$0xff] %v17452_v56  ;;  %v21585_v5 = vld [vmem:[#allocation15_spill] sm:$0xff]  ;;  %v11786_v7 = vunpack.i.h.bf16 %v21588_v44  ;;  %v11785_v34 = vunpack.i.l.bf16 %v21588_v44  ;;  %v17481_v4 = vld [vmem:[#allocation2 + $0x1c2] sm:$0xff] }
 0x268   : > { %12958 = vrot.lane.b32.xlu1 %v21581_v8, %s14813_s28  ;;  %v11661_v46 = vunpack.i.h.bf16 %v21585_v5 }
 0x269   : > { %v5242_v40 = vsel %vm5221_vm1, %v5190_v47, %v12670_v30  ;;  %v5243_v36 = vsel %vm5221_vm1, %v5191_v37, %v12671_v42  ;;  %12963 = vrot.lane.b32.xlu0 %v21582_v48, %s21439_s15  ;;  %v641_v42 = vld [vmem:[#allocation2 + $0x108] sm:$0xff]  ;;  %v11660_v30 = vunpack.i.l.bf16 %v21585_v5  ;;  %v11666_v47 = vunpack.i.h.bf16 %v21586_v12  ;;  %v21589_v48 = vld [vmem:[#allocation39_spill] sm:$0xff] }
 0x26a   : > { %v17390_v24 = vpop.permute.xlu1 %12678  ;;  %v5283_v20 = vpack.c.bf16 %v5243_v36, %v5242_v40  ;;  %v11665_v37 = vunpack.i.l.bf16 %v21586_v12  ;;  %v17471_v40 = vld [vmem:[#allocation2 + $0x1d1] sm:$0xff]  ;;  %v4519_v17 = vsel %vm469_vm0, %v641_v42, %v11661_v46  ;;  %v11791_v58 = vunpack.i.h.bf16 %v21589_v48  ;;  %v17518_v12 = vld [vmem:[#allocation2 + $0x1e0] sm:$0xff] }
 0x26b   : > { %v12684_v15 = vpop.permute.xlu0 %12683  ;;  %v645_v36 = vld [vmem:[#allocation2 + $0x130] sm:$0xff]  ;;  %v4571_v5 = vsel %vm4545_vm2, %v4519_v17, %v11786_v7  ;;  %v13037_v42 = vpack.i.bf16 %v17481_v4, %v17239_v38  ;;  %v21595_v7 = vld [vmem:[#allocation56_spill] sm:$0xff] }
 0x26c   : > { %12968 = vrot.lane.b32.xlu1 %v17102_v1, %s21522_s18  ;;  %11481 = vmatprep.mubr.msk.bf16.mxu0 %vm5331_vm5, %v5283_v20  ;;  %v12686_v31 = vunpack.i.h.bf16 %v12684_v15  ;;  %v12685_v33 = vunpack.i.l.bf16 %v12684_v15  ;;  %v11790_v20 = vunpack.i.l.bf16 %v21589_v48  ;;  %v4518_v15 = vsel %vm469_vm0, %v640_v52, %v11660_v30  ;;  %v17514_v30 = vld [vmem:[#allocation2 + $0x1cb] sm:$0xff] }
 0x26d   : > { %12973 = vrot.lane.b32.xlu0 %v21583_v16, %s21439_s15  ;;  %v4520_v29 = vsel %vm469_vm0, %v642_v59, %v11665_v37  ;;  %v17516_v59 = vld [vmem:[#allocation2 + $0x1d3] sm:$0xff]  ;;  %v21593_v37 = vld [vmem:[#allocation40_spill] sm:$0xff] }
 0x26e   : > { %v17409_v1 = vpop.permute.xlu1 %12688  ;;  %v5244_v10 = vsel %vm5221_vm1, %v5192_v23, %v12685_v33  ;;  %v5245_v25 = vsel %vm5221_vm1, %v5193_v28, %v12686_v31  ;;  %v17491_v31 = vpack.i.bf16 %v17471_v40, %v17469_v0  ;;  %v17493_v33 = vld [vmem:[#allocation2 + $0x1ca] sm:$0xff]  ;;  %v17495_v23 = vld [vmem:[#allocation2 + $0x1d2] sm:$0xff]  ;;  %v17498_v28 = vsel %vm469_vm0, %v645_v36, %v11671_v45 }
 0x26f   : > { %v17415_v39 = vpop.permute.xlu0 %12693  ;;  %v5284_v9 = vpack.c.bf16 %v5245_v25, %v5244_v10  ;;  %v21591_v10 = vld [vmem:[#allocation18_spill] sm:$0xff]  ;;  %v4572_v46 = vsel %vm4545_vm2, %v4520_v29, %v11790_v20  ;;  %v21594_v45 = vld [vmem:[#allocation53_spill] sm:$0xff]  ;;  %v17525_v44 = vpack.i.bf16 %v17495_v23, %v17493_v33 }
 0x270   : > { %12978 = vrot.lane.b32.xlu1 %v12977_v60, %s14815_s16  ;;  %21590 = vst [vmem:[#allocation8_spill] sm:$0xff] %v17491_v31  ;;  %v12581_v36 = vunpack.i.h.bf16 %v21594_v45  ;;  %v12580_v38 = vunpack.i.l.bf16 %v21594_v45  ;;  %v17545_v45 = vpack.i.bf16 %v17516_v59, %v17514_v30 }
 0x271   : > { %12983 = vrot.lane.b32.xlu0 %v12977_v60, %s21522_s18  ;;  %11482 = vmatmul.mubr.msk.bf16.gmra.mxu0 %vm5331_vm5, %v5284_v9 }
 0x272   : > { %v17421_v32 = vpop.permute.xlu1 %12698  ;;  %v4623_v17 = vsel %vm4597_vm6, %v4571_v5, %v12581_v36  ;;  %v12636_v36 = vunpack.i.h.bf16 %v17279_v57 }
 0x273   : > { %v17428_v18 = vpop.permute.xlu0 %12703 }
 0x274   : > { %12988 = vrot.lane.b32.xlu1 %v17130_v14, %s21506_s20 }
 0x275   : > { %12993 = vrot.lane.b32.xlu0 %v17426_v50, %s14815_s16 }
 0x276   : > { %v17436_v51 = vpop.permute.xlu1 %12708 }
 0x277   : > { %v17442_v63 = vpop.permute.xlu0 %12713 }
 0x278   : > { %12998 = vrot.lane.b32.xlu1 %v12997_v27, %s21431_s17 }
 0x279   : > { %13003 = vrot.lane.b32.xlu0 %v12997_v27, %s21506_s20  ;;  %v17503_v27 = vld [vmem:[#allocation2 + $0x1c3] sm:$0xff] }
 0x27a   : > { %v17448_v14 = vpop.permute.xlu1 %12718  ;;  %v13057_v20 = vpack.i.bf16 %v17503_v27, %v17413_v54  ;;  %v12615_v54 = vunpack.i.l.bf16 %v17219_v62 }
 0x27b   : > { %v17454_v2 = vpop.permute.xlu0 %12723 }
 0x27c   : > { %13008 = vrot.lane.b32.xlu1 %v17153_v61, %s14809_s24  ;;  %v643_v61 = vld [vmem:[#allocation2 + $0x120] sm:$0xff] }
 0x27d   : > { %13013 = vrot.lane.b32.xlu0 %v17452_v56, %s21431_s17  ;;  %v4521_v60 = vsel %vm469_vm0, %v643_v61, %v11666_v47  ;;  %v13092_v61 = vpack.i.bf16 %v17493_v33, %v17481_v4 }
 0x27e   : > { %v17466_v8 = vpop.permute.xlu1 %12728  ;;  %v4573_v47 = vsel %vm4545_vm2, %v4521_v60, %v11791_v58  ;;  %v17539_v58 = vld [vmem:[#allocation2 + $0x1e2] sm:$0xff]  ;;  %v21597_v60 = vld [vmem:[#allocation58_spill] sm:$0xff] }
 0x27f   : > { %v17476_v55 = vpop.permute.xlu0 %12733  ;;  %v12600_v29 = vunpack.i.l.bf16 %v21597_v60  ;;  %v12601_v9 = vunpack.i.h.bf16 %v21597_v60  ;;  %v12635_v60 = vunpack.i.l.bf16 %v17279_v57  ;;  %v12660_v57 = vunpack.i.l.bf16 %v17345_v26 }
 0x280   : > { %13018 = vrot.lane.b32.xlu1 %v13017_v13, %s14817_s21 }
 0x281   : > { %13023 = vrot.lane.b32.xlu0 %v13017_v13, %s14809_s24  ;;  %v4570_v13 = vsel %vm4545_vm2, %v4518_v15, %v11785_v34  ;;  %v12595_v34 = vunpack.i.l.bf16 %v21595_v7  ;;  %v12596_v15 = vunpack.i.h.bf16 %v21595_v7  ;;  %v12620_v7 = vunpack.i.l.bf16 %v17237_v3 }
 0x282   : > { %v17487_v21 = vpop.permute.xlu1 %12738 }
 0x283   : > { %v17508_v52 = vpop.permute.xlu0 %12743  ;;  %v4624_v56 = vsel %vm4597_vm6, %v4572_v46, %v12595_v34 }
 0x284   : > { %21592 = vst [vmem:[#allocation30_spill] sm:$0xff] %v17508_v52  ;;  %13028 = vrot.lane.b32.xlu1 %v17175_v35, %s21435_s25  ;;  %v17527_v35 = vld [vmem:[#allocation2 + $0x1e1] sm:$0xff]  ;;  %v12621_v52 = vunpack.i.h.bf16 %v17237_v3  ;;  %v4676_v46 = vsel %vm4649_vm3, %v4624_v56, %v12615_v54  ;;  %v12640_v3 = vunpack.i.l.bf16 %v17293_v22 }
 0x285   : > { %13033 = vrot.lane.b32.xlu0 %v17491_v31, %s14817_s21  ;;  %v12616_v31 = vunpack.i.h.bf16 %v17219_v62  ;;  %v4625_v62 = vsel %vm4597_vm6, %v4573_v47, %v12596_v15  ;;  %v12655_v15 = vunpack.i.l.bf16 %v17329_v53 }
 0x286   : > { %v17533_v48 = vpop.permute.xlu1 %12748 }
 0x287   : > { %21596 = vst [vmem:[#allocation31_spill] sm:$0xff] %v17533_v48  ;;  %v17551_v25 = vpop.permute.xlu0 %12753  ;;  %v4622_v48 = vsel %vm4597_vm6, %v4570_v13, %v12580_v38  ;;  %v4675_v13 = vsel %vm4649_vm3, %v4623_v17, %v12601_v9  ;;  %v12641_v38 = vunpack.i.h.bf16 %v17293_v22  ;;  %v4677_v47 = vsel %vm4649_vm3, %v4625_v62, %v12616_v31 }
 0x288   : > { %13038 = vrot.lane.b32.xlu1 %v13037_v42, %s21429_s23  ;;  %v4674_v5 = vsel %vm4649_vm3, %v4622_v48, %v12600_v29  ;;  %v12656_v48 = vunpack.i.h.bf16 %v17329_v53  ;;  %v4727_v56 = vsel %vm4701_vm7, %v4675_v13, %v12621_v52  ;;  %v12661_v17 = vunpack.i.h.bf16 %v17345_v26 }
 0x289   : > { %13043 = vrot.lane.b32.xlu0 %v13037_v42, %s21435_s25  ;;  %v21598_v42 = vld [vmem:[#allocation57_spill] sm:$0xff]  ;;  %v4726_v9 = vsel %vm4701_vm7, %v4674_v5, %v12620_v7  ;;  %v12675_v22 = vunpack.i.l.bf16 %v17375_v6  ;;  %v4728_v31 = vsel %vm4701_vm7, %v4676_v46, %v12635_v60  ;;  %v4729_v54 = vsel %vm4701_vm7, %v4677_v47, %v12636_v36 }
 0x28a   : > { %v17569_v16 = vpop.permute.xlu1 %12758  ;;  %v12676_v53 = vunpack.i.h.bf16 %v17375_v6  ;;  %v12680_v62 = vunpack.i.l.bf16 %v17390_v24  ;;  %v4778_v7 = vsel %vm4753_vm8, %v4726_v9, %v12640_v3  ;;  %v4779_v52 = vsel %vm4753_vm8, %v4727_v56, %v12641_v38 }
 0x28b   : > { %v17579_v34 = vpop.permute.xlu0 %12763  ;;  %v12681_v26 = vunpack.i.h.bf16 %v17390_v24  ;;  %v12690_v5 = vunpack.i.l.bf16 %v17409_v1  ;;  %v4780_v60 = vsel %vm4753_vm8, %v4728_v31, %v12655_v15  ;;  %v4781_v36 = vsel %vm4753_vm8, %v4729_v54, %v12656_v48 }
 0x28c   : > { %13048 = vrot.lane.b32.xlu1 %v21598_v42, %s14811_s26  ;;  %v4830_v6 = vsel %vm4805_vm9, %v4778_v7, %v12660_v57  ;;  %v12691_v46 = vunpack.i.h.bf16 %v17409_v1  ;;  %v4831_v3 = vsel %vm4805_vm9, %v4779_v52, %v12661_v17  ;;  %v4832_v38 = vsel %vm4805_vm9, %v4780_v60, %v12675_v22 }
 0x28d   : > { %13053 = vrot.lane.b32.xlu0 %v17525_v44, %s21429_s23  ;;  %v12696_v24 = vunpack.i.h.bf16 %v17415_v39  ;;  %v12695_v42 = vunpack.i.l.bf16 %v17415_v39  ;;  %v4833_v9 = vsel %vm4805_vm9, %v4781_v36, %v12676_v53  ;;  %v4882_v15 = vsel %vm4857_vm4, %v4830_v6, %v12680_v62 }
 0x28e   : > { %v17593_v29 = vpop.permute.xlu1 %12768  ;;  %v12701_v48 = vunpack.i.h.bf16 %v17421_v32  ;;  %v12700_v57 = vunpack.i.l.bf16 %v17421_v32  ;;  %v4883_v1 = vsel %vm4857_vm4, %v4831_v3, %v12681_v26  ;;  %v4884_v56 = vsel %vm4857_vm4, %v4832_v38, %v12690_v5 }
 0x28f   : > { %v17603_v13 = vpop.permute.xlu0 %12773  ;;  %v12706_v17 = vunpack.i.h.bf16 %v17428_v18  ;;  %v12705_v22 = vunpack.i.l.bf16 %v17428_v18  ;;  %v4885_v31 = vsel %vm4857_vm4, %v4833_v9, %v12691_v46  ;;  %v12715_v54 = vunpack.i.l.bf16 %v17442_v63 }
 0x290   : > { %13058 = vrot.lane.b32.xlu1 %v13057_v20, %s14819_s22  ;;  %v12721_v32 = vunpack.i.h.bf16 %v17448_v14  ;;  %v12720_v53 = vunpack.i.l.bf16 %v17448_v14  ;;  %v4934_v62 = vsel %vm4909_vm10, %v4882_v15, %v12695_v42  ;;  %v4935_v7 = vsel %vm4909_vm10, %v4883_v1, %v12696_v24 }
 0x291   : > { %13063 = vrot.lane.b32.xlu0 %v13057_v20, %s14811_s26  ;;  %v21599_v20 = vpack.i.bf16 %v17438_v49, %v17418_v41  ;;  %v12741_v18 = vunpack.i.h.bf16 %v17487_v21  ;;  %v12740_v52 = vunpack.i.l.bf16 %v17487_v21  ;;  %v4936_v49 = vsel %vm4909_vm10, %v4884_v56, %v12700_v57 }
 0x292   : > { %v12779_v47 = vpop.permute.xlu1 %12778  ;;  %v4937_v26 = vsel %vm4909_vm10, %v4885_v31, %v12701_v48  ;;  %v12761_v5 = vunpack.i.h.bf16 %v17569_v16  ;;  %v12760_v14 = vunpack.i.l.bf16 %v17569_v16  ;;  %v4986_v60 = vsel %vm4961_vm11, %v4934_v62, %v12705_v22 }
 0x293   : > { %v17623_v39 = vpop.permute.xlu0 %12783  ;;  %v4987_v36 = vsel %vm4961_vm11, %v4935_v7, %v12706_v17  ;;  %v12781_v6 = vunpack.i.h.bf16 %v12779_v47  ;;  %v12780_v46 = vunpack.i.l.bf16 %v12779_v47  ;;  %v21600_v3 = vpack.i.bf16 %v17518_v12, %v17440_v43 }
 0x294   : > { %13068 = vrot.lane.b32.xlu1 %v21599_v20, %s21437_s27  ;;  %v12716_v38 = vunpack.i.h.bf16 %v17442_v63  ;;  %v4988_v24 = vsel %vm4961_vm11, %v4936_v49, %v12715_v54  ;;  %v5038_v42 = vsel %vm5013_vm12, %v4986_v60, %v12720_v53  ;;  %v5039_v16 = vsel %vm5013_vm12, %v4987_v36, %v12721_v32  ;;  %v644_v49 = vld [vmem:[#allocation2 + $0x128] sm:$0xff] }
 0x295   : > { %13073 = vrot.lane.b32.xlu0 %v17545_v45, %s14819_s22  ;;  %v12736_v9 = vunpack.i.h.bf16 %v17476_v55  ;;  %v12735_v15 = vunpack.i.l.bf16 %v17476_v55  ;;  %v5090_v47 = vsel %vm5065_vm13, %v5038_v42, %v12740_v52  ;;  %v5091_v48 = vsel %vm5065_vm13, %v5039_v16, %v12741_v18  ;;  %v17700_v16 = vld [vmem:[#allocation2 + $0x1e3] sm:$0xff] }
 0x296   : > { %v17639_v41 = vpop.permute.xlu1 %12788  ;;  %v21601_v43 = vpack.i.bf16 %v17469_v0, %v17445_v11  ;;  %v5142_v57 = vsel %vm5117_vm14, %v5090_v47, %v12760_v14  ;;  %v5143_v1 = vsel %vm5117_vm14, %v5091_v48, %v12761_v5  ;;  %v12756_v22 = vunpack.i.h.bf16 %v17551_v25  ;;  %v647_v5 = vld [vmem:[#allocation2 + $0x148] sm:$0xff] }
 0x297   : > { %v12794_v21 = vpop.permute.xlu0 %12793  ;;  %v12755_v55 = vunpack.i.l.bf16 %v17551_v25  ;;  %v5194_v20 = vsel %vm5169_vm15, %v5142_v57, %v12780_v46  ;;  %v5195_v31 = vsel %vm5169_vm15, %v5143_v1, %v12781_v6  ;;  %v21602_v11 = vpack.i.bf16 %v17527_v35, %v17471_v40  ;;  %v21603_v14 = vld [vmem:[#allocation41_spill] sm:$0xff]  ;;  %v646_v6 = vld [vmem:[#allocation2 + $0x140] sm:$0xff] }
 0x298   : > { %13078 = vrot.lane.b32.xlu1 %v21600_v3, %s21437_s27  ;;  %v12776_v0 = vunpack.i.h.bf16 %v17603_v13  ;;  %v12775_v32 = vunpack.i.l.bf16 %v17603_v13  ;;  %v4989_v25 = vsel %vm4961_vm11, %v4937_v26, %v12716_v38  ;;  %v12796_v7 = vunpack.i.h.bf16 %v12794_v21  ;;  %v17720_v57 = vld [vmem:[#allocation2 + $0x200] sm:$0xff] }
 0x299   : > { %13083 = vrot.lane.b32.xlu0 %v21601_v43, %s14813_s28  ;;  %v12795_v18 = vunpack.i.l.bf16 %v12794_v21  ;;  %v11795_v13 = vunpack.i.l.bf16 %v21593_v37  ;;  %v11801_v60 = vunpack.i.h.bf16 %v21603_v14  ;;  %v5040_v36 = vsel %vm5013_vm12, %v4988_v24, %v12735_v15 }
 0x29a   : > { %v12799_v63 = vpop.permute.xlu1 %12798  ;;  %v5041_v26 = vsel %vm5013_vm12, %v4989_v25, %v12736_v9  ;;  %v11800_v46 = vunpack.i.l.bf16 %v21603_v14  ;;  %v5092_v21 = vsel %vm5065_vm13, %v5040_v36, %v12755_v55  ;;  %v21604_v9 = vunpack.i.l.bf16 %v21587_v19  ;;  %v17718_v19 = vld [vmem:[#allocation2 + $0x1f0] sm:$0xff] }
 0x29b   : > { %v12801_v56 = vunpack.i.h.bf16 %v12799_v63  ;;  %v12800_v17 = vunpack.i.l.bf16 %v12799_v63  ;;  %v17669_v54 = vpop.permute.xlu0 %12803  ;;  %v5093_v4 = vsel %vm5065_vm13, %v5041_v26, %v12756_v22  ;;  %v5144_v3 = vsel %vm5117_vm14, %v5092_v21, %v12775_v32  ;;  %v17716_v63 = vld [vmem:[#allocation2 + $0x1e8] sm:$0xff]  ;;  %v21609_v26 = vld [vmem:[#allocation30_spill] sm:$0xff] }
 0x29c   : > { %13088 = vrot.lane.b32.xlu1 %v21602_v11, %s14813_s28  ;;  %v5145_v38 = vsel %vm5117_vm14, %v5093_v4, %v12776_v0  ;;  %v4522_v15 = vsel %vm469_vm0, %v644_v49, %v21604_v9  ;;  %v21605_v47 = vunpack.i.h.bf16 %v21591_v10  ;;  %v5196_v48 = vsel %vm5169_vm15, %v5144_v3, %v12795_v18  ;;  %v17755_v49 = vld [vmem:[#allocation2 + $0x202] sm:$0xff] }
 0x29d   : > { %v5246_v53 = vsel %vm5221_vm1, %v5194_v20, %v12800_v17  ;;  %v5247_v62 = vsel %vm5221_vm1, %v5195_v31, %v12801_v56  ;;  %13093 = vrot.lane.b32.xlu0 %v13092_v61, %s21439_s15  ;;  %v13107_v61 = vpack.i.bf16 %v17514_v30, %v17503_v27  ;;  %v5197_v27 = vsel %vm5169_vm15, %v5145_v38, %v12796_v7  ;;  %v17730_v20 = vld [vmem:[#allocation2 + $0x1f1] sm:$0xff]  ;;  %v17732_v31 = vld [vmem:[#allocation2 + $0x201] sm:$0xff] }
 0x29e   : > { %v17684_v52 = vpop.permute.xlu1 %12808  ;;  %v5285_v40 = vpack.c.bf16 %v5247_v62, %v5246_v53  ;;  %v21606_v30 = vpack.i.bf16 %v17539_v58, %v17495_v23  ;;  %v21607_v1 = vunpack.i.l.bf16 %v21591_v10  ;;  %v4574_v17 = vsel %vm4545_vm2, %v4522_v15, %v11795_v13  ;;  %v17728_v23 = vld [vmem:[#allocation2 + $0x1e9] sm:$0xff] }
 0x29f   : > { %v12814_v33 = vpop.permute.xlu0 %12813  ;;  %v21608_v11 = vunpack.i.h.bf16 %v21593_v37  ;;  %v12711_v25 = vunpack.i.h.bf16 %v17436_v51  ;;  %v12710_v7 = vunpack.i.l.bf16 %v17436_v51  ;;  %v17747_v18 = vpack.i.bf16 %v17700_v16, %v17516_v59  ;;  %v17751_v37 = vld [vmem:[#allocation2 + $0x1ea] sm:$0xff] }
 0x2a0   : > { %13098 = vrot.lane.b32.xlu1 %v17426_v50, %s21522_s18  ;;  %11485 = vmatprep.mubr.msk.bf16.mxu0 %vm5331_vm5, %v5285_v40  ;;  %v12816_v24 = vunpack.i.h.bf16 %v12814_v33  ;;  %v12815_v42 = vunpack.i.l.bf16 %v12814_v33  ;;  %v4525_v50 = vsel %vm469_vm0, %v647_v5, %v21605_v47  ;;  %v4524_v56 = vsel %vm469_vm0, %v646_v6, %v21607_v1  ;;  %v17753_v40 = vld [vmem:[#allocation2 + $0x1f2] sm:$0xff] }
 0x2a1   : > { %13103 = vrot.lane.b32.xlu0 %v21606_v30, %s21439_s15  ;;  %v4575_v0 = vsel %vm4545_vm2, %v17498_v28, %v21608_v11  ;;  %v4576_v10 = vsel %vm4545_vm2, %v4524_v56, %v11800_v46  ;;  %v4577_v32 = vsel %vm4545_vm2, %v4525_v50, %v11801_v60  ;;  %v13127_v28 = vpack.i.bf16 %v17716_v63, %v17518_v12 }
 0x2a2   : > { %v17714_v43 = vpop.permute.xlu1 %12818  ;;  %v5248_v22 = vsel %vm5221_vm1, %v5196_v48, %v12815_v42  ;;  %v5249_v55 = vsel %vm5221_vm1, %v5197_v27, %v12816_v24  ;;  %v17763_v51 = vpack.i.bf16 %v17720_v57, %v17718_v19  ;;  %v17767_v59 = vpack.i.bf16 %v17728_v23, %v17527_v35  ;;  %v21610_v35 = vld [vmem:[#allocation7_spill] sm:$0xff] }
 0x2a3   : > { %v17740_v53 = vpop.permute.xlu0 %12823  ;;  %v5286_v62 = vpack.c.bf16 %v5249_v55, %v5248_v22  ;;  %v17771_v12 = vpack.i.bf16 %v17732_v31, %v17730_v20  ;;  %v12726_v13 = vunpack.i.h.bf16 %v17454_v2  ;;  %v12725_v14 = vunpack.i.l.bf16 %v17454_v2 }
 0x2a4   : > { %13108 = vrot.lane.b32.xlu1 %v13107_v61, %s14815_s16  ;;  %v12731_v60 = vunpack.i.h.bf16 %v17466_v8  ;;  %v12730_v36 = vunpack.i.l.bf16 %v17466_v8  ;;  %v12746_v6 = vunpack.i.h.bf16 %v21609_v26  ;;  %v12745_v46 = vunpack.i.l.bf16 %v21609_v26 }
 0x2a5   : > { %13113 = vrot.lane.b32.xlu0 %v13107_v61, %s21522_s18  ;;  %11486 = vmatmul.mubr.msk.bf16.gmra.mxu0 %vm5331_vm5, %v5286_v62  ;;  %v17785_v4 = vpack.i.bf16 %v17751_v37, %v17539_v58  ;;  %v17789_v2 = vpack.i.bf16 %v17755_v49, %v17753_v40  ;;  %v4627_v33 = vsel %vm4597_vm6, %v4575_v0, %v12711_v25  ;;  %v21611_v61 = vld [vmem:[#allocation31_spill] sm:$0xff]  ;;  %v12766_v24 = vunpack.i.h.bf16 %v17579_v34 }
 0x2a6   : > { %v17758_v5 = vpop.permute.xlu1 %12828  ;;  %v4626_v8 = vsel %vm4597_vm6, %v4574_v17, %v12710_v7  ;;  %v12751_v3 = vunpack.i.h.bf16 %v21611_v61  ;;  %v12750_v38 = vunpack.i.l.bf16 %v21611_v61  ;;  %v12765_v42 = vunpack.i.l.bf16 %v17579_v34 }
 0x2a7   : > { %v17779_v21 = vpop.permute.xlu0 %12833  ;;  %v12771_v9 = vunpack.i.h.bf16 %v17593_v29  ;;  %v12770_v58 = vunpack.i.l.bf16 %v17593_v29  ;;  %v4628_v47 = vsel %vm4597_vm6, %v4576_v10, %v12725_v14  ;;  %v4629_v50 = vsel %vm4597_vm6, %v4577_v32, %v12726_v13 }
 0x2a8   : > { %13118 = vrot.lane.b32.xlu1 %v21610_v35, %s21506_s20  ;;  %v4678_v48 = vsel %vm4649_vm3, %v4626_v8, %v12730_v36  ;;  %v4679_v27 = vsel %vm4649_vm3, %v4627_v33, %v12731_v60  ;;  %v4680_v30 = vsel %vm4649_vm3, %v4628_v47, %v12745_v46  ;;  %v4681_v34 = vsel %vm4649_vm3, %v4629_v50, %v12746_v6 }
 0x2a9   : > { %13123 = vrot.lane.b32.xlu0 %v17747_v18, %s14815_s16  ;;  %v12786_v1 = vunpack.i.h.bf16 %v17623_v39  ;;  %v12785_v29 = vunpack.i.l.bf16 %v17623_v39  ;;  %v4730_v17 = vsel %vm4701_vm7, %v4678_v48, %v12750_v38  ;;  %v4731_v22 = vsel %vm4701_vm7, %v4679_v27, %v12751_v3 }
 0x2aa   : > { %v17801_v15 = vpop.permute.xlu1 %12838  ;;  %v12791_v55 = vunpack.i.h.bf16 %v17639_v41  ;;  %v12790_v11 = vunpack.i.l.bf16 %v17639_v41  ;;  %v4732_v0 = vsel %vm4701_vm7, %v4680_v30, %v12765_v42  ;;  %v4733_v10 = vsel %vm4701_vm7, %v4681_v34, %v12766_v24 }
 0x2ab   : > { %v17811_v56 = vpop.permute.xlu0 %12843  ;;  %v4782_v32 = vsel %vm4753_vm8, %v4730_v17, %v12770_v58  ;;  %v4783_v39 = vsel %vm4753_vm8, %v4731_v22, %v12771_v9  ;;  %v12806_v25 = vunpack.i.h.bf16 %v17669_v54  ;;  %v12805_v7 = vunpack.i.l.bf16 %v17669_v54 }
 0x2ac   : > { %13128 = vrot.lane.b32.xlu1 %v13127_v28, %s21431_s17  ;;  %v12811_v13 = vunpack.i.h.bf16 %v17684_v52  ;;  %v12810_v41 = vunpack.i.l.bf16 %v17684_v52  ;;  %v4784_v14 = vsel %vm4753_vm8, %v4732_v0, %v12785_v29  ;;  %v4785_v60 = vsel %vm4753_vm8, %v4733_v10, %v12786_v1 }
 0x2ad   : > { %13133 = vrot.lane.b32.xlu0 %v13127_v28, %s21506_s20  ;;  %v12821_v36 = vunpack.i.h.bf16 %v17714_v43  ;;  %v12820_v26 = vunpack.i.l.bf16 %v17714_v43  ;;  %v21612_v28 = vld [vmem:[#allocation8_spill] sm:$0xff]  ;;  %v4834_v46 = vsel %vm4805_vm9, %v4782_v32, %v12790_v11  ;;  %v4835_v54 = vsel %vm4805_vm9, %v4783_v39, %v12791_v55 }
 0x2ae   : > { %v17823_v62 = vpop.permute.xlu1 %12848  ;;  %v12826_v35 = vunpack.i.h.bf16 %v17740_v53  ;;  %v12825_v52 = vunpack.i.l.bf16 %v17740_v53  ;;  %v12831_v33 = vunpack.i.h.bf16 %v17758_v5  ;;  %v12830_v8 = vunpack.i.l.bf16 %v17758_v5 }
 0x2af   : > { %v12854_v6 = vpop.permute.xlu0 %12853  ;;  %v12836_v61 = vunpack.i.h.bf16 %v17779_v21  ;;  %v12835_v43 = vunpack.i.l.bf16 %v17779_v21  ;;  %v4836_v38 = vsel %vm4805_vm9, %v4784_v14, %v12805_v7  ;;  %v4837_v24 = vsel %vm4805_vm9, %v4785_v60, %v12806_v25 }
 0x2b0   : > { %13138 = vrot.lane.b32.xlu1 %v21612_v28, %s14809_s24  ;;  %v4886_v42 = vsel %vm4857_vm4, %v4834_v46, %v12810_v41  ;;  %v4887_v53 = vsel %vm4857_vm4, %v4835_v54, %v12811_v13  ;;  %v4888_v9 = vsel %vm4857_vm4, %v4836_v38, %v12820_v26  ;;  %v4889_v5 = vsel %vm4857_vm4, %v4837_v24, %v12821_v36  ;;  %v1420_v24 = vld [vmem:[#allocation2 + $0x1eb] sm:$0xff] }
 0x2b1   : > { %13143 = vrot.lane.b32.xlu0 %v17763_v51, %s21431_s17  ;;  %v12841_v58 = vunpack.i.h.bf16 %v17801_v15  ;;  %v12840_v21 = vunpack.i.l.bf16 %v17801_v15  ;;  %v4938_v50 = vsel %vm4909_vm10, %v4886_v42, %v12825_v52  ;;  %v4939_v48 = vsel %vm4909_vm10, %v4887_v53, %v12826_v35 }
 0x2b2   : > { %v12859_v3 = vpop.permute.xlu1 %12858  ;;  %v12846_v27 = vunpack.i.h.bf16 %v17811_v56  ;;  %v12845_v30 = vunpack.i.l.bf16 %v17811_v56  ;;  %v4940_v34 = vsel %vm4909_vm10, %v4888_v9, %v12830_v8  ;;  %v4941_v1 = vsel %vm4909_vm10, %v4889_v5, %v12831_v33 }
 0x2b3   : > { %v12864_v47 = vpop.permute.xlu0 %12863  ;;  %v4990_v29 = vsel %vm4961_vm11, %v4938_v50, %v12835_v43  ;;  %v4991_v15 = vsel %vm4961_vm11, %v4939_v48, %v12836_v61  ;;  %v12851_v22 = vunpack.i.h.bf16 %v17823_v62  ;;  %v12850_v55 = vunpack.i.l.bf16 %v17823_v62 }
 0x2b4   : > { %13148 = vrot.lane.b32.xlu1 %v17767_v59, %s14817_s21  ;;  %v12856_v11 = vunpack.i.h.bf16 %v12854_v6  ;;  %v12855_v0 = vunpack.i.l.bf16 %v12854_v6  ;;  %v4992_v56 = vsel %vm4961_vm11, %v4940_v34, %v12840_v21  ;;  %v4993_v10 = vsel %vm4961_vm11, %v4941_v1, %v12841_v58 }
 0x2b5   : > { %13153 = vrot.lane.b32.xlu0 %v17767_v59, %s14809_s24  ;;  %v12861_v32 = vunpack.i.h.bf16 %v12859_v3  ;;  %v12860_v39 = vunpack.i.l.bf16 %v12859_v3  ;;  %v5042_v7 = vsel %vm5013_vm12, %v4990_v29, %v12845_v30  ;;  %v5043_v59 = vsel %vm5013_vm12, %v4991_v15, %v12846_v27 }
 0x2b6   : > { %v12869_v17 = vpop.permute.xlu1 %12868  ;;  %v12866_v13 = vunpack.i.h.bf16 %v12864_v47  ;;  %v12865_v41 = vunpack.i.l.bf16 %v12864_v47  ;;  %v5044_v6 = vsel %vm5013_vm12, %v4992_v56, %v12850_v55  ;;  %v5045_v28 = vsel %vm5013_vm12, %v4993_v10, %v12851_v22  ;;  %v1421_v55 = vld [vmem:[#allocation2 + $0x1f3] sm:$0xff] }
 0x2b7   : > { %v12874_v25 = vpop.permute.xlu0 %12873  ;;  %v12871_v14 = vunpack.i.h.bf16 %v12869_v17  ;;  %v12870_v62 = vunpack.i.l.bf16 %v12869_v17  ;;  %v5095_v46 = vsel %vm5065_vm13, %v5043_v59, %v12856_v11  ;;  %v5096_v54 = vsel %vm5065_vm13, %v5044_v6, %v12860_v39  ;;  %v1422_v11 = vld [vmem:[#allocation2 + $0x203] sm:$0xff] }
 0x2b8   : > { %13158 = vrot.lane.b32.xlu1 %v17525_v44, %s21435_s25  ;;  %v12876_v60 = vunpack.i.h.bf16 %v12874_v25  ;;  %v12875_v36 = vunpack.i.l.bf16 %v12874_v25  ;;  %v5094_v44 = vsel %vm5065_vm13, %v5042_v7, %v12855_v0  ;;  %v5097_v35 = vsel %vm5065_vm13, %v5045_v28, %v12861_v32  ;;  %v1119_v25 = vld [vmem:[#allocation2 + $0x209] sm:$0xff] }
 0x2b9   : > { %13163 = vrot.lane.b32.xlu0 %v17771_v12, %s14817_s21  ;;  %v5146_v61 = vsel %vm5117_vm14, %v5094_v44, %v12865_v41  ;;  %v5147_v43 = vsel %vm5117_vm14, %v5095_v46, %v12866_v13  ;;  %v5148_v42 = vsel %vm5117_vm14, %v5096_v54, %v12870_v62  ;;  %v5149_v53 = vsel %vm5117_vm14, %v5097_v35, %v12871_v14  ;;  %v17937_v41 = vld [vmem:[#allocation2 + $0x20a] sm:$0xff]  ;;  %v17976_v44 = vld [vmem:[#allocation2 + $0x220] sm:$0xff] }
 0x2ba   : > { %v12879_v26 = vpop.permute.xlu1 %12878  ;;  %v5198_v9 = vsel %vm5169_vm15, %v5146_v61, %v12875_v36  ;;  %v5199_v5 = vsel %vm5169_vm15, %v5147_v43, %v12876_v60  ;;  %v13187_v29 = vpack.i.bf16 %v1420_v24, %v17700_v16  ;;  %v1068_v16 = vld [vmem:[#allocation2 + $0x208] sm:$0xff]  ;;  %v17916_v10 = vpack.i.bf16 %v1422_v11, %v1421_v55  ;;  %v17959_v36 = vld [vmem:[#allocation2 + $0x210] sm:$0xff] }
 0x2bb   : > { %v12881_v52 = vunpack.i.h.bf16 %v12879_v26  ;;  %v12880_v33 = vunpack.i.l.bf16 %v12879_v26  ;;  %v12884_v8 = vpop.permute.xlu0 %12883  ;;  %v13207_v39 = vpack.i.bf16 %v1068_v16, %v17720_v57  ;;  %v13217_v59 = vpack.i.bf16 %v1119_v25, %v17732_v31  ;;  %v17978_v46 = vld [vmem:[#allocation2 + $0x228] sm:$0xff]  ;;  %v17983_v35 = vld [vmem:[#allocation2 + $0x211] sm:$0xff] }
 0x2bc   : > { %13168 = vrot.lane.b32.xlu1 %v17785_v4, %s21429_s23  ;;  %v12886_v3 = vunpack.i.h.bf16 %v12884_v8  ;;  %v12885_v38 = vunpack.i.l.bf16 %v12884_v8  ;;  %v13222_v57 = vpack.i.bf16 %v17753_v40, %v17751_v37  ;;  %v13237_v62 = vpack.i.bf16 %v1421_v55, %v1420_v24  ;;  %v17954_v40 = vld [vmem:[#allocation2 + $0x20b] sm:$0xff] }
 0x2bd   : > { %13173 = vrot.lane.b32.xlu0 %v17785_v4, %s21435_s25  ;;  %v5200_v27 = vsel %vm5169_vm15, %v5148_v42, %v12880_v33  ;;  %v5201_v30 = vsel %vm5169_vm15, %v5149_v53, %v12881_v52  ;;  %v17965_v26 = vpack.i.bf16 %v17954_v40, %v1422_v11  ;;  %v13257_v6 = vpack.i.bf16 %v17959_v36, %v1068_v16  ;;  %v648_v43 = vld [vmem:[#allocation2 + $0x150] sm:$0xff]  ;;  %v21614_v42 = vld [vmem:[#allocation20_spill] sm:$0xff] }
 0x2be   : > { %v12889_v58 = vpop.permute.xlu1 %12888  ;;  %v5250_v21 = vsel %vm5221_vm1, %v5198_v9, %v12885_v38  ;;  %v5251_v47 = vsel %vm5221_vm1, %v5199_v5, %v12886_v3  ;;  %v17990_v52 = vpack.i.bf16 %v17978_v46, %v17976_v44  ;;  %v13277_v8 = vpack.i.bf16 %v17983_v35, %v1119_v25  ;;  %v21613_v3 = vld [vmem:[#allocation19_spill] sm:$0xff]  ;;  %v18005_v5 = vld [vmem:[#allocation2 + $0x221] sm:$0xff] }
 0x2bf   : > { %v12891_v50 = vunpack.i.h.bf16 %v12889_v58  ;;  %v12890_v48 = vunpack.i.l.bf16 %v12889_v58  ;;  %v17895_v34 = vpop.permute.xlu0 %12893  ;;  %v5287_v1 = vpack.c.bf16 %v5251_v47, %v5250_v21  ;;  %v11681_v38 = vunpack.i.h.bf16 %v21613_v3  ;;  %v18007_v58 = vld [vmem:[#allocation2 + $0x229] sm:$0xff]  ;;  %v18029_v16 = vld [vmem:[#allocation2 + $0x213] sm:$0xff] }
 0x2c0   : > { %13178 = vrot.lane.b32.xlu1 %v17545_v45, %s14811_s26  ;;  %v13197_v45 = vpack.i.bf16 %v17718_v19, %v17716_v63  ;;  %v13212_v63 = vpack.i.bf16 %v17730_v20, %v17728_v23  ;;  %v13232_v20 = vpack.i.bf16 %v17937_v41, %v17755_v49  ;;  %v11680_v24 = vunpack.i.l.bf16 %v21613_v3  ;;  %v650_v21 = vld [vmem:[#allocation2 + $0x168] sm:$0xff]  ;;  %v651_v47 = vld [vmem:[#allocation2 + $0x170] sm:$0xff] }
 0x2c1   : > { %v5252_v4 = vsel %vm5221_vm1, %v5200_v27, %v12890_v48  ;;  %v5253_v15 = vsel %vm5221_vm1, %v5201_v30, %v12891_v50  ;;  %13183 = vrot.lane.b32.xlu0 %v17789_v2, %s21429_s23  ;;  %11489 = vmatprep.mubr.msk.bf16.mxu0 %vm5331_vm5, %v5287_v1  ;;  %v11686_v53 = vunpack.i.h.bf16 %v21614_v42  ;;  %v11685_v9 = vunpack.i.l.bf16 %v21614_v42  ;;  %v21615_v50 = vld [vmem:[#allocation42_spill] sm:$0xff]  ;;  %v21616_v30 = vld [vmem:[#allocation43_spill] sm:$0xff]  ;;  %v18025_v11 = vld [vmem:[#allocation2 + $0x222] sm:$0xff] }
 0x2c2   : > { %v17904_v17 = vpop.permute.xlu1 %12898  ;;  %v5288_v22 = vpack.c.bf16 %v5253_v15, %v5252_v4  ;;  %v11806_v48 = vunpack.i.h.bf16 %v21615_v50  ;;  %v11805_v27 = vunpack.i.l.bf16 %v21615_v50  ;;  %v11810_v1 = vunpack.i.l.bf16 %v21616_v30  ;;  %v18016_v15 = vld [vmem:[#allocation2 + $0x212] sm:$0xff] }
 0x2c3   : > { %v17907_v0 = vpop.permute.xlu0 %12903  ;;  %v11811_v4 = vunpack.i.h.bf16 %v21616_v30  ;;  %v18023_v55 = vpack.i.bf16 %v18007_v58, %v18005_v5  ;;  %v4526_v25 = vsel %vm469_vm0, %v648_v43, %v11680_v24  ;;  %v13297_v43 = vpack.i.bf16 %v18016_v15, %v17937_v41 }
 0x2c4   : > { %13188 = vrot.lane.b32.xlu1 %v13187_v29, %s14819_s22  ;;  %11490 = vmatmul.mubr.msk.bf16.gmra.mxu0 %vm5331_vm5, %v5288_v22  ;;  %v12896_v42 = vunpack.i.h.bf16 %v17895_v34  ;;  %v12900_v41 = vunpack.i.l.bf16 %v17904_v17 }
 0x2c5   : > { %13193 = vrot.lane.b32.xlu0 %v13187_v29, %s14811_s26  ;;  %21617 = vst [vmem:[#allocation54_spill] sm:$0xff] %v18023_v55 }
 0x2c6   : > { %v17914_v56 = vpop.permute.xlu1 %12908 }
 0x2c7   : > { %v17918_v32 = vpop.permute.xlu0 %12913 }
 0x2c8   : > { %13198 = vrot.lane.b32.xlu1 %v13197_v45, %s21437_s27  ;;  %v18027_v45 = vld [vmem:[#allocation2 + $0x22a] sm:$0xff] }
 0x2c9   : > { %13203 = vrot.lane.b32.xlu0 %v17916_v10, %s14819_s22 }
 0x2ca   : > { %v17924_v7 = vpop.permute.xlu1 %12918 }
 0x2cb   : > { %v17928_v19 = vpop.permute.xlu0 %12923 }
 0x2cc   : > { %13208 = vrot.lane.b32.xlu1 %v13207_v39, %s21437_s27 }
 0x2cd   : > { %13213 = vrot.lane.b32.xlu0 %v13212_v63, %s14813_s28  ;;  %v4529_v63 = vsel %vm469_vm0, %v651_v47, %v11686_v53  ;;  %v18054_v53 = vpack.i.bf16 %v18027_v45, %v18025_v11 }
 0x2ce   : > { %v17933_v13 = vpop.permute.xlu1 %12928  ;;  %v4581_v24 = vsel %vm4545_vm2, %v4529_v63, %v11811_v4  ;;  %v12910_v4 = vunpack.i.l.bf16 %v17914_v56 }
 0x2cf   : > { %v17939_v14 = vpop.permute.xlu0 %12933 }
 0x2d0   : > { %13218 = vrot.lane.b32.xlu1 %v13217_v59, %s14813_s28  ;;  %v4528_v59 = vsel %vm469_vm0, %v650_v21, %v11685_v9  ;;  %v18058_v9 = vpack.i.bf16 %v18029_v16, %v17954_v40  ;;  %v18074_v40 = vld [vmem:[#allocation2 + $0x232] sm:$0xff] }
 0x2d1   : > { %13223 = vrot.lane.b32.xlu0 %v13222_v57, %s21439_s15  ;;  %v18035_v57 = vld [vmem:[#allocation2 + $0x223] sm:$0xff]  ;;  %v13357_v30 = vpack.i.bf16 %v18074_v40, %v18027_v45 }
 0x2d2   : > { %v17943_v23 = vpop.permute.xlu1 %12938 }
 0x2d3   : > { %v17947_v31 = vpop.permute.xlu0 %12943 }
 0x2d4   : > { %13228 = vrot.lane.b32.xlu1 %v17747_v18, %s21522_s18 }
 0x2d5   : > { %13233 = vrot.lane.b32.xlu0 %v13232_v20, %s21439_s15  ;;  %v18037_v20 = vld [vmem:[#allocation2 + $0x22b] sm:$0xff] }
 0x2d6   : > { %v17952_v37 = vpop.permute.xlu1 %12948  ;;  %v18072_v50 = vpack.i.bf16 %v18037_v20, %v18035_v57 }
 0x2d7   : > { %v17956_v60 = vpop.permute.xlu0 %12953 }
 0x2d8   : > { %13238 = vrot.lane.b32.xlu1 %v13237_v62, %s14815_s16 }
 0x2d9   : > { %13243 = vrot.lane.b32.xlu0 %v13237_v62, %s21522_s18  ;;  %v4578_v62 = vsel %vm4545_vm2, %v4526_v25, %v11805_v27  ;;  %v12915_v25 = vunpack.i.l.bf16 %v17918_v32 }
 0x2da   : > { %v17962_v49 = vpop.permute.xlu1 %12958 }
 0x2db   : > { %v17967_v18 = vpop.permute.xlu0 %12963 }
 0x2dc   : > { %13248 = vrot.lane.b32.xlu1 %v17763_v51, %s21506_s20 }
 0x2dd   : > { %13253 = vrot.lane.b32.xlu0 %v17965_v26, %s14815_s16 }
 0x2de   : > { %v17974_v28 = vpop.permute.xlu1 %12968 }
 0x2df   : > { %v17980_v54 = vpop.permute.xlu0 %12973 }
 0x2e0   : > { %13258 = vrot.lane.b32.xlu1 %v13257_v6, %s21431_s17 }
 0x2e1   : > { %13263 = vrot.lane.b32.xlu0 %v13257_v6, %s21506_s20 }
 0x2e2   : > { %v17986_v51 = vpop.permute.xlu1 %12978 }
 0x2e3   : > { %v17992_v33 = vpop.permute.xlu0 %12983 }
 0x2e4   : > { %13268 = vrot.lane.b32.xlu1 %v17771_v12, %s14809_s24  ;;  %v649_v12 = vld [vmem:[#allocation2 + $0x160] sm:$0xff] }
 0x2e5   : > { %13273 = vrot.lane.b32.xlu0 %v17990_v52, %s21431_s17  ;;  %v4527_v39 = vsel %vm469_vm0, %v649_v12, %v11681_v38  ;;  %v18048_v38 = vld [vmem:[#allocation2 + $0x230] sm:$0xff] }
 0x2e6   : > { %v17999_v61 = vpop.permute.xlu1 %12988  ;;  %v4579_v6 = vsel %vm4545_vm2, %v4527_v39, %v11806_v48  ;;  %v18060_v12 = vld [vmem:[#allocation2 + $0x231] sm:$0xff]  ;;  %v12901_v48 = vunpack.i.h.bf16 %v17904_v17 }
 0x2e7   : > { %v18012_v29 = vpop.permute.xlu0 %12993  ;;  %v4631_v63 = vsel %vm4597_vm6, %v4579_v6, %v12896_v42  ;;  %v12921_v42 = vunpack.i.h.bf16 %v17924_v7 }
 0x2e8   : > { %13278 = vrot.lane.b32.xlu1 %v13277_v8, %s14817_s21 }
 0x2e9   : > { %13283 = vrot.lane.b32.xlu0 %v13277_v8, %s14809_s24  ;;  %v4580_v8 = vsel %vm4545_vm2, %v4528_v59, %v11810_v1  ;;  %v12906_v1 = vunpack.i.h.bf16 %v17907_v0  ;;  %v12911_v59 = vunpack.i.h.bf16 %v17914_v56  ;;  %v4633_v56 = vsel %vm4597_vm6, %v4581_v24, %v12901_v48 }
 0x2ea   : > { %v18019_v22 = vpop.permute.xlu1 %12998  ;;  %v4632_v47 = vsel %vm4597_vm6, %v4580_v8, %v12900_v41  ;;  %v12931_v24 = vunpack.i.h.bf16 %v17933_v13  ;;  %v12930_v48 = vunpack.i.l.bf16 %v17933_v13  ;;  %v12941_v13 = vunpack.i.h.bf16 %v17943_v23 }
 0x2eb   : > { %v18042_v3 = vpop.permute.xlu0 %13003  ;;  %v4684_v8 = vsel %vm4649_vm3, %v4632_v47, %v12910_v4 }
 0x2ec   : > { %13288 = vrot.lane.b32.xlu1 %v17789_v2, %s21435_s25  ;;  %v12895_v2 = vunpack.i.l.bf16 %v17895_v34  ;;  %v12905_v34 = vunpack.i.l.bf16 %v17907_v0  ;;  %v12920_v0 = vunpack.i.l.bf16 %v17924_v7  ;;  %v12935_v7 = vunpack.i.l.bf16 %v17939_v14 }
 0x2ed   : > { %13293 = vrot.lane.b32.xlu0 %v18023_v55, %s14817_s21  ;;  %v12916_v55 = vunpack.i.h.bf16 %v17918_v32  ;;  %v12925_v32 = vunpack.i.l.bf16 %v17928_v19 }
 0x2ee   : > { %v18066_v21 = vpop.permute.xlu1 %13008  ;;  %v4630_v27 = vsel %vm4597_vm6, %v4578_v62, %v12895_v2  ;;  %v4683_v62 = vsel %vm4649_vm3, %v4631_v63, %v12906_v1  ;;  %v12926_v2 = vunpack.i.h.bf16 %v17928_v19  ;;  %v12940_v19 = vunpack.i.l.bf16 %v17943_v23 }
 0x2ef   : > { %v18084_v39 = vpop.permute.xlu0 %13013  ;;  %v4682_v6 = vsel %vm4649_vm3, %v4630_v27, %v12905_v34  ;;  %v4735_v47 = vsel %vm4701_vm7, %v4683_v62, %v12916_v55  ;;  %v12936_v27 = vunpack.i.h.bf16 %v17939_v14  ;;  %v4736_v1 = vsel %vm4701_vm7, %v4684_v8, %v12920_v0 }
 0x2f0   : > { %13298 = vrot.lane.b32.xlu1 %v13297_v43, %s21429_s23  ;;  %v4734_v34 = vsel %vm4701_vm7, %v4682_v6, %v12915_v25  ;;  %v12945_v63 = vunpack.i.l.bf16 %v17947_v31  ;;  %v4787_v55 = vsel %vm4753_vm8, %v4735_v47, %v12926_v2  ;;  %v12946_v14 = vunpack.i.h.bf16 %v17947_v31 }
 0x2f1   : > { %13303 = vrot.lane.b32.xlu0 %v13297_v43, %s21435_s25  ;;  %v4685_v43 = vsel %vm4649_vm3, %v4633_v56, %v12911_v59  ;;  %v4786_v25 = vsel %vm4753_vm8, %v4734_v34, %v12925_v32  ;;  %v12950_v59 = vunpack.i.l.bf16 %v17952_v37  ;;  %v4788_v0 = vsel %vm4753_vm8, %v4736_v1, %v12930_v48 }
 0x2f2   : > { %v18102_v17 = vpop.permute.xlu1 %13018  ;;  %v4737_v4 = vsel %vm4701_vm7, %v4685_v43, %v12921_v42  ;;  %v4838_v23 = vsel %vm4805_vm9, %v4786_v25, %v12935_v7  ;;  %v12951_v42 = vunpack.i.h.bf16 %v17952_v37  ;;  %v4839_v62 = vsel %vm4805_vm9, %v4787_v55, %v12936_v27 }
 0x2f3   : > { %v18112_v41 = vpop.permute.xlu0 %13023  ;;  %v4789_v6 = vsel %vm4753_vm8, %v4737_v4, %v12931_v24  ;;  %v4840_v8 = vsel %vm4805_vm9, %v4788_v0, %v12940_v19  ;;  %v12956_v31 = vunpack.i.h.bf16 %v17956_v60  ;;  %v12955_v2 = vunpack.i.l.bf16 %v17956_v60 }
 0x2f4   : > { %13308 = vrot.lane.b32.xlu1 %v17916_v10, %s14811_s26  ;;  %v4841_v43 = vsel %vm4805_vm9, %v4789_v6, %v12941_v13  ;;  %v4890_v24 = vsel %vm4857_vm4, %v4838_v23, %v12945_v63  ;;  %v12961_v48 = vunpack.i.h.bf16 %v17962_v49  ;;  %v12960_v37 = vunpack.i.l.bf16 %v17962_v49 }
 0x2f5   : > { %13313 = vrot.lane.b32.xlu0 %v18054_v53, %s21429_s23  ;;  %v4891_v7 = vsel %vm4857_vm4, %v4839_v62, %v12946_v14  ;;  %v4892_v34 = vsel %vm4857_vm4, %v4840_v8, %v12950_v59  ;;  %v12966_v47 = vunpack.i.h.bf16 %v17967_v18  ;;  %v12965_v60 = vunpack.i.l.bf16 %v17967_v18 }
 0x2f6   : > { %v18126_v10 = vpop.permute.xlu1 %13028  ;;  %v4893_v19 = vsel %vm4857_vm4, %v4841_v43, %v12951_v42  ;;  %v12975_v1 = vunpack.i.l.bf16 %v17980_v54  ;;  %v12981_v49 = vunpack.i.h.bf16 %v17986_v51  ;;  %v12980_v4 = vunpack.i.l.bf16 %v17986_v51 }
 0x2f7   : > { %v18136_v56 = vpop.permute.xlu0 %13033  ;;  %v4942_v13 = vsel %vm4909_vm10, %v4890_v24, %v12955_v2  ;;  %v4943_v63 = vsel %vm4909_vm10, %v4891_v7, %v12956_v31  ;;  %v13001_v18 = vunpack.i.h.bf16 %v18019_v22  ;;  %v13000_v25 = vunpack.i.l.bf16 %v18019_v22 }
 0x2f8   : > { %13318 = vrot.lane.b32.xlu1 %v18058_v9, %s14819_s22  ;;  %v4945_v55 = vsel %vm4909_vm10, %v4893_v19, %v12961_v48  ;;  %v13021_v14 = vunpack.i.h.bf16 %v18102_v17  ;;  %v13020_v51 = vunpack.i.l.bf16 %v18102_v17  ;;  %v4994_v59 = vsel %vm4961_vm11, %v4942_v13, %v12965_v60 }
 0x2f9   : > { %13323 = vrot.lane.b32.xlu0 %v18058_v9, %s14811_s26  ;;  %v21618_v9 = vpack.i.bf16 %v17976_v44, %v17959_v36  ;;  %v4944_v44 = vsel %vm4909_vm10, %v4892_v34, %v12960_v37  ;;  %v4995_v0 = vsel %vm4961_vm11, %v4943_v63, %v12966_v47  ;;  %v21619_v42 = vpack.i.bf16 %v18048_v38, %v17978_v46 }
 0x2fa   : > { %v13039_v32 = vpop.permute.xlu1 %13038  ;;  %v12976_v62 = vunpack.i.h.bf16 %v17980_v54  ;;  %v4996_v8 = vsel %vm4961_vm11, %v4944_v44, %v12975_v1  ;;  %v5047_v31 = vsel %vm5013_vm12, %v4995_v0, %v12981_v49  ;;  %v5046_v17 = vsel %vm5013_vm12, %v4994_v59, %v12980_v4 }
 0x2fb   : > { %v18158_v27 = vpop.permute.xlu0 %13043  ;;  %v13041_v6 = vunpack.i.h.bf16 %v13039_v32  ;;  %v13040_v23 = vunpack.i.l.bf16 %v13039_v32  ;;  %v12996_v2 = vunpack.i.h.bf16 %v18012_v29  ;;  %v12995_v43 = vunpack.i.l.bf16 %v18012_v29 }
 0x2fc   : > { %13328 = vrot.lane.b32.xlu1 %v21618_v9, %s21437_s27  ;;  %v5098_v32 = vsel %vm5065_vm13, %v5046_v17, %v13000_v25  ;;  %v5099_v24 = vsel %vm5065_vm13, %v5047_v31, %v13001_v18  ;;  %v21620_v46 = vpack.i.bf16 %v18005_v5, %v17983_v35  ;;  %v13016_v47 = vunpack.i.h.bf16 %v18084_v39 }
 0x2fd   : > { %13333 = vrot.lane.b32.xlu0 %v18072_v50, %s14819_s22  ;;  %v5150_v48 = vsel %vm5117_vm14, %v5098_v32, %v13020_v51  ;;  %v5151_v37 = vsel %vm5117_vm14, %v5099_v24, %v13021_v14  ;;  %v13015_v29 = vunpack.i.l.bf16 %v18084_v39  ;;  %v21621_v35 = vpack.i.bf16 %v18060_v12, %v18007_v58  ;;  %v18214_v39 = vld [vmem:[#allocation2 + $0x233] sm:$0xff]  ;;  %v18225_v51 = vld [vmem:[#allocation2 + $0x240] sm:$0xff] }
 0x2fe   : > { %v18174_v36 = vpop.permute.xlu1 %13048  ;;  %v5202_v60 = vsel %vm5169_vm15, %v5150_v48, %v13040_v23  ;;  %v5203_v9 = vsel %vm5169_vm15, %v5151_v37, %v13041_v6  ;;  %v13036_v5 = vunpack.i.h.bf16 %v18136_v56  ;;  %v13035_v1 = vunpack.i.l.bf16 %v18136_v56 }
 0x2ff   : > { %v13054_v22 = vpop.permute.xlu0 %13053  ;;  %v4997_v13 = vsel %vm4961_vm11, %v4945_v55, %v12976_v62  ;;  %v21622_v25 = vpack.i.bf16 %v18025_v11, %v18016_v15  ;;  %v5048_v56 = vsel %vm5013_vm12, %v4996_v8, %v12995_v43  ;;  %v13367_v15 = vpack.i.bf16 %v18214_v39, %v18037_v20  ;;  %v18240_v62 = vld [vmem:[#allocation2 + $0x250] sm:$0xff]  ;;  %v18254_v43 = vld [vmem:[#allocation2 + $0x241] sm:$0xff] }
 0x300   : > { %13338 = vrot.lane.b32.xlu1 %v21619_v42, %s21437_s27  ;;  %v13056_v63 = vunpack.i.h.bf16 %v13054_v22  ;;  %v13055_v18 = vunpack.i.l.bf16 %v13054_v22  ;;  %v5049_v14 = vsel %vm5013_vm12, %v4997_v13, %v12996_v2  ;;  %v5100_v59 = vsel %vm5065_vm13, %v5048_v56, %v13015_v29  ;;  %v18238_v42 = vld [vmem:[#allocation2 + $0x248] sm:$0xff]  ;;  %v18296_v13 = vld [vmem:[#allocation2 + $0x253] sm:$0xff] }
 0x301   : > { %13343 = vrot.lane.b32.xlu0 %v21620_v46, %s14813_s28  ;;  %v5101_v55 = vsel %vm5065_vm13, %v5049_v14, %v13016_v47  ;;  %v5152_v11 = vsel %vm5117_vm14, %v5100_v59, %v13035_v1  ;;  %v13372_v31 = vpack.i.bf16 %v18225_v51, %v18048_v38  ;;  %v18261_v46 = vld [vmem:[#allocation2 + $0x249] sm:$0xff]  ;;  %v13382_v37 = vpack.i.bf16 %v18254_v43, %v18060_v12 }
 0x302   : > { %v13059_v54 = vpop.permute.xlu1 %13058  ;;  %v5153_v6 = vsel %vm5117_vm14, %v5101_v55, %v13036_v5  ;;  %v5204_v8 = vsel %vm5169_vm15, %v5152_v11, %v13055_v18  ;;  %v18278_v29 = vld [vmem:[#allocation2 + $0x24a] sm:$0xff]  ;;  %v652_v55 = vld [vmem:[#allocation2 + $0x180] sm:$0xff] }
 0x303   : > { %v13061_v7 = vunpack.i.h.bf16 %v13059_v54  ;;  %v13060_v34 = vunpack.i.l.bf16 %v13059_v54  ;;  %v18204_v19 = vpop.permute.xlu0 %13063  ;;  %v5205_v45 = vsel %vm5169_vm15, %v5153_v6, %v13056_v63  ;;  %v18263_v54 = vld [vmem:[#allocation2 + $0x251] sm:$0xff]  ;;  %v18287_v5 = vld [vmem:[#allocation2 + $0x243] sm:$0xff] }
 0x304   : > { %13348 = vrot.lane.b32.xlu1 %v21621_v35, %s14813_s28  ;;  %v13387_v47 = vpack.i.bf16 %v18263_v54, %v18261_v46  ;;  %v13402_v18 = vpack.i.bf16 %v18287_v5, %v18214_v39  ;;  %v21624_v14 = vld [vmem:[#allocation21_spill] sm:$0xff]  ;;  %v21625_v11 = vld [vmem:[#allocation22_spill] sm:$0xff] }
 0x305   : > { %v5254_v49 = vsel %vm5221_vm1, %v5202_v60, %v13060_v34  ;;  %v5255_v4 = vsel %vm5221_vm1, %v5203_v9, %v13061_v7  ;;  %13353 = vrot.lane.b32.xlu0 %v21622_v25, %s21439_s15  ;;  %v18271_v7 = vld [vmem:[#allocation2 + $0x242] sm:$0xff]  ;;  %v18280_v60 = vld [vmem:[#allocation2 + $0x252] sm:$0xff]  ;;  %v11691_v59 = vunpack.i.h.bf16 %v21624_v14  ;;  %v11696_v6 = vunpack.i.h.bf16 %v21625_v11 }
 0x306   : > { %v18221_v58 = vpop.permute.xlu1 %13068  ;;  %v5289_v44 = vpack.c.bf16 %v5255_v4, %v5254_v49  ;;  %v13392_v35 = vpack.i.bf16 %v18271_v7, %v18074_v40  ;;  %v13397_v49 = vpack.i.bf16 %v18280_v60, %v18278_v29  ;;  %v18294_v4 = vld [vmem:[#allocation2 + $0x24b] sm:$0xff] }
 0x307   : > { %v13074_v0 = vpop.permute.xlu0 %13073 }
 0x308   : > { %13358 = vrot.lane.b32.xlu1 %v13357_v30, %s21439_s15  ;;  %11493 = vmatprep.mubr.msk.bf16.mxu0 %vm5331_vm5, %v5289_v44  ;;  %v13076_v23 = vunpack.i.h.bf16 %v13074_v0  ;;  %v13075_v22 = vunpack.i.l.bf16 %v13074_v0  ;;  %v21623_v30 = vpack.i.bf16 %v18035_v57, %v18029_v16  ;;  %v13377_v57 = vpack.i.bf16 %v18240_v62, %v18238_v42  ;;  %v653_v0 = vld [vmem:[#allocation2 + $0x188] sm:$0xff] }
 0x309   : > { %v13407_v44 = vpack.i.bf16 %v18296_v13, %v18294_v4 }
 0x30a   : > { %13363 = vrot.lane.b32.xlu0 %v21623_v30, %s14815_s16  ;;  %v18248_v20 = vpop.permute.xlu1 %13078  ;;  %v5256_v17 = vsel %vm5221_vm1, %v5204_v8, %v13075_v22  ;;  %v5257_v2 = vsel %vm5221_vm1, %v5205_v45, %v13076_v23  ;;  %v11695_v23 = vunpack.i.l.bf16 %v21625_v11  ;;  %v654_v8 = vld [vmem:[#allocation2 + $0x190] sm:$0xff]  ;;  %v655_v45 = vld [vmem:[#allocation2 + $0x1a0] sm:$0xff] }
 0x30b   : > { %v18256_v32 = vpop.permute.xlu0 %13083  ;;  %v5290_v24 = vpack.c.bf16 %v5257_v2, %v5256_v17  ;;  %v21626_v30 = vld [vmem:[#allocation44_spill] sm:$0xff]  ;;  %v21627_v2 = vld [vmem:[#allocation45_spill] sm:$0xff] }
 0x30c   : > { %13368 = vrot.lane.b32.xlu1 %v13367_v15, %s14815_s16  ;;  %v11690_v15 = vunpack.i.l.bf16 %v21624_v14  ;;  %v11815_v17 = vunpack.i.l.bf16 %v21626_v30  ;;  %v4532_v14 = vsel %vm469_vm0, %v654_v8, %v11695_v23  ;;  %v12970_v23 = vunpack.i.l.bf16 %v17974_v28 }
 0x30d   : > { %11494 = vmatmul.mubr.msk.bf16.gmra.mxu0 %vm5331_vm5, %v5290_v24  ;;  %v11820_v24 = vunpack.i.l.bf16 %v21627_v2 }
 0x30e   : > { %13373 = vrot.lane.b32.xlu0 %v13372_v31, %s21431_s17  ;;  %v18266_v48 = vpop.permute.xlu1 %13088  ;;  %v11816_v31 = vunpack.i.h.bf16 %v21626_v30 }
 0x30f   : > { %v18273_v34 = vpop.permute.xlu0 %13093 }
 0x310   : > { %13378 = vrot.lane.b32.xlu1 %v13377_v57, %s21431_s17  ;;  %v6127_v57 = vld [vmem:[#allocation3 + $0x2] sm:$0xff] }
 0x311   : > { %v13422_v30 = vpack.i.bf16 %v6127_v57, %v18048_v38  ;;  %v12991_v57 = vunpack.i.h.bf16 %v17999_v61 }
 0x312   : > { %13383 = vrot.lane.b32.xlu0 %v13382_v37, %s14817_s21  ;;  %v18283_v9 = vpop.permute.xlu1 %13098  ;;  %v11821_v37 = vunpack.i.h.bf16 %v21627_v2 }
 0x313   : > { %v18289_v1 = vpop.permute.xlu0 %13103 }
 0x314   : > { %13388 = vrot.lane.b32.xlu1 %v13387_v47, %s14817_s21 }
 0x316   : > { %13393 = vrot.lane.b32.xlu0 %v13392_v35, %s21429_s23  ;;  %v18299_v63 = vpop.permute.xlu1 %13108  ;;  %v4531_v35 = vsel %vm469_vm0, %v653_v0, %v11691_v59  ;;  %v4584_v0 = vsel %vm4545_vm2, %v4532_v14, %v11820_v24  ;;  %v13447_v24 = vpack.i.bf16 %v18238_v42, %v18225_v51 }
 0x317   : > { %v18303_v25 = vpop.permute.xlu0 %13113  ;;  %v4583_v59 = vsel %vm4545_vm2, %v4531_v35, %v11816_v31  ;;  %v12986_v31 = vunpack.i.h.bf16 %v17992_v33 }
 0x318   : > { %13398 = vrot.lane.b32.xlu1 %v13397_v49, %s21429_s23  ;;  %v18327_v49 = vld [vmem:[#allocation3 + $0x3] sm:$0xff] }
 0x319   : > { %v13437_v8 = vpack.i.bf16 %v18327_v49, %v18074_v40  ;;  %v13006_v49 = vunpack.i.h.bf16 %v18042_v3  ;;  %v13011_v40 = vunpack.i.h.bf16 %v18066_v21 }
 0x31a   : > { %13403 = vrot.lane.b32.xlu0 %v13402_v18, %s14819_s22  ;;  %v18309_v56 = vpop.permute.xlu1 %13118  ;;  %v4530_v18 = vsel %vm469_vm0, %v652_v55, %v11690_v15  ;;  %v12971_v55 = vunpack.i.h.bf16 %v17974_v28  ;;  %v13025_v28 = vunpack.i.l.bf16 %v18112_v41 }
 0x31b   : > { %v18315_v22 = vpop.permute.xlu0 %13123  ;;  %v4582_v2 = vsel %vm4545_vm2, %v4530_v18, %v11815_v17  ;;  %v12990_v17 = vunpack.i.l.bf16 %v17999_v61  ;;  %v13026_v61 = vunpack.i.h.bf16 %v18112_v41  ;;  %v13050_v41 = vunpack.i.l.bf16 %v18174_v36 }
 0x31c   : > { %13408 = vrot.lane.b32.xlu1 %v13407_v44, %s14819_s22  ;;  %v4533_v44 = vsel %vm469_vm0, %v655_v45, %v11696_v6  ;;  %v18344_v6 = vpop.f32.mrf.mxu0  ;;  %v18354_v45 = vld [vmem:[#allocation3 + $0x19] sm:$0xff]  ;;  %v4635_v35 = vsel %vm4597_vm6, %v4583_v59, %v12971_v55  ;;  %v4634_v14 = vsel %vm4597_vm6, %v4582_v2, %v12970_v23  ;;  %v21628_v59 = vld [vmem:[#allocation54_spill] sm:$0xff]  ;;  %v13031_v23 = vunpack.i.h.bf16 %v18126_v10 }
 0x31d   : > { %v4585_v15 = vsel %vm4545_vm2, %v4533_v44, %v11821_v37  ;;  %v4686_v18 = vsel %vm4649_vm3, %v4634_v14, %v12990_v17  ;;  %v4687_v2 = vsel %vm4649_vm3, %v4635_v35, %v12991_v57  ;;  %v13045_v17 = vunpack.i.l.bf16 %v18158_v27 }
 0x31e   : > { %13413 = vrot.lane.b32.xlu0 %v17965_v26, %s21522_s18  ;;  %v18324_v47 = vpop.permute.xlu1 %13128  ;;  %v18337_v26 = vld [vmem:[#allocation3 + $0x18] sm:$0xff]  ;;  %v18377_v44 = vpop.f32.mrf.mxu0  ;;  %v4637_v55 = vsel %vm4597_vm6, %v4585_v15, %v12986_v31  ;;  %v13046_v31 = vunpack.i.h.bf16 %v18158_v27  ;;  %v4739_v35 = vsel %vm4701_vm7, %v4687_v2, %v13011_v40  ;;  %v13065_v14 = vunpack.i.l.bf16 %v18204_v19 }
 0x31f   : > { %v18332_v11 = vpop.permute.xlu0 %13133  ;;  %v4689_v15 = vsel %vm4649_vm3, %v4637_v55, %v13006_v49  ;;  %v4791_v40 = vsel %vm4753_vm8, %v4739_v35, %v13031_v23  ;;  %v13086_v23 = vunpack.i.h.bf16 %v18256_v32  ;;  %v21629_v42 = vpack.i.bf16 %v18337_v26, %v18240_v62 }
 0x320   : > { %1993 = vrot.lane.b32.xlu1 %v18029_v16, %s21522_s18  ;;  %v12985_v16 = vunpack.i.l.bf16 %v17992_v33  ;;  %v13010_v33 = vunpack.i.l.bf16 %v18066_v21  ;;  %v13030_v21 = vunpack.i.l.bf16 %v18126_v10  ;;  %v18403_v57 = vpop.f32.mrf.mxu0  ;;  %v13051_v10 = vunpack.i.h.bf16 %v18174_v36  ;;  %s21651_s18 = smov 72  }
 0x321   : > { %v4741_v27 = vsel %vm4701_vm7, %v4689_v15, %v13026_v61  ;;  %v13071_v36 = vunpack.i.h.bf16 %v18221_v58  ;;  %v13081_v61 = vunpack.i.h.bf16 %v18248_v20  ;;  %v21630_v62 = vpack.i.bf16 %v18261_v46, %v18254_v43 }
 0x322   : > { %13418 = vrot.lane.b32.xlu0 %v17990_v52, %s21506_s20  ;;  %v18350_v38 = vpop.permute.xlu1 %13138  ;;  %v13005_v52 = vunpack.i.l.bf16 %v18042_v3  ;;  %v18428_v2 = vpop.f32.mrf.mxu0 }
 0x323   : > { %v18364_v37 = vpop.permute.xlu0 %13143 }
 0x324   : > { %13423 = vrot.lane.b32.xlu1 %v13422_v30, %s21506_s20  ;;  %v4636_v30 = vsel %vm4597_vm6, %v4584_v0, %v12985_v16 }
 0x325   : > { %v4688_v0 = vsel %vm4649_vm3, %v4636_v30, %v13005_v52  ;;  %v4738_v52 = vsel %vm4701_vm7, %v4686_v18, %v13010_v33  ;;  %v13066_v30 = vunpack.i.h.bf16 %v18204_v19  ;;  %v13080_v18 = vunpack.i.l.bf16 %v18248_v20 }
 0x326   : > { %13428 = vrot.lane.b32.xlu0 %v21628_v59, %s14809_s24  ;;  %v18385_v3 = vpop.permute.xlu1 %13148  ;;  %v4740_v49 = vsel %vm4701_vm7, %v4688_v0, %v13025_v28  ;;  %v13070_v59 = vunpack.i.l.bf16 %v18221_v58  ;;  %v4790_v33 = vsel %vm4753_vm8, %v4738_v52, %v13030_v21  ;;  %v4793_v28 = vsel %vm4753_vm8, %v4741_v27, %v13046_v31 }
 0x327   : > { %v18395_v16 = vpop.permute.xlu0 %13153  ;;  %v4842_v19 = vsel %vm4805_vm9, %v4790_v33, %v13050_v41  ;;  %v4843_v0 = vsel %vm4805_vm9, %v4791_v40, %v13051_v10  ;;  %v13085_v21 = vunpack.i.l.bf16 %v18256_v32  ;;  %v4845_v15 = vsel %vm4805_vm9, %v4793_v28, %v13066_v30  ;;  %v18440_v41 = vpop.f32.mrf.mxu0 }
 0x328   : > { %2401 = vrot.lane.b32.xlu1 %v18060_v12, %s14809_s24  ;;  %v4894_v31 = vsel %vm4857_vm4, %v4842_v19, %v13070_v59  ;;  %v13091_v20 = vunpack.i.h.bf16 %v18266_v48  ;;  %v4895_v52 = vsel %vm4857_vm4, %v4843_v0, %v13071_v36  ;;  %v13096_v32 = vunpack.i.h.bf16 %v18273_v34  ;;  %s21649_s24 = smov 56  }
 0x329   : > { %v13095_v10 = vunpack.i.l.bf16 %v18273_v34  ;;  %v13110_v27 = vunpack.i.l.bf16 %v18299_v63  ;;  %v4946_v30 = vsel %vm4909_vm10, %v4894_v31, %v13085_v21  ;;  %v4947_v59 = vsel %vm4909_vm10, %v4895_v52, %v13086_v23 }
 0x32a   : > { %13433 = vrot.lane.b32.xlu0 %v18054_v53, %s21435_s25  ;;  %v18411_v12 = vpop.permute.xlu1 %13158  ;;  %v4792_v53 = vsel %vm4753_vm8, %v4740_v49, %v13045_v17  ;;  %v13090_v17 = vunpack.i.l.bf16 %v18266_v48  ;;  %v13105_v49 = vunpack.i.l.bf16 %v18289_v1  ;;  %v13111_v48 = vunpack.i.h.bf16 %v18299_v63 }
 0x32b   : > { %v18421_v55 = vpop.permute.xlu0 %13163  ;;  %v4844_v58 = vsel %vm4805_vm9, %v4792_v53, %v13065_v14  ;;  %v4897_v14 = vsel %vm4857_vm4, %v4845_v15, %v13081_v61  ;;  %v13131_v33 = vunpack.i.h.bf16 %v18324_v47  ;;  %v13130_v34 = vunpack.i.l.bf16 %v18324_v47  ;;  %v18468_v53 = vpop.f32.mrf.mxu0 }
 0x32c   : > { %13438 = vrot.lane.b32.xlu1 %v13437_v8, %s21435_s25  ;;  %v4896_v35 = vsel %vm4857_vm4, %v4844_v58, %v13080_v18  ;;  %v4949_v36 = vsel %vm4909_vm10, %v4897_v14, %v13091_v20  ;;  %v13151_v63 = vunpack.i.h.bf16 %v18385_v3  ;;  %v13150_v18 = vunpack.i.l.bf16 %v18385_v3 }
 0x32d   : > { %v4948_v40 = vsel %vm4909_vm10, %v4896_v35, %v13090_v17  ;;  %v4998_v28 = vsel %vm4961_vm11, %v4946_v30, %v13095_v10  ;;  %v4999_v47 = vsel %vm4961_vm11, %v4947_v59, %v13096_v32  ;;  %v13126_v23 = vunpack.i.h.bf16 %v18315_v22  ;;  %v18490_v52 = vpop.f32.mrf.mxu0 }
 0x32e   : > { %13443 = vrot.lane.b32.xlu0 %v18072_v50, %s14811_s26  ;;  %v13169_v8 = vpop.permute.xlu1 %13168  ;;  %v5000_v0 = vsel %vm4961_vm11, %v4948_v40, %v13105_v49  ;;  %v5050_v3 = vsel %vm5013_vm12, %v4998_v28, %v13110_v27  ;;  %v5051_v58 = vsel %vm5013_vm12, %v4999_v47, %v13111_v48  ;;  %v13125_v21 = vunpack.i.l.bf16 %v18315_v22  ;;  %v1278_v40 = vld [vmem:[#allocation2 + $0x260] sm:$0xff] }
 0x32f   : > { %v18446_v50 = vpop.permute.xlu0 %13173  ;;  %v13171_v19 = vunpack.i.h.bf16 %v13169_v8  ;;  %v13170_v61 = vunpack.i.l.bf16 %v13169_v8  ;;  %v5102_v8 = vsel %vm5065_vm13, %v5050_v3, %v13130_v34  ;;  %v5103_v15 = vsel %vm5065_vm13, %v5051_v58, %v13131_v33 }
 0x330   : > { %2809 = vrot.lane.b32.xlu1 %v18214_v39, %s14811_s26  ;;  %v5154_v26 = vsel %vm5117_vm14, %v5102_v8, %v13150_v18  ;;  %v5155_v31 = vsel %vm5117_vm14, %v5103_v15, %v13151_v63  ;;  %v13146_v22 = vunpack.i.h.bf16 %v18364_v37  ;;  %v13145_v35 = vunpack.i.l.bf16 %v18364_v37  ;;  %v1279_v63 = vld [vmem:[#allocation2 + $0x268] sm:$0xff]  ;;  %v18513_v18 = vpop.f32.mrf.mxu0  ;;  %s21443_s26 = smov 64  }
 0x331   : > { %v5206_v32 = vsel %vm5169_vm15, %v5154_v26, %v13170_v61  ;;  %v5207_v10 = vsel %vm5169_vm15, %v5155_v31, %v13171_v19  ;;  %v13166_v43 = vunpack.i.h.bf16 %v18421_v55  ;;  %v13165_v46 = vunpack.i.l.bf16 %v18421_v55  ;;  %v1329_v15 = vld [vmem:[#allocation2 + $0x261] sm:$0xff] }
 0x332   : > { %13448 = vrot.lane.b32.xlu0 %v13447_v24, %s21437_s27  ;;  %v18462_v39 = vpop.permute.xlu1 %13178  ;;  %v13106_v24 = vunpack.i.h.bf16 %v18289_v1  ;;  %v21631_v59 = vpack.i.bf16 %v18278_v29, %v18271_v7  ;;  %v5052_v34 = vsel %vm5013_vm12, %v5000_v0, %v13125_v21  ;;  %v21632_v7 = vpack.i.bf16 %v18354_v45, %v18280_v60  ;;  %v18524_v0 = vpop.f32.mrf.mxu0 }
 0x333   : > { %v13184_v51 = vpop.permute.xlu0 %13183  ;;  %v21633_v60 = vpack.i.bf16 %v18294_v4, %v18287_v5 }
 0x334   : > { %13453 = vrot.lane.b32.xlu1 %v21629_v42, %s21437_s27  ;;  %v5001_v27 = vsel %vm4961_vm11, %v4949_v36, %v13106_v24  ;;  %v13186_v37 = vunpack.i.h.bf16 %v13184_v51  ;;  %v13185_v30 = vunpack.i.l.bf16 %v13184_v51  ;;  %v5104_v36 = vsel %vm5065_vm13, %v5052_v34, %v13145_v35  ;;  %v1280_v42 = vld [vmem:[#allocation2 + $0x270] sm:$0xff]  ;;  %v6208_v24 = vld [vmem:[#allocation3 + $0x1a] sm:$0xff] }
 0x335   : > { %v5053_v55 = vsel %vm5013_vm12, %v5001_v27, %v13126_v23  ;;  %v5156_v29 = vsel %vm5117_vm14, %v5104_v36, %v13165_v46  ;;  %v13477_v23 = vpack.i.bf16 %v1279_v63, %v1278_v40  ;;  %v13482_v31 = vpack.i.bf16 %v6208_v24, %v1280_v42  ;;  %v1432_v27 = vld [vmem:[#allocation2 + $0x26b] sm:$0xff]  ;;  %v1433_v63 = vld [vmem:[#allocation2 + $0x273] sm:$0xff]  ;;  %v21635_v24 = vld [vmem:[#allocation24_spill] sm:$0xff] }
 0x336   : > { %13458 = vrot.lane.b32.xlu0 %v21630_v62, %s14813_s28  ;;  %v13189_v1 = vpop.permute.xlu1 %13188  ;;  %v5105_v28 = vsel %vm5065_vm13, %v5053_v55, %v13146_v22  ;;  %v5208_v3 = vsel %vm5169_vm15, %v5156_v29, %v13185_v30  ;;  %v1330_v62 = vld [vmem:[#allocation2 + $0x269] sm:$0xff] }
 0x337   : > { %v13191_v20 = vunpack.i.h.bf16 %v13189_v1  ;;  %v13190_v17 = vunpack.i.l.bf16 %v13189_v1  ;;  %v18496_v14 = vpop.permute.xlu0 %13193  ;;  %v5157_v19 = vsel %vm5117_vm14, %v5105_v28, %v13166_v43  ;;  %v13487_v4 = vpack.i.bf16 %v1330_v62, %v1329_v15  ;;  %v1381_v22 = vld [vmem:[#allocation2 + $0x26a] sm:$0xff] }
 0x338   : > { %3217 = vrot.lane.b32.xlu1 %v18263_v54, %s14813_s28  ;;  %v5209_v58 = vsel %vm5169_vm15, %v5157_v19, %v13186_v37  ;;  %v657_v42 = vld [vmem:[#allocation2 + $0x1b0] sm:$0xff]  ;;  %s21433_s28 = smov 72  }
 0x339   : > { %v5258_v49 = vsel %vm5221_vm1, %v5206_v32, %v13190_v17  ;;  %v5259_v48 = vsel %vm5221_vm1, %v5207_v10, %v13191_v20  ;;  %v18540_v20 = vpop.f32.mrf.mxu0  ;;  %v1380_v17 = vld [vmem:[#allocation2 + $0x262] sm:$0xff]  ;;  %v1331_v32 = vld [vmem:[#allocation2 + $0x271] sm:$0xff] }
 0x33a   : > { %13463 = vrot.lane.b32.xlu0 %v21631_v59, %s21439_s15  ;;  %v18509_v33 = vpop.permute.xlu1 %13198  ;;  %v5291_v54 = vpack.c.bf16 %v5259_v48, %v5258_v49  ;;  %v1382_v10 = vld [vmem:[#allocation2 + $0x272] sm:$0xff]  ;;  %v13492_v49 = vpack.i.bf16 %v1381_v22, %v1380_v17  ;;  %v1431_v48 = vld [vmem:[#allocation2 + $0x263] sm:$0xff]  ;;  %v13101_v22 = vunpack.i.h.bf16 %v18283_v9 }
 0x33b   : > { %v13204_v47 = vpop.permute.xlu0 %13203  ;;  %v18549_v43 = vpop.f32.mrf.mxu0  ;;  %v13502_v34 = vpack.i.bf16 %v1432_v27, %v1431_v48 }
 0x33c   : > { %13468 = vrot.lane.b32.xlu1 %v21632_v7, %s21439_s15  ;;  %11497 = vmatprep.mubr.msk.bf16.mxu0 %vm5331_vm5, %v5291_v54  ;;  %v13206_v61 = vunpack.i.h.bf16 %v13204_v47  ;;  %v13205_v51 = vunpack.i.l.bf16 %v13204_v47  ;;  %v21634_v7 = vld [vmem:[#allocation23_spill] sm:$0xff] }
 0x33d   : > { %v18557_v59 = vpop.f32.mrf.mxu0  ;;  %v11701_v29 = vunpack.i.h.bf16 %v21634_v7  ;;  %v11700_v19 = vunpack.i.l.bf16 %v21634_v7 }
 0x33e   : > { %13473 = vrot.lane.b32.xlu0 %v21633_v60, %s14815_s16  ;;  %v18532_v45 = vpop.permute.xlu1 %13208  ;;  %v5260_v21 = vsel %vm5221_vm1, %v5208_v3, %v13205_v51  ;;  %v5261_v8 = vsel %vm5221_vm1, %v5209_v58, %v13206_v61  ;;  %v656_v51 = vld [vmem:[#allocation2 + $0x1a8] sm:$0xff]  ;;  %v11706_v3 = vunpack.i.h.bf16 %v21635_v24  ;;  %v11705_v58 = vunpack.i.l.bf16 %v21635_v24  ;;  %v658_v60 = vld [vmem:[#allocation2 + $0x1c0] sm:$0xff] }
 0x33f   : > { %v18536_v1 = vpop.permute.xlu0 %13213  ;;  %v5292_v26 = vpack.c.bf16 %v5261_v8, %v5260_v21  ;;  %v18562_v55 = vpop.f32.mrf.mxu0  ;;  %v21636_v21 = vld [vmem:[#allocation46_spill] sm:$0xff] }
 0x340   : > { %3625 = vrot.lane.b32.xlu1 %v18296_v13, %s14815_s16  ;;  %v6228_v13 = vld [vmem:[#allocation3 + $0x1b] sm:$0xff]  ;;  %v11826_v8 = vunpack.i.h.bf16 %v21636_v21  ;;  %v11825_v15 = vunpack.i.l.bf16 %v21636_v21  ;;  %s21441_s16 = smov 80  }
 0x341   : > { %11498 = vmatmul.mubr.msk.bf16.gmra.mxu0 %vm5331_vm5, %v5292_v26  ;;  %v13497_v30 = vpack.i.bf16 %v6228_v13, %v1382_v10  ;;  %v18570_v28 = vpop.f32.mrf.mxu0  ;;  %v4534_v10 = vsel %vm469_vm0, %v656_v51, %v11700_v19  ;;  %v13100_v13 = vunpack.i.l.bf16 %v18283_v9  ;;  %v13121_v9 = vunpack.i.h.bf16 %v18309_v56 }
 0x342   : > { %13478 = vrot.lane.b32.xlu0 %v13477_v23, %s21431_s17  ;;  %v18543_v5 = vpop.permute.xlu1 %13218  ;;  %v659_v23 = vld [vmem:[#allocation2 + $0x1c8] sm:$0xff]  ;;  %v4586_v7 = vsel %vm4545_vm2, %v4534_v10, %v11825_v15  ;;  %v13135_v19 = vunpack.i.l.bf16 %v18332_v11  ;;  %v13161_v10 = vunpack.i.h.bf16 %v18411_v12 }
 0x343   : > { %v18546_v35 = vpop.permute.xlu0 %13223  ;;  %v18583_v62 = vpop.f32.mrf.mxu0  ;;  %v4537_v27 = vsel %vm469_vm0, %v659_v23, %v11706_v3  ;;  %v4638_v23 = vsel %vm4597_vm6, %v4586_v7, %v13100_v13  ;;  %v13160_v13 = vunpack.i.l.bf16 %v18411_v12  ;;  %v13195_v12 = vunpack.i.l.bf16 %v18496_v14 }
 0x344   : > { %13483 = vrot.lane.b32.xlu1 %v13482_v31, %s21431_s17  ;;  %v21637_v31 = vld [vmem:[#allocation47_spill] sm:$0xff]  ;;  %s21647_s17 = smov 8  }
 0x345   : > { %v11830_v17 = vunpack.i.l.bf16 %v21637_v31 }
 0x346   : > { %13488 = vrot.lane.b32.xlu0 %v13487_v4, %s14817_s21  ;;  %v18552_v46 = vpop.permute.xlu1 %13228  ;;  %v11831_v4 = vunpack.i.h.bf16 %v21637_v31 }
 0x347   : > { %v18554_v37 = vpop.permute.xlu0 %13233 }
 0x348   : > { %4033 = vrot.lane.b32.xlu1 %v1331_v32, %s14817_s21  ;;  %v4535_v32 = vsel %vm469_vm0, %v657_v42, %v11701_v29  ;;  %v18602_v42 = vpop.f32.mrf.mxu0  ;;  %v4589_v3 = vsel %vm4545_vm2, %v4537_v27, %v11831_v4  ;;  %v13176_v27 = vunpack.i.h.bf16 %v18446_v50  ;;  %s21648_s21 = smov 48  }
 0x349   : > { %v4587_v29 = vsel %vm4545_vm2, %v4535_v32, %v11826_v8  ;;  %v13140_v8 = vunpack.i.l.bf16 %v18350_v38 }
 0x34a   : > { %13493 = vrot.lane.b32.xlu0 %v13492_v49, %s21429_s23  ;;  %v18560_v54 = vpop.permute.xlu1 %13238  ;;  %v13115_v49 = vunpack.i.l.bf16 %v18303_v25 }
 0x34b   : > { %v18564_v40 = vpop.permute.xlu0 %13243 }
 0x34c   : > { %13498 = vrot.lane.b32.xlu1 %v13497_v30, %s21429_s23  ;;  %v4536_v30 = vsel %vm469_vm0, %v658_v60, %v11705_v58  ;;  %v13136_v58 = vunpack.i.h.bf16 %v18332_v11  ;;  %v18612_v60 = vpop.f32.mrf.mxu0  ;;  %v13155_v11 = vunpack.i.l.bf16 %v18395_v16  ;;  %s21460_s23 = smov 88  }
 0x34d   : > { %v4588_v24 = vsel %vm4545_vm2, %v4536_v30, %v11830_v17  ;;  %v13156_v17 = vunpack.i.h.bf16 %v18395_v16  ;;  %v13175_v30 = vunpack.i.l.bf16 %v18446_v50  ;;  %v13196_v50 = vunpack.i.h.bf16 %v18496_v14 }
 0x34e   : > { %13503 = vrot.lane.b32.xlu0 %v13502_v34, %s14819_s22  ;;  %v18568_v36 = vpop.permute.xlu1 %13248  ;;  %v13116_v34 = vunpack.i.h.bf16 %v18303_v25  ;;  %v4639_v25 = vsel %vm4597_vm6, %v4587_v29, %v13101_v22  ;;  %v4640_v21 = vsel %vm4597_vm6, %v4588_v24, %v13115_v49  ;;  %v13181_v29 = vunpack.i.h.bf16 %v18462_v39 }
 0x34f   : > { %v18572_v47 = vpop.permute.xlu0 %13253  ;;  %v4691_v22 = vsel %vm4649_vm3, %v4639_v25, %v13121_v9  ;;  %v4692_v32 = vsel %vm4649_vm3, %v4640_v21, %v13135_v19  ;;  %v13211_v14 = vunpack.i.h.bf16 %v18532_v45 }
 0x350   : > { %4441 = vrot.lane.b32.xlu1 %v1433_v63, %s14819_s22  ;;  %v13120_v63 = vunpack.i.l.bf16 %v18309_v56  ;;  %v13141_v56 = vunpack.i.h.bf16 %v18350_v38  ;;  %v4641_v31 = vsel %vm4597_vm6, %v4589_v3, %v13116_v34  ;;  %v13180_v34 = vunpack.i.l.bf16 %v18462_v39  ;;  %s14827_s22 = smov 120  }
 0x351   : > { %v4693_v38 = vsel %vm4649_vm3, %v4641_v31, %v13136_v58  ;;  %v4744_v19 = vsel %vm4701_vm7, %v4692_v32, %v13155_v11  ;;  %v13200_v3 = vunpack.i.l.bf16 %v18509_v33  ;;  %v13210_v39 = vunpack.i.l.bf16 %v18532_v45 }
 0x352   : > { %v18577_v61 = vpop.permute.xlu1 %13258  ;;  %v4690_v4 = vsel %vm4649_vm3, %v4638_v23, %v13120_v63  ;;  %v18634_v63 = vpop.f32.mrf.mxu0  ;;  %v4743_v7 = vsel %vm4701_vm7, %v4691_v22, %v13141_v56  ;;  %v4745_v24 = vsel %vm4701_vm7, %v4693_v38, %v13156_v17  ;;  %v13201_v23 = vunpack.i.h.bf16 %v18509_v33 }
 0x353   : > { %v18585_v26 = vpop.permute.xlu0 %13263  ;;  %v4742_v16 = vsel %vm4701_vm7, %v4690_v4, %v13140_v8  ;;  %v4795_v58 = vsel %vm4753_vm8, %v4743_v7, %v13161_v10  ;;  %v4796_v56 = vsel %vm4753_vm8, %v4744_v19, %v13175_v30  ;;  %v4797_v8 = vsel %vm4753_vm8, %v4745_v24, %v13176_v27 }
 0x354   : > { %v4794_v25 = vsel %vm4753_vm8, %v4742_v16, %v13160_v13  ;;  %v18656_v4 = vpop.f32.mrf.mxu0  ;;  %v4847_v17 = vsel %vm4805_vm9, %v4795_v58, %v13181_v29  ;;  %v4848_v11 = vsel %vm4805_vm9, %v4796_v56, %v13195_v12  ;;  %v13216_v33 = vunpack.i.h.bf16 %v18536_v1 }
 0x355   : > { %v4846_v31 = vsel %vm4805_vm9, %v4794_v25, %v13180_v34  ;;  %v13215_v22 = vunpack.i.l.bf16 %v18536_v1  ;;  %v4849_v10 = vsel %vm4805_vm9, %v4797_v8, %v13196_v50  ;;  %v13221_v38 = vunpack.i.h.bf16 %v18543_v5 }
 0x356   : > { %v18594_v48 = vpop.permute.xlu1 %13268  ;;  %v4898_v13 = vsel %vm4857_vm4, %v4846_v31, %v13200_v3  ;;  %v13220_v27 = vunpack.i.l.bf16 %v18543_v5  ;;  %v4899_v45 = vsel %vm4857_vm4, %v4847_v17, %v13201_v23  ;;  %v4900_v30 = vsel %vm4857_vm4, %v4848_v11, %v13210_v39  ;;  %v18676_v24 = vpop.f32.mrf.mxu0 }
 0x357   : > { %v18606_v51 = vpop.permute.xlu0 %13273  ;;  %v13226_v34 = vunpack.i.h.bf16 %v18546_v35  ;;  %v13225_v16 = vunpack.i.l.bf16 %v18546_v35  ;;  %v4901_v1 = vsel %vm4857_vm4, %v4849_v10, %v13211_v14  ;;  %v13235_v29 = vunpack.i.l.bf16 %v18554_v37 }
 0x358   : > { %v13241_v12 = vunpack.i.h.bf16 %v18560_v54  ;;  %v13240_v19 = vunpack.i.l.bf16 %v18560_v54  ;;  %v4950_v5 = vsel %vm4909_vm10, %v4898_v13, %v13215_v22  ;;  %v4951_v50 = vsel %vm4909_vm10, %v4899_v45, %v13216_v33  ;;  %v18688_v56 = vpop.f32.mrf.mxu0 }
 0x359   : > { %v13261_v3 = vunpack.i.h.bf16 %v18577_v61  ;;  %v13260_v35 = vunpack.i.l.bf16 %v18577_v61  ;;  %v4952_v58 = vsel %vm4909_vm10, %v4900_v30, %v13220_v27  ;;  %v4953_v23 = vsel %vm4909_vm10, %v4901_v1, %v13221_v38 }
 0x35a   : > { %v18618_v15 = vpop.permute.xlu1 %13278  ;;  %v5002_v8 = vsel %vm4961_vm11, %v4950_v5, %v13225_v16  ;;  %v5003_v31 = vsel %vm4961_vm11, %v4951_v50, %v13226_v34  ;;  %v13236_v61 = vunpack.i.h.bf16 %v18554_v37  ;;  %v5004_v33 = vsel %vm4961_vm11, %v4952_v58, %v13235_v29  ;;  %v18702_v16 = vpop.f32.mrf.mxu0 }
 0x35b   : > { %v18628_v49 = vpop.permute.xlu0 %13283  ;;  %v13281_v39 = vunpack.i.h.bf16 %v18618_v15  ;;  %v13280_v54 = vunpack.i.l.bf16 %v18618_v15  ;;  %v5054_v22 = vsel %vm5013_vm12, %v5002_v8, %v13240_v19  ;;  %v5055_v10 = vsel %vm5013_vm12, %v5003_v31, %v13241_v12  ;;  %v21638_v31 = vld [vmem:[#allocation25_spill] sm:$0xff] }
 0x35c   : > { %v13256_v13 = vunpack.i.h.bf16 %v18572_v47  ;;  %v13255_v15 = vunpack.i.l.bf16 %v18572_v47  ;;  %v5106_v38 = vsel %vm5065_vm13, %v5054_v22, %v13260_v35  ;;  %v5107_v27 = vsel %vm5065_vm13, %v5055_v10, %v13261_v3 }
 0x35d   : > { %v5159_v30 = vsel %vm5117_vm14, %v5107_v27, %v13281_v39  ;;  %v13276_v1 = vunpack.i.h.bf16 %v18606_v51  ;;  %v13275_v29 = vunpack.i.l.bf16 %v18606_v51  ;;  %v5005_v58 = vsel %vm4961_vm11, %v4953_v23, %v13236_v61 }
 0x35e   : > { %v18640_v9 = vpop.permute.xlu1 %13288  ;;  %v5056_v22 = vsel %vm5013_vm12, %v5004_v33, %v13255_v15  ;;  %v5057_v10 = vsel %vm5013_vm12, %v5005_v58, %v13256_v13  ;;  %v660_v13 = vld [vmem:[#allocation2 + $0x1d0] sm:$0xff] }
 0x35f   : > { %v18650_v21 = vpop.permute.xlu0 %13293  ;;  %v5108_v23 = vsel %vm5065_vm13, %v5056_v22, %v13275_v29  ;;  %v663_v58 = vld [vmem:[#allocation2 + $0x1f0] sm:$0xff] }
 0x360   : > { %v13296_v5 = vunpack.i.h.bf16 %v18650_v21  ;;  %v13295_v50 = vunpack.i.l.bf16 %v18650_v21  ;;  %v21639_v21 = vld [vmem:[#allocation26_spill] sm:$0xff] }
 0x361   : > { %v11715_v27 = vunpack.i.l.bf16 %v21639_v21 }
 0x362   : > { %v13299_v32 = vpop.permute.xlu1 %13298 }
 0x363   : > { %v18670_v7 = vpop.permute.xlu0 %13303  ;;  %v13301_v14 = vunpack.i.h.bf16 %v13299_v32  ;;  %v13300_v17 = vunpack.i.l.bf16 %v13299_v32  ;;  %v5158_v32 = vsel %vm5117_vm14, %v5106_v38, %v13280_v54  ;;  %v11716_v38 = vunpack.i.h.bf16 %v21639_v21 }
 0x365   : > { %v5210_v12 = vsel %vm5169_vm15, %v5158_v32, %v13300_v17  ;;  %v5211_v47 = vsel %vm5169_vm15, %v5159_v30, %v13301_v14  ;;  %v11711_v17 = vunpack.i.h.bf16 %v21638_v31  ;;  %v11710_v14 = vunpack.i.l.bf16 %v21638_v31 }
 0x366   : > { %v18682_v25 = vpop.permute.xlu1 %13308  ;;  %v5160_v32 = vsel %vm5117_vm14, %v5108_v23, %v13295_v50 }
 0x367   : > { %v13314_v11 = vpop.permute.xlu0 %13313 }
 0x368   : > { %v13316_v39 = vunpack.i.h.bf16 %v13314_v11  ;;  %v13315_v54 = vunpack.i.l.bf16 %v13314_v11  ;;  %v5109_v11 = vsel %vm5065_vm13, %v5057_v10, %v13276_v1 }
 0x369   : > { %v5161_v30 = vsel %vm5117_vm14, %v5109_v11, %v13296_v5  ;;  %v13231_v11 = vunpack.i.h.bf16 %v18552_v46 }
 0x36a   : > { %v13319_v45 = vpop.permute.xlu1 %13318  ;;  %v5213_v29 = vsel %vm5169_vm15, %v5161_v30, %v13316_v39  ;;  %v4538_v39 = vsel %vm469_vm0, %v660_v13, %v11710_v14  ;;  %v13245_v14 = vunpack.i.l.bf16 %v18564_v40 }
 0x36b   : > { %v13321_v37 = vunpack.i.h.bf16 %v13319_v45  ;;  %v13320_v34 = vunpack.i.l.bf16 %v13319_v45  ;;  %v18708_v19 = vpop.permute.xlu0 %13323  ;;  %v18723_v45 = vpop.f32.mrf.mxu0 }
 0x36d   : > { %v5262_v3 = vsel %vm5221_vm1, %v5210_v12, %v13320_v34  ;;  %v5263_v35 = vsel %vm5221_vm1, %v5211_v47, %v13321_v37  ;;  %v661_v37 = vld [vmem:[#allocation2 + $0x1e0] sm:$0xff]  ;;  %v18740_v10 = vpop.f32.mrf.mxu0 }
 0x36e   : > { %v18715_v8 = vpop.permute.xlu1 %13328  ;;  %v5293_v51 = vpack.c.bf16 %v5263_v35, %v5262_v3  ;;  %v21640_v34 = vld [vmem:[#allocation48_spill] sm:$0xff]  ;;  %v5212_v3 = vsel %vm5169_vm15, %v5160_v32, %v13315_v54  ;;  %v662_v35 = vld [vmem:[#allocation2 + $0x1e8] sm:$0xff]  ;;  %v4539_v54 = vsel %vm469_vm0, %v661_v37, %v11711_v17  ;;  %v4541_v32 = vsel %vm469_vm0, %v663_v58, %v11716_v38 }
 0x36f   : > { %v13334_v61 = vpop.permute.xlu0 %13333  ;;  %v11836_v12 = vunpack.i.h.bf16 %v21640_v34  ;;  %v11835_v47 = vunpack.i.l.bf16 %v21640_v34  ;;  %v4540_v30 = vsel %vm469_vm0, %v662_v35, %v11715_v27  ;;  %v18752_v34 = vpop.f32.mrf.mxu0  ;;  %v13246_v17 = vunpack.i.h.bf16 %v18564_v40 }
 0x370   : > { %11501 = vmatprep.mubr.msk.bf16.mxu0 %vm5331_vm5, %v5293_v51  ;;  %v13336_v33 = vunpack.i.h.bf16 %v13334_v61  ;;  %v13335_v15 = vunpack.i.l.bf16 %v13334_v61  ;;  %v21641_v51 = vld [vmem:[#allocation49_spill] sm:$0xff]  ;;  %v13230_v61 = vunpack.i.l.bf16 %v18552_v46  ;;  %v13251_v46 = vunpack.i.h.bf16 %v18568_v36 }
 0x371   : > { %v11841_v31 = vunpack.i.h.bf16 %v21641_v51  ;;  %v11840_v22 = vunpack.i.l.bf16 %v21641_v51  ;;  %v13250_v38 = vunpack.i.l.bf16 %v18568_v36  ;;  %v13266_v37 = vunpack.i.h.bf16 %v18585_v26 }
 0x372   : > { %v18734_v1 = vpop.permute.xlu1 %13338  ;;  %v5264_v50 = vsel %vm5221_vm1, %v5212_v3, %v13335_v15  ;;  %v5265_v5 = vsel %vm5221_vm1, %v5213_v29, %v13336_v33  ;;  %v4590_v33 = vsel %vm4545_vm2, %v4538_v39, %v11835_v47  ;;  %v4591_v15 = vsel %vm4545_vm2, %v4539_v54, %v11836_v12 }
 0x373   : > { %v18742_v21 = vpop.permute.xlu0 %13343  ;;  %v5294_v23 = vpack.c.bf16 %v5265_v5, %v5264_v50  ;;  %v4592_v27 = vsel %vm4545_vm2, %v4540_v30, %v11840_v22  ;;  %v4593_v13 = vsel %vm4545_vm2, %v4541_v32, %v11841_v31  ;;  %v13265_v12 = vunpack.i.l.bf16 %v18585_v26  ;;  %v18775_v31 = vpop.f32.mrf.mxu0 }
 0x374   : > { %v4643_v29 = vsel %vm4597_vm6, %v4591_v15, %v13231_v11  ;;  %v4642_v35 = vsel %vm4597_vm6, %v4590_v33, %v13230_v61  ;;  %v13271_v40 = vunpack.i.h.bf16 %v18594_v48  ;;  %v13270_v58 = vunpack.i.l.bf16 %v18594_v48 }
 0x375   : > { %11502 = vmatmul.mubr.msk.bf16.gmra.mxu0 %vm5331_vm5, %v5294_v23  ;;  %v13286_v36 = vunpack.i.h.bf16 %v18628_v49  ;;  %v13285_v50 = vunpack.i.l.bf16 %v18628_v49  ;;  %v13291_v5 = vunpack.i.h.bf16 %v18640_v9  ;;  %v13290_v51 = vunpack.i.l.bf16 %v18640_v9 }
 0x376   : > { %v18754_v3 = vpop.permute.xlu1 %13348  ;;  %v4644_v22 = vsel %vm4597_vm6, %v4592_v27, %v13245_v14  ;;  %v4645_v23 = vsel %vm4597_vm6, %v4593_v13, %v13246_v17  ;;  %v4694_v54 = vsel %vm4649_vm3, %v4642_v35, %v13250_v38  ;;  %v4695_v48 = vsel %vm4649_vm3, %v4643_v29, %v13251_v46  ;;  %v18797_v27 = vpop.f32.mrf.mxu0 }
 0x377   : > { %v18765_v47 = vpop.permute.xlu0 %13353  ;;  %v4696_v39 = vsel %vm4649_vm3, %v4644_v22, %v13265_v12  ;;  %v4697_v49 = vsel %vm4649_vm3, %v4645_v23, %v13266_v37  ;;  %v13306_v11 = vunpack.i.h.bf16 %v18670_v7  ;;  %v13305_v9 = vunpack.i.l.bf16 %v18670_v7 }
 0x378   : > { %v4746_v32 = vsel %vm4701_vm7, %v4694_v54, %v13270_v58  ;;  %v4747_v30 = vsel %vm4701_vm7, %v4695_v48, %v13271_v40  ;;  %v13311_v33 = vunpack.i.h.bf16 %v18682_v25  ;;  %v13310_v15 = vunpack.i.l.bf16 %v18682_v25  ;;  %v18813_v22 = vpop.f32.mrf.mxu0 }
 0x379   : > { %v4748_v17 = vsel %vm4701_vm7, %v4696_v39, %v13285_v50  ;;  %v4749_v14 = vsel %vm4701_vm7, %v4697_v49, %v13286_v36  ;;  %v4798_v46 = vsel %vm4753_vm8, %v4746_v32, %v13290_v51  ;;  %v4799_v38 = vsel %vm4753_vm8, %v4747_v30, %v13291_v5 }
 0x37a   : > { %v18777_v26 = vpop.permute.xlu1 %13358  ;;  %v13326_v13 = vunpack.i.h.bf16 %v18708_v19  ;;  %v13325_v37 = vunpack.i.l.bf16 %v18708_v19  ;;  %v13331_v12 = vunpack.i.h.bf16 %v18715_v8  ;;  %v13330_v25 = vunpack.i.l.bf16 %v18715_v8 }
 0x37b   : > { %v4800_v29 = vsel %vm4753_vm8, %v4748_v17, %v13305_v9  ;;  %v4801_v35 = vsel %vm4753_vm8, %v4749_v14, %v13306_v11  ;;  %v13341_v40 = vunpack.i.h.bf16 %v18734_v1  ;;  %v13340_v58 = vunpack.i.l.bf16 %v18734_v1 }
 0x37c   : > { %v18787_v61 = vpop.permute.xlu0 %13363  ;;  %v4850_v50 = vsel %vm4805_vm9, %v4798_v46, %v13310_v15  ;;  %v4851_v5 = vsel %vm4805_vm9, %v4799_v38, %v13311_v33  ;;  %v13346_v51 = vunpack.i.h.bf16 %v18742_v21  ;;  %v13345_v19 = vunpack.i.l.bf16 %v18742_v21 }
 0x37d   : > { %v13351_v8 = vunpack.i.h.bf16 %v18754_v3  ;;  %v13350_v23 = vunpack.i.l.bf16 %v18754_v3  ;;  %v13356_v54 = vunpack.i.h.bf16 %v18765_v47  ;;  %v13355_v48 = vunpack.i.l.bf16 %v18765_v47 }
 0x37e   : > { %v18799_v7 = vpop.permute.xlu1 %13368  ;;  %v4852_v39 = vsel %vm4805_vm9, %v4800_v29, %v13325_v37  ;;  %v4853_v49 = vsel %vm4805_vm9, %v4801_v35, %v13326_v13  ;;  %v4902_v11 = vsel %vm4857_vm4, %v4850_v50, %v13330_v25  ;;  %v4903_v9 = vsel %vm4857_vm4, %v4851_v5, %v13331_v12 }
 0x37f   : > { %v4904_v21 = vsel %vm4857_vm4, %v4852_v39, %v13340_v58  ;;  %v4905_v32 = vsel %vm4857_vm4, %v4853_v49, %v13341_v40  ;;  %v13361_v30 = vunpack.i.h.bf16 %v18777_v26  ;;  %v13360_v3 = vunpack.i.l.bf16 %v18777_v26 }
 0x380   : > { %v13374_v36 = vpop.permute.xlu0 %13373  ;;  %v4954_v47 = vsel %vm4909_vm10, %v4902_v11, %v13345_v19  ;;  %v4955_v17 = vsel %vm4909_vm10, %v4903_v9, %v13346_v51  ;;  %v13366_v14 = vunpack.i.h.bf16 %v18787_v61  ;;  %v13365_v46 = vunpack.i.l.bf16 %v18787_v61 }
 0x381   : > { %v4956_v38 = vsel %vm4909_vm10, %v4904_v21, %v13350_v23  ;;  %v4957_v13 = vsel %vm4909_vm10, %v4905_v32, %v13351_v8  ;;  %v5006_v37 = vsel %vm4961_vm11, %v4954_v47, %v13355_v48  ;;  %v5007_v12 = vsel %vm4961_vm11, %v4955_v17, %v13356_v54 }
 0x382   : > { %v13379_v1 = vpop.permute.xlu1 %13378  ;;  %v13371_v29 = vunpack.i.h.bf16 %v18799_v7  ;;  %v13370_v35 = vunpack.i.l.bf16 %v18799_v7  ;;  %v13376_v40 = vunpack.i.h.bf16 %v13374_v36  ;;  %v13375_v58 = vunpack.i.l.bf16 %v13374_v36 }
 0x383   : > { %v5008_v50 = vsel %vm4961_vm11, %v4956_v38, %v13360_v3  ;;  %v5009_v61 = vsel %vm4961_vm11, %v4957_v13, %v13361_v30  ;;  %v13381_v5 = vunpack.i.h.bf16 %v13379_v1  ;;  %v13380_v51 = vunpack.i.l.bf16 %v13379_v1 }
 0x384   : > { %v13384_v33 = vpop.permute.xlu0 %13383  ;;  %v11491_v15 = vpop.f32.mrf.mxu0  ;;  %v5058_v23 = vsel %vm5013_vm12, %v5006_v37, %v13365_v46  ;;  %v5059_v54 = vsel %vm5013_vm12, %v5007_v12, %v13366_v14  ;;  %v5060_v21 = vsel %vm5013_vm12, %v5008_v50, %v13370_v35  ;;  %v5061_v1 = vsel %vm5013_vm12, %v5009_v61, %v13371_v29 }
 0x385   : > { %v13386_v48 = vunpack.i.h.bf16 %v13384_v33  ;;  %v13385_v39 = vunpack.i.l.bf16 %v13384_v33  ;;  %v5110_v32 = vsel %vm5065_vm13, %v5058_v23, %v13375_v58  ;;  %v5111_v30 = vsel %vm5065_vm13, %v5059_v54, %v13376_v40 }
 0x386   : > { %v13389_v25 = vpop.permute.xlu1 %13388  ;;  %v5556_v26 = vpop.f32.mrf.mxu0  ;;  %v5112_v3 = vsel %vm5065_vm13, %v5060_v21, %v13380_v51  ;;  %v5113_v33 = vsel %vm5065_vm13, %v5061_v1, %v13381_v5 }
 0x387   : > { %v13391_v49 = vunpack.i.h.bf16 %v13389_v25  ;;  %v13390_v11 = vunpack.i.l.bf16 %v13389_v25  ;;  %v5163_v38 = vsel %vm5117_vm14, %v5111_v30, %v13386_v48 }
 0x388   : > { %v13394_v19 = vpop.permute.xlu0 %13393  ;;  %v11492_v8 = vpop.f32.mrf.mxu0 }
 0x389   : > { %11136 = vmatprep.subr.mxu1 %v11492_v8  ;;  %v13396_v7 = vunpack.i.h.bf16 %v13394_v19  ;;  %v13395_v9 = vunpack.i.l.bf16 %v13394_v19  ;;  %v5164_v12 = vsel %vm5117_vm14, %v5112_v3, %v13390_v11  ;;  %v21646_v11 = vld [vmem:[#allocation50_spill] sm:$0xff] }
 0x38a   : > { %v13399_v36 = vpop.permute.xlu1 %13398  ;;  %11137 = vmatpush3.msra.mxu1 %v18583_v62  ;;  %v5559_v14 = vpop.f32.mrf.mxu0  ;;  %v5162_v62 = vsel %vm5117_vm14, %v5110_v32, %v13385_v39  ;;  %v664_v39 = vld [vmem:[#allocation2 + $0x200] sm:$0xff] }
 0x38b   : > { %11138 = vmatprep.subr.mxu1 %v11491_v15  ;;  %v13401_v47 = vunpack.i.h.bf16 %v13399_v36  ;;  %v13400_v17 = vunpack.i.l.bf16 %v13399_v36  ;;  %v5165_v15 = vsel %vm5117_vm14, %v5113_v33, %v13391_v49  ;;  %v5214_v25 = vsel %vm5169_vm15, %v5162_v62, %v13395_v9  ;;  %v665_v9 = vld [vmem:[#allocation2 + $0x208] sm:$0xff] }
 0x38c   : > { %v13404_v46 = vpop.permute.xlu0 %13403  ;;  %11139 = vmatpush3.msra.mxu1 %v18562_v55  ;;  %v5215_v29 = vsel %vm5169_vm15, %v5163_v38, %v13396_v7  ;;  %v11845_v7 = vunpack.i.l.bf16 %v21646_v11  ;;  %v11846_v36 = vunpack.i.h.bf16 %v21646_v11 }
 0x38d   : > { %v13406_v13 = vunpack.i.h.bf16 %v13404_v46  ;;  %v13405_v37 = vunpack.i.l.bf16 %v13404_v46  ;;  %11140 = vmatprep.subr.mxu1 %v5559_v14  ;;  %v5216_v61 = vsel %vm5169_vm15, %v5164_v12, %v13400_v17  ;;  %v5217_v5 = vsel %vm5169_vm15, %v5165_v15, %v13401_v47 }
 0x38e   : > { %v13409_v35 = vpop.permute.xlu1 %13408  ;;  %11141 = vmatpush3.msra.mxu1 %v18602_v42 }
 0x38f   : > { %v5266_v55 = vsel %vm5221_vm1, %v5214_v25, %v13405_v37  ;;  %v5267_v40 = vsel %vm5221_vm1, %v5215_v29, %v13406_v13  ;;  %v13411_v58 = vunpack.i.h.bf16 %v13409_v35  ;;  %v13410_v50 = vunpack.i.l.bf16 %v13409_v35  ;;  %11142 = vmatprep.subr.mxu1 %v5556_v26 }
 0x390   : > { %v18860_v51 = vpop.permute.xlu0 %13413  ;;  %11143 = vmatpush3.msra.mxu1 %v18570_v28  ;;  %v5295_v19 = vpack.c.bf16 %v5267_v40, %v5266_v55 }
 0x391   : > { %v5268_v8 = vsel %vm5221_vm1, %v5216_v61, %v13410_v50  ;;  %v5269_v42 = vsel %vm5221_vm1, %v5217_v5, %v13411_v58  ;;  %11144 = vmatprep.subr.mxu1 %v18797_v27  ;;  %v13416_v32 = vunpack.i.h.bf16 %v18860_v51  ;;  %v13415_v30 = vunpack.i.l.bf16 %v18860_v51 }
 0x392   : > { %v1994_v23 = vpop.permute.xlu1 %1993  ;;  %11505 = vmatprep.mubr.msk.bf16.mxu0 %vm5331_vm5, %v5295_v19  ;;  %11145 = vmatpush3.msra.mxu1 %v18549_v43  ;;  %v5296_v26 = vpack.c.bf16 %v5269_v42, %v5268_v8 }
 0x393   : > { %11146 = vmatprep.subr.mxu1 %v18752_v34 }
 0x394   : > { %v18869_v54 = vpop.permute.xlu0 %13418  ;;  %11506 = vmatmul.mubr.msk.bf16.gmra.mxu0 %vm5331_vm5, %v5296_v26  ;;  %11147 = vmatpush3.msra.mxu1 %v18524_v0 }
 0x395   : > { %11148 = vmatprep.subr.mxu1 %v18813_v22  ;;  %v21645_v22 = vld [vmem:[#allocation27_spill] sm:$0xff]  ;;  %v13421_v17 = vunpack.i.h.bf16 %v18869_v54  ;;  %v13420_v14 = vunpack.i.l.bf16 %v18869_v54 }
 0x396   : > { %v18874_v28 = vpop.permute.xlu1 %13423  ;;  %11149 = vmatpush3.msra.mxu1 %v18557_v59  ;;  %v11721_v49 = vunpack.i.h.bf16 %v21645_v22 }
 0x397   : > { %11150 = vmatprep.subr.mxu1 %v18775_v31 }
 0x398   : > { %v18878_v27 = vpop.permute.xlu0 %13428  ;;  %11151 = vmatpush3.msra.mxu1 %v18540_v20  ;;  %v4543_v62 = vsel %vm469_vm0, %v665_v9, %v11721_v49 }
 0x399   : > { %11152 = vmatprep.subr.mxu1 %v18723_v45  ;;  %v13431_v13 = vunpack.i.h.bf16 %v18878_v27  ;;  %v13430_v37 = vunpack.i.l.bf16 %v18878_v27  ;;  %v4595_v12 = vsel %vm4545_vm2, %v4543_v62, %v11846_v36 }
 0x39a   : > { %v2402_v43 = vpop.permute.xlu1 %2401  ;;  %11153 = vmatpush3.msra.mxu1 %v18490_v52  ;;  %v4647_v55 = vsel %vm4597_vm6, %v4595_v12, %v13416_v32 }
 0x39b   : > { %11154 = vmatprep.subr.mxu1 %v18688_v56  ;;  %v666_v56 = vld [vmem:[#allocation2 + $0x210] sm:$0xff]  ;;  %v4699_v5 = vsel %vm4649_vm3, %v4647_v55, %v13421_v17 }
 0x39c   : > { %v18884_v0 = vpop.permute.xlu0 %13433  ;;  %11155 = vmatpush3.msra.mxu1 %v18440_v41 }
 0x39d   : > { %11156 = vmatprep.subr.mxu1 %v18740_v10  ;;  %v13436_v15 = vunpack.i.h.bf16 %v18884_v0  ;;  %v13435_v25 = vunpack.i.l.bf16 %v18884_v0 }
 0x39e   : > { %v18888_v59 = vpop.permute.xlu1 %13438  ;;  %11157 = vmatpush3.msra.mxu1 %v18513_v18 }
 0x39f   : > { %11158 = vmatprep.subr.mxu1 %v18702_v16  ;;  %v21642_v16 = vld [vmem:[#allocation51_spill] sm:$0xff]  ;;  %v13440_v31 = vunpack.i.l.bf16 %v18888_v59 }
 0x3a0   : > { %v18892_v20 = vpop.permute.xlu0 %13443  ;;  %11159 = vmatpush3.msra.mxu1 %v18468_v53  ;;  %v11850_v53 = vunpack.i.l.bf16 %v21642_v16 }
 0x3a1   : > { %11160 = vmatprep.subr.mxu1 %v18656_v4  ;;  %v13446_v51 = vunpack.i.h.bf16 %v18892_v20  ;;  %v13445_v19 = vunpack.i.l.bf16 %v18892_v20 }
 0x3a2   : > { %v2810_v52 = vpop.permute.xlu1 %2809  ;;  %11161 = vmatpush3.msra.mxu1 %v18403_v57  ;;  %v13425_v57 = vunpack.i.l.bf16 %v18874_v28 }
 0x3a3   : > { %11162 = vmatprep.subr.mxu1 %v18612_v60  ;;  %v21643_v60 = vmov 0.0  }
 0x3a4   : > { %v18898_v41 = vpop.permute.xlu0 %13448  ;;  %11163 = vmatpush3.msra.mxu1 %v18344_v6  ;;  %v21644_v6 = vld [vmem:[#allocation28_spill] sm:$0xff] }
 0x3a5   : > { %11164 = vmatprep.subr.mxu1 %v18676_v24  ;;  %v4544_v24 = vsel %vm469_vm0, %v666_v56, %v21644_v6  ;;  %v13451_v26 = vunpack.i.h.bf16 %v18898_v41  ;;  %v13450_v54 = vunpack.i.l.bf16 %v18898_v41 }
 0x3a6   : > { %v18902_v18 = vpop.permute.xlu1 %13453  ;;  %11165 = vmatpush3.msra.mxu1 %v18428_v2  ;;  %v4596_v10 = vsel %vm4545_vm2, %v4544_v24, %v11850_v53 }
 0x3a7   : > { %11166 = vmatprep.subr.mxu1 %v18634_v63  ;;  %v4648_v2 = vsel %vm4597_vm6, %v4596_v10, %v1994_v23  ;;  %v13455_v33 = vunpack.i.l.bf16 %v18902_v18  ;;  %v4751_v23 = vsel %vm4701_vm7, %v4699_v5, %v13431_v13 }
 0x3a8   : > { %v18907_v4 = vpop.permute.xlu0 %13458  ;;  %11167 = vmatpush3.msra.mxu1 %v18377_v44  ;;  %v4700_v63 = vsel %vm4649_vm3, %v4648_v2, %v13425_v57  ;;  %v11720_v44 = vunpack.i.l.bf16 %v21645_v22 }
 0x3a9   : > { %5854 = vmatprep.subr.mxu1 %v21643_v60  ;;  %v4752_v21 = vsel %vm4701_vm7, %v4700_v63, %v2402_v43  ;;  %v4803_v43 = vsel %vm4753_vm8, %v4751_v23, %v13436_v15  ;;  %v13460_v0 = vunpack.i.l.bf16 %v18907_v4  ;;  %v13461_v20 = vunpack.i.h.bf16 %v18907_v4  ;;  %v5654_v23 = vld [vmem:[%s21355_s11 + $0x20] sm:$0xff] }
 0x3aa   : > { %v3218_v45 = vpop.permute.xlu1 %3217  ;;  %v4804_v3 = vsel %vm4753_vm8, %v4752_v21, %v13440_v31  ;;  %v4542_v47 = vsel %vm469_vm0, %v664_v39, %v11720_v44  ;;  %v4855_v41 = vsel %vm4805_vm9, %v4803_v43, %v13446_v51  ;;  %v5651_v51 = vld [vmem:[%s21355_s11 + $0x8] sm:$0xff]  ;;  %v5662_v43 = vld [vmem:[%s21355_s11 + $0x60] sm:$0xff]  ;;  %vm6009_vm0 = vcmask 59392  }
 0x3ab   : > { %v4594_v38 = vsel %vm4545_vm2, %v4542_v47, %v11845_v7  ;;  %v4856_v29 = vsel %vm4805_vm9, %v4804_v3, %v2810_v52  ;;  %v4907_v31 = vsel %vm4857_vm4, %v4855_v41, %v13451_v26  ;;  %5798 = vmatprep.mubr.f32.mxu1 %v5651_v51  ;;  %v5659_v26 = vld [vmem:[%s21355_s11 + $0x48] sm:$0xff]  ;;  %v5681_v51 = vld [vmem:[%s21355_s11 + $0xf8] sm:$0xff]  ;;  %6010 = vst.msk [vmem:[#allocation3 + $0x10] sm:$0x7] %vm6009_vm0, %v21643_v60  ;;  %6013 = vst.msk [vmem:[#allocation3 + $0x28] sm:$0x7] %vm6009_vm0, %v21643_v60 }
 0x3ac   : > { %v18916_v34 = vpop.permute.xlu0 %13463  ;;  %v4646_v40 = vsel %vm4597_vm6, %v4594_v38, %v13415_v30  ;;  %v4908_v58 = vsel %vm4857_vm4, %v4856_v29, %v13455_v33  ;;  %v4959_v9 = vsel %vm4909_vm10, %v4907_v31, %v13461_v20  ;;  %v5670_v20 = vld [vmem:[%s21355_s11 + $0xa0] sm:$0xff]  ;;  %v5683_v41 = vld [vmem:[%s21355_s11 + $0x108] sm:$0xff]  ;;  %6016 = vst.msk [vmem:[#allocation3 + $0x40] sm:$0x7] %vm6009_vm0, %v21643_v60  ;;  %6019 = vst.msk [vmem:[#allocation3 + $0x58] sm:$0x7] %vm6009_vm0, %v21643_v60 }
 0x3ad   : > { %v4698_v61 = vsel %vm4649_vm3, %v4646_v40, %v13420_v14  ;;  %v4960_v52 = vsel %vm4909_vm10, %v4908_v58, %v3218_v45  ;;  %v13465_v53 = vunpack.i.l.bf16 %v18916_v34  ;;  %v13466_v10 = vunpack.i.h.bf16 %v18916_v34  ;;  %v5690_v31 = vld [vmem:[%s21355_s11 + $0x140] sm:$0x1]  ;;  %6022 = vst.msk [vmem:[#allocation3 + $0x70] sm:$0x7] %vm6009_vm0, %v21643_v60  ;;  %6025 = vst.msk [vmem:[#allocation3 + $0x88] sm:$0x7] %vm6009_vm0, %v21643_v60 }
 0x3ae   : > { %v18921_v48 = vpop.permute.xlu1 %13468  ;;  %v4750_v42 = vsel %vm4701_vm7, %v4698_v61, %v13430_v37  ;;  %6028 = vst.msk [vmem:[#allocation3 + $0xa0] sm:$0x7] %vm6009_vm0, %v21643_v60  ;;  %6031 = vst.msk [vmem:[#allocation3 + $0xb8] sm:$0x7] %vm6009_vm0, %v21643_v60 }
 0x3af   : > { %v13470_v50 = vunpack.i.l.bf16 %v18921_v48  ;;  %v4802_v27 = vsel %vm4753_vm8, %v4750_v42, %v13435_v25  ;;  %v5011_v32 = vsel %vm4961_vm11, %v4959_v9, %v13466_v10  ;;  %v5655_v42 = vld [vmem:[%s21355_s11 + $0x28] sm:$0xff]  ;;  %v5682_v10 = vld [vmem:[%s21355_s11 + $0x100] sm:$0xff]  ;;  %6034 = vst.msk [vmem:[#allocation3 + $0xd0] sm:$0x7] %vm6009_vm0, %v21643_v60  ;;  %6037 = vst.msk [vmem:[#allocation3 + $0xe8] sm:$0x7] %vm6009_vm0, %v21643_v60 }
 0x3b0   : > { %v18927_v1 = vpop.permute.xlu0 %13473  ;;  %v4854_v24 = vsel %vm4805_vm9, %v4802_v27, %v13445_v19  ;;  %v5650_v19 = vld [vmem:[%s21355_s11] sm:$0xff]  ;;  %v5663_v27 = vld [vmem:[%s21355_s11 + $0x68] sm:$0xff]  ;;  %6040 = vst.msk [vmem:[#allocation3 + $0x100] sm:$0x7] %vm6009_vm0, %v21643_v60  ;;  %6043 = vst.msk [vmem:[#allocation3 + $0x118] sm:$0x7] %vm6009_vm0, %v21643_v60 }
 0x3b1   : > { %v5012_v57 = vsel %vm4961_vm11, %v4960_v52, %v13470_v50  ;;  %v13475_v2 = vunpack.i.l.bf16 %v18927_v1  ;;  %v4906_v45 = vsel %vm4857_vm4, %v4854_v24, %v13450_v54  ;;  %v13476_v4 = vunpack.i.h.bf16 %v18927_v1  ;;  %5799 = vmatmul.mubr.f32.vlgmr.msra.gmra.mxu1 %v5650_v19  ;;  %v5658_v54 = vld [vmem:[%s21355_s11 + $0x40] sm:$0xff]  ;;  %v5680_v19 = vld [vmem:[%s21355_s11 + $0xf0] sm:$0xff]  ;;  %6046 = vst.msk [vmem:[#allocation3 + $0x130] sm:$0x7] %vm6009_vm0, %v21643_v60 }
 0x3b2   : > { %v3626_v46 = vpop.permute.xlu1 %3625  ;;  %v4958_v44 = vsel %vm4909_vm10, %v4906_v45, %v13460_v0  ;;  %5803 = vmatprep.mubr.f32.mxu1 %v5655_v42  ;;  %v5667_v0 = vld [vmem:[%s21355_s11 + $0x88] sm:$0xff]  ;;  %v5666_v52 = vld [vmem:[%s21355_s11 + $0x80] sm:$0xff]  ;;  %v5685_v42 = vld [vmem:[%s21355_s11 + $0x118] sm:$0xff]  ;;  %vm6049_vm9 = vcmask 57344   ;;  %vm6052_vm10 = vcmask 64513  }
 0x3b3   : > { %v5064_v39 = vsel %vm5013_vm12, %v5012_v57, %v3626_v46  ;;  %v5010_v34 = vsel %vm4961_vm11, %v4958_v44, %v13465_v53  ;;  %v5063_v47 = vsel %vm5013_vm12, %v5011_v32, %v13476_v4  ;;  %v5675_v53 = vld [vmem:[%s21355_s11 + $0xc8] sm:$0xff]  ;;  %v5674_v57 = vld [vmem:[%s21355_s11 + $0xc0] sm:$0xff]  ;;  %v5653_v4 = vld [vmem:[%s21355_s11 + $0x18] sm:$0xff] }
 0x3b4   : > { %v13479_v35 = vpop.permute.xlu0 %13478  ;;  %v5062_v30 = vsel %vm5013_vm12, %v5010_v34, %v13475_v2  ;;  %v5678_v24 = vld [vmem:[%s21355_s11 + $0xe0] sm:$0xff]  ;;  %v5687_v2 = vld [vmem:[%s21355_s11 + $0x128] sm:$0xff]  ;;  %vm6054_vm12 = vcmask 58368  }
 0x3b5   : > { %v13480_v22 = vunpack.i.l.bf16 %v13479_v35  ;;  %v13481_v49 = vunpack.i.h.bf16 %v13479_v35  ;;  %5804 = vmatmul.mubr.f32.gmra.mxu1 %v5654_v23  ;;  %v5691_v45 = vld [vmem:[%s21355_s11 + $0x148] sm:$0x1]  ;;  %v5684_v23 = vld [vmem:[%s21355_s11 + $0x110] sm:$0xff] }
 0x3b6   : > { %v18952_v8 = vpop.permute.xlu1 %13483  ;;  %5808 = vmatprep.mubr.f32.mxu1 %v5659_v26  ;;  %v5689_v26 = vld [vmem:[%s21355_s11 + $0x138] sm:$0xff] }
 0x3b7   : > { %v13485_v6 = vunpack.i.l.bf16 %v18952_v8  ;;  %v5114_v17 = vsel %vm5065_vm13, %v5062_v30, %v13480_v22  ;;  %v5115_v46 = vsel %vm5065_vm13, %v5063_v47, %v13481_v49 }
 0x3b8   : > { %v13489_v56 = vpop.permute.xlu0 %13488 }
 0x3b9   : > { %v13490_v11 = vunpack.i.l.bf16 %v13489_v56  ;;  %v13491_v36 = vunpack.i.h.bf16 %v13489_v56  ;;  %v5116_v21 = vsel %vm5065_vm13, %v5064_v39, %v13485_v6  ;;  %5809 = vmatmul.mubr.f32.gmra.mxu1 %v5658_v54  ;;  %v5671_v56 = vld [vmem:[%s21355_s11 + $0xa8] sm:$0xff]  ;;  %v5688_v54 = vld [vmem:[%s21355_s11 + $0x130] sm:$0xff] }
 0x3ba   : > { %v4034_v63 = vpop.permute.xlu1 %4033  ;;  %5813 = vmatprep.mubr.f32.mxu1 %v5663_v27  ;;  %v5679_v6 = vld [vmem:[%s21355_s11 + $0xe8] sm:$0xff]  ;;  %v5693_v27 = vld [vmem:[%s21355_s11 + $0x158] sm:$0x1] }
 0x3bb   : > { %v5166_v62 = vsel %vm5117_vm14, %v5114_v17, %v13490_v11  ;;  %v5168_v38 = vsel %vm5117_vm14, %v5116_v21, %v4034_v63  ;;  %v5167_v37 = vsel %vm5117_vm14, %v5115_v46, %v13491_v36  ;;  %v5686_v63 = vld [vmem:[%s21355_s11 + $0x120] sm:$0xff] }
 0x3bc   : > { %v13494_v7 = vpop.permute.xlu0 %13493 }
 0x3bd   : > { %v13496_v1 = vunpack.i.h.bf16 %v13494_v7  ;;  %v13495_v3 = vunpack.i.l.bf16 %v13494_v7  ;;  %5814 = vmatmul.mubr.f32.gmra.mxu1 %v5662_v43  ;;  %v5692_v43 = vld [vmem:[%s21355_s11 + $0x150] sm:$0x1] }
 0x3be   : > { %v18980_v33 = vpop.permute.xlu1 %13498  ;;  %5818 = vmatprep.mubr.f32.mxu1 %v5667_v0  ;;  %v6108_v0 = vld [vmem:[#allocation3 + $0x9] sm:$0xff] }
 0x3bf   : > { %v13500_v14 = vunpack.i.l.bf16 %v18980_v33  ;;  %v5218_v29 = vsel %vm5169_vm15, %v5166_v62, %v13495_v3  ;;  %v5219_v35 = vsel %vm5169_vm15, %v5167_v37, %v13496_v1  ;;  %v5657_v37 = vld [vmem:[%s21355_s11 + $0x38] sm:$0xff] }
 0x3c0   : > { %v13504_v13 = vpop.permute.xlu0 %13503 }
 0x3c1   : > { %v13506_v12 = vunpack.i.h.bf16 %v13504_v13  ;;  %v13505_v15 = vunpack.i.l.bf16 %v13504_v13  ;;  %v5220_v25 = vsel %vm5169_vm15, %v5168_v38, %v13500_v14  ;;  %5819 = vmatmul.mubr.f32.gmra.mxu1 %v5666_v52  ;;  %v5652_v13 = vld [vmem:[%s21355_s11 + $0x10] sm:$0xff]  ;;  %v6109_v52 = vld [vmem:[#allocation3 + $0x19] sm:$0xff] }
 0x3c2   : > { %v4442_v55 = vpop.permute.xlu1 %4441  ;;  %5823 = vmatprep.mubr.f32.mxu1 %v5671_v56  ;;  %v13507_v56 = vpack.i.bf16 %v6109_v52, %v6108_v0  ;;  %v6110_v0 = vld [vmem:[#allocation3 + $0x21] sm:$0xff] }
 0x3c3   : > { %v5270_v40 = vsel %vm5221_vm1, %v5218_v29, %v13505_v15  ;;  %v5271_v58 = vsel %vm5221_vm1, %v5219_v35, %v13506_v12  ;;  %v5272_v50 = vsel %vm5221_vm1, %v5220_v25, %v4442_v55  ;;  %v5656_v12 = vld [vmem:[%s21355_s11 + $0x30] sm:$0xff]  ;;  %v5661_v15 = vld [vmem:[%s21355_s11 + $0x58] sm:$0xff]  ;;  %vm6057_vm1 = vcmask 64514  }
 0x3c4   : > { %v5298_v61 = vpack.c.bf16 %v5272_v50, %v5272_v50  ;;  %v5297_v5 = vpack.c.bf16 %v5271_v58, %v5270_v40  ;;  %v5660_v25 = vld [vmem:[%s21355_s11 + $0x50] sm:$0xff]  ;;  %v5665_v29 = vld [vmem:[%s21355_s11 + $0x78] sm:$0xff]  ;;  %13508 = vrot.lane.b32.xlu0 %v13507_v56, %s21647_s17 }
 0x3c5   : > { %5824 = vmatmul.mubr.f32.gmra.mxu1 %v5670_v20  ;;  %v5664_v35 = vld [vmem:[%s21355_s11 + $0x70] sm:$0xff]  ;;  %v5669_v55 = vld [vmem:[%s21355_s11 + $0x98] sm:$0xff] }
 0x3c6   : > { %11509 = vmatprep.mubr.msk.bf16.mxu0 %vm5331_vm5, %v5297_v5  ;;  %5828 = vmatprep.mubr.f32.mxu1 %v5675_v53  ;;  %v5668_v40 = vld [vmem:[%s21355_s11 + $0x90] sm:$0xff]  ;;  %v5673_v58 = vld [vmem:[%s21355_s11 + $0xb8] sm:$0xff] }
 0x3c7   : > { %11510 = vmatmul.mubr.msk.bf16.gmra.mxu0 %vm5331_vm5, %v5298_v61  ;;  %v5672_v50 = vld [vmem:[%s21355_s11 + $0xb0] sm:$0xff]  ;;  %v5677_v61 = vld [vmem:[%s21355_s11 + $0xd8] sm:$0xff] }
 0x3c8   : > { %v5676_v5 = vld [vmem:[%s21355_s11 + $0xd0] sm:$0xff]  ;;  %v6129_v53 = vld [vmem:[#allocation3 + $0x1a] sm:$0xff] }
 0x3c9   : > { %5829 = vmatmul.mubr.f32.gmra.mxu1 %v5674_v57  ;;  %v6128_v20 = vld [vmem:[#allocation3 + $0xa] sm:$0xff] }
 0x3ca   : > { %5833 = vmatprep.mubr.f32.mxu1 %v5679_v6  ;;  %v13517_v57 = vpack.i.bf16 %v6129_v53, %v6128_v20  ;;  %v6148_v6 = vld [vmem:[#allocation3 + $0xb] sm:$0xff] }
 0x3cc   : > { %13518 = vrot.lane.b32.xlu0 %v13517_v57, %s21506_s20 }
 0x3cd   : > { %5834 = vmatmul.mubr.f32.gmra.mxu1 %v5678_v24  ;;  %v11495_v22 = vpop.f32.mrf.mxu0  ;;  %v6149_v24 = vld [vmem:[#allocation3 + $0x1b] sm:$0xff] }
 0x3ce   : > { %5838 = vmatprep.mubr.f32.mxu1 %v5683_v41  ;;  %v13527_v41 = vpack.i.bf16 %v6149_v24, %v6148_v6 }
 0x3cf   : > { %v5572_v44 = vpop.f32.mrf.mxu0 }
 0x3d0   : > { %13528 = vrot.lane.b32.xlu0 %v13527_v41, %s21435_s25 }
 0x3d1   : > { %5839 = vmatmul.mubr.f32.gmra.mxu1 %v5682_v10  ;;  %v11496_v39 = vpop.f32.mrf.mxu0 }
 0x3d2   : > { %5843 = vmatprep.mubr.f32.mxu1 %v5687_v2 }
 0x3d3   : > { %v5575_v49 = vpop.f32.mrf.mxu0 }
 0x3d5   : > { %5844 = vmatmul.mubr.f32.gmra.mxu1 %v5686_v63 }
 0x3d6   : > { %5848 = vmatprep.mubr.f32.mxu1 %v5691_v45 }
 0x3d9   : > { %5849 = vmatmul.mubr.f32.gmra.mxu1 %v5690_v31 }
 0x3da   : > { %10958 = vmatprep.mubr.msk.f32.mxu1 %vm4753_vm8, %v5653_v4 }
 0x401   : > { %v11499_v11 = vpop.f32.mrf.mxu0 }
 0x403   : > { %v5588_v7 = vpop.f32.mrf.mxu0 }
 0x405   : > { %v11500_v9 = vpop.f32.mrf.mxu0 }
 0x407   : > { %v5591_v34 = vpop.f32.mrf.mxu0 }
 0x435   : > { %v11503_v36 = vpop.f32.mrf.mxu0 }
 0x437   : > { %v5604_v21 = vpop.f32.mrf.mxu0 }
 0x439   : > { %v11504_v32 = vpop.f32.mrf.mxu0 }
 0x43b   : > { %v5607_v30 = vpop.f32.mrf.mxu0 }
 0x454   : > { %v11507_v1 = vpop.f32.mrf.mxu0 }
 0x456   : > { %v5620_v3 = vpop.f32.mrf.mxu0 }
 0x458   : > { %v11508_v47 = vpop.f32.mrf.mxu0 }
 0x459   : > { %5855 = vmatpush1.msra.mxu1 %v11508_v47 }
 0x45a   : > { %5856 = vmatprep.subr.mxu1 %v21643_v60  ;;  %v5623_v17 = vpop.f32.mrf.mxu0 }
 0x45b   : > { %5857 = vmatpush1.msra.mxu1 %v11507_v1 }
 0x45c   : > { %5858 = vmatprep.subr.mxu1 %v21643_v60 }
 0x45d   : > { %5859 = vmatpush1.msra.mxu1 %v5623_v17 }
 0x45e   : > { %5860 = vmatprep.subr.mxu1 %v21643_v60 }
 0x45f   : > { %5861 = vmatpush1.msra.mxu1 %v5620_v3 }
 0x460   : > { %5862 = vmatprep.subr.mxu1 %v21643_v60 }
 0x461   : > { %5863 = vmatpush1.msra.mxu1 %v11504_v32 }
 0x462   : > { %5864 = vmatprep.subr.mxu1 %v21643_v60 }
 0x463   : > { %5865 = vmatpush1.msra.mxu1 %v11503_v36 }
 0x464   : > { %5866 = vmatprep.subr.mxu1 %v21643_v60 }
 0x465   : > { %5867 = vmatpush1.msra.mxu1 %v5607_v30 }
 0x466   : > { %5868 = vmatprep.subr.mxu1 %v21643_v60 }
 0x467   : > { %5869 = vmatpush1.msra.mxu1 %v5604_v21 }
 0x468   : > { %5870 = vmatprep.subr.mxu1 %v21643_v60 }
 0x469   : > { %5871 = vmatpush1.msra.mxu1 %v11500_v9 }
 0x46a   : > { %5872 = vmatprep.subr.mxu1 %v21643_v60 }
 0x46b   : > { %5873 = vmatpush1.msra.mxu1 %v11499_v11 }
 0x46c   : > { %5874 = vmatprep.subr.mxu1 %v21643_v60 }
 0x46d   : > { %5875 = vmatpush1.msra.mxu1 %v5591_v34 }
 0x46e   : > { %5876 = vmatprep.subr.mxu1 %v21643_v60 }
 0x46f   : > { %5877 = vmatpush1.msra.mxu1 %v5588_v7 }
 0x470   : > { %5878 = vmatprep.subr.mxu1 %v21643_v60 }
 0x471   : > { %5879 = vmatpush1.msra.mxu1 %v11496_v39  ;;  %v11168_v10 = vpop.f32.mrf.mxu1 }
 0x472   : > { %5880 = vmatprep.subr.mxu1 %v21643_v60 }
 0x473   : > { %5881 = vmatpush1.msra.mxu1 %v11495_v22  ;;  %v11169_v2 = vpop.f32.mrf.mxu1 }
 0x474   : > { %5882 = vmatprep.subr.mxu1 %v21643_v60  ;;  %v11170_v17 = vadd.f32 %v11169_v2, %v11168_v10 }
 0x475   : > { %5883 = vmatpush1.msra.mxu1 %v5575_v49  ;;  %v11171_v63 = vpop.f32.mrf.mxu1 }
 0x476   : > { %5884 = vmatprep.subr.mxu1 %v21643_v60 }
 0x477   : > { %5885 = vmatpush1.msra.mxu1 %v5572_v44  ;;  %v11172_v45 = vpop.f32.mrf.mxu1 }
 0x478   : > { %5912 = vmatprep.subr.mxu1 %v21643_v60 }
 0x479   : > { %v11174_v31 = vpop.f32.mrf.mxu1 }
 0x47b   : > { %v11175_v4 = vpop.f32.mrf.mxu1 }
 0x47d   : > { %v11177_v22 = vpop.f32.mrf.mxu1 }
 0x47f   : > { %v11178_v44 = vpop.f32.mrf.mxu1 }
 0x481   : > { %v11180_v39 = vpop.f32.mrf.mxu1 }
 0x483   : > { %v11181_v49 = vpop.f32.mrf.mxu1 }
 0x485   : > { %v11183_v11 = vpop.f32.mrf.mxu1 }
 0x487   : > { %v11511_v14 = vpop.f32.mrf.mxu0  ;;  %v11184_v7 = vpop.f32.mrf.mxu1 }
 0x488   : > { %5913 = vmatpush2.msra.mxu1 %v11511_v14  ;;  %v19209_v14 = vld [vmem:[%s21350_s6] ss:$0 sm:$0xff]  ;;  %v11185_v6 = vadd.f32 %v11184_v7, %v11183_v11 }
 0x489   : > { %v5636_v46 = vpop.f32.mrf.mxu0  ;;  %5914 = vmatprep.subr.mxu1 %v21643_v60  ;;  %v19188_v9 = vpop.f32.mrf.mxu1 }
 0x48a   : > { %v5826_v11 = vadd.f32 %v11185_v6, %v19209_v14 }
 0x48b   : > { %v11512_v62 = vpop.f32.mrf.mxu0  ;;  %v19190_v34 = vpop.f32.mrf.mxu1 }
 0x48c   : > { %v11173_v62 = vadd.f32 %v11172_v45, %v11171_v63  ;;  %v6130_v45 = vld [vmem:[#allocation3 + $0x22] sm:$0xff] }
 0x48d   : > { %v5639_v38 = vpop.f32.mrf.mxu0  ;;  %v19192_v36 = vpop.f32.mrf.mxu1 }
 0x48e   : > { %5915 = vmatpush2.msra.mxu1 %v5639_v38  ;;  %v5801_v38 = vadd.f32 %v11170_v17, %v19209_v14  ;;  %v6150_v17 = vld [vmem:[#allocation3 + $0x23] sm:$0xff] }
 0x48f   : > { %5916 = vmatprep.subr.mxu1 %v21643_v60  ;;  %v19194_v21 = vpop.f32.mrf.mxu1 }
 0x490   : > { %5917 = vmatpush2.msra.mxu1 %v5636_v46 }
 0x491   : > { %5919 = vmatmul.mubr.f32.vlgmr.msra.gmra.mxu1 %v5652_v13  ;;  %8129 = vmatprep.subr.mxu1 %v21643_v60  ;;  %v19196_v32 = vpop.f32.mrf.mxu1 }
 0x492   : > { %10959 = vmatprep.mubr.msk.f32.mxu1 %vm4753_vm8, %v5657_v37 }
 0x493   : > { %v19198_v30 = vpop.f32.mrf.mxu1 }
 0x495   : > { %5924 = vmatmul.mubr.f32.gmra.mxu1 %v5656_v12  ;;  %v19200_v1 = vpop.f32.mrf.mxu1  ;;  %v11176_v12 = vadd.f32 %v11175_v4, %v11174_v31 }
 0x496   : > { %10960 = vmatprep.mubr.msk.f32.mxu1 %vm4753_vm8, %v5661_v15 }
 0x497   : > { %v19202_v3 = vpop.f32.mrf.mxu1 }
 0x499   : > { %5929 = vmatmul.mubr.f32.gmra.mxu1 %v5660_v25  ;;  %v19204_v47 = vpop.f32.mrf.mxu1 }
 0x49a   : > { %10961 = vmatprep.mubr.msk.f32.mxu1 %vm4753_vm8, %v5665_v29  ;;  %v5806_v29 = vadd.f32 %v11173_v62, %v19209_v14 }
 0x49b   : > { %v19211_v46 = vpop.f32.mrf.mxu1 }
 0x49d   : > { %5934 = vmatmul.mubr.f32.gmra.mxu1 %v5664_v35 }
 0x49e   : > { %10962 = vmatprep.mubr.msk.f32.mxu1 %vm4753_vm8, %v5669_v55 }
 0x4a1   : > { %5939 = vmatmul.mubr.f32.gmra.mxu1 %v5668_v40 }
 0x4a2   : > { %10963 = vmatprep.mubr.msk.f32.mxu1 %vm4753_vm8, %v5673_v58  ;;  %v11179_v58 = vadd.f32 %v11178_v44, %v11177_v22 }
 0x4a5   : > { %5944 = vmatmul.mubr.f32.gmra.mxu1 %v5672_v50 }
 0x4a6   : > { %10964 = vmatprep.mubr.msk.f32.mxu1 %vm4753_vm8, %v5677_v61  ;;  %v5811_v61 = vadd.f32 %v11176_v12, %v19209_v14 }
 0x4a9   : > { %5949 = vmatmul.mubr.f32.gmra.mxu1 %v5676_v5 }
 0x4aa   : > { %10965 = vmatprep.mubr.msk.f32.mxu1 %vm4753_vm8, %v5681_v51 }
 0x4ad   : > { %5954 = vmatmul.mubr.f32.gmra.mxu1 %v5680_v19 }
 0x4ae   : > { %10966 = vmatprep.mubr.msk.f32.mxu1 %vm4753_vm8, %v5685_v42 }
 0x4b1   : > { %5959 = vmatmul.mubr.f32.gmra.mxu1 %v5684_v23 }
 0x4b2   : > { %10967 = vmatprep.mubr.msk.f32.mxu1 %vm4753_vm8, %v5689_v26  ;;  %v5816_v26 = vadd.f32 %v11179_v58, %v19209_v14 }
 0x4b5   : > { %5964 = vmatmul.mubr.f32.gmra.mxu1 %v5688_v54  ;;  %v11182_v54 = vadd.f32 %v11181_v49, %v11180_v39  ;;  %v11188_v39 = vadd.f32 %v19190_v34, %v19188_v9 }
 0x4b6   : > { %10968 = vmatprep.mubr.msk.f32.mxu1 %vm4753_vm8, %v5693_v27 }
 0x4b7   : > { %v5821_v63 = vadd.f32 %v11182_v54, %v19209_v14  ;;  %v5831_v12 = vadd.f32 %v11188_v39, %v19209_v14 }
 0x4b9   : > { %5969 = vmatmul.mubr.f32.gmra.mxu1 %v5692_v43  ;;  %v19219_v43 = vld [vmem:[#allocation3 + $0x20] sm:$0xff] }
 0x551   : > { %v5920_v13 = vpop.f32.mrf.mxu1 }
 0x552   : > { %v5921_v37 = vadd.f32 %v5920_v13, %v5801_v38 }
 0x553   : > { %v5922_v15 = vpop.f32.mrf.mxu1 }
 0x554   : > { %vm5974_vm6 = vcmp.ge.f32.partialorder %v5921_v37, 0.0  ;;  %v5985_v25 = vmul.f32 0.2, %v5921_v37 }
 0x555   : > { %v5925_v35 = vpop.f32.mrf.mxu1 }
 0x556   : > { %v5996_v55 = vsel %vm5974_vm6, %v5921_v37, %v5985_v25  ;;  %v5926_v40 = vadd.f32 %v5925_v35, %v5806_v29  ;;  %v11191_v25 = vadd.f32 %v19194_v21, %v19192_v36 }
 0x557   : > { %6048 = vst.msk [vmem:[#allocation3 + $0x32] sm:$0xff] %vm4545_vm2, %v5996_v55  ;;  %v5927_v50 = vpop.f32.mrf.mxu1 }
 0x558   : > { %vm5975_vm7 = vcmp.ge.f32.partialorder %v5926_v40, 0.0  ;;  %v5986_v5 = vmul.f32 0.2, %v5926_v40 }
 0x559   : > { %v5930_v51 = vpop.f32.mrf.mxu1 }
 0x55a   : > { %v5997_v19 = vsel %vm5975_vm7, %v5926_v40, %v5986_v5  ;;  %v5931_v42 = vadd.f32 %v5930_v51, %v5811_v61  ;;  %vm6061_vm7 = vcmask 64515   ;;  %v11194_v61 = vadd.f32 %v19198_v30, %v19196_v32 }
 0x55b   : > { %6050 = vst.msk [vmem:[#allocation3 + $0x3a] sm:$0x1] %vm6049_vm9, %v5997_v19  ;;  %v5932_v23 = vpop.f32.mrf.mxu1  ;;  %v5836_v51 = vadd.f32 %v11191_v25, %v19209_v14 }
 0x55c   : > { %6053 = vst.msk [vmem:[#allocation3 + $0x49] sm:$0xfe] %vm6052_vm10, %v5997_v19  ;;  %vm5976_vm14 = vcmp.ge.f32.partialorder %v5931_v42, 0.0  ;;  %v5987_v27 = vmul.f32 0.2, %v5931_v42  ;;  %v5841_v54 = vadd.f32 %v11194_v61, %v19209_v14 }
 0x55d   : > { %v5935_v52 = vpop.f32.mrf.mxu1 }
 0x55e   : > { %v5998_v56 = vsel %vm5976_vm14, %v5931_v42, %v5987_v27  ;;  %v5936_v20 = vadd.f32 %v5935_v52, %v5816_v26  ;;  %v19221_v53 = vld [vmem:[#allocation3 + $0x30] sm:$0xff]  ;;  %vm6066_vm14 = vcmask 64516   ;;  %v11197_v52 = vadd.f32 %v19202_v3, %v19200_v1 }
 0x55f   : > { %v19223_v57 = vld [vmem:[#allocation3 + $0x31] sm:$0xff]  ;;  %6055 = vst.msk [vmem:[#allocation3 + $0x51] sm:$0x3] %vm6054_vm12, %v5998_v56  ;;  %v5937_v24 = vpop.f32.mrf.mxu1  ;;  %v13537_v41 = vpack.i.bf16 %v19221_v53, %v19219_v43  ;;  %vm6063_vm12 = vcmask 60416  }
 0x560   : > { %6058 = vst.msk [vmem:[#allocation3 + $0x60] sm:$0xfc] %vm6057_vm1, %v5998_v56  ;;  %v13512_v10 = vpack.i.bf16 %v19223_v57, %v6110_v0  ;;  %vm5977_vm6 = vcmp.ge.f32.partialorder %v5936_v20, 0.0  ;;  %v5988_v2 = vmul.f32 0.2, %v5936_v20  ;;  %v19229_v31 = vld [vmem:[#allocation3 + $0x32] sm:$0xff] }
 0x561   : > { %v5940_v4 = vpop.f32.mrf.mxu1  ;;  %13538 = vrot.lane.b32.xlu0 %v13537_v41, %s21437_s27  ;;  %v13522_v7 = vpack.i.bf16 %v19229_v31, %v6130_v45 }
 0x562   : > { %13513 = vrot.lane.b32.xlu1 %v13512_v10, %s21647_s17  ;;  %v5999_v22 = vsel %vm5977_vm6, %v5936_v20, %v5988_v2  ;;  %v5941_v44 = vadd.f32 %v5940_v4, %v5821_v63  ;;  %v19238_v38 = vld [vmem:[#allocation3 + $0x33] sm:$0xff]  ;;  %vm6071_vm6 = vcmask 64517   ;;  %v11200_v63 = vadd.f32 %v19211_v46, %v19204_v47 }
 0x563   : > { %6059 = vst.msk [vmem:[#allocation3 + $0x68] sm:$0x7] %vm6009_vm0, %v5999_v22  ;;  %v5942_v49 = vpop.f32.mrf.mxu1  ;;  %vm6068_vm0 = vcmask 61440   ;;  %v13532_v15 = vpack.i.bf16 %v19238_v38, %v6150_v17  ;;  %v6171_v35 = vld [vmem:[#allocation3 + $0x38] sm:$0xff]  ;;  %v6172_v55 = vld [vmem:[#allocation3 + $0x48] sm:$0xff]  ;;  %v5846_v4 = vadd.f32 %v11197_v52, %v19209_v14  ;;  %v14659_v52 = vld [vmem:[%s21346_s2 + $0x20] sm:$0xff]  }
 0x564   : > { %6062 = vst.msk [vmem:[#allocation3 + $0x77] sm:$0xf8] %vm6061_vm7, %v5999_v22  ;;  %vm5978_vm10 = vcmp.ge.f32.partialorder %v5941_v44, 0.0  ;;  %v5989_v62 = vmul.f32 0.2, %v5941_v44  ;;  %vm6073_vm7 = vcmask 62464   ;;  %v13542_v21 = vpack.i.bf16 %v6172_v55, %v6171_v35 }
 0x565   : > { %v5945_v13 = vpop.f32.mrf.mxu1  ;;  %13548 = vrot.lane.b32.xlu0 %v13512_v10, %s21439_s15  ;;  %v19252_v19 = vld [vmem:[#allocation3 + $0x39] sm:$0xff]  ;;  %v6192_v42 = vld [vmem:[#allocation3 + $0x49] sm:$0xff]  ;;  %v13577_v27 = vpack.i.bf16 %v6171_v35, %v19221_v53 }
 0x566   : > { %13523 = vrot.lane.b32.xlu1 %v13522_v7, %s21506_s20  ;;  %v6000_v9 = vsel %vm5978_vm10, %v5941_v44, %v5989_v62  ;;  %v5946_v34 = vadd.f32 %v5945_v13, %v5826_v11  ;;  %v13552_v0 = vpack.i.bf16 %v6192_v42, %v19252_v19  ;;  %v19261_v20 = vld [vmem:[#allocation3 + $0x50] sm:$0xff]  ;;  %v6211_v53 = vld [vmem:[#allocation3 + $0x3a] sm:$0xff] }
 0x567   : > { %6064 = vst.msk [vmem:[#allocation3 + $0x7f] sm:$0xf] %vm6063_vm12, %v6000_v9  ;;  %v5947_v37 = vpop.f32.mrf.mxu1  ;;  %vm6076_vm12 = vcmask 64518   ;;  %21650 = vst [vmem:[#allocation55_spill] sm:$0xff] %v19261_v20  ;;  %v6212_v6 = vld [vmem:[#allocation3 + $0x4a] sm:$0xff]  ;;  %v19267_v1 = vpack.i.bf16 %v19261_v20, %v6172_v55  ;;  %v6231_v17 = vld [vmem:[#allocation3 + $0x3b] sm:$0xff] }
 0x568   : > { %6067 = vst.msk [vmem:[#allocation3 + $0x8e] sm:$0xf0] %vm6066_vm14, %v6000_v9  ;;  %vm5979_vm1 = vcmp.ge.f32.partialorder %v5946_v34, 0.0  ;;  %v5990_v29 = vmul.f32 0.2, %v5946_v34  ;;  %vm6078_vm14 = vcmask 63488   ;;  %v13562_v3 = vpack.i.bf16 %v6212_v6, %v6211_v53 }
 0x569   : > { %v5950_v40 = vpop.f32.mrf.mxu1  ;;  %13558 = vrot.lane.b32.xlu0 %v13522_v7, %s21648_s21  ;;  %v6232_v44 = vld [vmem:[#allocation3 + $0x4b] sm:$0xff]  ;;  %v5851_v9 = vadd.f32 %v11200_v63, %v19209_v14 }
 0x56a   : > { %13533 = vrot.lane.b32.xlu1 %v13532_v15, %s21435_s25  ;;  %v6001_v58 = vsel %vm5979_vm1, %v5946_v34, %v5990_v29  ;;  %v5951_v50 = vadd.f32 %v5950_v40, %v5831_v12  ;;  %v19272_v22 = vld [vmem:[#allocation3 + $0x61] sm:$0xff]  ;;  %v6114_v7 = vld [vmem:[#allocation3 + $0x51] sm:$0xff]  ;;  %v13572_v62 = vpack.i.bf16 %v6232_v44, %v6231_v17 }
 0x56b   : > { %6069 = vst.msk [vmem:[#allocation3 + $0x96] sm:$0x1f] %vm6068_vm0, %v6001_v58  ;;  %v5952_v36 = vpop.f32.mrf.mxu1  ;;  %v19279_v46 = vpack.i.bf16 %v19272_v22, %v6114_v7  ;;  %v19288_v35 = vld [vmem:[#allocation3 + $0x62] sm:$0xff]  ;;  %v6134_v55 = vld [vmem:[#allocation3 + $0x52] sm:$0xff] }
 0x56c   : > { %6072 = vst.msk [vmem:[#allocation3 + $0xa5] sm:$0xe0] %vm6071_vm6, %v6001_v58  ;;  %vm5980_vm10 = vcmp.ge.f32.partialorder %v5951_v50, 0.0  ;;  %v5991_v5 = vmul.f32 0.2, %v5951_v50  ;;  %vm6081_vm6 = vcmask 64519   ;;  %v19295_v40 = vpack.i.bf16 %v19288_v35, %v6134_v55 }
 0x56d   : > { %v5955_v23 = vpop.f32.mrf.mxu1  ;;  %13568 = vrot.lane.b32.xlu0 %v13532_v15, %s21649_s24  ;;  %v19286_v15 = vpack.i.bf16 %v6114_v7, %v6192_v42  ;;  %v13592_v58 = vpack.i.bf16 %v19252_v19, %v19223_v57  ;;  %v19304_v61 = vld [vmem:[#allocation3 + $0x63] sm:$0xff]  ;;  %v6154_v36 = vld [vmem:[#allocation3 + $0x53] sm:$0xff]  ;;  %v13612_v57 = vpack.i.bf16 %v6211_v53, %v19229_v31 }
 0x56e   : > { %13543 = vrot.lane.b32.xlu1 %v13542_v21, %s21437_s27  ;;  %v6002_v32 = vsel %vm5980_vm10, %v5951_v50, %v5991_v5  ;;  %v5956_v30 = vadd.f32 %v5955_v23, %v5836_v51  ;;  %v19302_v50 = vpack.i.bf16 %v6134_v55, %v6212_v6  ;;  %v19310_v21 = vpack.i.bf16 %v19304_v61, %v6154_v36  ;;  %v14656_v5 = vld [vmem:[%s21346_s2 + $0x38] sm:$0xff]   ;;  %v6175_v31 = vld [vmem:[#allocation3 + $0x68] sm:$0xff]  ;;  %v14657_v42 = vld [vmem:[%s21346_s2 + $0x30] sm:$0xff]  }
 0x56f   : > { %6074 = vst.msk [vmem:[#allocation3 + $0xad] sm:$0x3f] %vm6073_vm7, %v6002_v32  ;;  %v5957_v26 = vpop.f32.mrf.mxu1  ;;  %v19319_v51 = vpack.i.bf16 %v6154_v36, %v6232_v44  ;;  %v19321_v19 = vld [vmem:[#allocation3 + $0x78] sm:$0xff]  ;;  %11513 = vmatprep.subr.bf16.mxu0 %v14656_v5  ;;  %v14661_v53 = vld [vmem:[%s21346_s2 + $0x10] sm:$0xff]   ;;  %v6118_v7 = vld [vmem:[#allocation3 + $0x81] sm:$0xff] }
 0x570   : > { %6077 = vst.msk [vmem:[#allocation3 + $0xbc] sm:$0xc0] %vm6076_vm12, %v6002_v32  ;;  %vm5981_vm1 = vcmp.ge.f32.partialorder %v5956_v30, 0.0  ;;  %v5992_v56 = vmul.f32 0.2, %v5956_v30  ;;  %11514 = vmatpush3.bf16.msra.mxu0 %v14656_v5  ;;  %v13657_v23 = vpack.i.bf16 %v19321_v19, %v6175_v31  ;;  %v13632_v32 = vpack.i.bf16 %v6231_v17, %v19238_v38  ;;  %v14658_v26 = vld [vmem:[%s21346_s2 + $0x28] sm:$0xff]  }
 0x571   : > { %v5960_v24 = vpop.f32.mrf.mxu1  ;;  %13578 = vrot.lane.b32.xlu0 %v13577_v27, %s21443_s26  ;;  %11515 = vmatprep.subr.bf16.mxu0 %v14657_v42  ;;  %v6195_v38 = vld [vmem:[#allocation3 + $0x69] sm:$0xff]  ;;  %v14660_v6 = vld [vmem:[%s21346_s2 + $0x18] sm:$0xff]  }
 0x572   : > { %13553 = vrot.lane.b32.xlu1 %v13552_v0, %s21439_s15  ;;  %v6003_v41 = vsel %vm5981_vm1, %v5956_v30, %v5992_v56  ;;  %v5961_v10 = vadd.f32 %v5960_v24, %v5841_v54  ;;  %v6330_v30 = vld [vmem:[#allocation3 + $0x60] sm:$0xff]  ;;  %v13687_v24 = vpack.i.bf16 %v6195_v38, %v19272_v22  ;;  %vm7810_vm1 = vcmask 719872  }
 0x573   : > { %6079 = vst.msk [vmem:[#allocation3 + $0xc4] sm:$0x7f] %vm6078_vm14, %v6003_v41  ;;  %v5962_v2 = vpop.f32.mrf.mxu1  ;;  %v13667_v54 = vpack.i.bf16 %v6175_v31, %v6330_v30  ;;  %v13642_v27 = vpack.i.bf16 %v6330_v30, %v19261_v20  ;;  %v6236_v63 = vld [vmem:[#allocation3 + $0x7b] sm:$0xff]  ;;  %vm7789_vm14 = vcmask 654336  }
 0x574   : > { %6082 = vst.msk [vmem:[#allocation3 + $0xd3] sm:$0x80] %vm6081_vm6, %v6003_v41  ;;  %vm5982_vm7 = vcmp.ge.f32.partialorder %v5961_v10, 0.0  ;;  %v5993_v45 = vmul.f32 0.2, %v5961_v10  ;;  %11516 = vmatpush3.bf16.msra.mxu0 %v14657_v42  ;;  %v6216_v41 = vld [vmem:[#allocation3 + $0x7a] sm:$0xff] }
 0x575   : > { %v5965_v39 = vpop.f32.mrf.mxu1  ;;  %13588 = vrot.lane.b32.xlu0 %v19267_v1, %s21443_s26  ;;  %11517 = vmatprep.subr.bf16.mxu0 %v14658_v26  ;;  %vm7831_vm6 = vcmask 785408  }
 0x576   : > { %13563 = vrot.lane.b32.xlu1 %v13562_v3, %s21648_s21  ;;  %v6004_v49 = vsel %vm5982_vm7, %v5961_v10, %v5993_v45  ;;  %v5966_v11 = vadd.f32 %v5965_v39, %v5846_v4  ;;  %v6215_v10 = vld [vmem:[#allocation3 + $0x6a] sm:$0xff]  ;;  %v14663_v4 = vld [vmem:[%s21346_s2] sm:$0xff]   ;;  %vm7852_vm7 = vcmask 850944  }
 0x577   : > { %6083 = vst.msk [vmem:[#allocation3 + $0xdb] sm:$0xff] %vm4545_vm2, %v6004_v49  ;;  %v5967_v47 = vpop.f32.mrf.mxu1  ;;  %v13697_v2 = vpack.i.bf16 %v6216_v41, %v6215_v10  ;;  %v6235_v45 = vld [vmem:[#allocation3 + $0x6b] sm:$0xff]  ;;  %v6255_v39 = vld [vmem:[#allocation3 + $0x80] sm:$0xff] }
 0x578   : > { %vm5983_vm10 = vcmp.ge.f32.partialorder %v5966_v11, 0.0  ;;  %v5994_v13 = vmul.f32 0.2, %v5966_v11  ;;  %11518 = vmatpush3.bf16.msra.mxu0 %v14658_v26  ;;  %v13717_v22 = vpack.i.bf16 %v6236_v63, %v6235_v45  ;;  %v13727_v44 = vpack.i.bf16 %v6235_v45, %v19304_v61  ;;  %v6200_v36 = vld [vmem:[#allocation3 + $0xa9] sm:$0xff] }
 0x579   : > { %v5970_v34 = vpop.f32.mrf.mxu1  ;;  %13598 = vrot.lane.b32.xlu0 %v19279_v46, %s21647_s17  ;;  %11519 = vmatprep.subr.bf16.mxu0 %v14659_v52  ;;  %v13737_v49 = vpack.i.bf16 %v6255_v39, %v19321_v19 }
 0x57a   : > { %13573 = vrot.lane.b32.xlu1 %v13572_v62, %s21649_s24  ;;  %v6005_v37 = vsel %vm5983_vm10, %v5966_v11, %v5994_v13  ;;  %v5971_v12 = vadd.f32 %v5970_v34, %v5851_v9  ;;  %v6119_v11 = vld [vmem:[#allocation3 + $0x91] sm:$0xff]  ;;  %vm7873_vm10 = vcmask 916480  }
 0x57b   : > { %6085 = vst.msk [vmem:[#allocation3 + $0xf2] sm:$0xff] %vm4545_vm2, %v6005_v37  ;;  %v5972_v25 = vpop.f32.mrf.mxu1  ;;  %v13747_v17 = vpack.i.bf16 %v6119_v11, %v6118_v7  ;;  %v6159_v34 = vld [vmem:[#allocation3 + $0x93] sm:$0xff]  ;;  %v19387_v37 = vpop.permute.xlu0 %13508 }
 0x57c   : > { %vm5984_vm12 = vcmp.ge.f32.partialorder %v5971_v12, 0.0  ;;  %v5995_v29 = vmul.f32 0.2, %v5971_v12  ;;  %11520 = vmatpush3.bf16.msra.mxu0 %v14659_v52  ;;  %v6240_v52 = vld [vmem:[#allocation3 + $0xab] sm:$0xff] }
 0x57d   : > { %13608 = vrot.lane.b32.xlu0 %v19286_v15, %s21433_s28  ;;  %11521 = vmatprep.subr.bf16.mxu0 %v14660_v6 }
 0x57e   : > { %13583 = vrot.lane.b32.xlu1 %v13552_v0, %s21647_s17  ;;  %v6006_v14 = vsel %vm5984_vm12, %v5971_v12, %v5995_v29  ;;  %v6196_v0 = vld [vmem:[#allocation3 + $0x79] sm:$0xff]  ;;  %v6158_v12 = vld [vmem:[#allocation3 + $0x83] sm:$0xff]  ;;  %vm7894_vm12 = vcmask 982016  }
 0x57f   : > { %6086 = vst.msk [vmem:[#allocation3 + $0xfa] sm:$0x1] %vm6049_vm9, %v6006_v14  ;;  %v13677_v56 = vpack.i.bf16 %v6196_v0, %v6195_v38  ;;  %v13757_v47 = vpack.i.bf16 %v6118_v7, %v6196_v0  ;;  %v13797_v25 = vpack.i.bf16 %v6158_v12, %v6236_v63  ;;  %v19391_v29 = vpop.permute.xlu0 %13518  ;;  %v6179_v14 = vld [vmem:[#allocation3 + $0x98] sm:$0xff]  ;;  %vm7768_vm9 = vcmask 588800  }
 0x580   : > { %11522 = vmatpush3.bf16.msra.mxu0 %v14660_v6 }
 0x581   : > { %13618 = vrot.lane.b32.xlu0 %v19295_v40, %s21506_s20  ;;  %11523 = vmatprep.subr.bf16.mxu0 %v14661_v53 }
 0x582   : > { %13593 = vrot.lane.b32.xlu1 %v13592_v58, %s21433_s28  ;;  %s21456_s28 = smov 96  }
 0x583   : > { %v19397_v58 = vpop.permute.xlu0 %13528 }
 0x584   : > { %11524 = vmatpush3.bf16.msra.mxu0 %v14661_v53 }
 0x585   : > { %13628 = vrot.lane.b32.xlu0 %v19302_v50, %s21441_s16 }
 0x586   : > { %13603 = vrot.lane.b32.xlu1 %v13562_v3, %s21506_s20  ;;  %v13707_v3 = vpack.i.bf16 %v6215_v10, %v19288_v35  ;;  %v6180_v35 = vld [vmem:[#allocation3 + $0xa8] sm:$0xff] }
 0x587   : > { %v13807_v55 = vpack.i.bf16 %v6180_v35, %v6179_v14 }
 0x589   : > { %13638 = vrot.lane.b32.xlu0 %v19310_v21, %s21435_s25 }
 0x58a   : > { %13613 = vrot.lane.b32.xlu1 %v13612_v57, %s21441_s16 }
 0x58d   : > { %13648 = vrot.lane.b32.xlu0 %v19319_v51, %s21460_s23 }
 0x58e   : > { %13623 = vrot.lane.b32.xlu1 %v13572_v62, %s21435_s25  ;;  %v6138_v62 = vld [vmem:[#allocation3 + $0x82] sm:$0xff]  ;;  %s21652_s25 = smov 24  }
 0x58f   : > { %v13777_v9 = vpack.i.bf16 %v6138_v62, %v6216_v41 }
 0x591   : > { %13658 = vrot.lane.b32.xlu0 %v13657_v23, %s21437_s27  ;;  %v6220_v23 = vld [vmem:[#allocation3 + $0xaa] sm:$0xff] }
 0x592   : > { %13633 = vrot.lane.b32.xlu1 %v13632_v32, %s21460_s23  ;;  %v6219_v32 = vld [vmem:[#allocation3 + $0x9a] sm:$0xff] }
 0x595   : > { %13668 = vrot.lane.b32.xlu0 %v13667_v54, %s21456_s28 }
 0x596   : > { %13643 = vrot.lane.b32.xlu1 %v13642_v27, %s21437_s27  ;;  %s21458_s27 = smov 104  }
 0x599   : > { %13678 = vrot.lane.b32.xlu0 %v13677_v56, %s21439_s15 }
 0x59a   : > { %13653 = vrot.lane.b32.xlu1 %v19267_v1, %s21456_s28  ;;  %v14662_v1 = vld [vmem:[%s21346_s2 + $0x8] sm:$0xff]  }
 0x59b   : > { %11525 = vmatprep.subr.bf16.mxu0 %v14662_v1 }
 0x59c   : > { %11526 = vmatpush3.bf16.msra.mxu0 %v14662_v1  ;;  %v19437_v1 = vld [vmem:[#allocation3 + $0xb0] sm:$0xff] }
 0x59d   : > { %13688 = vrot.lane.b32.xlu0 %v13687_v24, %s21458_s27  ;;  %11527 = vmatprep.subr.bf16.mxu0 %v14663_v4  ;;  %v19447_v45 = vpack.i.bf16 %v19437_v1, %v6180_v35  ;;  %v6162_v35 = vld [vmem:[#allocation3 + $0xb3] sm:$0xff] }
 0x59e   : > { %13663 = vrot.lane.b32.xlu1 %v19279_v46, %s21439_s15  ;;  %s21454_s15 = smov 112   ;;  %v6139_v46 = vld [vmem:[#allocation3 + $0x92] sm:$0xff] }
 0x59f   : > { %v13767_v13 = vpack.i.bf16 %v6139_v46, %v6138_v62  ;;  %v13857_v38 = vpack.i.bf16 %v6219_v32, %v6139_v46  ;;  %v6142_v46 = vld [vmem:[#allocation3 + $0xb2] sm:$0xff] }
 0x5a0   : > { %11528 = vmatpush3.bf16.msra.mxu0 %v14663_v4  ;;  %v19449_v4 = vld [vmem:[#allocation3 + $0xc1] sm:$0xff] }
 0x5a1   : > { %13698 = vrot.lane.b32.xlu0 %v13697_v2, %s21648_s21 }
 0x5a2   : > { %13673 = vrot.lane.b32.xlu1 %v19286_v15, %s21458_s27  ;;  %v13787_v15 = vpack.i.bf16 %v6159_v34, %v6158_v12 }
 0x5a5   : > { %13708 = vrot.lane.b32.xlu0 %v13707_v3, %s21454_s15 }
 0x5a6   : > { %13683 = vrot.lane.b32.xlu1 %v19295_v40, %s21648_s21  ;;  %v6334_v40 = vld [vmem:[#allocation3 + $0x90] sm:$0xff] }
 0x5a7   : > { %v13792_v61 = vpack.i.bf16 %v6334_v40, %v6255_v39 }
 0x5a9   : > { %13718 = vrot.lane.b32.xlu0 %v13717_v22, %s21649_s24 }
 0x5aa   : > { %13693 = vrot.lane.b32.xlu1 %v19302_v50, %s21454_s15  ;;  %v13817_v50 = vpack.i.bf16 %v6179_v14, %v6334_v40 }
 0x5ad   : > { %13728 = vrot.lane.b32.xlu0 %v13727_v44, %s14827_s22 }
 0x5ae   : > { %13703 = vrot.lane.b32.xlu1 %v19310_v21, %s21649_s24  ;;  %v6199_v21 = vld [vmem:[#allocation3 + $0x99] sm:$0xff] }
 0x5af   : > { %v13837_v42 = vpack.i.bf16 %v6199_v21, %v6119_v11 }
 0x5b1   : > { %13738 = vrot.lane.b32.xlu0 %v13737_v49, %s21443_s26 }
 0x5b2   : > { %13713 = vrot.lane.b32.xlu1 %v19319_v51, %s14827_s22  ;;  %v13827_v51 = vpack.i.bf16 %v6200_v36, %v6199_v21  ;;  %v13510_v21 = vunpack.i.l.bf16 %v19387_v37 }
 0x5b5   : > { %13748 = vrot.lane.b32.xlu0 %v13747_v17, %s21647_s17 }
 0x5b6   : > { %13723 = vrot.lane.b32.xlu1 %v13667_v54, %s21443_s26  ;;  %v13847_v54 = vpack.i.bf16 %v6220_v23, %v6219_v32  ;;  %v13426_v32 = vunpack.i.h.bf16 %v18874_v28  ;;  %v6183_v28 = vld [vmem:[#allocation3 + $0xc8] sm:$0xff] }
 0x5b9   : > { %13758 = vrot.lane.b32.xlu0 %v13757_v47, %s21651_s18 }
 0x5ba   : > { %13733 = vrot.lane.b32.xlu1 %v13677_v56, %s21647_s17  ;;  %v6239_v56 = vld [vmem:[#allocation3 + $0x9b] sm:$0xff] }
 0x5bb   : > { %v13867_v41 = vpack.i.bf16 %v6240_v52, %v6239_v56 }
 0x5bd   : > { %13768 = vrot.lane.b32.xlu0 %v13767_v13, %s21506_s20 }
 0x5be   : > { %13743 = vrot.lane.b32.xlu1 %v13687_v24, %s21651_s18 }
 0x5c1   : > { %13778 = vrot.lane.b32.xlu0 %v13777_v9, %s21441_s16 }
 0x5c2   : > { %13753 = vrot.lane.b32.xlu1 %v13697_v2, %s21506_s20  ;;  %v19435_v2 = vpack.i.bf16 %v6239_v56, %v6159_v34  ;;  %v6089_v56 = vld [vmem:[#allocation3 + $0x18] sm:$0xff] }
 0x5c5   : > { %13788 = vrot.lane.b32.xlu0 %v13787_v15, %s21652_s25 }
 0x5c6   : > { %13763 = vrot.lane.b32.xlu1 %v13707_v3, %s21441_s16  ;;  %s21654_s16 = smov 40  }
 0x5c9   : > { %13798 = vrot.lane.b32.xlu0 %v13797_v25, %s21460_s23 }
 0x5ca   : > { %13773 = vrot.lane.b32.xlu1 %v13717_v22, %s21652_s25  ;;  %v6122_v22 = vld [vmem:[#allocation3 + $0xb1] sm:$0xff] }
 0x5cd   : > { %13808 = vrot.lane.b32.xlu0 %v13807_v55, %s21653_s19 }
 0x5ce   : > { %13783 = vrot.lane.b32.xlu1 %v13727_v44, %s21460_s23 }
 0x5d1   : > { %13818 = vrot.lane.b32.xlu0 %v13817_v50, %s21456_s28 }
 0x5d2   : > { %13793 = vrot.lane.b32.xlu1 %v13792_v61, %s21653_s19  ;;  %v6087_v61 = vld [vmem:[#allocation3] sm:$0xff] }
 0x5d3   : > { %v19401_v57 = vpop.permute.xlu0 %13538 }
 0x5d4   : > { %v19403_v5 = vpop.permute.xlu1 %13513 }
 0x5d5   : > { %13828 = vrot.lane.b32.xlu0 %v13827_v51, %s21654_s16 }
 0x5d6   : > { %13803 = vrot.lane.b32.xlu1 %v13737_v49, %s21456_s28  ;;  %v19459_v49 = vpack.i.bf16 %v19449_v4, %v6122_v22 }
 0x5d7   : > { %v19407_v19 = vpop.permute.xlu0 %13548 }
 0x5d8   : > { %v19409_v31 = vpop.permute.xlu1 %13523 }
 0x5d9   : > { %13838 = vrot.lane.b32.xlu0 %v13837_v42, %s21458_s27 }
 0x5da   : > { %13813 = vrot.lane.b32.xlu1 %v13747_v17, %s21654_s16  ;;  %v19468_v17 = vpack.i.bf16 %v6122_v22, %v6200_v36  ;;  %v13511_v36 = vunpack.i.h.bf16 %v19387_v37  ;;  %v19516_v22 = vld [vmem:[#allocation3 + $0xd8] sm:$0xff]  ;;  %v13456_v37 = vunpack.i.h.bf16 %v18902_v18  ;;  %v13486_v18 = vunpack.i.h.bf16 %v18952_v8 }
 0x5db   : > { %v19413_v30 = vpop.permute.xlu0 %13558 }
 0x5dc   : > { %v19415_v26 = vpop.permute.xlu1 %13533  ;;  %v7610_v60 = vsel %vm4545_vm2, %v6089_v56, %v13511_v36  ;;  %v13530_v36 = vunpack.i.l.bf16 %v19397_v58 }
 0x5dd   : > { %13848 = vrot.lane.b32.xlu0 %v13847_v54, %s21648_s21 }
 0x5de   : > { %13823 = vrot.lane.b32.xlu1 %v13757_v47, %s21458_s27  ;;  %v19470_v47 = vld [vmem:[#allocation3 + $0xc2] sm:$0xff] }
 0x5df   : > { %v19419_v27 = vpop.permute.xlu0 %13568 }
 0x5e0   : > { %v19421_v0 = vpop.permute.xlu1 %13543 }
 0x5e1   : > { %13858 = vrot.lane.b32.xlu0 %v13857_v38, %s21454_s15 }
 0x5e2   : > { %13833 = vrot.lane.b32.xlu1 %v13767_v13, %s21648_s21 }
 0x5e3   : > { %v19425_v6 = vpop.permute.xlu0 %13578 }
 0x5e4   : > { %v19427_v24 = vpop.permute.xlu1 %13553 }
 0x5e5   : > { %13868 = vrot.lane.b32.xlu0 %v13867_v41, %s21649_s24 }
 0x5e6   : > { %13843 = vrot.lane.b32.xlu1 %v13777_v9, %s21454_s15  ;;  %v19480_v9 = vpack.i.bf16 %v19470_v47, %v6142_v46 }
 0x5e7   : > { %v19431_v10 = vpop.permute.xlu0 %13588 }
 0x5e8   : > { %v19433_v53 = vpop.permute.xlu1 %13563 }
 0x5e9   : > { %13878 = vrot.lane.b32.xlu0 %v19435_v2, %s14827_s22 }
 0x5ea   : > { %13853 = vrot.lane.b32.xlu1 %v13787_v15, %s21649_s24  ;;  %v19489_v15 = vpack.i.bf16 %v6142_v46, %v6220_v23  ;;  %v19513_v23 = vpack.i.bf16 %v6162_v35, %v6240_v52  ;;  %v13521_v52 = vunpack.i.h.bf16 %v19391_v29  ;;  %v13520_v46 = vunpack.i.l.bf16 %v19391_v29 }
 0x5eb   : > { %v19442_v3 = vpop.permute.xlu0 %13598 }
 0x5ec   : > { %v19444_v63 = vpop.permute.xlu1 %13573  ;;  %v7630_v8 = vsel %vm4649_vm3, %v7610_v60, %v13521_v52 }
 0x5ed   : > { %13888 = vrot.lane.b32.xlu0 %v19447_v45, %s21443_s26 }
 0x5ee   : > { %13863 = vrot.lane.b32.xlu1 %v13797_v25, %s14827_s22  ;;  %v19491_v25 = vld [vmem:[#allocation3 + $0xc3] sm:$0xff] }
 0x5ef   : > { %v19454_v44 = vpop.permute.xlu0 %13608  ;;  %v19501_v40 = vpack.i.bf16 %v19491_v25, %v6162_v35  ;;  %v13471_v35 = vunpack.i.h.bf16 %v18921_v48  ;;  %v13531_v48 = vunpack.i.h.bf16 %v19397_v58 }
 0x5f0   : > { %v19456_v39 = vpop.permute.xlu1 %13583 }
 0x5f1   : > { %13898 = vrot.lane.b32.xlu0 %v19459_v49, %s21647_s17  ;;  %v7650_v52 = vsel %vm4753_vm8, %v7630_v8, %v13531_v48  ;;  %v13535_v48 = vunpack.i.l.bf16 %v19415_v26  ;;  %v13545_v8 = vunpack.i.l.bf16 %v19421_v0 }
 0x5f2   : > { %13873 = vrot.lane.b32.xlu1 %v13817_v50, %s21443_s26  ;;  %s21657_s26 = smov 80   ;;  %v11851_v50 = vunpack.i.h.bf16 %v21642_v16 }
 0x5f3   : > { %v19464_v11 = vpop.permute.xlu0 %13618 }
 0x5f4   : > { %v19466_v7 = vpop.permute.xlu1 %13593  ;;  %v7608_v16 = vsel %vm4545_vm2, %v6087_v61, %v11851_v50  ;;  %v6338_v61 = vld [vmem:[#allocation3 + $0xc0] sm:$0xff] }
 0x5f5   : > { %13908 = vrot.lane.b32.xlu0 %v19468_v17, %s21651_s18  ;;  %v7628_v50 = vsel %vm4649_vm3, %v7608_v16, %v13426_v32  ;;  %v13942_v58 = vpack.i.bf16 %v6338_v61, %v19437_v1  ;;  %v6203_v16 = vld [vmem:[#allocation3 + $0xc9] sm:$0xff]  ;;  %v19566_v1 = vld [vmem:[#allocation3 + $0xda] sm:$0xff] }
 0x5f6   : > { %13883 = vrot.lane.b32.xlu1 %v13827_v51, %s21647_s17 }
 0x5f7   : > { %v19475_v62 = vpop.permute.xlu0 %13628 }
 0x5f8   : > { %v19477_v13 = vpop.permute.xlu1 %13603 }
 0x5f9   : > { %21655 = vst [vmem:[#allocation9_spill] sm:$0xff] %v19477_v13  ;;  %13918 = vrot.lane.b32.xlu0 %v19480_v9, %s21506_s20 }
 0x5fa   : > { %13893 = vrot.lane.b32.xlu1 %v13837_v42, %s21651_s18 }
 0x5fb   : > { %v19485_v34 = vpop.permute.xlu0 %13638 }
 0x5fc   : > { %21656 = vst [vmem:[#allocation10_spill] sm:$0xff] %v19485_v34  ;;  %v19487_v12 = vpop.permute.xlu1 %13613  ;;  %v13501_v34 = vunpack.i.h.bf16 %v18980_v33 }
 0x5fd   : > { %13928 = vrot.lane.b32.xlu0 %v19489_v15, %s21657_s26 }
 0x5fe   : > { %13903 = vrot.lane.b32.xlu1 %v13847_v54, %s21506_s20  ;;  %v6088_v54 = vld [vmem:[#allocation3 + $0x8] sm:$0xff] }
 0x5ff   : > { %v19496_v14 = vpop.permute.xlu0 %13648 }
 0x600   : > { %v19498_v55 = vpop.permute.xlu1 %13623 }
 0x601   : > { %21658 = vst [vmem:[#allocation32_spill] sm:$0xff] %v19498_v55  ;;  %13938 = vrot.lane.b32.xlu0 %v19501_v40, %s21652_s25 }
 0x602   : > { %13913 = vrot.lane.b32.xlu1 %v13857_v38, %s21657_s26  ;;  %v13441_v38 = vunpack.i.h.bf16 %v18888_v59  ;;  %v7609_v59 = vsel %vm4545_vm2, %v6088_v54, %v13510_v21 }
 0x603   : > { %v19509_v51 = vpop.permute.xlu0 %13658  ;;  %v7629_v32 = vsel %vm4649_vm3, %v7609_v59, %v13520_v46  ;;  %v19570_v59 = vpack.i.bf16 %v6203_v16, %v19449_v4  ;;  %v19588_v4 = vld [vmem:[#allocation3 + $0xdb] sm:$0xff] }
 0x604   : > { %21659 = vst [vmem:[#allocation33_spill] sm:$0xff] %v19509_v51  ;;  %v19511_v42 = vpop.permute.xlu1 %13633  ;;  %v7648_v29 = vsel %vm4753_vm8, %v7628_v50, %v13441_v38  ;;  %v19551_v38 = vpack.i.bf16 %v6183_v28, %v6338_v61  ;;  %v6243_v50 = vld [vmem:[#allocation3 + $0xcb] sm:$0xff]  ;;  %v7649_v60 = vsel %vm4753_vm8, %v7629_v32, %v13530_v36  ;;  %v13541_v61 = vunpack.i.h.bf16 %v19401_v57 }
 0x605   : > { %13948 = vrot.lane.b32.xlu0 %v19513_v23, %s21460_s23  ;;  %v7668_v21 = vsel %vm4857_vm4, %v7648_v29, %v13456_v37  ;;  %v19555_v37 = vld [vmem:[#allocation3 + $0xd9] sm:$0xff]  ;;  %v13540_v29 = vunpack.i.l.bf16 %v19401_v57 }
 0x606   : > { %13923 = vrot.lane.b32.xlu1 %v13867_v41, %s21652_s25  ;;  %v13957_v41 = vpack.i.bf16 %v19516_v22, %v6183_v28  ;;  %v7688_v54 = vsel %vm4961_vm11, %v7668_v21, %v13471_v35  ;;  %v13515_v35 = vunpack.i.l.bf16 %v19403_v5  ;;  %v13525_v28 = vunpack.i.l.bf16 %v19409_v31 }
 0x607   : > { %v19529_v51 = vpop.permute.xlu0 %13668  ;;  %v19586_v32 = vpack.i.bf16 %v19555_v37, %v6203_v16  ;;  %v13560_v16 = vunpack.i.l.bf16 %v19413_v30 }
 0x608   : > { %v19531_v55 = vpop.permute.xlu1 %13643 }
 0x609   : > { %21660 = vst [vmem:[#allocation11_spill] sm:$0xff] %v19531_v55  ;;  %13958 = vrot.lane.b32.xlu0 %v13957_v41, %s21653_s19  ;;  %v6223_v41 = vld [vmem:[#allocation3 + $0xca] sm:$0xff]  ;;  %v13575_v55 = vunpack.i.l.bf16 %v19444_v63 }
 0x60a   : > { %13933 = vrot.lane.b32.xlu1 %v19435_v2, %s21460_s23  ;;  %v7708_v2 = vsel %vm5065_vm13, %v7688_v54, %v13486_v18  ;;  %v19576_v18 = vpack.i.bf16 %v6243_v50, %v19491_v25  ;;  %v13550_v25 = vunpack.i.l.bf16 %v19407_v19  ;;  %v19594_v57 = vpack.i.bf16 %v19566_v1, %v6223_v41 }
 0x60b   : > { %v19547_v56 = vpop.permute.xlu0 %13678  ;;  %v19558_v46 = vsel %vm5169_vm15, %v7708_v2, %v13501_v34  ;;  %v19573_v34 = vpack.i.bf16 %v6223_v41, %v19470_v47  ;;  %v13551_v47 = vunpack.i.h.bf16 %v19407_v19  ;;  %v7611_v54 = vsel %vm4545_vm2, %v19219_v43, %v13515_v35 }
 0x60c   : > { %21661 = vst [vmem:[#allocation12_spill] sm:$0xff] %v19547_v56  ;;  %v19549_v33 = vpop.permute.xlu1 %13653  ;;  %v13555_v2 = vunpack.i.l.bf16 %v19427_v24  ;;  %v7631_v19 = vsel %vm4649_vm3, %v7611_v54, %v13525_v28  ;;  %v13570_v41 = vunpack.i.l.bf16 %v19419_v27  ;;  %v19609_v43 = vpack.i.bf16 %v19588_v4, %v6243_v50 }
 0x60d   : > { %13968 = vrot.lane.b32.xlu0 %v19551_v38, %s21456_s28  ;;  %v7669_v35 = vsel %vm4857_vm4, %v7649_v60, %v13540_v29  ;;  %v7651_v56 = vsel %vm4753_vm8, %v7631_v19, %v13535_v48  ;;  %v13571_v50 = vunpack.i.h.bf16 %v19419_v27  ;;  %v13580_v27 = vunpack.i.l.bf16 %v19425_v6 }
 0x60e   : > { %13943 = vrot.lane.b32.xlu1 %v13942_v58, %s21653_s19  ;;  %v13561_v58 = vunpack.i.h.bf16 %v19413_v30  ;;  %v7670_v30 = vsel %vm4857_vm4, %v7650_v52, %v13541_v61  ;;  %v7689_v28 = vsel %vm4961_vm11, %v7669_v35, %v13550_v25  ;;  %v7671_v13 = vsel %vm4857_vm4, %v7651_v56, %v13545_v8 }
 0x60f   : > { %v19581_v36 = vpop.permute.xlu0 %13688  ;;  %v7690_v54 = vsel %vm4961_vm11, %v7670_v30, %v13551_v47  ;;  %v7709_v52 = vsel %vm5065_vm13, %v7689_v28, %v13560_v16  ;;  %v13581_v61 = vunpack.i.h.bf16 %v19425_v6  ;;  %v7691_v29 = vsel %vm4961_vm11, %v7671_v13, %v13555_v2 }
 0x610   : > { %v19583_v21 = vpop.permute.xlu1 %13663  ;;  %v7710_v60 = vsel %vm5065_vm13, %v7690_v54, %v13561_v58  ;;  %v7729_v48 = vsel %vm5169_vm15, %v7709_v52, %v13570_v41  ;;  %v13590_v56 = vunpack.i.l.bf16 %v19431_v10  ;;  %v13611_v8 = vunpack.i.h.bf16 %v19454_v44 }
 0x611   : > { %21662 = vst [vmem:[#allocation34_spill] sm:$0xff] %v19583_v21  ;;  %13978 = vrot.lane.b32.xlu0 %v19586_v32, %s21654_s16  ;;  %v13565_v21 = vunpack.i.l.bf16 %v19433_v53  ;;  %v13610_v13 = vunpack.i.l.bf16 %v19454_v44  ;;  %v13596_v58 = vunpack.i.h.bf16 %v19466_v7  ;;  %v7730_v2 = vsel %vm5169_vm15, %v7710_v60, %v13571_v50 }
 0x612   : > { %13953 = vrot.lane.b32.xlu1 %v19447_v45, %s21456_s28  ;;  %v13591_v6 = vunpack.i.h.bf16 %v19431_v10  ;;  %v13595_v19 = vunpack.i.l.bf16 %v19466_v7  ;;  %v13631_v41 = vunpack.i.h.bf16 %v19475_v62  ;;  %v13616_v44 = vunpack.i.h.bf16 %v19487_v12 }
 0x613   : > { %v19615_v20 = vpop.permute.xlu0 %13698  ;;  %v7711_v47 = vsel %vm5065_vm13, %v7691_v29, %v13565_v21  ;;  %v13630_v21 = vunpack.i.l.bf16 %v19475_v62  ;;  %v13615_v30 = vunpack.i.l.bf16 %v19487_v12  ;;  %v7750_v10 = vsel %vm5331_vm5, %v7730_v2, %v13590_v56 }
 0x614   : > { %21663 = vst [vmem:[#allocation35_spill] sm:$0xff] %v19615_v20  ;;  %v19617_v45 = vpop.permute.xlu1 %13673  ;;  %v7731_v25 = vsel %vm5169_vm15, %v7711_v47, %v13575_v55  ;;  %v7749_v55 = vsel %vm5331_vm5, %v7729_v48, %v13581_v61  ;;  %v13651_v35 = vunpack.i.h.bf16 %v19496_v14  ;;  %v13650_v28 = vunpack.i.l.bf16 %v19496_v14 }
 0x615   : > { %13988 = vrot.lane.b32.xlu0 %v19570_v59, %s21458_s27  ;;  %v7751_v7 = vsel %vm5331_vm5, %v7731_v25, %v13591_v6  ;;  %v7748_v62 = vsel %vm5331_vm5, %v19558_v46, %v13580_v27  ;;  %v7771_v12 = vsel %vm7768_vm9, %v7750_v10, %v13610_v13  ;;  %v7770_v50 = vsel %vm7768_vm9, %v7749_v55, %v13596_v58 }
 0x616   : > { %13963 = vrot.lane.b32.xlu1 %v19459_v49, %s21654_s16  ;;  %v7772_v54 = vsel %vm7768_vm9, %v7751_v7, %v13611_v8  ;;  %v7769_v60 = vsel %vm7768_vm9, %v7748_v62, %v13595_v19  ;;  %v7792_v61 = vsel %vm7789_vm14, %v7771_v12, %v13630_v21  ;;  %v13636_v29 = vunpack.i.h.bf16 %v19511_v42 }
 0x617   : > { %v19639_v16 = vpop.permute.xlu0 %13708  ;;  %v13635_v14 = vunpack.i.l.bf16 %v19511_v42  ;;  %v7793_v46 = vsel %vm7789_vm14, %v7772_v54, %v13631_v41  ;;  %v7790_v48 = vsel %vm7789_vm14, %v7769_v60, %v13615_v30  ;;  %v7791_v27 = vsel %vm7789_vm14, %v7770_v50, %v13616_v44 }
 0x618   : > { %v19641_v49 = vpop.permute.xlu1 %13683  ;;  %v13670_v56 = vunpack.i.l.bf16 %v19529_v51  ;;  %v7813_v47 = vsel %vm7810_vm1, %v7792_v61, %v13650_v28  ;;  %v7814_v25 = vsel %vm7810_vm1, %v7793_v46, %v13651_v35  ;;  %v13671_v42 = vunpack.i.h.bf16 %v19529_v51 }
 0x619   : > { %13998 = vrot.lane.b32.xlu0 %v19594_v57, %s21648_s21  ;;  %v13655_v8 = vunpack.i.l.bf16 %v19549_v33  ;;  %v13656_v13 = vunpack.i.h.bf16 %v19549_v33  ;;  %v13691_v58 = vunpack.i.h.bf16 %v19581_v36  ;;  %v13690_v2 = vunpack.i.l.bf16 %v19581_v36 }
 0x61a   : > { %13973 = vrot.lane.b32.xlu1 %v19468_v17, %s21458_s27  ;;  %v13675_v6 = vunpack.i.l.bf16 %v19617_v45  ;;  %v7812_v55 = vsel %vm7810_vm1, %v7791_v27, %v13636_v29  ;;  %v13676_v41 = vunpack.i.h.bf16 %v19617_v45  ;;  %v13710_v51 = vunpack.i.l.bf16 %v19639_v16 }
 0x61b   : > { %v19664_v52 = vpop.permute.xlu0 %13718  ;;  %v7834_v44 = vsel %vm7831_vm6, %v7813_v47, %v13670_v56  ;;  %v13711_v33 = vunpack.i.h.bf16 %v19639_v16  ;;  %v7835_v36 = vsel %vm7831_vm6, %v7814_v25, %v13671_v42  ;;  %v7833_v28 = vsel %vm7831_vm6, %v7812_v55, %v13656_v13  ;;  %v19754_v55 = vld [vmem:[#allocation3 + $0xe2] sm:$0xff] }
 0x61c   : > { %v13694_v17 = vpop.permute.xlu1 %13693  ;;  %v7855_v62 = vsel %vm7852_vm7, %v7834_v44, %v13690_v2  ;;  %v7856_v16 = vsel %vm7852_vm7, %v7835_v36, %v13691_v58  ;;  %v19731_v2 = vld [vmem:[#allocation3 + $0xe0] sm:$0xff] }
 0x61d   : > { %14008 = vrot.lane.b32.xlu0 %v19573_v34, %s21454_s15  ;;  %v13696_v30 = vunpack.i.h.bf16 %v13694_v17  ;;  %v13695_v10 = vunpack.i.l.bf16 %v13694_v17  ;;  %v7854_v17 = vsel %vm7852_vm7, %v7833_v28, %v13676_v41  ;;  %v7877_v29 = vsel %vm7873_vm10, %v7856_v16, %v13711_v33 }
 0x61e   : > { %13983 = vrot.lane.b32.xlu1 %v19480_v9, %s21648_s21  ;;  %v7811_v9 = vsel %vm7810_vm1, %v7790_v48, %v13635_v14  ;;  %v13536_v28 = vunpack.i.h.bf16 %v19415_v26  ;;  %v13546_v16 = vunpack.i.h.bf16 %v19421_v0  ;;  %v19811_v26 = vld [vmem:[#allocation3 + $0xfa] sm:$0xff] }
 0x61f   : > { %v13729_v19 = vpop.permute.xlu0 %13728  ;;  %v7832_v7 = vsel %vm7831_vm6, %v7811_v9, %v13655_v8  ;;  %v7875_v46 = vsel %vm7873_vm10, %v7854_v17, %v13696_v30  ;;  %v19774_v30 = vld [vmem:[#allocation3 + $0xf8] sm:$0xff]  ;;  %v14790_v17 = vld [vmem:[#allocation3 + $0x30] sm:$0xff] }
 0x620   : > { %v19686_v21 = vpop.permute.xlu1 %13703  ;;  %v13731_v35 = vunpack.i.h.bf16 %v13729_v19  ;;  %v13730_v45 = vunpack.i.l.bf16 %v13729_v19  ;;  %v7853_v12 = vsel %vm7852_vm7, %v7832_v7, %v13675_v6  ;;  %v19743_v19 = vld [vmem:[#allocation3 + $0xe1] sm:$0xff] }
 0x621   : > { %14018 = vrot.lane.b32.xlu0 %v19609_v43, %s21649_s24  ;;  %v7874_v14 = vsel %vm7873_vm10, %v7853_v12, %v13695_v10  ;;  %v19815_v0 = vld [vmem:[#allocation3 + $0xfb] sm:$0xff] }
 0x622   : > { %13993 = vrot.lane.b32.xlu1 %v19489_v15, %s21454_s15  ;;  %v7876_v15 = vsel %vm7873_vm10, %v7855_v62, %v13710_v51  ;;  %v7898_v27 = vsel %vm7894_vm12, %v7877_v29, %v13731_v35  ;;  %s21664_s15 = smov 64   ;;  %v19764_v51 = vld [vmem:[#allocation3 + $0xe3] sm:$0xff]  ;;  %v13516_v35 = vunpack.i.h.bf16 %v19403_v5  ;;  %v19796_v62 = vld [vmem:[#allocation3 + $0xf1] sm:$0xff] }
 0x623   : > { %v19704_v54 = vpop.permute.xlu0 %13738  ;;  %v7897_v48 = vsel %vm7894_vm12, %v7876_v15, %v13730_v45  ;;  %v14062_v33 = vpack.i.bf16 %v19764_v51, %v19588_v4  ;;  %v19789_v45 = vld [vmem:[#allocation3 + $0xf9] sm:$0xff]  ;;  %v13526_v4 = vunpack.i.h.bf16 %v19409_v31 }
 0x624   : > { %v13714_v50 = vpop.permute.xlu1 %13713  ;;  %v7916_v13 = vpack.c.bf16 %v7898_v27, %v7897_v48  ;;  %v19805_v5 = vpack.i.bf16 %v19789_v45, %v19796_v62  ;;  %v19807_v31 = vld [vmem:[#allocation3 + $0xf2] sm:$0xff]  ;;  %v7612_v15 = vsel %vm4545_vm2, %v14790_v17, %v13516_v35  ;;  %v13600_v48 = vunpack.i.l.bf16 %v19442_v3 }
 0x625   : > { %v13716_v60 = vunpack.i.h.bf16 %v13714_v50  ;;  %v13715_v61 = vunpack.i.l.bf16 %v13714_v50  ;;  %14028 = vrot.lane.b32.xlu0 %v19576_v18, %s14827_s22  ;;  %v21674_v17 = vld [vmem:[#allocation55_spill] sm:$0xff] }
 0x626   : > { %14003 = vrot.lane.b32.xlu1 %v19501_v40, %s21649_s24  ;;  %v21678_v29 = vld [vmem:[#allocation11_spill] sm:$0xff] }
 0x627   : > { %v7895_v56 = vsel %vm7894_vm12, %v7874_v14, %v13715_v61  ;;  %v7896_v47 = vsel %vm7894_vm12, %v7875_v46, %v13716_v60  ;;  %v19719_v25 = vpop.permute.xlu0 %13748  ;;  %v13556_v60 = vunpack.i.h.bf16 %v19427_v24  ;;  %v19813_v61 = vld [vmem:[#allocation3 + $0xf3] sm:$0xff]  ;;  %v7632_v14 = vsel %vm4649_vm3, %v7612_v15, %v13526_v4 }
 0x628   : > { %v19721_v42 = vpop.permute.xlu1 %13723  ;;  %v7915_v8 = vpack.c.bf16 %v7896_v47, %v7895_v56  ;;  %v13566_v46 = vunpack.i.h.bf16 %v19433_v53  ;;  %v7652_v27 = vsel %vm4753_vm8, %v7632_v14, %v13536_v28  ;;  %v13586_v56 = vunpack.i.h.bf16 %v19456_v39 }
 0x629   : > { %14038 = vrot.lane.b32.xlu0 %v19570_v59, %s21651_s18  ;;  %v13585_v47 = vunpack.i.l.bf16 %v19456_v39  ;;  %v7615_v15 = vsel %vm4545_vm2, %v21674_v17, %v13600_v48  ;;  %v13576_v14 = vunpack.i.h.bf16 %v19444_v63  ;;  %v21677_v17 = vld [vmem:[#allocation33_spill] sm:$0xff] }
 0x62a   : > { %14013 = vrot.lane.b32.xlu1 %v19513_v23, %s14827_s22  ;;  %11529 = vmatprep.mubr.bf16.mxu0 %v7915_v8  ;;  %v14032_v23 = vpack.i.bf16 %v19731_v2, %v19516_v22  ;;  %v7672_v8 = vsel %vm4857_vm4, %v7652_v27, %v13546_v16  ;;  %v21675_v27 = vld [vmem:[#allocation10_spill] sm:$0xff]  ;;  %v13660_v24 = vunpack.i.l.bf16 %v21677_v17 }
 0x62b   : > { %11530 = vmatmul.mubr.bf16.vlgmr.msra.gmra.mxu0 %v7916_v13  ;;  %v19727_v40 = vpop.permute.xlu0 %13758  ;;  %v13620_v13 = vunpack.i.l.bf16 %v19464_v11  ;;  %v7692_v39 = vsel %vm4961_vm11, %v7672_v8, %v13556_v60  ;;  %v13640_v53 = vunpack.i.l.bf16 %v21675_v27  ;;  %v14791_v60 = vld [vmem:[#allocation3 + $0x48] sm:$0xff] }
 0x62c   : > { %v19729_v58 = vpop.permute.xlu1 %13733  ;;  %v7712_v16 = vsel %vm5065_vm13, %v7692_v39, %v13566_v46  ;;  %v7614_v8 = vsel %vm4545_vm2, %v14791_v60, %v13586_v56  ;;  %v21676_v46 = vld [vmem:[#allocation32_spill] sm:$0xff] }
 0x62d   : > { %14048 = vrot.lane.b32.xlu0 %v19573_v34, %s21657_s26  ;;  %v13626_v39 = vunpack.i.h.bf16 %v21676_v46  ;;  %v13625_v48 = vunpack.i.l.bf16 %v21676_v46  ;;  %v7635_v63 = vsel %vm4649_vm3, %v7615_v15, %v13620_v13  ;;  %v21680_v60 = vld [vmem:[#allocation12_spill] sm:$0xff] }
 0x62e   : > { %14023 = vrot.lane.b32.xlu1 %v19551_v38, %s21664_s15  ;;  %v14042_v38 = vpack.i.bf16 %v19743_v19, %v19555_v37  ;;  %v7655_v13 = vsel %vm4753_vm8, %v7635_v63, %v13640_v53  ;;  %v13720_v53 = vunpack.i.l.bf16 %v19664_v52 }
 0x62f   : > { %v19737_v6 = vpop.permute.xlu0 %13768 }
 0x630   : > { %v19739_v59 = vpop.permute.xlu1 %13743 }
 0x631   : > { %14058 = vrot.lane.b32.xlu0 %v19576_v18, %s21460_s23  ;;  %v14052_v18 = vpack.i.bf16 %v19754_v55, %v19566_v1  ;;  %v19778_v1 = vld [vmem:[#allocation3 + $0xf0] sm:$0xff] }
 0x632   : > { %14033 = vrot.lane.b32.xlu1 %v14032_v23, %s21664_s15  ;;  %v19786_v7 = vpack.i.bf16 %v19774_v30, %v19778_v1 }
 0x633   : > { %v19748_v9 = vpop.permute.xlu0 %13778 }
 0x634   : > { %v19750_v34 = vpop.permute.xlu1 %13753 }
 0x635   : > { %14068 = vrot.lane.b32.xlu0 %v14032_v23, %s21456_s28  ;;  %s21667_s28 = smov 112  }
 0x636   : > { %14043 = vrot.lane.b32.xlu1 %v14042_v38, %s21651_s18 }
 0x637   : > { %v19758_v22 = vpop.permute.xlu0 %13788 }
 0x638   : > { %21665 = vst [vmem:[#allocation29_spill] sm:$0xff] %v19758_v22  ;;  %v19760_v41 = vpop.permute.xlu1 %13763  ;;  %v13700_v22 = vunpack.i.l.bf16 %v19615_v20 }
 0x639   : > { %14078 = vrot.lane.b32.xlu0 %v14042_v38, %s21458_s27  ;;  %s21669_s27 = smov 96   ;;  %v19841_v38 = vpack.i.bf16 %v19811_v26, %v19807_v31 }
 0x63a   : > { %14053 = vrot.lane.b32.xlu1 %v14052_v18, %s21657_s26 }
 0x63b   : > { %v19768_v37 = vpop.permute.xlu0 %13798 }
 0x63c   : > { %v19770_v44 = vpop.permute.xlu1 %13773 }
 0x63d   : > { %21666 = vst [vmem:[#allocation13_spill] sm:$0xff] %v19770_v44  ;;  %14088 = vrot.lane.b32.xlu0 %v14052_v18, %s21667_s28  ;;  %v19845_v18 = vpack.i.bf16 %v19815_v0, %v19813_v61  ;;  %v21681_v44 = vld [vmem:[#allocation34_spill] sm:$0xff] }
 0x63e   : > { %14063 = vrot.lane.b32.xlu1 %v14062_v33, %s21460_s23  ;;  %s21671_s23 = smov 104   ;;  %v13665_v46 = vunpack.i.l.bf16 %v21681_v44  ;;  %v13666_v15 = vunpack.i.h.bf16 %v21681_v44  ;;  %v7732_v44 = vsel %vm5169_vm15, %v7712_v16, %v13576_v14 }
 0x63f   : > { %v19780_v10 = vpop.permute.xlu0 %13808 }
 0x640   : > { %21668 = vst [vmem:[#allocation14_spill] sm:$0xff] %v19780_v10  ;;  %v19782_v36 = vpop.permute.xlu1 %13783 }
 0x641   : > { %14098 = vrot.lane.b32.xlu0 %v14062_v33, %s14827_s22  ;;  %v21673_v33 = vld [vmem:[#allocation9_spill] sm:$0xff] }
 0x642   : > { %14073 = vrot.lane.b32.xlu1 %v19786_v7, %s21669_s27  ;;  %v13606_v35 = vunpack.i.h.bf16 %v21673_v33  ;;  %v13605_v4 = vunpack.i.l.bf16 %v21673_v33  ;;  %v14792_v33 = vld [vmem:[#allocation3 + $0x38] sm:$0xff] }
 0x643   : > { %v19799_v12 = vpop.permute.xlu0 %13818  ;;  %v7613_v28 = vsel %vm4545_vm2, %v14792_v33, %v13585_v47  ;;  %v13680_v33 = vunpack.i.l.bf16 %v21680_v60 }
 0x644   : > { %v19801_v50 = vpop.permute.xlu1 %13793  ;;  %v7633_v56 = vsel %vm4649_vm3, %v7613_v28, %v13605_v4  ;;  %v7634_v47 = vsel %vm4649_vm3, %v7614_v8, %v13606_v35  ;;  %v13686_v28 = vunpack.i.h.bf16 %v19641_v49  ;;  %v7675_v8 = vsel %vm4857_vm4, %v7655_v13, %v13660_v24 }
 0x645   : > { %21670 = vst [vmem:[#allocation36_spill] sm:$0xff] %v19801_v50  ;;  %14108 = vrot.lane.b32.xlu0 %v19586_v32, %s21647_s17  ;;  %v7653_v35 = vsel %vm4753_vm8, %v7633_v56, %v13625_v48  ;;  %v7654_v4 = vsel %vm4753_vm8, %v7634_v47, %v13626_v39  ;;  %v7695_v48 = vsel %vm4961_vm11, %v7675_v8, %v13680_v33  ;;  %v13705_v56 = vunpack.i.l.bf16 %v19686_v21 }
 0x646   : > { %14083 = vrot.lane.b32.xlu1 %v19805_v5, %s21671_s23  ;;  %v7715_v24 = vsel %vm5065_vm13, %v7695_v48, %v13700_v22  ;;  %v13725_v22 = vunpack.i.l.bf16 %v19721_v42  ;;  %v13726_v33 = vunpack.i.h.bf16 %v19721_v42  ;;  %v13760_v13 = vunpack.i.l.bf16 %v19727_v40 }
 0x647   : > { %v19835_v32 = vpop.permute.xlu0 %13828  ;;  %v21683_v8 = vpack.i.bf16 %v19796_v62, %v19743_v19  ;;  %v13801_v48 = vunpack.i.h.bf16 %v19768_v37 }
 0x648   : > { %21672 = vst [vmem:[#allocation37_spill] sm:$0xff] %v19835_v32  ;;  %v19837_v23 = vpop.permute.xlu1 %13803  ;;  %v13646_v32 = vunpack.i.h.bf16 %v21678_v29 }
 0x649   : > { %14113 = vrot.lane.b32.xlu0 %v19594_v57, %s21506_s20  ;;  %v13645_v57 = vunpack.i.l.bf16 %v21678_v29  ;;  %v13685_v29 = vunpack.i.l.bf16 %v19641_v49  ;;  %v13706_v49 = vunpack.i.h.bf16 %v19686_v21  ;;  %v7735_v21 = vsel %vm5169_vm15, %v7715_v24, %v13720_v53 }
 0x64a   : > { %14093 = vrot.lane.b32.xlu1 %v19841_v38, %s21667_s28  ;;  %v13765_v53 = vunpack.i.l.bf16 %v19760_v41 }
 0x64b   : > { %v19869_v50 = vpop.permute.xlu0 %13838  ;;  %v7673_v63 = vsel %vm4857_vm4, %v7653_v35, %v13645_v57  ;;  %v21682_v57 = vpack.i.bf16 %v19778_v1, %v19731_v2  ;;  %v13745_v2 = vunpack.i.l.bf16 %v19739_v59 }
 0x64c   : > { %v19871_v10 = vpop.permute.xlu1 %13813  ;;  %v7693_v39 = vsel %vm4961_vm11, %v7673_v63, %v13665_v46  ;;  %v13761_v46 = vunpack.i.h.bf16 %v19727_v40  ;;  %v13766_v40 = vunpack.i.h.bf16 %v19760_v41  ;;  %v7752_v63 = vsel %vm5331_vm5, %v7732_v44, %v13725_v22 }
 0x64d   : > { %21679 = vst [vmem:[#allocation52_spill] sm:$0xff] %v19871_v10  ;;  %14118 = vrot.lane.b32.xlu0 %v19609_v43, %s21652_s25  ;;  %v7674_v10 = vsel %vm4857_vm4, %v7654_v4, %v13646_v32  ;;  %v7713_v14 = vsel %vm5065_vm13, %v7693_v39, %v13685_v29  ;;  %v13740_v32 = vunpack.i.l.bf16 %v19704_v54  ;;  %v13780_v4 = vunpack.i.l.bf16 %v19748_v9 }
 0x64e   : > { %14103 = vrot.lane.b32.xlu1 %v19845_v18, %s14827_s22  ;;  %v7694_v16 = vsel %vm4961_vm11, %v7674_v10, %v13666_v15  ;;  %v13741_v10 = vunpack.i.h.bf16 %v19704_v54  ;;  %v7733_v29 = vsel %vm5169_vm15, %v7713_v14, %v13705_v56  ;;  %v13746_v54 = vunpack.i.h.bf16 %v19739_v59 }
 0x64f   : > { %v19893_v43 = vpop.permute.xlu0 %13848  ;;  %v7714_v47 = vsel %vm5065_vm13, %v7694_v16, %v13686_v28  ;;  %v13781_v28 = vunpack.i.h.bf16 %v19748_v9  ;;  %v13800_v9 = vunpack.i.l.bf16 %v19768_v37  ;;  %v7753_v39 = vsel %vm5331_vm5, %v7733_v29, %v13726_v33 }
 0x650   : > { %v19895_v20 = vpop.permute.xlu1 %13823  ;;  %v7734_v35 = vsel %vm5169_vm15, %v7714_v47, %v13706_v49  ;;  %v7755_v59 = vsel %vm5331_vm5, %v7735_v21, %v13741_v10  ;;  %v7774_v16 = vsel %vm7768_vm9, %v7753_v39, %v13746_v54  ;;  %v13786_v44 = vunpack.i.h.bf16 %v19782_v36 }
 0x651   : > { %14123 = vrot.lane.b32.xlu0 %v21682_v57, %s21653_s19  ;;  %v7754_v42 = vsel %vm5331_vm5, %v7734_v35, %v13740_v32  ;;  %v7776_v49 = vsel %vm7768_vm9, %v7755_v59, %v13761_v46  ;;  %v13785_v14 = vunpack.i.l.bf16 %v19782_v36  ;;  %v7795_v57 = vsel %vm7789_vm14, %v7774_v16, %v13766_v40 }
 0x652   : > { %6466 = vrot.lane.b32.xlu1 %v19743_v19, %s21647_s17  ;;  %v7775_v41 = vsel %vm7768_vm9, %v7754_v42, %v13760_v13  ;;  %v7773_v19 = vsel %vm7768_vm9, %v7752_v63, %v13745_v2  ;;  %v7797_v37 = vsel %vm7789_vm14, %v7776_v49, %v13781_v28  ;;  %v13820_v47 = vunpack.i.l.bf16 %v19799_v12  ;;  %s21686_s17 = smov 88  }
 0x653   : > { %v19919_v1 = vpop.permute.xlu0 %13858  ;;  %v7796_v24 = vsel %vm7789_vm14, %v7775_v41, %v13780_v4  ;;  %v7794_v32 = vsel %vm7789_vm14, %v7773_v19, %v13765_v53  ;;  %v21684_v21 = vpack.i.bf16 %v19807_v31, %v19754_v55  ;;  %v7818_v36 = vsel %vm7810_vm1, %v7797_v37, %v13801_v48 }
 0x654   : > { %v19921_v15 = vpop.permute.xlu1 %13833  ;;  %v7817_v10 = vsel %vm7810_vm1, %v7796_v24, %v13800_v9  ;;  %v13821_v22 = vunpack.i.h.bf16 %v19799_v12  ;;  %v13805_v33 = vunpack.i.l.bf16 %v19837_v23  ;;  %v13806_v46 = vunpack.i.h.bf16 %v19837_v23 }
 0x655   : > { %14128 = vrot.lane.b32.xlu0 %v21683_v8, %s21654_s16  ;;  %v13841_v13 = vunpack.i.h.bf16 %v19869_v50  ;;  %v13840_v2 = vunpack.i.l.bf16 %v19869_v50  ;;  %v7815_v35 = vsel %vm7810_vm1, %v7794_v32, %v13785_v14  ;;  %v7816_v54 = vsel %vm7810_vm1, %v7795_v57, %v13786_v44 }
 0x656   : > { %6546 = vrot.lane.b32.xlu1 %v19754_v55, %s21506_s20  ;;  %v13825_v55 = vunpack.i.l.bf16 %v19895_v20  ;;  %v13826_v4 = vunpack.i.h.bf16 %v19895_v20  ;;  %v13860_v12 = vunpack.i.l.bf16 %v19919_v1  ;;  %v7838_v42 = vsel %vm7831_vm6, %v7817_v10, %v13820_v47  ;;  %v6266_v47 = vld [vmem:[#allocation3 + $0x108] sm:$0xff] }
 0x657   : > { %v19945_v62 = vpop.permute.xlu0 %13868  ;;  %v13861_v23 = vunpack.i.h.bf16 %v19919_v1  ;;  %v21685_v50 = vpack.i.bf16 %v19813_v61, %v19764_v51  ;;  %v7839_v53 = vsel %vm7831_vm6, %v7818_v36, %v13821_v22  ;;  %v7836_v20 = vsel %vm7831_vm6, %v7815_v35, %v13805_v33  ;;  %v6287_v33 = vld [vmem:[#allocation3 + $0x111] sm:$0xff] }
 0x658   : > { %v13844_v56 = vpop.permute.xlu1 %13843  ;;  %v7837_v63 = vsel %vm7831_vm6, %v7816_v54, %v13806_v46  ;;  %v7859_v1 = vsel %vm7852_vm7, %v7838_v42, %v13840_v2  ;;  %v7860_v48 = vsel %vm7852_vm7, %v7839_v53, %v13841_v13  ;;  %v7857_v9 = vsel %vm7852_vm7, %v7836_v20, %v13825_v55  ;;  %v6306_v2 = vld [vmem:[#allocation3 + $0x10a] sm:$0xff]  ;;  %v6307_v55 = vld [vmem:[#allocation3 + $0x112] sm:$0xff]  ;;  %v6346_v42 = vld [vmem:[#allocation3 + $0x120] sm:$0xff] }
 0x659   : > { %14133 = vrot.lane.b32.xlu0 %v21684_v21, %s21648_s21  ;;  %v13846_v28 = vunpack.i.h.bf16 %v13844_v56  ;;  %v13845_v40 = vunpack.i.l.bf16 %v13844_v56  ;;  %v7858_v61 = vsel %vm7852_vm7, %v7837_v63, %v13826_v4  ;;  %v7880_v49 = vsel %vm7873_vm10, %v7859_v1, %v13860_v12  ;;  %v6267_v21 = vld [vmem:[#allocation3 + $0x110] sm:$0xff]  ;;  %v6366_v53 = vld [vmem:[#allocation3 + $0x121] sm:$0xff] }
 0x65a   : > { %6626 = vrot.lane.b32.xlu1 %v19764_v51, %s21652_s25  ;;  %v7881_v16 = vsel %vm7873_vm10, %v7860_v48, %v13861_v23  ;;  %v14147_v22 = vpack.i.bf16 %v6267_v21, %v6266_v47  ;;  %v6326_v35 = vld [vmem:[#allocation3 + $0x10b] sm:$0xff]  ;;  %v6327_v54 = vld [vmem:[#allocation3 + $0x113] sm:$0xff]  ;;  %v13621_v1 = vunpack.i.h.bf16 %v19464_v11  ;;  %v13755_v47 = vunpack.i.l.bf16 %v19750_v34 }
 0x65b   : > { %v13879_v31 = vpop.permute.xlu0 %13878  ;;  %v7878_v19 = vsel %vm7873_vm10, %v7857_v9, %v13845_v40  ;;  %v7879_v56 = vsel %vm7873_vm10, %v7858_v61, %v13846_v28  ;;  %v6347_v23 = vld [vmem:[#allocation3 + $0x128] sm:$0xff]  ;;  %v13641_v9 = vunpack.i.h.bf16 %v21675_v27  ;;  %v13735_v27 = vunpack.i.l.bf16 %v19729_v58 }
 0x65c   : > { %v19969_v29 = vpop.permute.xlu1 %13853  ;;  %v13881_v8 = vunpack.i.h.bf16 %v13879_v31  ;;  %v13880_v59 = vunpack.i.l.bf16 %v13879_v31  ;;  %v6367_v20 = vld [vmem:[#allocation3 + $0x129] sm:$0xff] }
 0x65d   : > { %14138 = vrot.lane.b32.xlu0 %v21685_v50, %s21649_s24  ;;  %v14187_v50 = vpack.i.bf16 %v6347_v23, %v6346_v42  ;;  %v14197_v48 = vpack.i.bf16 %v6367_v20, %v6366_v53  ;;  %v6387_v61 = vld [vmem:[#allocation3 + $0x12a] sm:$0xff] }
 0x65e   : > { %6706 = vrot.lane.b32.xlu1 %v19774_v30, %s21653_s19  ;;  %v7901_v14 = vsel %vm7894_vm12, %v7880_v49, %v13880_v59  ;;  %v7902_v37 = vsel %vm7894_vm12, %v7881_v16, %v13881_v8  ;;  %v13601_v8 = vunpack.i.h.bf16 %v19442_v3  ;;  %v13661_v3 = vunpack.i.h.bf16 %v21677_v17  ;;  %v6407_v16 = vld [vmem:[#allocation3 + $0x12b] sm:$0xff] }
 0x65f   : > { %v19989_v39 = vpop.permute.xlu0 %13888  ;;  %v13770_v17 = vunpack.i.l.bf16 %v19737_v6 }
 0x660   : > { %v13864_v51 = vpop.permute.xlu1 %13863 }
 0x661   : > { %v13866_v30 = vunpack.i.h.bf16 %v13864_v51  ;;  %v13865_v41 = vunpack.i.l.bf16 %v13864_v51  ;;  %14143 = vrot.lane.b32.xlu0 %v19786_v7, %s21664_s15  ;;  %v6386_v51 = vld [vmem:[#allocation3 + $0x122] sm:$0xff] }
 0x662   : > { %6786 = vrot.lane.b32.xlu1 %v19789_v45, %s21654_s16  ;;  %v7918_v45 = vpack.c.bf16 %v7902_v37, %v7901_v14  ;;  %v14207_v14 = vpack.i.bf16 %v6387_v61, %v6386_v51  ;;  %v21692_v61 = vld [vmem:[#allocation37_spill] sm:$0xff]  ;;  %s11564_s16 = smul.u32 40, %s21696_s30 }
 0x663   : > { %v7899_v24 = vsel %vm7894_vm12, %v7878_v19, %v13865_v41  ;;  %v7900_v44 = vsel %vm7894_vm12, %v7879_v56, %v13866_v30  ;;  %v20004_v32 = vpop.permute.xlu0 %13898  ;;  %v14793_v30 = vld [vmem:[#allocation3 + $0x60] sm:$0xff] }
 0x664   : > { %v20006_v7 = vpop.permute.xlu1 %13873  ;;  %v7917_v57 = vpack.c.bf16 %v7900_v44, %v7899_v24  ;;  %v7616_v41 = vsel %vm4545_vm2, %v14793_v30, %v13601_v8  ;;  %v6406_v56 = vld [vmem:[#allocation3 + $0x123] sm:$0xff]  ;;  %v13750_v24 = vunpack.i.l.bf16 %v19719_v25  ;;  %v13736_v44 = vunpack.i.h.bf16 %v19729_v58  ;;  %v21690_v8 = vld [vmem:[#allocation14_spill] sm:$0xff] }
 0x665   : > { %14153 = vrot.lane.b32.xlu0 %v19805_v5, %s21651_s18  ;;  %v6286_v5 = vld [vmem:[#allocation3 + $0x109] sm:$0xff]  ;;  %v7636_v11 = vsel %vm4649_vm3, %v7616_v41, %v13621_v1  ;;  %v13810_v1 = vunpack.i.l.bf16 %v21690_v8  ;;  %v13830_v30 = vunpack.i.l.bf16 %v21692_v61  ;;  %v21693_v41 = vld [vmem:[#allocation52_spill] sm:$0xff] }
 0x666   : > { %6866 = vrot.lane.b32.xlu1 %v19811_v26, %s21648_s21  ;;  %11533 = vmatprep.mubr.bf16.mxu0 %v7917_v57  ;;  %v14157_v13 = vpack.i.bf16 %v6287_v33, %v6286_v5  ;;  %v7656_v37 = vsel %vm4753_vm8, %v7636_v11, %v13641_v9  ;;  %v14217_v5 = vpack.i.bf16 %v6407_v16, %v6406_v56  ;;  %v21687_v33 = vld [vmem:[#allocation35_spill] sm:$0xff] }
 0x667   : > { %11534 = vmatmul.mubr.bf16.gmra.mxu0 %v7918_v45  ;;  %v20012_v10 = vpop.permute.xlu0 %13908  ;;  %v7676_v57 = vsel %vm4857_vm4, %v7656_v37, %v13661_v3  ;;  %v13681_v45 = vunpack.i.h.bf16 %v21680_v60  ;;  %v13701_v58 = vunpack.i.h.bf16 %v21687_v33  ;;  %v13815_v3 = vunpack.i.l.bf16 %v21693_v41 }
 0x668   : > { %v20014_v36 = vpop.permute.xlu1 %13883  ;;  %v13836_v37 = vunpack.i.h.bf16 %v19921_v15 }
 0x669   : > { %14163 = vrot.lane.b32.xlu0 %v19841_v38, %s21657_s26  ;;  %v7696_v33 = vsel %vm4961_vm11, %v7676_v57, %v13681_v45 }
 0x66a   : > { %6946 = vrot.lane.b32.xlu1 %v19815_v0, %s21649_s24  ;;  %v14167_v0 = vpack.i.bf16 %v6307_v55, %v6306_v2  ;;  %v6098_v2 = vld [vmem:[#allocation3 + $0x80] sm:$0xff]  ;;  %v6096_v55 = vld [vmem:[#allocation3 + $0x68] sm:$0xff] }
 0x66b   : > { %v20020_v46 = vpop.permute.xlu0 %13918  ;;  %v7619_v60 = vsel %vm4545_vm2, %v6098_v2, %v13750_v24  ;;  %v7617_v23 = vsel %vm4545_vm2, %v6096_v55, %v13735_v27  ;;  %v13850_v27 = vunpack.i.l.bf16 %v19893_v43 }
 0x66c   : > { %v20022_v26 = vpop.permute.xlu1 %13893  ;;  %v7639_v20 = vsel %vm4649_vm3, %v7619_v60, %v13770_v17  ;;  %v7637_v9 = vsel %vm4649_vm3, %v7617_v23, %v13755_v47  ;;  %v13835_v17 = vunpack.i.l.bf16 %v19921_v15  ;;  %v13870_v47 = vunpack.i.l.bf16 %v19945_v62 }
 0x66d   : > { %14173 = vrot.lane.b32.xlu0 %v19845_v18, %s21686_s17  ;;  %v14177_v18 = vpack.i.bf16 %v6327_v54, %v6326_v35  ;;  %v13756_v35 = vunpack.i.h.bf16 %v19750_v34  ;;  %v21688_v54 = vld [vmem:[#allocation29_spill] sm:$0xff] }
 0x66e   : > { %14148 = vrot.lane.b32.xlu1 %v14147_v22, %s21664_s15 }
 0x66f   : > { %v20027_v31 = vpop.permute.xlu0 %13928 }
 0x670   : > { %v20029_v38 = vpop.permute.xlu1 %13903 }
 0x671   : > { %14183 = vrot.lane.b32.xlu0 %v14147_v22, %s21669_s27 }
 0x672   : > { %14158 = vrot.lane.b32.xlu1 %v14157_v13, %s21651_s18 }
 0x673   : > { %v20033_v4 = vpop.permute.xlu0 %13938 }
 0x674   : > { %v20035_v12 = vpop.permute.xlu1 %13913 }
 0x675   : > { %14193 = vrot.lane.b32.xlu0 %v14157_v13, %s21671_s23  ;;  %v13721_v13 = vunpack.i.h.bf16 %v19664_v52 }
 0x676   : > { %14168 = vrot.lane.b32.xlu1 %v14167_v0, %s21657_s26 }
 0x677   : > { %v20039_v28 = vpop.permute.xlu0 %13948 }
 0x678   : > { %v20041_v40 = vpop.permute.xlu1 %13923 }
 0x679   : > { %14203 = vrot.lane.b32.xlu0 %v14167_v0, %s21667_s28  ;;  %v6097_v0 = vld [vmem:[#allocation3 + $0x78] sm:$0xff] }
 0x67a   : > { %14178 = vrot.lane.b32.xlu1 %v14177_v18, %s21686_s17  ;;  %v7618_v42 = vsel %vm4545_vm2, %v6097_v0, %v13736_v44  ;;  %v13816_v44 = vunpack.i.h.bf16 %v21693_v41 }
 0x67b   : > { %v20046_v59 = vpop.permute.xlu0 %13958  ;;  %v7638_v16 = vsel %vm4649_vm3, %v7618_v42, %v13756_v35  ;;  %v7716_v35 = vsel %vm5065_vm13, %v7696_v33, %v13701_v58 }
 0x67c   : > { %v20048_v63 = vpop.permute.xlu1 %13933  ;;  %v7736_v58 = vsel %vm5169_vm15, %v7716_v35, %v13721_v13  ;;  %v13896_v13 = vunpack.i.h.bf16 %v20022_v26 }
 0x67d   : > { %14213 = vrot.lane.b32.xlu0 %v14177_v18, %s14827_s22  ;;  %v13790_v18 = vunpack.i.l.bf16 %v21688_v54 }
 0x67e   : > { %14188 = vrot.lane.b32.xlu1 %v14187_v50, %s21669_s27  ;;  %v21689_v50 = vld [vmem:[#allocation13_spill] sm:$0xff] }
 0x67f   : > { %v20056_v49 = vpop.permute.xlu0 %13968  ;;  %v13775_v53 = vunpack.i.l.bf16 %v21689_v50  ;;  %v13776_v52 = vunpack.i.h.bf16 %v21689_v50  ;;  %v7659_v24 = vsel %vm4753_vm8, %v7639_v20, %v13790_v18  ;;  %v13855_v50 = vunpack.i.l.bf16 %v19969_v29 }
 0x680   : > { %v20058_v19 = vpop.permute.xlu1 %13943  ;;  %v7679_v55 = vsel %vm4857_vm4, %v7659_v24, %v13810_v1  ;;  %v13891_v1 = vunpack.i.h.bf16 %v19989_v39 }
 0x681   : > { %v7658_v2 = vsel %vm4753_vm8, %v7638_v16, %v13776_v52  ;;  %v7699_v60 = vsel %vm4961_vm11, %v7679_v55, %v13830_v30  ;;  %v13895_v30 = vunpack.i.l.bf16 %v20022_v26 }
 0x682   : > { %14198 = vrot.lane.b32.xlu1 %v14197_v48, %s21671_s23  ;;  %v21691_v48 = vld [vmem:[#allocation36_spill] sm:$0xff]  ;;  %v7719_v45 = vsel %vm5065_vm13, %v7699_v60, %v13850_v27  ;;  %v13915_v27 = vunpack.i.l.bf16 %v20035_v12  ;;  %v13935_v60 = vunpack.i.l.bf16 %v20048_v63 }
 0x683   : > { %v20070_v21 = vpop.permute.xlu0 %13978  ;;  %v13795_v34 = vunpack.i.l.bf16 %v21691_v48  ;;  %v13796_v51 = vunpack.i.h.bf16 %v21691_v48  ;;  %v7739_v52 = vsel %vm5169_vm15, %v7719_v45, %v13870_v47  ;;  %v13890_v48 = vunpack.i.l.bf16 %v19989_v39 }
 0x684   : > { %v20072_v22 = vpop.permute.xlu1 %13953  ;;  %v13931_v39 = vunpack.i.h.bf16 %v20027_v31 }
 0x685   : > { %v7678_v18 = vsel %vm4857_vm4, %v7658_v2, %v13796_v51  ;;  %v13911_v51 = vunpack.i.h.bf16 %v20012_v10 }
 0x686   : > { %14208 = vrot.lane.b32.xlu1 %v14207_v14, %s21667_s28  ;;  %v7657_v14 = vsel %vm4753_vm8, %v7637_v9, %v13775_v53  ;;  %v7698_v57 = vsel %vm4961_vm11, %v7678_v18, %v13816_v44  ;;  %v13875_v9 = vunpack.i.l.bf16 %v20006_v7  ;;  %v13930_v44 = vunpack.i.l.bf16 %v20027_v31 }
 0x687   : > { %v20091_v11 = vpop.permute.xlu0 %13988  ;;  %v7677_v0 = vsel %vm4857_vm4, %v7657_v14, %v13795_v34  ;;  %v7718_v20 = vsel %vm5065_vm13, %v7698_v57, %v13836_v37  ;;  %v13876_v34 = vunpack.i.h.bf16 %v20006_v7  ;;  %v13916_v7 = vunpack.i.h.bf16 %v20035_v12 }
 0x688   : > { %v20093_v56 = vpop.permute.xlu1 %13963  ;;  %v7697_v15 = vsel %vm4961_vm11, %v7677_v0, %v13815_v3  ;;  %v13950_v14 = vunpack.i.l.bf16 %v20039_v28  ;;  %v7759_v37 = vsel %vm5331_vm5, %v7739_v52, %v13891_v1  ;;  %v13936_v18 = vunpack.i.h.bf16 %v20048_v63 }
 0x689   : > { %v7717_v53 = vsel %vm5065_vm13, %v7697_v15, %v13835_v17  ;;  %v7756_v17 = vsel %vm5331_vm5, %v7736_v58, %v13875_v9  ;;  %v7780_v31 = vsel %vm7768_vm9, %v7759_v37, %v13911_v51  ;;  %v13970_v58 = vunpack.i.l.bf16 %v20056_v49 }
 0x68a   : > { %14218 = vrot.lane.b32.xlu1 %v14217_v5, %s14827_s22  ;;  %v13856_v5 = vunpack.i.h.bf16 %v19969_v29  ;;  %v13910_v29 = vunpack.i.l.bf16 %v20012_v10  ;;  %v7737_v16 = vsel %vm5169_vm15, %v7717_v53, %v13855_v50  ;;  %v13951_v10 = vunpack.i.h.bf16 %v20039_v28 }
 0x68b   : > { %v20112_v42 = vpop.permute.xlu0 %13998  ;;  %v7757_v47 = vsel %vm5331_vm5, %v7737_v16, %v13876_v34  ;;  %v7777_v2 = vsel %vm7768_vm9, %v7756_v17, %v13895_v30  ;;  %v7801_v35 = vsel %vm7789_vm14, %v7780_v31, %v13931_v39  ;;  %v13971_v50 = vunpack.i.h.bf16 %v20056_v49 }
 0x68c   : > { %v20114_v23 = vpop.permute.xlu1 %13973  ;;  %v7738_v24 = vsel %vm5169_vm15, %v7718_v20, %v13856_v5  ;;  %v7778_v12 = vsel %vm7768_vm9, %v7757_v47, %v13896_v13  ;;  %v7798_v15 = vsel %vm7789_vm14, %v7777_v2, %v13915_v27  ;;  %v7822_v5 = vsel %vm7810_vm1, %v7801_v35, %v13951_v10 }
 0x68d   : > { %v7758_v26 = vsel %vm5331_vm5, %v7738_v24, %v13890_v48  ;;  %v7799_v57 = vsel %vm7789_vm14, %v7778_v12, %v13916_v7  ;;  %v13956_v53 = vunpack.i.h.bf16 %v20072_v22  ;;  %v13955_v20 = vunpack.i.l.bf16 %v20072_v22 }
 0x68e   : > { %v7779_v33 = vsel %vm7768_vm9, %v7758_v26, %v13910_v29  ;;  %v13991_v52 = vunpack.i.h.bf16 %v20091_v11  ;;  %v13990_v63 = vunpack.i.l.bf16 %v20091_v11  ;;  %v13976_v1 = vunpack.i.h.bf16 %v20114_v23 }
 0x68f   : > { %v14009_v41 = vpop.permute.xlu0 %14008  ;;  %v7800_v28 = vsel %vm7789_vm14, %v7779_v33, %v13930_v44  ;;  %v13975_v48 = vunpack.i.l.bf16 %v20114_v23  ;;  %v7819_v51 = vsel %vm7810_vm1, %v7798_v15, %v13935_v60  ;;  %v7820_v29 = vsel %vm7810_vm1, %v7799_v57, %v13936_v18 }
 0x690   : > { %v20132_v3 = vpop.permute.xlu1 %13983  ;;  %v7821_v45 = vsel %vm7810_vm1, %v7800_v28, %v13950_v14  ;;  %v14011_v49 = vunpack.i.h.bf16 %v14009_v41  ;;  %v14010_v13 = vunpack.i.l.bf16 %v14009_v41  ;;  %v7843_v11 = vsel %vm7831_vm6, %v7822_v5, %v13971_v50 }
 0x691   : > { %v7842_v39 = vsel %vm7831_vm6, %v7821_v45, %v13970_v58  ;;  %v7840_v44 = vsel %vm7831_vm6, %v7819_v51, %v13955_v20  ;;  %v7841_v23 = vsel %vm7831_vm6, %v7820_v29, %v13956_v53  ;;  %v7864_v27 = vsel %vm7852_vm7, %v7843_v11, %v13991_v52  ;;  %v6100_v52 = vld [vmem:[#allocation3 + $0x98] sm:$0xff] }
 0x692   : > { %v7863_v7 = vsel %vm7852_vm7, %v7842_v39, %v13990_v63  ;;  %v7861_v10 = vsel %vm7852_vm7, %v7840_v44, %v13975_v48  ;;  %v7862_v41 = vsel %vm7852_vm7, %v7841_v23, %v13976_v1  ;;  %v7885_v33 = vsel %vm7873_vm10, %v7864_v27, %v14011_v49  ;;  %v14794_v1 = vld [vmem:[#allocation3 + $0x90] sm:$0xff] }
 0x693   : > { %v20150_v55 = vpop.permute.xlu0 %14018  ;;  %v7884_v47 = vsel %vm7873_vm10, %v7863_v7, %v14010_v13  ;;  %v13751_v28 = vunpack.i.h.bf16 %v19719_v25  ;;  %v13885_v35 = vunpack.i.l.bf16 %v20014_v36  ;;  %v13771_v15 = vunpack.i.h.bf16 %v19737_v6 }
 0x694   : > { %v13994_v0 = vpop.permute.xlu1 %13993  ;;  %v13905_v57 = vunpack.i.l.bf16 %v20029_v38  ;;  %v13791_v58 = vunpack.i.h.bf16 %v21688_v54  ;;  %v13925_v53 = vunpack.i.l.bf16 %v20041_v40  ;;  %v13811_v25 = vunpack.i.h.bf16 %v21690_v8 }
 0x695   : > { %v13996_v30 = vunpack.i.h.bf16 %v13994_v0  ;;  %v13995_v16 = vunpack.i.l.bf16 %v13994_v0  ;;  %v13945_v63 = vunpack.i.l.bf16 %v20058_v19  ;;  %v7620_v6 = vsel %vm4545_vm2, %v14794_v1, %v13751_v28 }
 0x696   : > { %v13831_v48 = vunpack.i.h.bf16 %v21692_v61  ;;  %v13965_v51 = vunpack.i.l.bf16 %v20093_v56  ;;  %v7640_v54 = vsel %vm4649_vm3, %v7620_v6, %v13771_v15  ;;  %v13851_v29 = vunpack.i.h.bf16 %v19893_v43 }
 0x697   : > { %v14029_v34 = vpop.permute.xlu0 %14028  ;;  %v7882_v31 = vsel %vm7873_vm10, %v7861_v10, %v13995_v16  ;;  %v7883_v2 = vsel %vm7873_vm10, %v7862_v41, %v13996_v30  ;;  %v13985_v49 = vunpack.i.l.bf16 %v20132_v3  ;;  %v7660_v16 = vsel %vm4753_vm8, %v7640_v54, %v13791_v58 }
 0x698   : > { %v20168_v9 = vpop.permute.xlu1 %14003  ;;  %v14031_v22 = vunpack.i.h.bf16 %v14029_v34  ;;  %v14030_v24 = vunpack.i.l.bf16 %v14029_v34  ;;  %v7621_v34 = vsel %vm4545_vm2, %v6100_v52, %v13885_v35  ;;  %v13871_v61 = vunpack.i.h.bf16 %v19945_v62 }
 0x699   : > { %v7641_v8 = vsel %vm4649_vm3, %v7621_v34, %v13905_v57  ;;  %v7680_v39 = vsel %vm4857_vm4, %v7660_v16, %v13811_v25  ;;  %v13900_v10 = vunpack.i.l.bf16 %v20004_v32  ;;  %v13906_v15 = vunpack.i.h.bf16 %v20029_v38 }
 0x69a   : > { %v7905_v12 = vsel %vm7894_vm12, %v7884_v47, %v14030_v24  ;;  %v7906_v0 = vsel %vm7894_vm12, %v7885_v33, %v14031_v22  ;;  %v7661_v22 = vsel %vm4753_vm8, %v7641_v8, %v13925_v53  ;;  %v14005_v24 = vunpack.i.l.bf16 %v20168_v9 }
 0x69b   : > { %v20180_v14 = vpop.permute.xlu0 %14038  ;;  %v7920_v20 = vpack.c.bf16 %v7906_v0, %v7905_v12  ;;  %v7681_v11 = vsel %vm4857_vm4, %v7661_v22, %v13945_v63  ;;  %v7700_v23 = vsel %vm4961_vm11, %v7680_v39, %v13831_v48  ;;  %v13926_v58 = vunpack.i.h.bf16 %v20041_v40 }
 0x69c   : > { %v14014_v26 = vpop.permute.xlu1 %14013  ;;  %v7701_v7 = vsel %vm4961_vm11, %v7681_v11, %v13965_v51  ;;  %v7720_v27 = vsel %vm5065_vm13, %v7700_v23, %v13851_v29  ;;  %v14041_v12 = vunpack.i.h.bf16 %v20180_v14  ;;  %v14040_v0 = vunpack.i.l.bf16 %v20180_v14 }
 0x69d   : > { %v14016_v37 = vunpack.i.h.bf16 %v14014_v26  ;;  %v14015_v17 = vunpack.i.l.bf16 %v14014_v26  ;;  %v7721_v62 = vsel %vm5065_vm13, %v7701_v7, %v13985_v49  ;;  %v13960_v25 = vunpack.i.l.bf16 %v20046_v59 }
 0x69e   : > { %v13946_v22 = vunpack.i.h.bf16 %v20058_v19  ;;  %v13980_v11 = vunpack.i.l.bf16 %v20070_v21 }
 0x69f   : > { %v7903_v18 = vsel %vm7894_vm12, %v7882_v31, %v14015_v17  ;;  %v7904_v60 = vsel %vm7894_vm12, %v7883_v2, %v14016_v37  ;;  %v20194_v45 = vpop.permute.xlu0 %14048  ;;  %v7740_v37 = vsel %vm5169_vm15, %v7720_v27, %v13871_v61  ;;  %v7741_v17 = vsel %vm5169_vm15, %v7721_v62, %v14005_v24  ;;  %v6102_v31 = vld [vmem:[#allocation3 + $0xb0] sm:$0xff] }
 0x6a0   : > { %v14024_v5 = vpop.permute.xlu1 %14023  ;;  %v7919_v50 = vpack.c.bf16 %v7904_v60, %v7903_v18  ;;  %v13886_v2 = vunpack.i.h.bf16 %v20014_v36  ;;  %v7623_v28 = vsel %vm4545_vm2, %v6102_v31, %v13900_v10  ;;  %v13920_v60 = vunpack.i.l.bf16 %v20020_v46 }
 0x6a1   : > { %v14026_v43 = vunpack.i.h.bf16 %v14024_v5  ;;  %v14025_v44 = vunpack.i.l.bf16 %v14024_v5  ;;  %v13940_v36 = vunpack.i.l.bf16 %v20033_v4  ;;  %v14051_v14 = vunpack.i.h.bf16 %v20194_v45 }
 0x6a2   : > { %11537 = vmatprep.mubr.bf16.mxu0 %v7919_v50  ;;  %v6101_v50 = vld [vmem:[#allocation3 + $0xa8] sm:$0xff]  ;;  %v14050_v53 = vunpack.i.l.bf16 %v20194_v45  ;;  %v7643_v40 = vsel %vm4649_vm3, %v7623_v28, %v13920_v60  ;;  %v14006_v31 = vunpack.i.h.bf16 %v20168_v9 }
 0x6a3   : > { %11538 = vmatmul.mubr.bf16.gmra.mxu0 %v7920_v20  ;;  %v14059_v13 = vpop.permute.xlu0 %14058  ;;  %v7760_v47 = vsel %vm5331_vm5, %v7740_v37, %v14025_v44  ;;  %v7761_v33 = vsel %vm5331_vm5, %v7741_v17, %v14026_v43  ;;  %v7622_v20 = vsel %vm4545_vm2, %v6101_v50, %v13886_v2  ;;  %v7663_v8 = vsel %vm4753_vm8, %v7643_v40, %v13940_v36 }
 0x6a4   : > { %v20208_v30 = vpop.permute.xlu1 %14033  ;;  %v7781_v57 = vsel %vm7768_vm9, %v7760_v47, %v14040_v0  ;;  %v7782_v5 = vsel %vm7768_vm9, %v7761_v33, %v14041_v12  ;;  %v14061_v52 = vunpack.i.h.bf16 %v14059_v13  ;;  %v14060_v63 = vunpack.i.l.bf16 %v14059_v13 }
 0x6a5   : > { %v7802_v38 = vsel %vm7789_vm14, %v7781_v57, %v14050_v53  ;;  %v7803_v1 = vsel %vm7789_vm14, %v7782_v5, %v14051_v14  ;;  %v7642_v54 = vsel %vm4649_vm3, %v7622_v20, %v13906_v15  ;;  %v7683_v61 = vsel %vm4857_vm4, %v7663_v8, %v13960_v25 }
 0x6a6   : > { %v7662_v49 = vsel %vm4753_vm8, %v7642_v54, %v13926_v58  ;;  %v7823_v24 = vsel %vm7810_vm1, %v7802_v38, %v14060_v63  ;;  %v7824_v39 = vsel %vm7810_vm1, %v7803_v1, %v14061_v52  ;;  %v13966_v43 = vunpack.i.h.bf16 %v20093_v56 }
 0x6a7   : > { %v14069_v41 = vpop.permute.xlu0 %14068  ;;  %v14000_v37 = vunpack.i.l.bf16 %v20112_v42  ;;  %v13986_v17 = vunpack.i.h.bf16 %v20132_v3  ;;  %v14020_v33 = vunpack.i.l.bf16 %v20150_v55  ;;  %v7682_v0 = vsel %vm4857_vm4, %v7662_v49, %v13946_v22 }
 0x6a8   : > { %v20221_v26 = vpop.permute.xlu1 %14043  ;;  %v14071_v6 = vunpack.i.h.bf16 %v14069_v41  ;;  %v14070_v48 = vunpack.i.l.bf16 %v14069_v41  ;;  %v14036_v28 = vunpack.i.h.bf16 %v20208_v30  ;;  %v7703_v57 = vsel %vm4961_vm11, %v7683_v61, %v13980_v11 }
 0x6a9   : > { %v7702_v5 = vsel %vm4961_vm11, %v7682_v0, %v13966_v43  ;;  %v14046_v9 = vunpack.i.h.bf16 %v20221_v26  ;;  %v14045_v50 = vunpack.i.l.bf16 %v20221_v26  ;;  %v7723_v36 = vsel %vm5065_vm13, %v7703_v57, %v14000_v37 }
 0x6aa   : > { %v7844_v44 = vsel %vm7831_vm6, %v7823_v24, %v14070_v48  ;;  %v7845_v23 = vsel %vm7831_vm6, %v7824_v39, %v14071_v6  ;;  %v7722_v58 = vsel %vm5065_vm13, %v7702_v5, %v13986_v17  ;;  %v7743_v53 = vsel %vm5169_vm15, %v7723_v36, %v14020_v33 }
 0x6ab   : > { %v14079_v35 = vpop.permute.xlu0 %14078  ;;  %v7742_v20 = vsel %vm5169_vm15, %v7722_v58, %v14006_v31  ;;  %v7763_v63 = vsel %vm5331_vm5, %v7743_v53, %v14036_v28  ;;  %v13921_v57 = vunpack.i.h.bf16 %v20020_v46  ;;  %v13961_v58 = vunpack.i.h.bf16 %v20046_v59 }
 0x6ac   : > { %v20231_v18 = vpop.permute.xlu1 %14053  ;;  %v14081_v45 = vunpack.i.h.bf16 %v14079_v35  ;;  %v14080_v29 = vunpack.i.l.bf16 %v14079_v35  ;;  %v14035_v35 = vunpack.i.l.bf16 %v20208_v30 }
 0x6ad   : > { %v14056_v14 = vunpack.i.h.bf16 %v20231_v18  ;;  %v14055_v30 = vunpack.i.l.bf16 %v20231_v18 }
 0x6ae   : > { %v7865_v10 = vsel %vm7852_vm7, %v7844_v44, %v14080_v29  ;;  %v7866_v62 = vsel %vm7852_vm7, %v7845_v23, %v14081_v45  ;;  %v7762_v26 = vsel %vm5331_vm5, %v7742_v20, %v14035_v35  ;;  %v13981_v20 = vunpack.i.h.bf16 %v20070_v21 }
 0x6af   : > { %v14089_v34 = vpop.permute.xlu0 %14088  ;;  %v7783_v18 = vsel %vm7768_vm9, %v7762_v26, %v14045_v50  ;;  %v13941_v50 = vunpack.i.h.bf16 %v20033_v4 }
 0x6b0   : > { %v20245_v51 = vpop.permute.xlu1 %14063  ;;  %v14091_v13 = vunpack.i.h.bf16 %v14089_v34  ;;  %v14090_v16 = vunpack.i.l.bf16 %v14089_v34  ;;  %v7784_v34 = vsel %vm7768_vm9, %v7763_v63, %v14046_v9  ;;  %v7804_v45 = vsel %vm7789_vm14, %v7783_v18, %v14055_v30  ;;  %v14795_v30 = vld [vmem:[#allocation3 + $0xc0] sm:$0xff] }
 0x6b1   : > { %v14066_v25 = vunpack.i.h.bf16 %v20245_v51  ;;  %v14065_v52 = vunpack.i.l.bf16 %v20245_v51  ;;  %v7805_v29 = vsel %vm7789_vm14, %v7784_v34, %v14056_v14 }
 0x6b2   : > { %v7886_v47 = vsel %vm7873_vm10, %v7865_v10, %v14090_v16  ;;  %v7887_v56 = vsel %vm7873_vm10, %v7866_v62, %v14091_v13 }
 0x6b3   : > { %v14099_v7 = vpop.permute.xlu0 %14098  ;;  %v7825_v49 = vsel %vm7810_vm1, %v7804_v45, %v14065_v52  ;;  %v7826_v13 = vsel %vm7810_vm1, %v7805_v29, %v14066_v25  ;;  %v14001_v25 = vunpack.i.h.bf16 %v20112_v42  ;;  %v6104_v52 = vld [vmem:[#allocation3 + $0xc8] sm:$0xff] }
 0x6b4   : > { %v14074_v27 = vpop.permute.xlu1 %14073  ;;  %v14101_v41 = vunpack.i.h.bf16 %v14099_v7  ;;  %v14100_v19 = vunpack.i.l.bf16 %v14099_v7 }
 0x6b5   : > { %v14076_v38 = vunpack.i.h.bf16 %v14074_v27  ;;  %v14075_v1 = vunpack.i.l.bf16 %v14074_v27 }
 0x6b6   : > { %v7907_v2 = vsel %vm7894_vm12, %v7886_v47, %v14100_v19  ;;  %v7908_v12 = vsel %vm7894_vm12, %v7887_v56, %v14101_v41 }
 0x6b7   : > { %v20272_v60 = vpop.permute.xlu0 %14108  ;;  %v7921_v15 = vpack.c.bf16 %v7908_v12, %v7907_v2  ;;  %v7846_v16 = vsel %vm7831_vm6, %v7825_v49, %v14075_v1  ;;  %v7847_v61 = vsel %vm7831_vm6, %v7826_v13, %v14076_v38  ;;  %v14021_v38 = vunpack.i.h.bf16 %v20150_v55 }
 0x6b8   : > { %v14084_v3 = vpop.permute.xlu1 %14083  ;;  %v14110_v36 = vunpack.i.l.bf16 %v20272_v60  ;;  %v14111_v18 = vunpack.i.h.bf16 %v20272_v60 }
 0x6b9   : > { %11541 = vmatprep.mubr.bf16.mxu0 %v7921_v15  ;;  %v14086_v40 = vunpack.i.h.bf16 %v14084_v3  ;;  %v14085_v54 = vunpack.i.l.bf16 %v14084_v3  ;;  %v13901_v15 = vunpack.i.h.bf16 %v20004_v32 }
 0x6ba   : > { %v7625_v1 = vsel %vm4545_vm2, %v6104_v52, %v14110_v36 }
 0x6bb   : > { %v20288_v6 = vpop.permute.xlu0 %14113  ;;  %v7867_v39 = vsel %vm7852_vm7, %v7846_v16, %v14085_v54  ;;  %v7868_v11 = vsel %vm7852_vm7, %v7847_v61, %v14086_v40  ;;  %v7624_v53 = vsel %vm4545_vm2, %v14795_v30, %v13901_v15  ;;  %v6105_v16 = vld [vmem:[#allocation3 + $0xd8] sm:$0xff] }
 0x6bc   : > { %v14094_v48 = vpop.permute.xlu1 %14093  ;;  %v14115_v14 = vunpack.i.l.bf16 %v20288_v6  ;;  %v7644_v46 = vsel %vm4649_vm3, %v7624_v53, %v13921_v57 }
 0x6bd   : > { %v14096_v51 = vunpack.i.h.bf16 %v14094_v48  ;;  %v14095_v8 = vunpack.i.l.bf16 %v14094_v48  ;;  %v7664_v59 = vsel %vm4753_vm8, %v7644_v46, %v13941_v50 }
 0x6be   : > { %v7684_v48 = vsel %vm4857_vm4, %v7664_v59, %v13961_v58  ;;  %v7645_v42 = vsel %vm4649_vm3, %v7625_v1, %v14115_v14  ;;  %v6106_v1 = vld [vmem:[#allocation3 + $0xe0] sm:$0xff] }
 0x6bf   : > { %v20298_v22 = vpop.permute.xlu0 %14118  ;;  %v7888_v23 = vsel %vm7873_vm10, %v7867_v39, %v14095_v8  ;;  %v7889_v7 = vsel %vm7873_vm10, %v7868_v11, %v14096_v51  ;;  %v7704_v40 = vsel %vm4961_vm11, %v7684_v48, %v13981_v20  ;;  %v7626_v11 = vsel %vm4545_vm2, %v6105_v16, %v14111_v18 }
 0x6c0   : > { %v14104_v24 = vpop.permute.xlu1 %14103  ;;  %v14120_v32 = vunpack.i.l.bf16 %v20298_v22  ;;  %v7724_v55 = vsel %vm5065_vm13, %v7704_v40, %v14001_v25  ;;  %v14121_v52 = vunpack.i.h.bf16 %v20298_v22 }
 0x6c1   : > { %v14106_v43 = vunpack.i.h.bf16 %v14104_v24  ;;  %v14105_v44 = vunpack.i.l.bf16 %v14104_v24  ;;  %v7744_v60 = vsel %vm5169_vm15, %v7724_v55, %v14021_v38 }
 0x6c2   : > { %v7665_v54 = vsel %vm4753_vm8, %v7645_v42, %v14120_v32 }
 0x6c3   : > { %v7909_v27 = vsel %vm7894_vm12, %v7888_v23, %v14105_v44  ;;  %v7910_v10 = vsel %vm7894_vm12, %v7889_v7, %v14106_v43  ;;  %v20306_v62 = vpop.permute.xlu0 %14123  ;;  %v14116_v7 = vunpack.i.h.bf16 %v20288_v6 }
 0x6c4   : > { %v20308_v41 = vpop.permute.xlu1 %6466  ;;  %v7922_v19 = vpack.c.bf16 %v7910_v10, %v7909_v27  ;;  %v14125_v4 = vunpack.i.l.bf16 %v20306_v62 }
 0x6c5   : > { %v7646_v32 = vsel %vm4649_vm3, %v7626_v11, %v14116_v7  ;;  %v7627_v40 = vsel %vm4545_vm2, %v6106_v1, %v20308_v41  ;;  %vm8227_vm2 = vcmask 124928  }
 0x6c6   : > { %11542 = vmatmul.mubr.bf16.gmra.mxu0 %v7922_v19  ;;  %v7685_v29 = vsel %vm4857_vm4, %v7665_v54, %v14125_v4  ;;  %v14126_v4 = vunpack.i.h.bf16 %v20306_v62 }
 0x6c7   : > { %v20310_v37 = vpop.permute.xlu0 %14128 }
 0x6c8   : > { %v20312_v17 = vpop.permute.xlu1 %6546  ;;  %v14130_v21 = vunpack.i.l.bf16 %v20310_v37  ;;  %v14131_v22 = vunpack.i.h.bf16 %v20310_v37 }
 0x6ca   : > { %v7705_v61 = vsel %vm4961_vm11, %v7685_v29, %v14130_v21 }
 0x6cb   : > { %v20314_v47 = vpop.permute.xlu0 %14133 }
 0x6cc   : > { %v20316_v56 = vpop.permute.xlu1 %6626  ;;  %v14135_v34 = vunpack.i.l.bf16 %v20314_v47  ;;  %v14136_v55 = vunpack.i.h.bf16 %v20314_v47 }
 0x6ce   : > { %v7725_v43 = vsel %vm5065_vm13, %v7705_v61, %v14135_v34 }
 0x6cf   : > { %v20318_v33 = vpop.permute.xlu0 %14138 }
 0x6d0   : > { %v20320_v31 = vpop.permute.xlu1 %6706  ;;  %v14140_v45 = vunpack.i.l.bf16 %v20318_v33  ;;  %v14141_v37 = vunpack.i.h.bf16 %v20318_v33 }
 0x6d2   : > { %v7745_v27 = vsel %vm5169_vm15, %v7725_v43, %v14140_v45  ;;  %v7647_v45 = vsel %vm4649_vm3, %v7627_v40, %v20312_v17 }
 0x6d3   : > { %v14144_v2 = vpop.permute.xlu0 %14143  ;;  %v7667_v41 = vsel %vm4753_vm8, %v7647_v45, %v20316_v56 }
 0x6d4   : > { %v20322_v12 = vpop.permute.xlu1 %6786  ;;  %v14146_v51 = vunpack.i.h.bf16 %v14144_v2  ;;  %v14145_v8 = vunpack.i.l.bf16 %v14144_v2  ;;  %v7687_v16 = vsel %vm4857_vm4, %v7667_v41, %v20320_v31 }
 0x6d6   : > { %v7764_v2 = vsel %vm5331_vm5, %v7744_v60, %v14145_v8  ;;  %v7666_v8 = vsel %vm4753_vm8, %v7646_v32, %v14121_v52 }
 0x6d7   : > { %v14154_v0 = vpop.permute.xlu0 %14153  ;;  %v7686_v60 = vsel %vm4857_vm4, %v7666_v8, %v14126_v4  ;;  %v21694_v8 = vmov 0.0  }
 0x6d8   : > { %v20324_v28 = vpop.permute.xlu1 %6866  ;;  %v14156_v24 = vunpack.i.h.bf16 %v14154_v0  ;;  %v14155_v39 = vunpack.i.l.bf16 %v14154_v0  ;;  %v7765_v0 = vsel %vm5331_vm5, %v7745_v27, %v14146_v51  ;;  %8228 = vst.msk [vmem:[#allocation4 + $0x8] sm:$0x7] %vm8227_vm2, %v21694_v8  ;;  %8230 = vst.msk [vmem:[#allocation4 + $0x18] sm:$0x7] %vm8227_vm2, %v21694_v8 }
 0x6d9   : > { %8232 = vst.msk [vmem:[#allocation4 + $0x28] sm:$0x7] %vm8227_vm2, %v21694_v8  ;;  %8234 = vst.msk [vmem:[#allocation4 + $0x38] sm:$0x7] %vm8227_vm2, %v21694_v8 }
 0x6da   : > { %v7785_v36 = vsel %vm7768_vm9, %v7764_v2, %v14155_v39  ;;  %v7786_v58 = vsel %vm7768_vm9, %v7765_v0, %v14156_v24  ;;  %v7706_v24 = vsel %vm4961_vm11, %v7686_v60, %v14131_v22  ;;  %v7707_v39 = vsel %vm4961_vm11, %v7687_v16, %v20322_v12  ;;  %8236 = vst.msk [vmem:[#allocation4 + $0x48] sm:$0x7] %vm8227_vm2, %v21694_v8 }
 0x6db   : > { %v20326_v35 = vpop.permute.xlu0 %14163  ;;  %v7726_v11 = vsel %vm5065_vm13, %v7706_v24, %v14136_v55  ;;  %v7727_v31 = vsel %vm5065_vm13, %v7707_v39, %v20324_v28  ;;  %v8107_v24 = vld [vmem:[%s21356_s12 + $0x28] sm:$0xff]  ;;  %v8106_v39 = vld [vmem:[%s21356_s12 + $0x20] sm:$0xff]  ;;  %8238 = vst.msk [vmem:[#allocation4 + $0x58] sm:$0x7] %vm8227_vm2, %v21694_v8  ;;  %8240 = vst.msk [vmem:[#allocation4 + $0x68] sm:$0x7] %vm8227_vm2, %v21694_v8 }
 0x6dc   : > { %v20328_v3 = vpop.permute.xlu1 %6946  ;;  %v14166_v44 = vunpack.i.h.bf16 %v20326_v35  ;;  %v14165_v23 = vunpack.i.l.bf16 %v20326_v35  ;;  %8242 = vst.msk [vmem:[#allocation4 + $0x78] sm:$0x7] %vm8227_vm2, %v21694_v8  ;;  %8244 = vst.msk [vmem:[#allocation4 + $0x88] sm:$0x7] %vm8227_vm2, %v21694_v8  ;;  %vm8246_vm11 = vcmask 126976  }
 0x6de   : > { %v7806_v30 = vsel %vm7789_vm14, %v7785_v36, %v14165_v23  ;;  %v7807_v53 = vsel %vm7789_vm14, %v7786_v58, %v14166_v44  ;;  %v7746_v44 = vsel %vm5169_vm15, %v7726_v11, %v14141_v37  ;;  %v7747_v23 = vsel %vm5169_vm15, %v7727_v31, %v20328_v3 }
 0x6df   : > { %v20332_v5 = vpop.permute.xlu0 %14173  ;;  %v8272_v11 = vld [vmem:[#allocation4 + $0x1] sm:$0xff]  ;;  %v20496_v31 = vld [vmem:[#allocation4 + $0x11] sm:$0xff]  ;;  %vm8249_vm15 = vcmask 130053  }
 0x6e0   : > { %v20334_v9 = vpop.permute.xlu1 %14148  ;;  %v14176_v10 = vunpack.i.h.bf16 %v20332_v5  ;;  %v14175_v19 = vunpack.i.l.bf16 %v20332_v5 }
 0x6e1   : > { %v14151_v17 = vunpack.i.h.bf16 %v20334_v9  ;;  %v14150_v47 = vunpack.i.l.bf16 %v20334_v9 }
 0x6e2   : > { %v7827_v46 = vsel %vm7810_vm1, %v7806_v30, %v14175_v19  ;;  %v7828_v25 = vsel %vm7810_vm1, %v7807_v53, %v14176_v10 }
 0x6e3   : > { %v14184_v63 = vpop.permute.xlu0 %14183  ;;  %v7766_v27 = vsel %vm5331_vm5, %v7746_v44, %v14150_v47  ;;  %v8105_v47 = vld [vmem:[%s21356_s12 + $0x18] sm:$0xff]  ;;  %v20500_v44 = vld [vmem:[#allocation4 + $0x12] sm:$0xff] }
 0x6e4   : > { %v20346_v26 = vpop.permute.xlu1 %14158  ;;  %v14186_v15 = vunpack.i.h.bf16 %v14184_v63  ;;  %v14185_v57 = vunpack.i.l.bf16 %v14184_v63 }
 0x6e5   : > { %v14161_v56 = vunpack.i.h.bf16 %v20346_v26  ;;  %v14160_v33 = vunpack.i.l.bf16 %v20346_v26  ;;  %v7767_v26 = vsel %vm5331_vm5, %v7747_v23, %v14151_v17  ;;  %v8102_v17 = vld [vmem:[%s21356_s12] sm:$0xff] }
 0x6e6   : > { %v7848_v63 = vsel %vm7831_vm6, %v7827_v46, %v14185_v57  ;;  %v7849_v59 = vsel %vm7831_vm6, %v7828_v25, %v14186_v15 }
 0x6e7   : > { %v14194_v49 = vpop.permute.xlu0 %14193  ;;  %v7787_v2 = vsel %vm7768_vm9, %v7766_v27, %v14160_v33  ;;  %v8108_v33 = vld [vmem:[%s21356_s12 + $0x30] sm:$0x1]  ;;  %v8284_v27 = vld [vmem:[#allocation4 + $0x3] sm:$0xff] }
 0x6e8   : > { %v20361_v13 = vpop.permute.xlu1 %14168  ;;  %v14196_v35 = vunpack.i.h.bf16 %v14194_v49  ;;  %v14195_v14 = vunpack.i.l.bf16 %v14194_v49 }
 0x6e9   : > { %v14171_v43 = vunpack.i.h.bf16 %v20361_v13  ;;  %v14170_v9 = vunpack.i.l.bf16 %v20361_v13  ;;  %v7788_v13 = vsel %vm7768_vm9, %v7767_v26, %v14161_v56  ;;  %v8109_v56 = vld [vmem:[%s21356_s12 + $0x38] sm:$0x1]  ;;  %vm8251_vm9 = vcmask 123904  }
 0x6ea   : > { %v7869_v21 = vsel %vm7852_vm7, %v7848_v63, %v14195_v14  ;;  %v7870_v48 = vsel %vm7852_vm7, %v7849_v59, %v14196_v35  ;;  %v8103_v59 = vld [vmem:[%s21356_s12 + $0x8] sm:$0xff] }
 0x6eb   : > { %v14204_v50 = vpop.permute.xlu0 %14203  ;;  %v7808_v57 = vsel %vm7789_vm14, %v7787_v2, %v14170_v9  ;;  %v7809_v3 = vsel %vm7789_vm14, %v7788_v13, %v14171_v43  ;;  %10978 = vmatprep.mubr.msk.f32.mxu1 %vm4857_vm4, %v8103_v59  ;;  %v14222_v43 = vpack.i.bf16 %v20496_v31, %v8272_v11  ;;  %v8278_v9 = vld [vmem:[#allocation4 + $0x2] sm:$0xff] }
 0x6ec   : > { %v20377_v6 = vpop.permute.xlu1 %14178  ;;  %v14206_v5 = vunpack.i.h.bf16 %v14204_v50  ;;  %v14205_v20 = vunpack.i.l.bf16 %v14204_v50  ;;  %v14227_v23 = vpack.i.bf16 %v20500_v44, %v8278_v9  ;;  %v8350_v2 = vld [vmem:[#allocation4 + $0x81] sm:$0xff] }
 0x6ed   : > { %v14181_v12 = vunpack.i.h.bf16 %v20377_v6  ;;  %v14180_v7 = vunpack.i.l.bf16 %v20377_v6  ;;  %14223 = vrot.lane.b32.xlu1 %v14222_v43, %s21506_s20  ;;  %v14675_v43 = vld [vmem:[%s21347_s3 + $0x10] sm:$0xff]  }
 0x6ee   : > { %v7890_v62 = vsel %vm7873_vm10, %v7869_v21, %v14205_v20  ;;  %v7891_v54 = vsel %vm7873_vm10, %v7870_v48, %v14206_v5 }
 0x6ef   : > { %v14214_v38 = vpop.permute.xlu0 %14213  ;;  %v7829_v58 = vsel %vm7810_vm1, %v7808_v57, %v14180_v7  ;;  %v7830_v35 = vsel %vm7810_vm1, %v7809_v3, %v14181_v12  ;;  %v20503_v12 = vld [vmem:[#allocation4 + $0x70] sm:$0xff]  ;;  %v8344_v7 = vld [vmem:[#allocation4 + $0x80] sm:$0xff]  ;;  %v10977_v3 = vld [vmem:[%s21351_s7] ss:$0 sm:$0xff] }
 0x6f0   : > { %v14216_v18 = vunpack.i.h.bf16 %v14214_v38  ;;  %v14215_v42 = vunpack.i.l.bf16 %v14214_v38  ;;  %v14189_v34 = vpop.permute.xlu1 %14188  ;;  %v11531_v38 = vpop.f32.mrf.mxu0  ;;  %v14237_v26 = vpack.i.bf16 %v8344_v7, %v20503_v12 }
 0x6f1   : > { %v14191_v10 = vunpack.i.h.bf16 %v14189_v34  ;;  %v14190_v19 = vunpack.i.l.bf16 %v14189_v34  ;;  %14228 = vrot.lane.b32.xlu1 %v14227_v23, %s21653_s19  ;;  %v14676_v23 = vld [vmem:[%s21347_s3 + $0x48] sm:$0xff]  }
 0x6f2   : > { %v7911_v29 = vsel %vm7894_vm12, %v7890_v62, %v14215_v42  ;;  %v7912_v51 = vsel %vm7894_vm12, %v7891_v54, %v14216_v18  ;;  %v8023_v1 = vpop.f32.mrf.mxu0  ;;  %14238 = vrot.lane.b32.xlu0 %v14237_v26, %s21664_s15  ;;  %v14677_v26 = vld [vmem:[%s21347_s3 + $0x8] sm:$0xff]  }
 0x6f3   : > { %v7923_v49 = vpack.c.bf16 %v7912_v51, %v7911_v29  ;;  %v7850_v14 = vsel %vm7831_vm6, %v7829_v58, %v14190_v19  ;;  %v7851_v6 = vsel %vm7831_vm6, %v7830_v35, %v14191_v10  ;;  %v20508_v10 = vld [vmem:[#allocation4 + $0x13] sm:$0xff] }
 0x6f4   : > { %v14199_v61 = vpop.permute.xlu1 %14198  ;;  %v11532_v21 = vpop.f32.mrf.mxu0  ;;  %v14232_v19 = vpack.i.bf16 %v20508_v10, %v8284_v27 }
 0x6f5   : > { %11545 = vmatprep.mubr.bf16.mxu0 %v7923_v49  ;;  %v14201_v0 = vunpack.i.h.bf16 %v14199_v61  ;;  %v14200_v15 = vunpack.i.l.bf16 %v14199_v61  ;;  %v8104_v61 = vld [vmem:[%s21356_s12 + $0x10] sm:$0xff] }
 0x6f6   : > { %v8026_v48 = vpop.f32.mrf.mxu0  ;;  %14233 = vrot.lane.b32.xlu1 %v14232_v19, %s21648_s21 }
 0x6f7   : > { %v7871_v53 = vsel %vm7852_vm7, %v7850_v14, %v14200_v15  ;;  %v7872_v5 = vsel %vm7852_vm7, %v7851_v6, %v14201_v0  ;;  %v20516_v0 = vld [vmem:[#allocation4 + $0x72] sm:$0xff]  ;;  %v8356_v15 = vld [vmem:[#allocation4 + $0x82] sm:$0xff]  ;;  %vm8254_vm7 = vcmask 129026  }
 0x6f8   : > { %v14209_v28 = vpop.permute.xlu1 %14208  ;;  %v14247_v57 = vpack.i.bf16 %v8356_v15, %v20516_v0 }
 0x6f9   : > { %v14211_v50 = vunpack.i.h.bf16 %v14209_v28  ;;  %v14210_v36 = vunpack.i.l.bf16 %v14209_v28  ;;  %v20511_v28 = vld [vmem:[#allocation4 + $0x71] sm:$0xff] }
 0x6fa   : > { %v14242_v13 = vpack.i.bf16 %v8350_v2, %v20511_v28  ;;  %v14679_v2 = vld [vmem:[%s21347_s3] sm:$0xff]  }
 0x6fb   : > { %v7892_v46 = vsel %vm7873_vm10, %v7871_v53, %v14210_v36  ;;  %v7893_v25 = vsel %vm7873_vm10, %v7872_v5, %v14211_v50  ;;  %v14664_v53 = vld [vmem:[%s21347_s3 + $0x78] sm:$0xff]  }
 0x6fc   : > { %v14219_v30 = vpop.permute.xlu1 %14218  ;;  %14243 = vrot.lane.b32.xlu0 %v14242_v13, %s21657_s26  ;;  %v14665_v5 = vld [vmem:[%s21347_s3 + $0x38] sm:$0xff]  }
 0x6fd   : > { %v14221_v20 = vunpack.i.h.bf16 %v14219_v30  ;;  %v14220_v32 = vunpack.i.l.bf16 %v14219_v30 }
 0x6ff   : > { %v7913_v52 = vsel %vm7894_vm12, %v7892_v46, %v14220_v32  ;;  %v7914_v4 = vsel %vm7894_vm12, %v7893_v25, %v14221_v20  ;;  %vm8257_vm12 = vcmask 130055  }
 0x700   : > { %v7924_v63 = vpack.c.bf16 %v7914_v4, %v7913_v52  ;;  %14248 = vrot.lane.b32.xlu0 %v14247_v57, %s21669_s27  ;;  %v14666_v4 = vld [vmem:[%s21347_s3 + $0x70] sm:$0xff]  }
 0x702   : > { %11546 = vmatmul.mubr.bf16.gmra.mxu0 %v7924_v63  ;;  %v14667_v63 = vld [vmem:[%s21347_s3 + $0x30] sm:$0xff]  }
 0x727   : > { %v11535_v18 = vpop.f32.mrf.mxu0 }
 0x729   : > { %v8039_v42 = vpop.f32.mrf.mxu0 }
 0x72b   : > { %v11536_v34 = vpop.f32.mrf.mxu0 }
 0x72d   : > { %v8042_v40 = vpop.f32.mrf.mxu0 }
 0x763   : > { %v11539_v22 = vpop.f32.mrf.mxu0 }
 0x765   : > { %v8055_v62 = vpop.f32.mrf.mxu0 }
 0x767   : > { %v11540_v54 = vpop.f32.mrf.mxu0 }
 0x769   : > { %v8058_v45 = vpop.f32.mrf.mxu0 }
 0x786   : > { %v11543_v55 = vpop.f32.mrf.mxu0 }
 0x788   : > { %v8071_v29 = vpop.f32.mrf.mxu0 }
 0x78a   : > { %v11544_v51 = vpop.f32.mrf.mxu0 }
 0x78b   : > { %8130 = vmatpush1.msra.mxu1 %v11544_v51 }
 0x78c   : > { %8131 = vmatprep.subr.mxu1 %v21694_v8  ;;  %v8074_v41 = vpop.f32.mrf.mxu0 }
 0x78d   : > { %8132 = vmatpush1.msra.mxu1 %v11543_v55 }
 0x78e   : > { %8133 = vmatprep.subr.mxu1 %v21694_v8 }
 0x78f   : > { %8134 = vmatpush1.msra.mxu1 %v8074_v41 }
 0x790   : > { %8135 = vmatprep.subr.mxu1 %v21694_v8 }
 0x791   : > { %8136 = vmatpush1.msra.mxu1 %v8071_v29 }
 0x792   : > { %8137 = vmatprep.subr.mxu1 %v21694_v8 }
 0x793   : > { %8138 = vmatpush1.msra.mxu1 %v11540_v54 }
 0x794   : > { %8139 = vmatprep.subr.mxu1 %v21694_v8 }
 0x795   : > { %8140 = vmatpush1.msra.mxu1 %v11539_v22  ;;  %v14668_v22 = vld [vmem:[%s21347_s3 + $0x68] sm:$0xff]  }
 0x796   : > { %8141 = vmatprep.subr.mxu1 %v21694_v8 }
 0x797   : > { %8142 = vmatpush1.msra.mxu1 %v8058_v45 }
 0x798   : > { %8143 = vmatprep.subr.mxu1 %v21694_v8 }
 0x799   : > { %8144 = vmatpush1.msra.mxu1 %v8055_v62  ;;  %v14669_v62 = vld [vmem:[%s21347_s3 + $0x28] sm:$0xff]  }
 0x79a   : > { %8145 = vmatprep.subr.mxu1 %v21694_v8 }
 0x79b   : > { %8146 = vmatpush1.msra.mxu1 %v11536_v34 }
 0x79c   : > { %8147 = vmatprep.subr.mxu1 %v21694_v8 }
 0x79d   : > { %8148 = vmatpush1.msra.mxu1 %v11535_v18 }
 0x79e   : > { %8149 = vmatprep.subr.mxu1 %v21694_v8 }
 0x79f   : > { %8150 = vmatpush1.msra.mxu1 %v8042_v40 }
 0x7a0   : > { %8151 = vmatprep.subr.mxu1 %v21694_v8 }
 0x7a1   : > { %8152 = vmatpush1.msra.mxu1 %v8039_v42 }
 0x7a2   : > { %8153 = vmatprep.subr.mxu1 %v21694_v8 }
 0x7a3   : > { %8154 = vmatpush1.msra.mxu1 %v11532_v21 }
 0x7a4   : > { %8155 = vmatprep.subr.mxu1 %v21694_v8 }
 0x7a5   : > { %8156 = vmatpush1.msra.mxu1 %v11531_v38 }
 0x7a6   : > { %8157 = vmatprep.subr.mxu1 %v21694_v8 }
 0x7a7   : > { %8158 = vmatpush1.msra.mxu1 %v8026_v48 }
 0x7a8   : > { %8159 = vmatprep.subr.mxu1 %v21694_v8 }
 0x7a9   : > { %8160 = vmatpush1.msra.mxu1 %v8023_v1  ;;  %v20535_v1 = vld [vmem:[#allocation4 + $0x10] sm:$0xff] }
 0x7aa   : > { %8185 = vmatprep.subr.mxu1 %v21694_v8 }
 0x7c2   : > { %v11547_v37 = vpop.f32.mrf.mxu0 }
 0x7c4   : > { %v8087_v49 = vpop.f32.mrf.mxu0 }
 0x7c6   : > { %v11548_v60 = vpop.f32.mrf.mxu0 }
 0x7c7   : > { %8186 = vmatpush2.msra.mxu1 %v11548_v60  ;;  %v14670_v60 = vld [vmem:[%s21347_s3 + $0x60] sm:$0xff]  }
 0x7c8   : > { %8187 = vmatprep.subr.mxu1 %v21694_v8  ;;  %v8090_v16 = vpop.f32.mrf.mxu0 }
 0x7c9   : > { %8188 = vmatpush2.msra.mxu1 %v11547_v37 }
 0x7ca   : > { %8189 = vmatprep.subr.mxu1 %v21694_v8 }
 0x7cb   : > { %8190 = vmatpush2.msra.mxu1 %v8090_v16  ;;  %v14671_v16 = vld [vmem:[%s21347_s3 + $0x20] sm:$0xff]  }
 0x7cc   : > { %8191 = vmatprep.subr.mxu1 %v21694_v8 }
 0x7cd   : > { %8192 = vmatpush2.msra.mxu1 %v8087_v49 }
 0x7ce   : > { %8194 = vmatmul.mubr.f32.vlgmr.msra.gmra.mxu1 %v8102_v17  ;;  %11219 = vmatprep.subr.bf16.mxu1 %v14664_v53 }
 0x7cf   : > { %10979 = vmatprep.mubr.msk.f32.mxu1 %vm4857_vm4, %v8105_v47  ;;  %11220 = vmatpush3.bf16.msra.mxu1 %v14665_v5 }
 0x7d0   : > { %11221 = vmatprep.subr.bf16.mxu1 %v14666_v4 }
 0x7d2   : > { %8199 = vmatmul.mubr.f32.gmra.mxu1 %v8104_v61  ;;  %v14672_v61 = vld [vmem:[%s21347_s3 + $0x58] sm:$0xff]  }
 0x7d3   : > { %10980 = vmatprep.mubr.msk.f32.mxu1 %vm4857_vm4, %v8107_v24  ;;  %11222 = vmatpush3.bf16.msra.mxu1 %v14667_v63  ;;  %v14673_v24 = vld [vmem:[%s21347_s3 + $0x18] sm:$0xff]  }
 0x7d4   : > { %11223 = vmatprep.subr.bf16.mxu1 %v14668_v22 }
 0x7d6   : > { %8204 = vmatmul.mubr.f32.gmra.mxu1 %v8106_v39 }
 0x7d7   : > { %10981 = vmatprep.mubr.msk.f32.mxu1 %vm4857_vm4, %v8109_v56  ;;  %11224 = vmatpush3.bf16.msra.mxu1 %v14669_v62 }
 0x7d8   : > { %11225 = vmatprep.subr.bf16.mxu1 %v14670_v60 }
 0x7da   : > { %8209 = vmatmul.mubr.f32.gmra.mxu1 %v8108_v33 }
 0x7db   : > { %11226 = vmatpush3.bf16.msra.mxu1 %v14671_v16 }
 0x7dc   : > { %11227 = vmatprep.subr.bf16.mxu1 %v14672_v61 }
 0x7df   : > { %11228 = vmatpush3.bf16.msra.mxu1 %v14673_v24 }
 0x88e   : > { %v8195_v50 = vpop.f32.mrf.mxu1 }
 0x88f   : > { %v8196_v36 = vadd.f32 %v10977_v3, %v8195_v50 }
 0x890   : > { %v8197_v58 = vpop.f32.mrf.mxu1 }
 0x891   : > { %vm8214_vm8 = vcmp.ge.f32.partialorder %v8196_v36, 0.0  ;;  %v8218_v35 = vmul.f32 0.2, %v8196_v36 }
 0x892   : > { %v8200_v14 = vpop.f32.mrf.mxu1 }
 0x893   : > { %v8222_v6 = vsel %vm8214_vm8, %v8196_v36, %v8218_v35  ;;  %v8201_v30 = vadd.f32 %v10977_v3, %v8200_v14  ;;  %vm8259_vm8 = vcmask 125952  }
 0x894   : > { %8247 = vst.msk [vmem:[#allocation4 + $0x22] sm:$0x1f] %vm8246_vm11, %v8222_v6  ;;  %v8202_v20 = vpop.f32.mrf.mxu1  ;;  %vm8262_vm11 = vcmask 130052  }
 0x895   : > { %8250 = vst.msk [vmem:[#allocation4 + $0x2d] sm:$0xe0] %vm8249_vm15, %v8222_v6  ;;  %vm8215_vm1 = vcmp.ge.f32.partialorder %v8201_v30, 0.0  ;;  %v8219_v32 = vmul.f32 0.2, %v8201_v30 }
 0x896   : > { %v8205_v46 = vpop.f32.mrf.mxu1 }
 0x897   : > { %v8223_v25 = vsel %vm8215_vm1, %v8201_v30, %v8219_v32  ;;  %v8206_v52 = vadd.f32 %v10977_v3, %v8205_v46 }
 0x898   : > { %8252 = vst.msk [vmem:[#allocation4 + $0x35] sm:$0x3] %vm8251_vm9, %v8223_v25  ;;  %v8207_v59 = vpop.f32.mrf.mxu1  ;;  %vm8264_vm9 = vcmask 122880  }
 0x899   : > { %8255 = vst.msk [vmem:[#allocation4 + $0x40] sm:$0x7c] %vm8254_vm7, %v8223_v25  ;;  %vm8216_vm2 = vcmp.ge.f32.partialorder %v8206_v52, 0.0  ;;  %v8220_v38 = vmul.f32 0.2, %v8206_v52  ;;  %vm9091_vm7 = vcmask 261126  }
 0x89a   : > { %8258 = vst.msk [vmem:[#allocation4 + $0x4b] sm:$0x80] %vm8257_vm12, %v8223_v25  ;;  %v8210_v21 = vpop.f32.mrf.mxu1 }
 0x89b   : > { %v8224_v48 = vsel %vm8216_vm2, %v8206_v52, %v8220_v38  ;;  %v8211_v18 = vadd.f32 %v10977_v3, %v8210_v21  ;;  %v20537_v42 = vld [vmem:[#allocation4 + $0x20] sm:$0xff]  ;;  %v8338_v38 = vld [vmem:[#allocation4 + $0x73] sm:$0xff] }
 0x89c   : > { %8260 = vst.msk [vmem:[#allocation4 + $0x53] sm:$0xf] %vm8259_vm8, %v8224_v48  ;;  %v14252_v34 = vpack.i.bf16 %v20537_v42, %v20535_v1  ;;  %v8212_v40 = vpop.f32.mrf.mxu1  ;;  %v8321_v45 = vld [vmem:[#allocation4 + $0x21] sm:$0xff] }
 0x89d   : > { %8263 = vst.msk [vmem:[#allocation4 + $0x5e] sm:$0xf0] %vm8262_vm11, %v8224_v48  ;;  %vm8217_vm15 = vcmp.ge.f32.partialorder %v8211_v18, 0.0  ;;  %v8221_v54 = vmul.f32 0.2, %v8211_v18  ;;  %v14257_v41 = vpack.i.bf16 %v8321_v45, %v20496_v31  ;;  %v8327_v37 = vld [vmem:[#allocation4 + $0x22] sm:$0xff] }
 0x89e   : > { %14253 = vrot.lane.b32.xlu1 %v14252_v34, %s21664_s15  ;;  %v14262_v47 = vpack.i.bf16 %v8327_v37, %v20500_v44  ;;  %v8333_v39 = vld [vmem:[#allocation4 + $0x23] sm:$0xff]  ;;  %v14674_v31 = vld [vmem:[%s21347_s3 + $0x50] sm:$0xff]   ;;  %v20630_v34 = vpop.permute.xlu0 %14238 }
 0x89f   : > { %v8225_v55 = vsel %vm8217_vm15, %v8211_v18, %v8221_v54  ;;  %v8322_v29 = vld [vmem:[#allocation4 + $0x31] sm:$0xff]  ;;  %v14267_v11 = vpack.i.bf16 %v8333_v39, %v20508_v10  ;;  %11229 = vmatprep.subr.bf16.mxu1 %v14674_v31  ;;  %v14678_v10 = vld [vmem:[%s21347_s3 + $0x40] sm:$0xff]  }
 0x8a0   : > { %8265 = vst.msk [vmem:[#allocation4 + $0x66] sm:$0x1] %vm8264_vm9, %v8225_v55  ;;  %v14272_v51 = vpack.i.bf16 %v8322_v29, %v8321_v45  ;;  %v8328_v49 = vld [vmem:[#allocation4 + $0x32] sm:$0xff]  ;;  %v20575_v44 = vld [vmem:[#allocation4 + $0x40] sm:$0xff]  ;;  %11230 = vmatpush3.bf16.msra.mxu1 %v14675_v43 }
 0x8a1   : > { %v14277_v17 = vpack.i.bf16 %v8328_v49, %v8327_v37  ;;  %v8334_v56 = vld [vmem:[#allocation4 + $0x33] sm:$0xff]  ;;  %v8346_v27 = vld [vmem:[#allocation4 + $0x41] sm:$0xff]  ;;  %11231 = vmatprep.subr.bf16.mxu1 %v14676_v23 }
 0x8a2   : > { %14273 = vrot.lane.b32.xlu0 %v14272_v51, %s21506_s20  ;;  %14258 = vrot.lane.b32.xlu1 %v14257_v41, %s21657_s26  ;;  %v14282_v33 = vpack.i.bf16 %v8334_v56, %v8333_v39  ;;  %v20573_v9 = vld [vmem:[#allocation4 + $0x30] sm:$0xff]  ;;  %v14292_v19 = vpack.i.bf16 %v8346_v27, %v8322_v29  ;;  %v8352_v13 = vld [vmem:[#allocation4 + $0x42] sm:$0xff]  ;;  %v20632_v22 = vpop.permute.xlu0 %14243 }
 0x8a3   : > { %v14287_v7 = vpack.i.bf16 %v20575_v44, %v20573_v9  ;;  %v14297_v15 = vpack.i.bf16 %v8352_v13, %v8328_v49  ;;  %v8358_v57 = vld [vmem:[#allocation4 + $0x43] sm:$0xff]  ;;  %v8324_v50 = vld [vmem:[#allocation4 + $0x51] sm:$0xff] }
 0x8a4   : > { %11232 = vmatpush3.bf16.msra.mxu1 %v14677_v26  ;;  %v14302_v3 = vpack.i.bf16 %v8358_v57, %v8334_v56  ;;  %v14342_v36 = vpack.i.bf16 %v8324_v50, %v8346_v27  ;;  %v8330_v58 = vld [vmem:[#allocation4 + $0x52] sm:$0xff]  ;;  %v8362_v21 = vld [vmem:[#allocation4 + $0x83] sm:$0xff] }
 0x8a5   : > { %11233 = vmatprep.subr.bf16.mxu1 %v14678_v10  ;;  %v14347_v35 = vpack.i.bf16 %v8330_v58, %v8352_v13  ;;  %v8336_v14 = vld [vmem:[#allocation4 + $0x53] sm:$0xff]  ;;  %v14407_v18 = vpack.i.bf16 %v8362_v21, %v8338_v38  ;;  %v8266_v49 = vld [vmem:[#allocation4] sm:$0xff] }
 0x8a6   : > { %14278 = vrot.lane.b32.xlu0 %v14277_v17, %s21653_s19  ;;  %14263 = vrot.lane.b32.xlu1 %v14262_v47, %s21669_s27  ;;  %v14352_v6 = vpack.i.bf16 %v8336_v14, %v8358_v57  ;;  %v20609_v53 = vld [vmem:[#allocation4 + $0x50] sm:$0xff]  ;;  %v20634_v62 = vpop.permute.xlu0 %14248 }
 0x8a7   : > { %v20605_v30 = vld [vmem:[#allocation4 + $0x60] sm:$0xff] }
 0x8a8   : > { %11234 = vmatpush3.bf16.msra.mxu1 %v14679_v2  ;;  %v14372_v5 = vpack.i.bf16 %v20605_v30, %v20609_v53  ;;  %v8348_v20 = vld [vmem:[#allocation4 + $0x61] sm:$0xff] }
 0x8a9   : > { %v14377_v32 = vpack.i.bf16 %v8348_v20, %v8324_v50  ;;  %v8354_v46 = vld [vmem:[#allocation4 + $0x62] sm:$0xff]  ;;  %v14392_v63 = vpack.i.bf16 %v20511_v28, %v8348_v20  ;;  %v14224_v28 = vpop.permute.xlu1 %14223 }
 0x8aa   : > { %14283 = vrot.lane.b32.xlu0 %v14282_v33, %s21648_s21  ;;  %14268 = vrot.lane.b32.xlu1 %v14267_v11, %s21667_s28  ;;  %v14382_v25 = vpack.i.bf16 %v8354_v46, %v8330_v58  ;;  %v8360_v52 = vld [vmem:[#allocation4 + $0x63] sm:$0xff]  ;;  %v14397_v59 = vpack.i.bf16 %v20516_v0, %v8354_v46  ;;  %v14226_v41 = vunpack.i.h.bf16 %v14224_v28  ;;  %v14225_v37 = vunpack.i.l.bf16 %v14224_v28 }
 0x8ab   : > { %v14387_v4 = vpack.i.bf16 %v8360_v52, %v8336_v14  ;;  %v14402_v48 = vpack.i.bf16 %v8338_v38, %v8360_v52 }
 0x8ac   : > { %v8700_v61 = vsel %vm4649_vm3, %v20535_v1, %v14226_v41  ;;  %v8699_v24 = vsel %vm4649_vm3, %v8266_v49, %v14225_v37 }
 0x8ad   : > { %v14229_v40 = vpop.permute.xlu1 %14228 }
 0x8ae   : > { %14288 = vrot.lane.b32.xlu0 %v14287_v7, %s21664_s15  ;;  %14308 = vrot.lane.b32.xlu1 %v14272_v51, %s21506_s20  ;;  %v14230_v47 = vunpack.i.l.bf16 %v14229_v40 }
 0x8b0   : > { %v8705_v31 = vsel %vm4857_vm4, %v8699_v24, %v14230_v47 }
 0x8b1   : > { %v14234_v0 = vpop.permute.xlu1 %14233 }
 0x8b2   : > { %14293 = vrot.lane.b32.xlu0 %v14292_v19, %s21657_s26  ;;  %14313 = vrot.lane.b32.xlu1 %v14277_v17, %s21653_s19  ;;  %v14231_v17 = vunpack.i.h.bf16 %v14229_v40  ;;  %v14235_v11 = vunpack.i.l.bf16 %v14234_v0 }
 0x8b4   : > { %v8706_v43 = vsel %vm4857_vm4, %v8700_v61, %v14231_v17  ;;  %v8711_v1 = vsel %vm5065_vm13, %v8705_v31, %v14235_v11 }
 0x8b6   : > { %14298 = vrot.lane.b32.xlu0 %v14297_v15, %s21669_s27  ;;  %14318 = vrot.lane.b32.xlu1 %v14282_v33, %s21648_s21  ;;  %v14236_v33 = vunpack.i.h.bf16 %v14234_v0 }
 0x8b8   : > { %v8712_v2 = vsel %vm5065_vm13, %v8706_v43, %v14236_v33 }
 0x8ba   : > { %14303 = vrot.lane.b32.xlu0 %v14302_v3, %s21667_s28  ;;  %14323 = vrot.lane.b32.xlu1 %v14287_v7, %s21664_s15 }
 0x8be   : > { %14343 = vrot.lane.b32.xlu0 %v14342_v36, %s21506_s20  ;;  %14328 = vrot.lane.b32.xlu1 %v14292_v19, %s21657_s26 }
 0x8c2   : > { %14348 = vrot.lane.b32.xlu0 %v14347_v35, %s21653_s19  ;;  %14333 = vrot.lane.b32.xlu1 %v14297_v15, %s21669_s27 }
 0x8c6   : > { %14353 = vrot.lane.b32.xlu0 %v14352_v6, %s21648_s21  ;;  %14338 = vrot.lane.b32.xlu1 %v14302_v3, %s21667_s28 }
 0x8ca   : > { %14373 = vrot.lane.b32.xlu0 %v14372_v5, %s21664_s15  ;;  %14358 = vrot.lane.b32.xlu1 %v14342_v36, %s21506_s20 }
 0x8ce   : > { %14378 = vrot.lane.b32.xlu0 %v14377_v32, %s21657_s26  ;;  %14363 = vrot.lane.b32.xlu1 %v14347_v35, %s21653_s19 }
 0x8d2   : > { %14383 = vrot.lane.b32.xlu0 %v14382_v25, %s21669_s27  ;;  %14368 = vrot.lane.b32.xlu1 %v14352_v6, %s21648_s21 }
 0x8d6   : > { %14388 = vrot.lane.b32.xlu0 %v14387_v4, %s21667_s28  ;;  %14413 = vrot.lane.b32.xlu1 %v14372_v5, %s21664_s15 }
 0x8da   : > { %14393 = vrot.lane.b32.xlu0 %v14392_v63, %s21506_s20  ;;  %14418 = vrot.lane.b32.xlu1 %v14377_v32, %s21657_s26  ;;  %s21329_s26 = scalar_lea.vmem %s21358_s14, %s11564_s16 }
 0x8de   : > { %14398 = vrot.lane.b32.xlu0 %v14397_v59, %s21653_s19  ;;  %14423 = vrot.lane.b32.xlu1 %v14382_v25, %s21669_s27 }
 0x8e2   : > { %14403 = vrot.lane.b32.xlu0 %v14402_v48, %s21648_s21  ;;  %14428 = vrot.lane.b32.xlu1 %v14387_v4, %s21667_s28 }
 0x8e6   : > { %14408 = vrot.lane.b32.xlu0 %v14407_v18, %s21667_s28 }
 0x910   : > { %v14254_v54 = vpop.permute.xlu1 %14253 }
 0x911   : > { %v14256_v23 = vunpack.i.h.bf16 %v14254_v54  ;;  %v14255_v7 = vunpack.i.l.bf16 %v14254_v54 }
 0x913   : > { %v8718_v57 = vsel %vm5331_vm5, %v8712_v2, %v14256_v23  ;;  %v8717_v3 = vsel %vm5331_vm5, %v8711_v1, %v14255_v7 }
 0x914   : > { %v14274_v45 = vpop.permute.xlu0 %14273  ;;  %v14259_v55 = vpop.permute.xlu1 %14258 }
 0x915   : > { %v14276_v26 = vunpack.i.h.bf16 %v14274_v45  ;;  %v14275_v27 = vunpack.i.l.bf16 %v14274_v45  ;;  %v14261_v50 = vunpack.i.h.bf16 %v14259_v55  ;;  %v14260_v36 = vunpack.i.l.bf16 %v14259_v55 }
 0x917   : > { %v8742_v58 = vsel %vm4649_vm3, %v20573_v9, %v14276_v26  ;;  %v8741_v35 = vsel %vm4649_vm3, %v20537_v42, %v14275_v27  ;;  %v8723_v40 = vsel %vm7789_vm14, %v8717_v3, %v14260_v36  ;;  %v8724_v0 = vsel %vm7789_vm14, %v8718_v57, %v14261_v50 }
 0x918   : > { %v14279_v29 = vpop.permute.xlu0 %14278  ;;  %v14264_v51 = vpop.permute.xlu1 %14263 }
 0x919   : > { %v14281_v13 = vunpack.i.h.bf16 %v14279_v29  ;;  %v14280_v15 = vunpack.i.l.bf16 %v14279_v29  ;;  %v14266_v5 = vunpack.i.h.bf16 %v14264_v51  ;;  %v14265_v20 = vunpack.i.l.bf16 %v14264_v51 }
 0x91b   : > { %v8747_v4 = vsel %vm4857_vm4, %v8741_v35, %v14280_v15  ;;  %v8748_v63 = vsel %vm4857_vm4, %v8742_v58, %v14281_v13  ;;  %v8729_v55 = vsel %vm7831_vm6, %v8723_v40, %v14265_v20  ;;  %v8730_v29 = vsel %vm7831_vm6, %v8724_v0, %v14266_v5 }
 0x91c   : > { %v14284_v60 = vpop.permute.xlu0 %14283  ;;  %v14269_v16 = vpop.permute.xlu1 %14268 }
 0x91d   : > { %v14286_v14 = vunpack.i.h.bf16 %v14284_v60  ;;  %v14285_v6 = vunpack.i.l.bf16 %v14284_v60  ;;  %v14271_v21 = vunpack.i.h.bf16 %v14269_v16  ;;  %v14270_v48 = vunpack.i.l.bf16 %v14269_v16 }
 0x91f   : > { %v8753_v54 = vsel %vm5065_vm13, %v8747_v4, %v14285_v6  ;;  %v8754_v45 = vsel %vm5065_vm13, %v8748_v63, %v14286_v14  ;;  %v8735_v61 = vsel %vm7873_vm10, %v8729_v55, %v14270_v48  ;;  %v8736_v24 = vsel %vm7873_vm10, %v8730_v29, %v14271_v21 }
 0x920   : > { %v14289_v39 = vpop.permute.xlu0 %14288  ;;  %v20639_v56 = vpop.permute.xlu1 %14308  ;;  %v8783_v26 = vpack.c.bf16 %v8736_v24, %v8735_v61 }
 0x921   : > { %v14291_v32 = vunpack.i.h.bf16 %v14289_v39  ;;  %v14290_v46 = vunpack.i.l.bf16 %v14289_v39  ;;  %v14311_v13 = vunpack.i.h.bf16 %v20639_v56  ;;  %v14310_v15 = vunpack.i.l.bf16 %v20639_v56 }
 0x923   : > { %v8759_v51 = vsel %vm5331_vm5, %v8753_v54, %v14290_v46  ;;  %v8760_v41 = vsel %vm5331_vm5, %v8754_v45, %v14291_v32  ;;  %v8702_v5 = vsel %vm4649_vm3, %v20573_v9, %v14311_v13  ;;  %v8701_v20 = vsel %vm4649_vm3, %v20537_v42, %v14310_v15 }
 0x924   : > { %v14294_v10 = vpop.permute.xlu0 %14293  ;;  %v20643_v19 = vpop.permute.xlu1 %14313 }
 0x925   : > { %v14296_v59 = vunpack.i.h.bf16 %v14294_v10  ;;  %v14295_v38 = vunpack.i.l.bf16 %v14294_v10  ;;  %v14316_v57 = vunpack.i.h.bf16 %v20643_v19  ;;  %v14315_v3 = vunpack.i.l.bf16 %v20643_v19 }
 0x927   : > { %v8765_v60 = vsel %vm7789_vm14, %v8759_v51, %v14295_v38  ;;  %v8766_v16 = vsel %vm7789_vm14, %v8760_v41, %v14296_v59  ;;  %v8707_v56 = vsel %vm4857_vm4, %v8701_v20, %v14315_v3 }
 0x928   : > { %v14299_v25 = vpop.permute.xlu0 %14298  ;;  %v14319_v52 = vpop.permute.xlu1 %14318 }
 0x929   : > { %v14301_v18 = vunpack.i.h.bf16 %v14299_v25  ;;  %v14300_v28 = vunpack.i.l.bf16 %v14299_v25  ;;  %v14321_v58 = vunpack.i.h.bf16 %v14319_v52  ;;  %v14320_v35 = vunpack.i.l.bf16 %v14319_v52 }
 0x92a   : > { %v8708_v25 = vsel %vm4857_vm4, %v8702_v5, %v14316_v57 }
 0x92b   : > { %v8771_v39 = vsel %vm7831_vm6, %v8765_v60, %v14300_v28  ;;  %v8772_v33 = vsel %vm7831_vm6, %v8766_v16, %v14301_v18  ;;  %v8713_v63 = vsel %vm5065_vm13, %v8707_v56, %v14320_v35  ;;  %v8714_v52 = vsel %vm5065_vm13, %v8708_v25, %v14321_v58 }
 0x92c   : > { %v14304_v37 = vpop.permute.xlu0 %14303  ;;  %v14324_v49 = vpop.permute.xlu1 %14323  ;;  %v14241_v25 = vunpack.i.h.bf16 %v20630_v34 }
 0x92d   : > { %v14306_v17 = vunpack.i.h.bf16 %v14304_v37  ;;  %v14305_v47 = vunpack.i.l.bf16 %v14304_v37  ;;  %v14326_v14 = vunpack.i.h.bf16 %v14324_v49  ;;  %v14325_v6 = vunpack.i.l.bf16 %v14324_v49 }
 0x92f   : > { %v8777_v11 = vsel %vm7873_vm10, %v8771_v39, %v14305_v47  ;;  %v8778_v31 = vsel %vm7873_vm10, %v8772_v33, %v14306_v17  ;;  %v8719_v9 = vsel %vm5331_vm5, %v8713_v63, %v14325_v6  ;;  %v8720_v21 = vsel %vm5331_vm5, %v8714_v52, %v14326_v14 }
 0x930   : > { %v14344_v43 = vpop.permute.xlu0 %14343  ;;  %v14329_v23 = vpop.permute.xlu1 %14328  ;;  %v8784_v7 = vpack.c.bf16 %v8778_v31, %v8777_v11 }
 0x931   : > { %v14346_v32 = vunpack.i.h.bf16 %v14344_v43  ;;  %v14345_v46 = vunpack.i.l.bf16 %v14344_v43  ;;  %v14331_v42 = vunpack.i.h.bf16 %v14329_v23  ;;  %v14330_v48 = vunpack.i.l.bf16 %v14329_v23 }
 0x932   : > { %8949 = vmatprep.mubr.bf16.mxu1 %v8784_v7 }
 0x933   : > { %8950 = vmatmul.mubr.bf16.vlgmr.msra.gmra.mxu1 %v8783_v26  ;;  %v8744_v18 = vsel %vm4649_vm3, %v20609_v53, %v14346_v32  ;;  %v8743_v28 = vsel %vm4649_vm3, %v20575_v44, %v14345_v46  ;;  %v8725_v39 = vsel %vm7789_vm14, %v8719_v9, %v14330_v48  ;;  %v8726_v33 = vsel %vm7789_vm14, %v8720_v21, %v14331_v42 }
 0x934   : > { %v14349_v27 = vpop.permute.xlu0 %14348  ;;  %v14334_v10 = vpop.permute.xlu1 %14333  ;;  %v14251_v42 = vunpack.i.h.bf16 %v20634_v62 }
 0x935   : > { %v14351_v59 = vunpack.i.h.bf16 %v14349_v27  ;;  %v14350_v38 = vunpack.i.l.bf16 %v14349_v27  ;;  %v14336_v54 = vunpack.i.h.bf16 %v14334_v10  ;;  %v14335_v45 = vunpack.i.l.bf16 %v14334_v10 }
 0x937   : > { %v8749_v37 = vsel %vm4857_vm4, %v8743_v28, %v14350_v38  ;;  %v8750_v49 = vsel %vm4857_vm4, %v8744_v18, %v14351_v59  ;;  %v8731_v43 = vsel %vm7831_vm6, %v8725_v39, %v14335_v45  ;;  %v8732_v23 = vsel %vm7831_vm6, %v8726_v33, %v14336_v54 }
 0x938   : > { %v14354_v1 = vpop.permute.xlu0 %14353  ;;  %v20671_v2 = vpop.permute.xlu1 %14338  ;;  %v14246_v59 = vunpack.i.h.bf16 %v20632_v22  ;;  %v14245_v38 = vunpack.i.l.bf16 %v20632_v22 }
 0x939   : > { %v14356_v40 = vunpack.i.h.bf16 %v14354_v1  ;;  %v14355_v0 = vunpack.i.l.bf16 %v14354_v1  ;;  %v14341_v17 = vunpack.i.h.bf16 %v20671_v2  ;;  %v14340_v47 = vunpack.i.l.bf16 %v20671_v2 }
 0x93b   : > { %v8755_v11 = vsel %vm5065_vm13, %v8749_v37, %v14355_v0  ;;  %v8756_v31 = vsel %vm5065_vm13, %v8750_v49, %v14356_v40  ;;  %v8738_v58 = vsel %vm7873_vm10, %v8732_v23, %v14341_v17 }
 0x93c   : > { %v14374_v50 = vpop.permute.xlu0 %14373  ;;  %v20677_v36 = vpop.permute.xlu1 %14358 }
 0x93d   : > { %v14376_v55 = vunpack.i.h.bf16 %v14374_v50  ;;  %v14375_v29 = vunpack.i.l.bf16 %v14374_v50  ;;  %v8737_v50 = vsel %vm7873_vm10, %v8731_v43, %v14340_v47  ;;  %v14361_v32 = vunpack.i.h.bf16 %v20677_v36 }
 0x93e   : > { %v14360_v46 = vunpack.i.l.bf16 %v20677_v36  ;;  %v8785_v56 = vpack.c.bf16 %v8738_v58, %v8737_v50  ;;  %v14250_v36 = vunpack.i.l.bf16 %v20634_v62 }
 0x93f   : > { %v8761_v7 = vsel %vm5331_vm5, %v8755_v11, %v14375_v29  ;;  %v8762_v26 = vsel %vm5331_vm5, %v8756_v31, %v14376_v55  ;;  %v8704_v40 = vsel %vm4649_vm3, %v20609_v53, %v14361_v32 }
 0x940   : > { %v14379_v19 = vpop.permute.xlu0 %14378  ;;  %v20685_v4 = vpop.permute.xlu1 %14363 }
 0x941   : > { %v14381_v60 = vunpack.i.h.bf16 %v14379_v19  ;;  %v14380_v16 = vunpack.i.l.bf16 %v14379_v19  ;;  %v14240_v19 = vunpack.i.l.bf16 %v20630_v34  ;;  %v14366_v63 = vunpack.i.h.bf16 %v20685_v4 }
 0x942   : > { %v14365_v52 = vunpack.i.l.bf16 %v20685_v4  ;;  %v8703_v4 = vsel %vm4649_vm3, %v20575_v44, %v14360_v46  ;;  %v8974_v46 = vld [vmem:[%s21357_s13] sm:$0xff] }
 0x943   : > { %v8767_v1 = vsel %vm7789_vm14, %v8761_v7, %v14380_v16  ;;  %v8768_v2 = vsel %vm7789_vm14, %v8762_v26, %v14381_v60  ;;  %v8710_v45 = vsel %vm4857_vm4, %v8704_v40, %v14366_v63  ;;  %11561 = vmatprep.mubr.msk.f32.mxu0 %vm5065_vm13, %v8974_v46  ;;  %v14701_v46 = vld [vmem:[%s21348_s4 + $0x10] sm:$0xff]  }
 0x944   : > { %v14384_v51 = vpop.permute.xlu0 %14383  ;;  %v14369_v41 = vpop.permute.xlu1 %14368  ;;  %v8709_v22 = vsel %vm4857_vm4, %v8703_v4, %v14365_v52 }
 0x945   : > { %v14386_v61 = vunpack.i.h.bf16 %v14384_v51  ;;  %v14385_v24 = vunpack.i.l.bf16 %v14384_v51  ;;  %v14371_v9 = vunpack.i.h.bf16 %v14369_v41  ;;  %v14370_v21 = vunpack.i.l.bf16 %v14369_v41 }
 0x947   : > { %v8773_v57 = vsel %vm7831_vm6, %v8767_v1, %v14385_v24  ;;  %v8774_v3 = vsel %vm7831_vm6, %v8768_v2, %v14386_v61  ;;  %v8715_v62 = vsel %vm5065_vm13, %v8709_v22, %v14370_v21  ;;  %v8716_v51 = vsel %vm5065_vm13, %v8710_v45, %v14371_v9 }
 0x948   : > { %v14389_v27 = vpop.permute.xlu0 %14388  ;;  %v14414_v10 = vpop.permute.xlu1 %14413 }
 0x949   : > { %v14391_v13 = vunpack.i.h.bf16 %v14389_v27  ;;  %v14390_v15 = vunpack.i.l.bf16 %v14389_v27  ;;  %v14416_v48 = vunpack.i.h.bf16 %v14414_v10  ;;  %v14415_v18 = vunpack.i.l.bf16 %v14414_v10 }
 0x94b   : > { %v8779_v35 = vsel %vm7873_vm10, %v8773_v57, %v14390_v15  ;;  %v8780_v14 = vsel %vm7873_vm10, %v8774_v3, %v14391_v13  ;;  %v8721_v49 = vsel %vm5331_vm5, %v8715_v62, %v14415_v18  ;;  %v8722_v53 = vsel %vm5331_vm5, %v8716_v51, %v14416_v48 }
 0x94c   : > { %v14394_v6 = vpop.permute.xlu0 %14393  ;;  %v14419_v5 = vpop.permute.xlu1 %14418  ;;  %v8786_v20 = vpack.c.bf16 %v8780_v14, %v8779_v35 }
 0x94d   : > { %v14396_v0 = vunpack.i.h.bf16 %v14394_v6  ;;  %v14395_v54 = vunpack.i.l.bf16 %v14394_v6  ;;  %v14421_v41 = vunpack.i.h.bf16 %v14419_v5  ;;  %v14420_v37 = vunpack.i.l.bf16 %v14419_v5 }
 0x94e   : > { %8957 = vmatprep.mubr.bf16.mxu1 %v8786_v20 }
 0x94f   : > { %8958 = vmatmul.mubr.bf16.gmra.mxu1 %v8785_v56  ;;  %v8746_v47 = vsel %vm4649_vm3, %v20503_v12, %v14396_v0  ;;  %v8745_v61 = vsel %vm4649_vm3, %v20605_v30, %v14395_v54  ;;  %v8727_v23 = vsel %vm7789_vm14, %v8721_v49, %v14420_v37  ;;  %v8728_v7 = vsel %vm7789_vm14, %v8722_v53, %v14421_v41  ;;  %v8975_v54 = vld [vmem:[%s21357_s13 + $0x8] sm:$0x1] }
 0x950   : > { %v14399_v28 = vpop.permute.xlu0 %14398  ;;  %v14424_v34 = vpop.permute.xlu1 %14423  ;;  %vm9071_vm3 = vcmask 256000  }
 0x951   : > { %v14401_v55 = vunpack.i.h.bf16 %v14399_v28  ;;  %v14400_v29 = vunpack.i.l.bf16 %v14399_v28  ;;  %v14426_v60 = vunpack.i.h.bf16 %v14424_v34  ;;  %v14425_v44 = vunpack.i.l.bf16 %v14424_v34  ;;  %9072 = vst.msk [vmem:[#allocation5 + $0x8] sm:$0x7] %vm9071_vm3, %v21694_v8  ;;  %9074 = vst.msk [vmem:[#allocation5 + $0x18] sm:$0x7] %vm9071_vm3, %v21694_v8 }
 0x952   : > { %9076 = vst.msk [vmem:[#allocation5 + $0x28] sm:$0x7] %vm9071_vm3, %v21694_v8  ;;  %9078 = vst.msk [vmem:[#allocation5 + $0x38] sm:$0x7] %vm9071_vm3, %v21694_v8 }
 0x953   : > { %v8751_v33 = vsel %vm4857_vm4, %v8745_v61, %v14400_v29  ;;  %v8752_v11 = vsel %vm4857_vm4, %v8746_v47, %v14401_v55  ;;  %v8733_v12 = vsel %vm7831_vm6, %v8727_v23, %v14425_v44  ;;  %v8734_v30 = vsel %vm7831_vm6, %v8728_v7, %v14426_v60  ;;  %9080 = vst.msk [vmem:[#allocation5 + $0x48] sm:$0x7] %vm9071_vm3, %v21694_v8  ;;  %v14680_v61 = vld [vmem:[%s21348_s4 + $0x78] sm:$0xff]   ;;  %v14687_v23 = vld [vmem:[%s21348_s4 + $0xb0] sm:$0xff]   ;;  %v14688_v7 = vld [vmem:[%s21348_s4 + $0x68] sm:$0xff]  }
 0x954   : > { %v14404_v16 = vpop.permute.xlu0 %14403  ;;  %v14429_v17 = vpop.permute.xlu1 %14428  ;;  %9082 = vst.msk [vmem:[#allocation5 + $0x58] sm:$0x7] %vm9071_vm3, %v21694_v8  ;;  %9084 = vst.msk [vmem:[#allocation5 + $0x68] sm:$0x7] %vm9071_vm3, %v21694_v8  ;;  %11261 = vmatprep.subr.bf16.mxu1 %v14680_v61 }
 0x955   : > { %v14406_v24 = vunpack.i.h.bf16 %v14404_v16  ;;  %v14405_v39 = vunpack.i.l.bf16 %v14404_v16  ;;  %v14431_v31 = vunpack.i.h.bf16 %v14429_v17  ;;  %v14430_v43 = vunpack.i.l.bf16 %v14429_v17 }
 0x957   : > { %v8757_v26 = vsel %vm5065_vm13, %v8751_v33, %v14405_v39  ;;  %v8758_v27 = vsel %vm5065_vm13, %v8752_v11, %v14406_v24  ;;  %v8739_v35 = vsel %vm7873_vm10, %v8733_v12, %v14430_v43  ;;  %v8740_v14 = vsel %vm7873_vm10, %v8734_v30, %v14431_v31  ;;  %v14681_v24 = vld [vmem:[%s21348_s4 + $0x38] sm:$0xff]   ;;  %v14684_v11 = vld [vmem:[%s21348_s4 + $0x70] sm:$0xff]   ;;  %v14691_v12 = vld [vmem:[%s21348_s4 + $0xa8] sm:$0xff]  }
 0x958   : > { %v8763_v10 = vsel %vm5331_vm5, %v8757_v26, %v14240_v19  ;;  %v8764_v1 = vsel %vm5331_vm5, %v8758_v27, %v14241_v25  ;;  %v14409_v2 = vpop.permute.xlu0 %14408  ;;  %v8787_v32 = vpack.c.bf16 %v8740_v14, %v8739_v35  ;;  %v9099_v22 = vld [vmem:[#allocation5 + $0x1] sm:$0xff]  ;;  %v20779_v45 = vld [vmem:[#allocation5 + $0x11] sm:$0xff]  ;;  %11262 = vmatpush3.bf16.msra.mxu1 %v14681_v24 }
 0x959   : > { %v14411_v13 = vunpack.i.h.bf16 %v14409_v2  ;;  %v14410_v15 = vunpack.i.l.bf16 %v14409_v2  ;;  %v8769_v57 = vsel %vm7789_vm14, %v8763_v10, %v14245_v38  ;;  %v8770_v3 = vsel %vm7789_vm14, %v8764_v1, %v14246_v59  ;;  %v9107_v29 = vld [vmem:[#allocation5 + $0x3] sm:$0xff]  ;;  %v20783_v62 = vld [vmem:[#allocation5 + $0x13] sm:$0xff]  ;;  %11263 = vmatprep.subr.bf16.mxu1 %v14684_v11 }
 0x95a   : > { %v8775_v50 = vsel %vm7831_vm6, %v8769_v57, %v14250_v36  ;;  %v8776_v58 = vsel %vm7831_vm6, %v8770_v3, %v14251_v42  ;;  %v14432_v55 = vpack.i.bf16 %v20779_v45, %v9099_v22  ;;  %v9103_v51 = vld [vmem:[#allocation5 + $0x2] sm:$0xff]  ;;  %v14442_v41 = vpack.i.bf16 %v20783_v62, %v9107_v29  ;;  %v20786_v37 = vld [vmem:[#allocation5 + $0x12] sm:$0xff] }
 0x95b   : > { %v8781_v6 = vsel %vm7873_vm10, %v8775_v50, %v14410_v15  ;;  %v8782_v5 = vsel %vm7873_vm10, %v8776_v58, %v14411_v13  ;;  %v20788_v49 = vld [vmem:[#allocation5 + $0x52] sm:$0xff]  ;;  %v9155_v53 = vld [vmem:[#allocation5 + $0x62] sm:$0xff]  ;;  %v14437_v60 = vpack.i.bf16 %v20786_v37, %v9103_v51  ;;  %vm9093_vm14 = vcmask 253952  }
 0x95c   : > { %v8788_v20 = vpack.c.bf16 %v8782_v5, %v8781_v6  ;;  %14433 = vrot.lane.b32.xlu1 %v14432_v55, %s21653_s19  ;;  %v20791_v44 = vld [vmem:[#allocation5 + $0x51] sm:$0xff]  ;;  %v9151_v16 = vld [vmem:[#allocation5 + $0x61] sm:$0xff]  ;;  %14443 = vrot.lane.b32.xlu0 %v14442_v41, %s21669_s27  ;;  %v14452_v17 = vpack.i.bf16 %v9155_v53, %v20788_v49  ;;  %vm9088_vm10 = vcmask 259075  }
 0x95d   : > { %v14447_v47 = vpack.i.bf16 %v9151_v16, %v20791_v44  ;;  %v14682_v39 = vld [vmem:[%s21348_s4 + $0xf8] sm:$0xff]   ;;  %v14686_v31 = vld [vmem:[%s21348_s4 + $0xf0] sm:$0xff]   ;;  %v14690_v26 = vld [vmem:[%s21348_s4 + $0xe8] sm:$0xff]  }
 0x95e   : > { %8965 = vmatprep.mubr.bf16.mxu1 %v8788_v20  ;;  %v14683_v33 = vld [vmem:[%s21348_s4 + $0xb8] sm:$0xff]   ;;  %v14685_v43 = vld [vmem:[%s21348_s4 + $0x30] sm:$0xff]   ;;  %v14689_v27 = vld [vmem:[%s21348_s4 + $0x28] sm:$0xff]  }
 0x95f   : > { %8966 = vmatmul.mubr.bf16.gmra.mxu1 %v8787_v32  ;;  %v10998_v30 = vld [vmem:[%s21352_s8] ss:$0 sm:$0xff]  ;;  %v14696_v50 = vld [vmem:[%s21348_s4 + $0x58] sm:$0xff]   ;;  %v14700_v32 = vld [vmem:[%s21348_s4 + $0x50] sm:$0xff]  }
 0x960   : > { %14438 = vrot.lane.b32.xlu1 %v14437_v60, %s21664_s15  ;;  %14453 = vrot.lane.b32.xlu0 %v14452_v17, %s21664_s15  ;;  %v14692_v1 = vld [vmem:[%s21348_s4 + $0x60] sm:$0xff]   ;;  %v14697_v14 = vld [vmem:[%s21348_s4 + $0x18] sm:$0xff]   ;;  %v9159_v24 = vld [vmem:[#allocation5 + $0x63] sm:$0xff] }
 0x961   : > { %11264 = vmatpush3.bf16.msra.mxu1 %v14685_v43  ;;  %v14693_v13 = vld [vmem:[%s21348_s4 + $0x20] sm:$0xff]   ;;  %v14707_v22 = vld [vmem:[%s21348_s4 + $0x88] sm:$0xff]  }
 0x962   : > { %11265 = vmatprep.subr.bf16.mxu1 %v14688_v7  ;;  %v14694_v5 = vld [vmem:[%s21348_s4 + $0xe0] sm:$0xff]  }
 0x963   : > { %v14695_v20 = vld [vmem:[%s21348_s4 + $0xa0] sm:$0xff]  }
 0x964   : > { %14448 = vrot.lane.b32.xlu1 %v14447_v47, %s21653_s19  ;;  %v14710_v29 = vld [vmem:[%s21348_s4 + $0xc0] sm:$0xff]  }
 0x965   : > { %11266 = vmatpush3.bf16.msra.mxu1 %v14689_v27  ;;  %v9143_v61 = vld [vmem:[#allocation5 + $0x53] sm:$0xff] }
 0x966   : > { %11267 = vmatprep.subr.bf16.mxu1 %v14692_v1 }
 0x969   : > { %11268 = vmatpush3.bf16.msra.mxu1 %v14693_v13 }
 0x96a   : > { %11269 = vmatprep.subr.bf16.mxu1 %v14696_v50 }
 0x96d   : > { %11270 = vmatpush3.bf16.msra.mxu1 %v14697_v14 }
 0x96e   : > { %11271 = vmatprep.subr.bf16.mxu1 %v14700_v32 }
 0x971   : > { %11272 = vmatpush3.bf16.msra.mxu1 %v14701_v46 }
 0x9ce   : > { %v14444_v11 = vpop.permute.xlu0 %14443 }
 0x9d2   : > { %v20923_v43 = vpop.permute.xlu0 %14453 }
 0x9f3   : > { %v11235_v56 = vpop.f32.mrf.mxu1 }
 0x9f5   : > { %v11236_v25 = vpop.f32.mrf.mxu1 }
 0x9f6   : > { %v11237_v0 = vadd.f32 %v11236_v25, %v11235_v56  ;;  %v14698_v56 = vld [vmem:[%s21348_s4 + $0xd8] sm:$0xff]  }
 0x9f7   : > { %v11238_v19 = vpop.f32.mrf.mxu1  ;;  %v14699_v25 = vld [vmem:[%s21348_s4 + $0x98] sm:$0xff]  }
 0x9f9   : > { %v11239_v63 = vpop.f32.mrf.mxu1 }
 0x9fa   : > { %v11240_v4 = vadd.f32 %v11239_v63, %v11238_v19  ;;  %v14704_v19 = vld [vmem:[%s21348_s4 + $0x48] sm:$0xff]  }
 0x9fb   : > { %v14705_v63 = vld [vmem:[%s21348_s4 + $0x8] sm:$0xff]   ;;  %11273 = vmatprep.subr.bf16.mxu1 %v14704_v19 }
 0x9fc   : > { %11274 = vmatpush3.bf16.msra.mxu1 %v14705_v63 }
 0xa0f   : > { %v11241_v52 = vpop.f32.mrf.mxu1 }
 0xa11   : > { %v11242_v59 = vpop.f32.mrf.mxu1 }
 0xa12   : > { %v11243_v40 = vadd.f32 %v11242_v59, %v11241_v52 }
 0xa13   : > { %v11244_v38 = vpop.f32.mrf.mxu1 }
 0xa15   : > { %v11245_v9 = vpop.f32.mrf.mxu1 }
 0xa16   : > { %v11246_v34 = vadd.f32 %v11245_v9, %v11244_v38 }
 0xa1f   : > { %v11247_v21 = vpop.f32.mrf.mxu1 }
 0xa21   : > { %v11248_v42 = vpop.f32.mrf.mxu1 }
 0xa22   : > { %v11249_v28 = vadd.f32 %v11248_v42, %v11247_v21 }
 0xa23   : > { %v11250_v36 = vpop.f32.mrf.mxu1 }
 0xa25   : > { %v11251_v48 = vpop.f32.mrf.mxu1 }
 0xa26   : > { %v11252_v18 = vadd.f32 %v11251_v48, %v11250_v36  ;;  %v14702_v36 = vld [vmem:[%s21348_s4 + $0xd0] sm:$0xff]  }
 0xa27   : > { %v14703_v48 = vld [vmem:[%s21348_s4 + $0x90] sm:$0xff]  }
 0xa28   : > { %11549 = vmatprep.subr.mxu0 %v11252_v18 }
 0xa29   : > { %11550 = vmatpush3.msra.mxu0 %v11252_v18  ;;  %v14708_v18 = vld [vmem:[%s21348_s4 + $0x40] sm:$0xff]  }
 0xa2a   : > { %11551 = vmatprep.subr.mxu0 %v11249_v28  ;;  %11275 = vmatprep.subr.bf16.mxu1 %v14708_v18 }
 0xa2b   : > { %11552 = vmatpush3.msra.mxu0 %v11249_v28 }
 0xa2c   : > { %11553 = vmatprep.subr.mxu0 %v11246_v34 }
 0xa2d   : > { %11554 = vmatpush3.msra.mxu0 %v11246_v34 }
 0xa2e   : > { %11555 = vmatprep.subr.mxu0 %v11243_v40 }
 0xa2f   : > { %11556 = vmatpush3.msra.mxu0 %v11243_v40  ;;  %v14706_v40 = vld [vmem:[%s21348_s4 + $0xc8] sm:$0xff]  }
 0xa30   : > { %11557 = vmatprep.subr.mxu0 %v11240_v4 }
 0xa31   : > { %11558 = vmatpush3.msra.mxu0 %v11240_v4  ;;  %v14709_v4 = vld [vmem:[%s21348_s4] sm:$0xff]  }
 0xa32   : > { %11559 = vmatprep.subr.mxu0 %v11237_v0  ;;  %11276 = vmatpush3.bf16.msra.mxu1 %v14709_v4 }
 0xa33   : > { %11560 = vmatpush3.msra.mxu0 %v11237_v0 }
 0xa34   : > { %11562 = vmatmul.mubr.msk.f32.vlgmr.msra.gmra.mxu0 %vm5065_vm13, %v8975_v54  ;;  %11289 = vmatprep.subr.bf16.mxu0 %v14682_v39 }
 0xa35   : > { %11290 = vmatpush3.bf16.msra.mxu0 %v14683_v33  ;;  %v14532_v33 = vpack.i.bf16 %v9159_v24, %v9143_v61 }
 0xa36   : > { %11291 = vmatprep.subr.bf16.mxu0 %v14686_v31 }
 0xa39   : > { %11292 = vmatpush3.bf16.msra.mxu0 %v14687_v23 }
 0xa3a   : > { %11293 = vmatprep.subr.bf16.mxu0 %v14690_v26 }
 0xa3d   : > { %11294 = vmatpush3.bf16.msra.mxu0 %v14691_v12  ;;  %v9095_v12 = vld [vmem:[#allocation5] sm:$0xff] }
 0xa3e   : > { %11295 = vmatprep.subr.bf16.mxu0 %v14694_v5 }
 0xa41   : > { %11296 = vmatpush3.bf16.msra.mxu0 %v14695_v20 }
 0xa42   : > { %11297 = vmatprep.subr.bf16.mxu0 %v14698_v56 }
 0xa45   : > { %11298 = vmatpush3.bf16.msra.mxu0 %v14699_v25 }
 0xa46   : > { %11299 = vmatprep.subr.bf16.mxu0 %v14702_v36 }
 0xa49   : > { %11300 = vmatpush3.bf16.msra.mxu0 %v14703_v48 }
 0xa4a   : > { %11301 = vmatprep.subr.bf16.mxu0 %v14706_v40 }
 0xa4d   : > { %11302 = vmatpush3.bf16.msra.mxu0 %v14707_v22 }
 0xa4e   : > { %11303 = vmatprep.subr.bf16.mxu0 %v14710_v29 }
 0xaf4   : > { %v11563_v10 = vpop.f32.mrf.mxu0 }
 0xaf5   : > { %v9061_v2 = vadd.f32 %v11563_v10, %v10998_v30 }
 0xaf6   : > { %v9055_v15 = vpop.f32.mrf.mxu0 }
 0xaf7   : > { %vm9065_vm13 = vcmp.ge.f32.partialorder %v9061_v2, 0.0  ;;  %v9067_v57 = vmul.f32 0.2, %v9061_v2  ;;  %v9056_v3 = vadd.f32 %v10998_v30, %v9055_v15  ;;  %v9096_v30 = vld [vmem:[#allocation5 + $0x10] sm:$0xff] }
 0xaf9   : > { %v9069_v58 = vsel %vm9065_vm13, %v9061_v2, %v9067_v57  ;;  %vm9064_vm1 = vcmp.ge.f32.partialorder %v9056_v3, 0.0  ;;  %v9066_v35 = vmul.f32 0.2, %v9056_v3 }
 0xafa   : > { %9094 = vst.msk [vmem:[#allocation5 + $0x44] sm:$0x1] %vm9093_vm14, %v9069_v58  ;;  %v14446_v58 = vunpack.i.h.bf16 %v14444_v11 }
 0xafb   : > { %v9068_v6 = vsel %vm9064_vm1, %v9056_v3, %v9066_v35  ;;  %v14445_v35 = vunpack.i.l.bf16 %v14444_v11 }
 0xafc   : > { %9086 = vst.msk [vmem:[#allocation5 + $0x22] sm:$0x7] %vm9071_vm3, %v9068_v6 }
 0xafd   : > { %9089 = vst.msk [vmem:[#allocation5 + $0x2f] sm:$0x38] %vm9088_vm10, %v9068_v6 }
 0xafe   : > { %9092 = vst.msk [vmem:[#allocation5 + $0x3c] sm:$0xc0] %vm9091_vm7, %v9068_v6 }
 0xb03   : > { %v9117_v38 = vld [vmem:[#allocation5 + $0x21] sm:$0xff] }
 0xb04   : > { %v9148_v52 = vld [vmem:[#allocation5 + $0x31] sm:$0xff]  ;;  %v14457_v21 = vpack.i.bf16 %v9117_v38, %v20779_v45  ;;  %v9121_v42 = vld [vmem:[#allocation5 + $0x22] sm:$0xff] }
 0xb05   : > { %v9149_v59 = vld [vmem:[#allocation5 + $0x41] sm:$0xff]  ;;  %v14477_v28 = vpack.i.bf16 %v9148_v52, %v9117_v38  ;;  %v14462_v34 = vpack.i.bf16 %v9121_v42, %v20786_v37  ;;  %v9137_v0 = vld [vmem:[#allocation5 + $0x32] sm:$0xff] }
 0xb06   : > { %v14472_v9 = vpack.i.bf16 %v9149_v59, %v9148_v52  ;;  %14458 = vrot.lane.b32.xlu0 %v14457_v21, %s21653_s19  ;;  %v9125_v54 = vld [vmem:[#allocation5 + $0x23] sm:$0xff]  ;;  %v14487_v45 = vpack.i.bf16 %v9137_v0, %v9121_v42  ;;  %v9141_v51 = vld [vmem:[#allocation5 + $0x33] sm:$0xff]  ;;  %v14537_v17 = vpack.i.bf16 %v20791_v44, %v9149_v59  ;;  %v14434_v44 = vpop.permute.xlu1 %14433 }
 0xb07   : > { %v14467_v55 = vpack.i.bf16 %v9125_v54, %v20783_v62  ;;  %v9153_v41 = vld [vmem:[#allocation5 + $0x42] sm:$0xff]  ;;  %v14711_v37 = vld [vmem:[%s21348_s4 + $0x80] sm:$0xff]   ;;  %v14497_v53 = vpack.i.bf16 %v9141_v51, %v9125_v54  ;;  %v14436_v23 = vunpack.i.h.bf16 %v14434_v44  ;;  %v14435_v7 = vunpack.i.l.bf16 %v14434_v44 }
 0xb08   : > { %14473 = vrot.lane.b32.xlu1 %v14472_v9, %s21653_s19  ;;  %v14482_v60 = vpack.i.bf16 %v9153_v41, %v9137_v0  ;;  %v9157_v62 = vld [vmem:[#allocation5 + $0x43] sm:$0xff]  ;;  %11304 = vmatpush3.bf16.msra.mxu0 %v14711_v37  ;;  %v14542_v47 = vpack.i.bf16 %v20788_v49, %v9153_v41 }
 0xb09   : > { %v14492_v16 = vpack.i.bf16 %v9157_v62, %v9141_v51  ;;  %v14547_v39 = vpack.i.bf16 %v9143_v61, %v9157_v62  ;;  %v9353_v2 = vsel %vm4857_vm4, %v9096_v30, %v14436_v23  ;;  %v9352_v13 = vsel %vm4857_vm4, %v9095_v12, %v14435_v7  ;;  %v20931_v32 = vld [vmem:[#allocation5 + $0x20] sm:$0xff] }
 0xb0a   : > { %14463 = vrot.lane.b32.xlu0 %v14462_v34, %s21664_s15  ;;  %v14439_v31 = vpop.permute.xlu1 %14438  ;;  %v20942_v37 = vld [vmem:[#allocation5 + $0x40] sm:$0xff] }
 0xb0b   : > { %v14441_v10 = vunpack.i.h.bf16 %v14439_v31  ;;  %v14440_v1 = vunpack.i.l.bf16 %v14439_v31 }
 0xb0c   : > { %14478 = vrot.lane.b32.xlu1 %v14477_v28, %s21653_s19 }
 0xb0d   : > { %v9356_v5 = vsel %vm5331_vm5, %v9352_v13, %v14440_v1  ;;  %v9357_v20 = vsel %vm5331_vm5, %v9353_v2, %v14441_v10 }
 0xb0e   : > { %14468 = vrot.lane.b32.xlu0 %v14467_v55, %s21669_s27  ;;  %v20925_v49 = vpop.permute.xlu1 %14448  ;;  %v9360_v59 = vsel %vm7831_vm6, %v9356_v5, %v14445_v35  ;;  %v9361_v38 = vsel %vm7831_vm6, %v9357_v20, %v14446_v58  ;;  %v14456_v35 = vunpack.i.h.bf16 %v20923_v43 }
 0xb0f   : > { %v9400_v54 = vpack.c.bf16 %v9361_v38, %v9360_v59 }
 0xb10   : > { %14488 = vrot.lane.b32.xlu1 %v14487_v45, %s21664_s15 }
 0xb12   : > { %14483 = vrot.lane.b32.xlu0 %v14482_v60, %s21664_s15 }
 0xb14   : > { %14498 = vrot.lane.b32.xlu1 %v14497_v53, %s21669_s27 }
 0xb16   : > { %14493 = vrot.lane.b32.xlu0 %v14492_v16, %s21669_s27 }
 0xb18   : > { %14508 = vrot.lane.b32.xlu1 %v14477_v28, %s21653_s19 }
 0xb1a   : > { %14503 = vrot.lane.b32.xlu0 %v14472_v9, %s21653_s19 }
 0xb1c   : > { %14518 = vrot.lane.b32.xlu1 %v14487_v45, %s21664_s15 }
 0xb1e   : > { %14513 = vrot.lane.b32.xlu0 %v14482_v60, %s21664_s15 }
 0xb20   : > { %14538 = vrot.lane.b32.xlu1 %v14537_v17, %s21653_s19 }
 0xb22   : > { %14523 = vrot.lane.b32.xlu0 %v14492_v16, %s21669_s27 }
 0xb24   : > { %14543 = vrot.lane.b32.xlu1 %v14542_v47, %s21664_s15 }
 0xb26   : > { %14528 = vrot.lane.b32.xlu0 %v14497_v53, %s21669_s27  ;;  %v9144_v53 = vld [vmem:[#allocation5 + $0x30] sm:$0xff] }
 0xb28   : > { %14548 = vrot.lane.b32.xlu1 %v14547_v39, %s21669_s27 }
 0xb2a   : > { %14533 = vrot.lane.b32.xlu0 %v14532_v33, %s21669_s27 }
 0xb78   : > { %v14459_v27 = vpop.permute.xlu0 %14458 }
 0xb79   : > { %v14461_v3 = vunpack.i.h.bf16 %v14459_v27  ;;  %v14460_v50 = vunpack.i.l.bf16 %v14459_v27 }
 0xb7a   : > { %v14474_v26 = vpop.permute.xlu1 %14473 }
 0xb7b   : > { %v9364_v25 = vsel %vm4857_vm4, %v9096_v30, %v14460_v50  ;;  %v9365_v19 = vsel %vm4857_vm4, %v20931_v32, %v14461_v3  ;;  %v14476_v42 = vunpack.i.h.bf16 %v14474_v26  ;;  %v14475_v18 = vunpack.i.l.bf16 %v14474_v26 }
 0xb7c   : > { %v14464_v57 = vpop.permute.xlu0 %14463 }
 0xb7d   : > { %v14466_v14 = vunpack.i.h.bf16 %v14464_v57  ;;  %v14465_v6 = vunpack.i.l.bf16 %v14464_v57  ;;  %v9389_v60 = vsel %vm4857_vm4, %v20942_v37, %v14476_v42  ;;  %v9388_v62 = vsel %vm4857_vm4, %v9144_v53, %v14475_v18  ;;  %v9147_v18 = vld [vmem:[#allocation5 + $0x60] sm:$0xff] }
 0xb7e   : > { %v14479_v15 = vpop.permute.xlu1 %14478 }
 0xb7f   : > { %v9368_v9 = vsel %vm5331_vm5, %v9364_v25, %v14465_v6  ;;  %v9369_v21 = vsel %vm5331_vm5, %v9365_v19, %v14466_v14  ;;  %v14481_v28 = vunpack.i.h.bf16 %v14479_v15  ;;  %v14480_v34 = vunpack.i.l.bf16 %v14479_v15 }
 0xb80   : > { %v14469_v56 = vpop.permute.xlu0 %14468  ;;  %v14455_v14 = vunpack.i.l.bf16 %v20923_v43  ;;  %v14451_v6 = vunpack.i.h.bf16 %v20925_v49  ;;  %v14450_v43 = vunpack.i.l.bf16 %v20925_v49 }
 0xb81   : > { %v14471_v63 = vunpack.i.h.bf16 %v14469_v56  ;;  %v14470_v52 = vunpack.i.l.bf16 %v14469_v56  ;;  %v9377_v16 = vsel %vm4857_vm4, %v9144_v53, %v14481_v28  ;;  %v9376_v17 = vsel %vm4857_vm4, %v20931_v32, %v14480_v34 }
 0xb82   : > { %v14489_v46 = vpop.permute.xlu1 %14488 }
 0xb83   : > { %v9372_v36 = vsel %vm7831_vm6, %v9368_v9, %v14470_v52  ;;  %v9373_v48 = vsel %vm7831_vm6, %v9369_v21, %v14471_v63  ;;  %v14491_v22 = vunpack.i.h.bf16 %v14489_v46  ;;  %v14490_v45 = vunpack.i.l.bf16 %v14489_v46 }
 0xb84   : > { %v14484_v4 = vpop.permute.xlu0 %14483  ;;  %v9401_v0 = vpack.c.bf16 %v9373_v48, %v9372_v36  ;;  %v9146_v48 = vld [vmem:[#allocation5 + $0x50] sm:$0xff] }
 0xb85   : > { %v14486_v51 = vunpack.i.h.bf16 %v14484_v4  ;;  %v14485_v41 = vunpack.i.l.bf16 %v14484_v4  ;;  %v9380_v24 = vsel %vm5331_vm5, %v9376_v17, %v14490_v45  ;;  %v9381_v39 = vsel %vm5331_vm5, %v9377_v16, %v14491_v22 }
 0xb86   : > { %v14499_v40 = vpop.permute.xlu1 %14498  ;;  %9703 = vmatprep.mubr.bf16.mxu1 %v9401_v0 }
 0xb87   : > { %v14501_v55 = vunpack.i.h.bf16 %v14499_v40  ;;  %v14500_v29 = vunpack.i.l.bf16 %v14499_v40  ;;  %9704 = vmatmul.mubr.bf16.vlgmr.msra.gmra.mxu1 %v9400_v54  ;;  %v9393_v23 = vsel %vm5331_vm5, %v9389_v60, %v14486_v51  ;;  %v9392_v7 = vsel %vm5331_vm5, %v9388_v62, %v14485_v41 }
 0xb88   : > { %v14494_v47 = vpop.permute.xlu0 %14493  ;;  %v9391_v60 = vsel %vm4857_vm4, %v9147_v18, %v14451_v6  ;;  %v14719_v6 = vld [vmem:[%s21349_s5 + $0xf0] sm:$0xff]   ;;  %v14734_v18 = vld [vmem:[%s21349_s5 + $0x48] sm:$0xff]  }
 0xb89   : > { %v14496_v33 = vunpack.i.h.bf16 %v14494_v47  ;;  %v14495_v44 = vunpack.i.l.bf16 %v14494_v47  ;;  %v9384_v11 = vsel %vm7831_vm6, %v9380_v24, %v14500_v29  ;;  %v9385_v31 = vsel %vm7831_vm6, %v9381_v39, %v14501_v55 }
 0xb8a   : > { %v14509_v61 = vpop.permute.xlu1 %14508  ;;  %v9402_v1 = vpack.c.bf16 %v9385_v31, %v9384_v11 }
 0xb8b   : > { %v9396_v26 = vsel %vm7831_vm6, %v9392_v7, %v14495_v44  ;;  %v9397_v27 = vsel %vm7831_vm6, %v9393_v23, %v14496_v33  ;;  %v14511_v58 = vunpack.i.h.bf16 %v14509_v61  ;;  %v14510_v5 = vunpack.i.l.bf16 %v14509_v61 }
 0xb8c   : > { %v14504_v12 = vpop.permute.xlu0 %14503  ;;  %v9403_v10 = vpack.c.bf16 %v9397_v27, %v9396_v26  ;;  %v9395_v23 = vsel %vm5331_vm5, %v9391_v60, %v14456_v35  ;;  %v14717_v35 = vld [vmem:[%s21349_s5 + $0xb8] sm:$0xff]  }
 0xb8d   : > { %v14506_v15 = vunpack.i.h.bf16 %v14504_v12  ;;  %v14505_v57 = vunpack.i.l.bf16 %v14504_v12  ;;  %v9355_v21 = vsel %vm4857_vm4, %v9144_v53, %v14511_v58  ;;  %v9354_v28 = vsel %vm4857_vm4, %v20931_v32, %v14510_v5  ;;  %v14715_v58 = vld [vmem:[%s21349_s5 + $0xf8] sm:$0xff]   ;;  %v14718_v5 = vld [vmem:[%s21349_s5 + $0x68] sm:$0xff]  }
 0xb8e   : > { %v14519_v30 = vpop.permute.xlu1 %14518  ;;  %9752 = vmatprep.mubr.bf16.mxu0 %v9403_v10  ;;  %v9390_v32 = vsel %vm4857_vm4, %v9146_v48, %v14450_v43  ;;  %11351 = vmatprep.subr.bf16.mxu0 %v14715_v58  ;;  %v14728_v43 = vld [vmem:[%s21349_s5 + $0x18] sm:$0xff]   ;;  %v14742_v58 = vld [vmem:[%s21349_s5 + $0xc0] sm:$0xff]  }
 0xb8f   : > { %9753 = vmatmul.mubr.bf16.vlgmr.msra.gmra.mxu0 %v9402_v1  ;;  %v9367_v56 = vsel %vm4857_vm4, %v20942_v37, %v14506_v15  ;;  %v9366_v25 = vsel %vm4857_vm4, %v9144_v53, %v14505_v57  ;;  %v14521_v52 = vunpack.i.h.bf16 %v14519_v30  ;;  %v14520_v59 = vunpack.i.l.bf16 %v14519_v30 }
 0xb90   : > { %v14514_v2 = vpop.permute.xlu0 %14513  ;;  %v9394_v31 = vsel %vm5331_vm5, %v9390_v32, %v14455_v14  ;;  %v14716_v14 = vld [vmem:[%s21349_s5 + $0x30] sm:$0xff]   ;;  %11352 = vmatpush3.bf16.msra.mxu0 %v14717_v35  ;;  %v14743_v35 = vld [vmem:[%s21349_s5 + $0x80] sm:$0xff]  }
 0xb91   : > { %v14516_v3 = vunpack.i.h.bf16 %v14514_v2  ;;  %v14515_v50 = vunpack.i.l.bf16 %v14514_v2  ;;  %v9358_v29 = vsel %vm5331_vm5, %v9354_v28, %v14520_v59  ;;  %v9359_v51 = vsel %vm5331_vm5, %v9355_v21, %v14521_v52  ;;  %11353 = vmatprep.subr.bf16.mxu0 %v14719_v6  ;;  %v14724_v52 = vld [vmem:[%s21349_s5 + $0x20] sm:$0xff]   ;;  %v14726_v59 = vld [vmem:[%s21349_s5 + $0x58] sm:$0xff]   ;;  %v14730_v21 = vld [vmem:[%s21349_s5 + $0x50] sm:$0xff]  }
 0xb92   : > { %v14539_v13 = vpop.permute.xlu1 %14538  ;;  %v14737_v28 = vld [vmem:[%s21349_s5 + $0x90] sm:$0xff]  }
 0xb93   : > { %v9370_v38 = vsel %vm5331_vm5, %v9366_v25, %v14515_v50  ;;  %v9371_v9 = vsel %vm5331_vm5, %v9367_v56, %v14516_v3  ;;  %v14541_v34 = vunpack.i.h.bf16 %v14539_v13  ;;  %v14540_v40 = vunpack.i.l.bf16 %v14539_v13  ;;  %v14712_v3 = vld [vmem:[%s21349_s5 + $0x78] sm:$0xff]   ;;  %v14714_v50 = vld [vmem:[%s21349_s5 + $0x70] sm:$0xff]   ;;  %v14720_v56 = vld [vmem:[%s21349_s5 + $0x28] sm:$0xff]  }
 0xb94   : > { %v14524_v20 = vpop.permute.xlu0 %14523  ;;  %11317 = vmatprep.subr.bf16.mxu1 %v14712_v3  ;;  %v14722_v25 = vld [vmem:[%s21349_s5 + $0x60] sm:$0xff]  }
 0xb95   : > { %v14526_v19 = vunpack.i.h.bf16 %v14524_v20  ;;  %v14525_v63 = vunpack.i.l.bf16 %v14524_v20  ;;  %v9379_v17 = vsel %vm4857_vm4, %v9146_v48, %v14541_v34  ;;  %v9378_v47 = vsel %vm4857_vm4, %v20942_v37, %v14540_v40  ;;  %v14721_v20 = vld [vmem:[%s21349_s5 + $0xb0] sm:$0xff]   ;;  %v14739_v34 = vld [vmem:[%s21349_s5 + $0xc8] sm:$0xff]  }
 0xb96   : > { %v14544_v46 = vpop.permute.xlu1 %14543  ;;  %vm9782_vm4 = vcmask 518144   ;;  %11354 = vmatpush3.bf16.msra.mxu0 %v14721_v20  ;;  %v14732_v48 = vld [vmem:[%s21349_s5 + $0x10] sm:$0xff]   ;;  %v14736_v40 = vld [vmem:[%s21349_s5 + $0x8] sm:$0xff]   ;;  %v14745_v20 = vld [vmem:[%s21349_s5 + $0x138] sm:$0xff]  }
 0xb97   : > { %v9374_v42 = vsel %vm7831_vm6, %v9370_v38, %v14525_v63  ;;  %v9375_v36 = vsel %vm7831_vm6, %v9371_v9, %v14526_v19  ;;  %v14546_v22 = vunpack.i.h.bf16 %v14544_v46  ;;  %v14545_v45 = vunpack.i.l.bf16 %v14544_v46  ;;  %9783 = vst.msk [vmem:[#allocation6 + $0x8] sm:$0x7] %vm9782_vm4, %v21694_v8  ;;  %9785 = vst.msk [vmem:[#allocation6 + $0x18] sm:$0x7] %vm9782_vm4, %v21694_v8  ;;  %v14723_v46 = vld [vmem:[%s21349_s5 + $0xe8] sm:$0xff]   ;;  %v14727_v63 = vld [vmem:[%s21349_s5 + $0xe0] sm:$0xff]  }
 0xb98   : > { %v14529_v4 = vpop.permute.xlu0 %14528  ;;  %v9405_v54 = vpack.c.bf16 %v9375_v36, %v9374_v42  ;;  %9787 = vst.msk [vmem:[#allocation6 + $0x28] sm:$0x7] %vm9782_vm4, %v21694_v8  ;;  %9789 = vst.msk [vmem:[#allocation6 + $0x38] sm:$0x7] %vm9782_vm4, %v21694_v8  ;;  %v14725_v19 = vld [vmem:[%s21349_s5 + $0xa8] sm:$0xff]   ;;  %11355 = vmatprep.subr.bf16.mxu0 %v14723_v46  ;;  %v14729_v38 = vld [vmem:[%s21349_s5 + $0xa0] sm:$0xff]  }
 0xb99   : > { %v14531_v55 = vunpack.i.h.bf16 %v14529_v4  ;;  %v14530_v49 = vunpack.i.l.bf16 %v14529_v4  ;;  %v9382_v39 = vsel %vm5331_vm5, %v9378_v47, %v14545_v45  ;;  %v9383_v33 = vsel %vm5331_vm5, %v9379_v17, %v14546_v22  ;;  %9791 = vst.msk [vmem:[#allocation6 + $0x48] sm:$0x7] %vm9782_vm4, %v21694_v8  ;;  %9793 = vst.msk [vmem:[#allocation6 + $0x58] sm:$0x7] %vm9782_vm4, %v21694_v8  ;;  %v14731_v9 = vld [vmem:[%s21349_s5 + $0xd8] sm:$0xff]   ;;  %v14735_v36 = vld [vmem:[%s21349_s5 + $0xd0] sm:$0xff]  }
 0xb9a   : > { %v14549_v0 = vpop.permute.xlu1 %14548  ;;  %9711 = vmatprep.mubr.bf16.mxu1 %v9405_v54  ;;  %9795 = vst.msk [vmem:[#allocation6 + $0x68] sm:$0x7] %vm9782_vm4, %v21694_v8  ;;  %9797 = vst.msk [vmem:[#allocation6 + $0x78] sm:$0x7] %vm9782_vm4, %v21694_v8  ;;  %v14713_v8 = vld [vmem:[%s21349_s5 + $0x38] sm:$0xff]   ;;  %11356 = vmatpush3.bf16.msra.mxu0 %v14725_v19  ;;  %v14738_v4 = vld [vmem:[%s21349_s5 + $0x40] sm:$0xff]  }
 0xb9b   : > { %v14551_v41 = vunpack.i.h.bf16 %v14549_v0  ;;  %v14550_v53 = vunpack.i.l.bf16 %v14549_v0  ;;  %v9362_v62 = vsel %vm7831_vm6, %v9358_v29, %v14530_v49  ;;  %v9363_v16 = vsel %vm7831_vm6, %v9359_v51, %v14531_v55  ;;  %11318 = vmatpush3.bf16.msra.mxu1 %v14713_v8  ;;  %11357 = vmatprep.subr.bf16.mxu0 %v14727_v63  ;;  %v14733_v42 = vld [vmem:[%s21349_s5 + $0x98] sm:$0xff]   ;;  %v14741_v0 = vld [vmem:[%s21349_s5 + $0x88] sm:$0xff]   ;;  %v14740_v54 = vld [vmem:[%s21349_s5] sm:$0xff]  }
 0xb9c   : > { %v14534_v61 = vpop.permute.xlu0 %14533  ;;  %v9404_v24 = vpack.c.bf16 %v9363_v16, %v9362_v62  ;;  %11319 = vmatprep.subr.bf16.mxu1 %v14714_v50  ;;  %v21098_v51 = vld [vmem:[%s21353_s9] ss:$0 sm:$0xff] }
 0xb9d   : > { %v14536_v44 = vunpack.i.h.bf16 %v14534_v61  ;;  %v14535_v11 = vunpack.i.l.bf16 %v14534_v61  ;;  %v9386_v7 = vsel %vm7831_vm6, %v9382_v39, %v14550_v53  ;;  %v9387_v26 = vsel %vm7831_vm6, %v9383_v33, %v14551_v41  ;;  %v9807_v39 = vld [vmem:[#allocation6] sm:$0xff]  ;;  %v21101_v33 = vld [vmem:[#allocation6 + $0x10] sm:$0xff] }
 0xb9e   : > { %9712 = vmatmul.mubr.bf16.gmra.mxu1 %v9404_v24  ;;  %v9406_v30 = vpack.c.bf16 %v9387_v26, %v9386_v7  ;;  %v9822_v10 = vld [vmem:[#allocation6 + $0x3] sm:$0xff]  ;;  %v20997_v1 = vld [vmem:[#allocation6 + $0x13] sm:$0xff]  ;;  %11358 = vmatpush3.bf16.msra.mxu0 %v14729_v38 }
 0xb9f   : > { %v9398_v27 = vsel %vm7831_vm6, %v9394_v31, %v14535_v11  ;;  %v9399_v37 = vsel %vm7831_vm6, %v9395_v23, %v14536_v44  ;;  %v9812_v2 = vld [vmem:[#allocation6 + $0x1] sm:$0xff]  ;;  %v14552_v13 = vpack.i.bf16 %v20997_v1, %v9822_v10  ;;  %v21000_v15 = vld [vmem:[#allocation6 + $0x11] sm:$0xff]  ;;  %11320 = vmatpush3.bf16.msra.mxu1 %v14716_v14  ;;  %11359 = vmatprep.subr.bf16.mxu0 %v14731_v9  ;;  %vm9799_vm6 = vcmask 519168  }
 0xba0   : > { %v9407_v12 = vpack.c.bf16 %v9399_v37, %v9398_v27  ;;  %v14557_v57 = vpack.i.bf16 %v21000_v15, %v9812_v2  ;;  %11321 = vmatprep.subr.bf16.mxu1 %v14718_v5  ;;  %v9817_v26 = vld [vmem:[#allocation6 + $0x2] sm:$0xff]  ;;  %v21104_v27 = vld [vmem:[#allocation6 + $0x12] sm:$0xff] }
 0xba1   : > { %14553 = vrot.lane.b32.xlu0 %v14552_v13, %s21664_s15  ;;  %v14744_v5 = vld [vmem:[%s21349_s5 + $0x178] sm:$0xff]  }
 0xba2   : > { %9760 = vmatprep.mubr.bf16.mxu0 %v9407_v12  ;;  %14558 = vrot.lane.b32.xlu1 %v14557_v57, %s21664_s15  ;;  %v14747_v38 = vld [vmem:[%s21349_s5 + $0x1f8] sm:$0xff]  }
 0xba3   : > { %9761 = vmatmul.mubr.bf16.gmra.mxu0 %v9406_v30  ;;  %11322 = vmatpush3.bf16.msra.mxu1 %v14720_v56 }
 0xba4   : > { %11323 = vmatprep.subr.bf16.mxu1 %v14722_v25  ;;  %11360 = vmatpush3.bf16.msra.mxu0 %v14733_v42 }
 0xba5   : > { %11361 = vmatprep.subr.bf16.mxu0 %v14735_v36 }
 0xba7   : > { %11324 = vmatpush3.bf16.msra.mxu1 %v14724_v52 }
 0xba8   : > { %11325 = vmatprep.subr.bf16.mxu1 %v14726_v59  ;;  %11362 = vmatpush3.bf16.msra.mxu0 %v14737_v28  ;;  %v14746_v59 = vld [vmem:[%s21349_s5 + $0x170] sm:$0xff]  }
 0xba9   : > { %11363 = vmatprep.subr.bf16.mxu0 %v14739_v34 }
 0xbab   : > { %11326 = vmatpush3.bf16.msra.mxu1 %v14728_v43 }
 0xbac   : > { %11327 = vmatprep.subr.bf16.mxu1 %v14730_v21  ;;  %11364 = vmatpush3.bf16.msra.mxu0 %v14741_v0  ;;  %v14748_v21 = vld [vmem:[%s21349_s5 + $0x130] sm:$0xff]  }
 0xbad   : > { %11365 = vmatprep.subr.bf16.mxu0 %v14742_v58  ;;  %v9887_v58 = vld [vmem:[#allocation6 + $0x73] sm:$0xff] }
 0xbaf   : > { %11328 = vmatpush3.bf16.msra.mxu1 %v14732_v48 }
 0xbb0   : > { %11329 = vmatprep.subr.bf16.mxu1 %v14734_v18  ;;  %11366 = vmatpush3.bf16.msra.mxu0 %v14743_v35 }
 0xbb1   : > { %11419 = vmatprep.subr.bf16.mxu0 %v14747_v38 }
 0xbb3   : > { %11330 = vmatpush3.bf16.msra.mxu1 %v14736_v40  ;;  %v14752_v40 = vld [vmem:[%s21349_s5 + $0x128] sm:$0xff]  }
 0xbb4   : > { %11331 = vmatprep.subr.bf16.mxu1 %v14738_v4 }
 0xbb7   : > { %11332 = vmatpush3.bf16.msra.mxu1 %v14740_v54 }
 0xbb8   : > { %11385 = vmatprep.subr.bf16.mxu1 %v14744_v5 }
 0xc13   : > { %v14554_v17 = vpop.permute.xlu0 %14553 }
 0xc14   : > { %v14556_v61 = vunpack.i.h.bf16 %v14554_v17  ;;  %v14555_v24 = vunpack.i.l.bf16 %v14554_v17  ;;  %v14559_v44 = vpop.permute.xlu1 %14558  ;;  %v14760_v17 = vld [vmem:[%s21349_s5 + $0x118] sm:$0xff]  }
 0xc15   : > { %v14561_v23 = vunpack.i.h.bf16 %v14559_v44  ;;  %v14560_v7 = vunpack.i.l.bf16 %v14559_v44 }
 0xc16   : > { %v10053_v30 = vsel %vm5331_vm5, %v9817_v26, %v14555_v24  ;;  %v10054_v13 = vsel %vm5331_vm5, %v21104_v27, %v14556_v61  ;;  %v14762_v61 = vld [vmem:[%s21349_s5 + $0x150] sm:$0xff]  }
 0xc17   : > { %v10049_v10 = vsel %vm5331_vm5, %v21101_v33, %v14561_v23  ;;  %v10048_v2 = vsel %vm5331_vm5, %v9807_v39, %v14560_v7  ;;  %v10089_v50 = vpack.c.bf16 %v10054_v13, %v10053_v30  ;;  %v14764_v24 = vld [vmem:[%s21349_s5 + $0x110] sm:$0xff]   ;;  %v14766_v23 = vld [vmem:[%s21349_s5 + $0x148] sm:$0xff]  }
 0xc18   : > { %v10088_v8 = vpack.c.bf16 %v10049_v10, %v10048_v2  ;;  %v14768_v7 = vld [vmem:[%s21349_s5 + $0x108] sm:$0xff]   ;;  %v14770_v10 = vld [vmem:[%s21349_s5 + $0x140] sm:$0xff]  }
 0xc19   : > { %10663 = vmatprep.mubr.bf16.mxu1 %v10089_v50  ;;  %v14772_v2 = vld [vmem:[%s21349_s5 + $0x100] sm:$0xff]   ;;  %v9877_v50 = vld [vmem:[#allocation6 + $0x71] sm:$0xff] }
 0xc1a   : > { %10664 = vmatmul.mubr.bf16.vlgmr.msra.gmra.mxu1 %v10088_v8  ;;  %v9886_v8 = vld [vmem:[#allocation6 + $0x63] sm:$0xff]  ;;  %v14647_v5 = vpack.i.bf16 %v9877_v50, %v9887_v58  ;;  %v14771_v50 = vld [vmem:[%s21349_s5 + $0x1c8] sm:$0xff]  }
 0xc1b   : > { %11386 = vmatpush3.bf16.msra.mxu1 %v14745_v20 }
 0xc1c   : > { %11387 = vmatprep.subr.bf16.mxu1 %v14746_v59 }
 0xc1f   : > { %11388 = vmatpush3.bf16.msra.mxu1 %v14748_v21 }
 0xc47   : > { %v11277_v22 = vpop.f32.mrf.mxu1 }
 0xc49   : > { %v11278_v45 = vpop.f32.mrf.mxu1 }
 0xc4a   : > { %v11279_v49 = vadd.f32 %v11278_v45, %v11277_v22  ;;  %v14754_v22 = vld [vmem:[%s21349_s5 + $0x160] sm:$0xff]  }
 0xc4b   : > { %v11280_v55 = vpop.f32.mrf.mxu1 }
 0xc4c   : > { %v9706_v32 = vadd.f32 %v11279_v49, %v21098_v51 }
 0xc4d   : > { %v11281_v29 = vpop.f32.mrf.mxu1 }
 0xc4e   : > { %v11282_v60 = vadd.f32 %v11281_v29, %v11280_v55  ;;  %v14756_v29 = vld [vmem:[%s21349_s5 + $0x120] sm:$0xff]  }
 0xc4f   : > { %v11305_v41 = vpop.f32.mrf.mxu0 }
 0xc50   : > { %v9709_v11 = vadd.f32 %v11282_v60, %v21098_v51 }
 0xc51   : > { %v11306_v53 = vpop.f32.mrf.mxu0 }
 0xc52   : > { %v11307_v62 = vadd.f32 %v11306_v53, %v11305_v41 }
 0xc53   : > { %v11308_v16 = vpop.f32.mrf.mxu0 }
 0xc54   : > { %v9755_v47 = vadd.f32 %v11307_v62, %v9706_v32  ;;  %v14758_v32 = vld [vmem:[%s21349_s5 + $0x158] sm:$0xff]  }
 0xc55   : > { %v11309_v31 = vpop.f32.mrf.mxu0 }
 0xc56   : > { %vm9769_vm12 = vcmp.ge.f32.partialorder %v9755_v47, 0.0  ;;  %v9773_v37 = vmul.f32 0.2, %v9755_v47  ;;  %v11310_v12 = vadd.f32 %v11309_v31, %v11308_v16 }
 0xc58   : > { %v9777_v57 = vsel %vm9769_vm12, %v9755_v47, %v9773_v37  ;;  %v9758_v3 = vadd.f32 %v11310_v12, %v9709_v11 }
 0xc59   : > { %9800 = vst.msk [vmem:[#allocation6 + $0x22] sm:$0xf] %vm9799_vm6, %v9777_v57 }
 0xc5a   : > { %vm9770_vm2 = vcmp.ge.f32.partialorder %v9758_v3, 0.0  ;;  %v9774_v14 = vmul.f32 0.2, %v9758_v3 }
 0xc5c   : > { %v9778_v6 = vsel %vm9770_vm2, %v9758_v3, %v9774_v14  ;;  %v9876_v3 = vld [vmem:[#allocation6 + $0x61] sm:$0xff] }
 0xc5d   : > { %9802 = vst.msk [vmem:[#allocation6 + $0x32] sm:$0xf] %vm9799_vm6, %v9778_v6  ;;  %v14642_v6 = vpack.i.bf16 %v9876_v3, %v9886_v8 }
 0xc5e   : > { %v11283_v46 = vpop.f32.mrf.mxu1 }
 0xc60   : > { %v11284_v56 = vpop.f32.mrf.mxu1  ;;  %v9844_v25 = vld [vmem:[#allocation6 + $0x23] sm:$0xff] }
 0xc61   : > { %v9834_v19 = vld [vmem:[#allocation6 + $0x21] sm:$0xff]  ;;  %v14562_v63 = vpack.i.bf16 %v9844_v25, %v20997_v1  ;;  %v11285_v9 = vadd.f32 %v11284_v56, %v11283_v46  ;;  %v14750_v1 = vld [vmem:[%s21349_s5 + $0x168] sm:$0xff]  }
 0xc62   : > { %v14567_v52 = vpack.i.bf16 %v9834_v19, %v21000_v15  ;;  %v11286_v43 = vpop.f32.mrf.mxu1  ;;  %11389 = vmatprep.subr.bf16.mxu1 %v14750_v1  ;;  %v21197_v59 = vld [vmem:[#allocation6 + $0x22] sm:$0xff] }
 0xc63   : > { %14563 = vrot.lane.b32.xlu0 %v14562_v63, %s21664_s15  ;;  %v11311_v15 = vpop.f32.mrf.mxu0  ;;  %v9714_v4 = vadd.f32 %v11285_v9, %v21098_v51  ;;  %11390 = vmatpush3.bf16.msra.mxu1 %v14752_v40 }
 0xc64   : > { %14568 = vrot.lane.b32.xlu1 %v14567_v52, %s21664_s15  ;;  %v11287_v42 = vpop.f32.mrf.mxu1  ;;  %v9825_v36 = vld [vmem:[#allocation6 + $0x33] sm:$0xff]  ;;  %11391 = vmatprep.subr.bf16.mxu1 %v14754_v22  ;;  %v21195_v52 = vld [vmem:[#allocation6 + $0x20] sm:$0xff] }
 0xc65   : > { %v9815_v48 = vld [vmem:[#allocation6 + $0x31] sm:$0xff]  ;;  %v11312_v18 = vpop.f32.mrf.mxu0  ;;  %v14572_v28 = vpack.i.bf16 %v9825_v36, %v9844_v25  ;;  %v11288_v0 = vadd.f32 %v11287_v42, %v11286_v43 }
 0xc66   : > { %v14577_v34 = vpack.i.bf16 %v9815_v48, %v9834_v19  ;;  %v11313_v54 = vadd.f32 %v11312_v18, %v11311_v15 }
 0xc67   : > { %14573 = vrot.lane.b32.xlu0 %v14572_v28, %s21664_s15  ;;  %v11314_v45 = vpop.f32.mrf.mxu0  ;;  %v9717_v41 = vadd.f32 %v11288_v0, %v21098_v51  ;;  %11392 = vmatpush3.bf16.msra.mxu1 %v14756_v29  ;;  %v14753_v29 = vld [vmem:[%s21349_s5 + $0x1b0] sm:$0xff]  }
 0xc68   : > { %14578 = vrot.lane.b32.xlu1 %v14577_v34, %s21664_s15  ;;  %v9763_v55 = vadd.f32 %v11313_v54, %v9714_v4  ;;  %11393 = vmatprep.subr.bf16.mxu1 %v14758_v32  ;;  %v21215_v4 = vld [vmem:[#allocation6 + $0x30] sm:$0xff]  ;;  %v14761_v32 = vld [vmem:[%s21349_s5 + $0x1a0] sm:$0xff]  }
 0xc69   : > { %v11315_v49 = vpop.f32.mrf.mxu0 }
 0xc6a   : > { %vm9771_vm8 = vcmp.ge.f32.partialorder %v9763_v55, 0.0  ;;  %v9775_v53 = vmul.f32 0.2, %v9763_v55  ;;  %v11316_v60 = vadd.f32 %v11315_v49, %v11314_v45 }
 0xc6b   : > { %11394 = vmatpush3.bf16.msra.mxu1 %v14760_v17 }
 0xc6c   : > { %v9779_v62 = vsel %vm9771_vm8, %v9763_v55, %v9775_v53  ;;  %v9766_v16 = vadd.f32 %v11316_v60, %v9717_v41  ;;  %11395 = vmatprep.subr.bf16.mxu1 %v14762_v61  ;;  %v14755_v41 = vld [vmem:[%s21349_s5 + $0x1e8] sm:$0xff]   ;;  %v14759_v60 = vld [vmem:[%s21349_s5 + $0x1e0] sm:$0xff]  }
 0xc6d   : > { %9804 = vst.msk [vmem:[#allocation6 + $0x42] sm:$0xf] %vm9799_vm6, %v9779_v62  ;;  %v14757_v53 = vld [vmem:[%s21349_s5 + $0x1a8] sm:$0xff]   ;;  %v14763_v62 = vld [vmem:[%s21349_s5 + $0x1d8] sm:$0xff]  }
 0xc6e   : > { %vm9772_vm11 = vcmp.ge.f32.partialorder %v9766_v16, 0.0  ;;  %v9776_v47 = vmul.f32 0.2, %v9766_v16 }
 0xc6f   : > { %11396 = vmatpush3.bf16.msra.mxu1 %v14764_v24 }
 0xc70   : > { %v9780_v51 = vsel %vm9772_vm11, %v9766_v16, %v9776_v47  ;;  %11397 = vmatprep.subr.bf16.mxu1 %v14766_v23  ;;  %v14765_v47 = vld [vmem:[%s21349_s5 + $0x198] sm:$0xff]  }
 0xc71   : > { %9806 = vst.msk [vmem:[#allocation6 + $0x52] sm:$0xf] %vm9799_vm6, %v9780_v51 }
 0xc73   : > { %11398 = vmatpush3.bf16.msra.mxu1 %v14768_v7 }
 0xc74   : > { %v9846_v39 = vld [vmem:[#allocation6 + $0x43] sm:$0xff]  ;;  %11399 = vmatprep.subr.bf16.mxu1 %v14770_v10 }
 0xc75   : > { %v9836_v44 = vld [vmem:[#allocation6 + $0x41] sm:$0xff]  ;;  %v14582_v11 = vpack.i.bf16 %v9846_v39, %v9825_v36 }
 0xc76   : > { %v14587_v31 = vpack.i.bf16 %v9836_v44, %v9815_v48  ;;  %v14592_v30 = vpack.i.bf16 %v9836_v44, %v9846_v39  ;;  %v14749_v48 = vld [vmem:[%s21349_s5 + $0x1b8] sm:$0xff]  }
 0xc77   : > { %14583 = vrot.lane.b32.xlu0 %v14582_v11, %s21664_s15  ;;  %11400 = vmatpush3.bf16.msra.mxu1 %v14772_v2 }
 0xc78   : > { %14588 = vrot.lane.b32.xlu1 %v14587_v31, %s21664_s15  ;;  %v9837_v26 = vld [vmem:[#allocation6 + $0x51] sm:$0xff] }
 0xc79   : > { %v9847_v37 = vld [vmem:[#allocation6 + $0x53] sm:$0xff]  ;;  %v14627_v13 = vpack.i.bf16 %v9837_v26, %v9836_v44  ;;  %v14637_v35 = vpack.i.bf16 %v9876_v3, %v9837_v26 }
 0xc7a   : > { %v14597_v12 = vpack.i.bf16 %v9837_v26, %v9847_v37  ;;  %v14622_v57 = vpack.i.bf16 %v9847_v37, %v9846_v39  ;;  %v14632_v14 = vpack.i.bf16 %v9886_v8, %v9847_v37  ;;  %v14767_v44 = vld [vmem:[%s21349_s5 + $0x1d0] sm:$0xff]  }
 0xc7b   : > { %14593 = vrot.lane.b32.xlu0 %v14592_v30, %s21664_s15 }
 0xc7c   : > { %14598 = vrot.lane.b32.xlu1 %v14597_v12, %s21664_s15 }
 0xc7f   : > { %14603 = vrot.lane.b32.xlu0 %v14572_v28, %s21664_s15 }
 0xc80   : > { %14608 = vrot.lane.b32.xlu1 %v14577_v34, %s21664_s15 }
 0xc83   : > { %14613 = vrot.lane.b32.xlu0 %v14582_v11, %s21664_s15  ;;  %v21249_v11 = vld [vmem:[#allocation6 + $0x42] sm:$0xff] }
 0xc84   : > { %14618 = vrot.lane.b32.xlu1 %v14587_v31, %s21664_s15  ;;  %v21251_v31 = vld [vmem:[#allocation6 + $0x40] sm:$0xff] }
 0xc87   : > { %14623 = vrot.lane.b32.xlu0 %v14622_v57, %s21664_s15 }
 0xc88   : > { %14628 = vrot.lane.b32.xlu1 %v14627_v13, %s21664_s15  ;;  %v14769_v13 = vld [vmem:[%s21349_s5 + $0x190] sm:$0xff]  }
 0xc8b   : > { %14633 = vrot.lane.b32.xlu0 %v14632_v14, %s21664_s15 }
 0xc8c   : > { %14638 = vrot.lane.b32.xlu1 %v14637_v35, %s21664_s15  ;;  %v21267_v35 = vld [vmem:[#allocation6 + $0x52] sm:$0xff] }
 0xc8f   : > { %14643 = vrot.lane.b32.xlu0 %v14642_v6, %s21664_s15 }
 0xc90   : > { %14648 = vrot.lane.b32.xlu1 %v14647_v5, %s21664_s15 }
 0xcd5   : > { %v14564_v20 = vpop.permute.xlu0 %14563 }
 0xcd6   : > { %v14569_v46 = vpop.permute.xlu1 %14568  ;;  %v14566_v56 = vunpack.i.h.bf16 %v14564_v20  ;;  %v14565_v25 = vunpack.i.l.bf16 %v14564_v20 }
 0xcd7   : > { %v14571_v19 = vunpack.i.h.bf16 %v14569_v46  ;;  %v14570_v63 = vunpack.i.l.bf16 %v14569_v46 }
 0xcd8   : > { %v10063_v43 = vsel %vm5331_vm5, %v21104_v27, %v14565_v25  ;;  %v10064_v21 = vsel %vm5331_vm5, %v21197_v59, %v14566_v56  ;;  %v21213_v27 = vld [vmem:[#allocation6 + $0x32] sm:$0xff] }
 0xcd9   : > { %v10059_v38 = vsel %vm5331_vm5, %v21195_v52, %v14571_v19  ;;  %v10058_v9 = vsel %vm5331_vm5, %v21101_v33, %v14570_v63  ;;  %v14574_v15 = vpop.permute.xlu0 %14573  ;;  %v10091_v36 = vpack.c.bf16 %v10064_v21, %v10063_v43  ;;  %v14751_v33 = vld [vmem:[%s21349_s5 + $0x1f0] sm:$0xff]   ;;  %v14773_v63 = vld [vmem:[%s21349_s5 + $0x188] sm:$0xff]   ;;  %v14774_v21 = vld [vmem:[%s21349_s5 + $0x1c0] sm:$0xff]  }
 0xcda   : > { %v10090_v1 = vpack.c.bf16 %v10059_v38, %v10058_v9  ;;  %v14579_v42 = vpop.permute.xlu1 %14578  ;;  %v14576_v18 = vunpack.i.h.bf16 %v14574_v15  ;;  %v14575_v28 = vunpack.i.l.bf16 %v14574_v15  ;;  %v21278_v43 = vld [vmem:[#allocation6 + $0x50] sm:$0xff] }
 0xcdb   : > { %v14581_v34 = vunpack.i.h.bf16 %v14579_v42  ;;  %v14580_v40 = vunpack.i.l.bf16 %v14579_v42  ;;  %10719 = vmatprep.mubr.bf16.mxu0 %v10091_v36 }
 0xcdc   : > { %10720 = vmatmul.mubr.bf16.vlgmr.msra.gmra.mxu0 %v10090_v1  ;;  %v10055_v0 = vsel %vm5331_vm5, %v21197_v59, %v14575_v28  ;;  %v10056_v54 = vsel %vm5331_vm5, %v21213_v27, %v14576_v18 }
 0xcdd   : > { %v10050_v22 = vsel %vm5331_vm5, %v21195_v52, %v14580_v40  ;;  %v10051_v45 = vsel %vm5331_vm5, %v21215_v4, %v14581_v34  ;;  %v10097_v55 = vpack.c.bf16 %v10056_v54, %v10055_v0  ;;  %11420 = vmatpush3.bf16.msra.mxu0 %v14749_v48  ;;  %v14775_v40 = vld [vmem:[%s21349_s5 + $0x180] sm:$0xff]  }
 0xcde   : > { %v10096_v49 = vpack.c.bf16 %v10051_v45, %v10050_v22  ;;  %11421 = vmatprep.subr.bf16.mxu0 %v14751_v33 }
 0xcdf   : > { %10671 = vmatprep.mubr.bf16.mxu1 %v10097_v55 }
 0xce0   : > { %10672 = vmatmul.mubr.bf16.gmra.mxu1 %v10096_v49 }
 0xce1   : > { %11422 = vmatpush3.bf16.msra.mxu0 %v14753_v29 }
 0xce2   : > { %11423 = vmatprep.subr.bf16.mxu0 %v14755_v41 }
 0xce5   : > { %11424 = vmatpush3.bf16.msra.mxu0 %v14757_v53 }
 0xce6   : > { %11425 = vmatprep.subr.bf16.mxu0 %v14759_v60 }
 0xce9   : > { %v14584_v16 = vpop.permute.xlu0 %14583  ;;  %11426 = vmatpush3.bf16.msra.mxu0 %v14761_v32 }
 0xcea   : > { %v14589_v17 = vpop.permute.xlu1 %14588  ;;  %v14586_v51 = vunpack.i.h.bf16 %v14584_v16  ;;  %v14585_v61 = vunpack.i.l.bf16 %v14584_v16  ;;  %11427 = vmatprep.subr.bf16.mxu0 %v14763_v62 }
 0xceb   : > { %v14591_v24 = vunpack.i.h.bf16 %v14589_v17  ;;  %v14590_v39 = vunpack.i.l.bf16 %v14589_v17 }
 0xcec   : > { %v10065_v23 = vsel %vm5331_vm5, %v21213_v27, %v14585_v61  ;;  %v10066_v7 = vsel %vm5331_vm5, %v21249_v11, %v14586_v51 }
 0xced   : > { %v10060_v26 = vsel %vm5331_vm5, %v21215_v4, %v14590_v39  ;;  %v10061_v37 = vsel %vm5331_vm5, %v21251_v31, %v14591_v24  ;;  %v14594_v30 = vpop.permute.xlu0 %14593  ;;  %v10099_v10 = vpack.c.bf16 %v10066_v7, %v10065_v23  ;;  %11428 = vmatpush3.bf16.msra.mxu0 %v14765_v47  ;;  %v9881_v23 = vld [vmem:[#allocation6 + $0x62] sm:$0xff] }
 0xcee   : > { %v14599_v12 = vpop.permute.xlu1 %14598  ;;  %v10098_v2 = vpack.c.bf16 %v10061_v37, %v10060_v26  ;;  %v14596_v3 = vunpack.i.h.bf16 %v14594_v30  ;;  %v14595_v8 = vunpack.i.l.bf16 %v14594_v30  ;;  %11429 = vmatprep.subr.bf16.mxu0 %v14767_v44 }
 0xcef   : > { %v14600_v57 = vunpack.i.l.bf16 %v14599_v12  ;;  %v14601_v58 = vunpack.i.h.bf16 %v14599_v12  ;;  %10727 = vmatprep.mubr.bf16.mxu0 %v10099_v10 }
 0xcf0   : > { %10728 = vmatmul.mubr.bf16.gmra.mxu0 %v10098_v2  ;;  %v10057_v14 = vsel %vm5331_vm5, %v21249_v11, %v14595_v8  ;;  %v10052_v5 = vsel %vm5331_vm5, %v21251_v31, %v14596_v3 }
 0xcf1   : > { %v10067_v6 = vsel %vm5331_vm5, %v21267_v35, %v14600_v57  ;;  %v14604_v46 = vpop.permute.xlu0 %14603  ;;  %v10105_v56 = vpack.c.bf16 %v10057_v14, %v10057_v14  ;;  %v10104_v19 = vpack.c.bf16 %v10052_v5, %v10052_v5  ;;  %11430 = vmatpush3.bf16.msra.mxu0 %v14769_v13  ;;  %v10062_v42 = vsel %vm5331_vm5, %v21278_v43, %v14601_v58  ;;  %v9871_v13 = vld [vmem:[#allocation6 + $0x60] sm:$0xff] }
 0xcf2   : > { %v14609_v20 = vpop.permute.xlu1 %14608  ;;  %v10107_v25 = vpack.c.bf16 %v10067_v6, %v10067_v6  ;;  %v14606_v38 = vunpack.i.h.bf16 %v14604_v46  ;;  %v14605_v9 = vunpack.i.l.bf16 %v14604_v46  ;;  %11431 = vmatprep.subr.bf16.mxu0 %v14771_v50  ;;  %v10106_v54 = vpack.c.bf16 %v10062_v42, %v10062_v42  ;;  %v9882_v50 = vld [vmem:[#allocation6 + $0x72] sm:$0xff] }
 0xcf3   : > { %v14611_v1 = vunpack.i.h.bf16 %v14609_v20  ;;  %v14610_v15 = vunpack.i.l.bf16 %v14609_v20  ;;  %10679 = vmatprep.mubr.bf16.mxu1 %v10105_v56 }
 0xcf4   : > { %10735 = vmatprep.mubr.bf16.mxu0 %v10107_v25  ;;  %10680 = vmatmul.mubr.bf16.gmra.mxu1 %v10104_v19  ;;  %v10073_v36 = vsel %vm5331_vm5, %v21197_v59, %v14605_v9  ;;  %v10074_v48 = vsel %vm5331_vm5, %v21213_v27, %v14606_v38  ;;  %v9872_v9 = vld [vmem:[#allocation6 + $0x70] sm:$0xff] }
 0xcf5   : > { %v14614_v28 = vpop.permute.xlu0 %14613  ;;  %v10093_v34 = vpack.c.bf16 %v10074_v48, %v10073_v36  ;;  %11432 = vmatpush3.bf16.msra.mxu0 %v14773_v63  ;;  %v10069_v22 = vsel %vm5331_vm5, %v21215_v4, %v14611_v1  ;;  %v10068_v59 = vsel %vm5331_vm5, %v21195_v52, %v14610_v15  ;;  %v11333_v15 = vpop.f32.mrf.mxu1 }
 0xcf6   : > { %v14619_v18 = vpop.permute.xlu1 %14618  ;;  %v14616_v33 = vunpack.i.h.bf16 %v14614_v28  ;;  %v14615_v0 = vunpack.i.l.bf16 %v14614_v28  ;;  %11433 = vmatprep.subr.bf16.mxu0 %v14774_v21  ;;  %v10092_v32 = vpack.c.bf16 %v10069_v22, %v10068_v59 }
 0xcf7   : > { %v14621_v45 = vunpack.i.h.bf16 %v14619_v18  ;;  %v14620_v55 = vunpack.i.l.bf16 %v14619_v18  ;;  %10775 = vmatprep.mubr.bf16.mxu1 %v10093_v34  ;;  %v11334_v42 = vpop.f32.mrf.mxu1 }
 0xcf8   : > { %10736 = vmatmul.mubr.bf16.gmra.mxu0 %v10106_v54  ;;  %v10083_v49 = vsel %vm5331_vm5, %v21213_v27, %v14615_v0  ;;  %v10084_v29 = vsel %vm5331_vm5, %v21249_v11, %v14616_v33 }
 0xcf9   : > { %v14624_v53 = vpop.permute.xlu0 %14623  ;;  %v10095_v60 = vpack.c.bf16 %v10084_v29, %v10083_v49  ;;  %11434 = vmatpush3.bf16.msra.mxu0 %v14775_v40  ;;  %v10079_v52 = vsel %vm5331_vm5, %v21251_v31, %v14621_v45  ;;  %v10078_v17 = vsel %vm5331_vm5, %v21215_v4, %v14620_v55  ;;  %v11336_v36 = vpop.f32.mrf.mxu1 }
 0xcfa   : > { %v14629_v41 = vpop.permute.xlu1 %14628  ;;  %v14626_v62 = vunpack.i.h.bf16 %v14624_v53  ;;  %v14625_v16 = vunpack.i.l.bf16 %v14624_v53  ;;  %v10094_v7 = vpack.c.bf16 %v10079_v52, %v10078_v17 }
 0xcfb   : > { %v14631_v47 = vunpack.i.h.bf16 %v14629_v41  ;;  %v14630_v51 = vunpack.i.l.bf16 %v14629_v41  ;;  %10831 = vmatprep.mubr.bf16.mxu0 %v10095_v60  ;;  %v11337_v18 = vpop.f32.mrf.mxu1 }
 0xcfc   : > { %10776 = vmatmul.mubr.bf16.vlgmr.msra.gmra.mxu1 %v10092_v32  ;;  %v10075_v27 = vsel %vm5331_vm5, %v21249_v11, %v14625_v16  ;;  %v10076_v61 = vsel %vm5331_vm5, %v21267_v35, %v14626_v62  ;;  %v11335_v32 = vadd.f32 %v11334_v42, %v11333_v15  ;;  %v11034_v62 = vld [vmem:[%s21354_s10] ss:$0 sm:$0xff] }
 0xcfd   : > { %v14634_v39 = vpop.permute.xlu0 %14633  ;;  %v10101_v44 = vpack.c.bf16 %v10076_v61, %v10075_v27  ;;  %v10070_v4 = vsel %vm5331_vm5, %v21251_v31, %v14630_v51  ;;  %v10071_v10 = vsel %vm5331_vm5, %v21278_v43, %v14631_v47  ;;  %v11338_v61 = vadd.f32 %v11337_v18, %v11336_v36 }
 0xcfe   : > { %v14639_v24 = vpop.permute.xlu1 %14638  ;;  %v14636_v26 = vunpack.i.h.bf16 %v14634_v39  ;;  %v14635_v37 = vunpack.i.l.bf16 %v14634_v39  ;;  %v10100_v58 = vpack.c.bf16 %v10071_v10, %v10070_v4  ;;  %v10666_v51 = vadd.f32 %v11335_v32, %v11034_v62 }
 0xcff   : > { %v14641_v12 = vunpack.i.h.bf16 %v14639_v24  ;;  %v14640_v30 = vunpack.i.l.bf16 %v14639_v24  ;;  %10783 = vmatprep.mubr.bf16.mxu1 %v10101_v44 }
 0xd00   : > { %10832 = vmatmul.mubr.bf16.vlgmr.msra.gmra.mxu0 %v10094_v7  ;;  %v10085_v11 = vsel %vm5331_vm5, %v21267_v35, %v14635_v37  ;;  %v10086_v2 = vsel %vm5331_vm5, %v9881_v23, %v14636_v26 }
 0xd01   : > { %v10103_v57 = vpack.c.bf16 %v10086_v2, %v10085_v11  ;;  %v14644_v3 = vpop.permute.xlu0 %14643  ;;  %v10080_v31 = vsel %vm5331_vm5, %v21278_v43, %v14640_v30  ;;  %v10081_v20 = vsel %vm5331_vm5, %v9871_v13, %v14641_v12  ;;  %v10669_v12 = vadd.f32 %v11338_v61, %v11034_v62 }
 0xd02   : > { %v14649_v8 = vpop.permute.xlu1 %14648  ;;  %v14646_v14 = vunpack.i.h.bf16 %v14644_v3  ;;  %v14645_v6 = vunpack.i.l.bf16 %v14644_v3  ;;  %v10102_v38 = vpack.c.bf16 %v10081_v20, %v10080_v31 }
 0xd03   : > { %v14650_v5 = vunpack.i.l.bf16 %v14649_v8  ;;  %10839 = vmatprep.mubr.bf16.mxu0 %v10103_v57  ;;  %v14651_v56 = vunpack.i.h.bf16 %v14649_v8 }
 0xd04   : > { %10784 = vmatmul.mubr.bf16.gmra.mxu1 %v10100_v58  ;;  %v10077_v35 = vsel %vm5331_vm5, %v9881_v23, %v14645_v6  ;;  %v10072_v19 = vsel %vm5331_vm5, %v9871_v13, %v14646_v14 }
 0xd05   : > { %v10087_v46 = vsel %vm5331_vm5, %v9882_v50, %v14650_v5  ;;  %v10109_v25 = vpack.c.bf16 %v10077_v35, %v10077_v35  ;;  %v10108_v21 = vpack.c.bf16 %v10072_v19, %v10072_v19  ;;  %v10082_v43 = vsel %vm5331_vm5, %v9872_v9, %v14651_v56 }
 0xd06   : > { %v10111_v63 = vpack.c.bf16 %v10087_v46, %v10087_v46  ;;  %v10110_v1 = vpack.c.bf16 %v10082_v43, %v10082_v43 }
 0xd07   : > { %10791 = vmatprep.mubr.bf16.mxu1 %v10109_v25 }
 0xd08   : > { %10840 = vmatmul.mubr.bf16.gmra.mxu0 %v10102_v38 }
 0xd09   : > { %10847 = vmatprep.mubr.bf16.mxu0 %v10111_v63 }
 0xd0c   : > { %10792 = vmatmul.mubr.bf16.gmra.mxu1 %v10108_v21 }
 0xd10   : > { %10848 = vmatmul.mubr.bf16.gmra.mxu0 %v10110_v1 }
 0xd9c   : > { %v11367_v48 = vpop.f32.mrf.mxu0 }
 0xd9e   : > { %v11368_v28 = vpop.f32.mrf.mxu0 }
 0xd9f   : > { %v11369_v27 = vadd.f32 %v11368_v28, %v11367_v48 }
 0xda0   : > { %v11339_v34 = vpop.f32.mrf.mxu1  ;;  %v11370_v40 = vpop.f32.mrf.mxu0 }
 0xda1   : > { %v10722_v26 = vadd.f32 %v11369_v27, %v10666_v51 }
 0xda2   : > { %v11340_v33 = vpop.f32.mrf.mxu1  ;;  %v11371_v0 = vpop.f32.mrf.mxu0 }
 0xda3   : > { %v11372_v37 = vadd.f32 %v11371_v0, %v11370_v40  ;;  %v11341_v10 = vadd.f32 %v11340_v33, %v11339_v34 }
 0xda4   : > { %v11342_v54 = vpop.f32.mrf.mxu1 }
 0xda5   : > { %v10725_v8 = vadd.f32 %v11372_v37, %v10669_v12  ;;  %v10674_v31 = vadd.f32 %v11341_v10, %v11034_v62 }
 0xda6   : > { %v11343_v59 = vpop.f32.mrf.mxu1 }
 0xda7   : > { %v11344_v14 = vadd.f32 %v11343_v59, %v11342_v54 }
 0xda9   : > { %v10677_v9 = vadd.f32 %v11344_v14, %v11034_v62 }
 0xdb0   : > { %v11373_v22 = vpop.f32.mrf.mxu0 }
 0xdb2   : > { %v11374_v45 = vpop.f32.mrf.mxu0 }
 0xdb3   : > { %v11375_v50 = vadd.f32 %v11374_v45, %v11373_v22 }
 0xdb4   : > { %v11345_v55 = vpop.f32.mrf.mxu1  ;;  %v11376_v49 = vpop.f32.mrf.mxu0 }
 0xdb5   : > { %v10730_v19 = vadd.f32 %v11375_v50, %v10674_v31 }
 0xdb6   : > { %v11346_v29 = vpop.f32.mrf.mxu1  ;;  %v11377_v41 = vpop.f32.mrf.mxu0 }
 0xdb7   : > { %v11378_v63 = vadd.f32 %v11377_v41, %v11376_v49  ;;  %v11347_v1 = vadd.f32 %v11346_v29, %v11345_v55 }
 0xdb8   : > { %v11348_v53 = vpop.f32.mrf.mxu1  ;;  %v11379_v60 = vpop.f32.mrf.mxu0 }
 0xdb9   : > { %v10733_v28 = vadd.f32 %v11378_v63, %v10677_v9  ;;  %v10682_v54 = vadd.f32 %v11347_v1, %v11034_v62 }
 0xdba   : > { %v11349_v16 = vpop.f32.mrf.mxu1  ;;  %v11380_v52 = vpop.f32.mrf.mxu0 }
 0xdbb   : > { %v11381_v34 = vadd.f32 %v11380_v52, %v11379_v60 }
 0xdbc   : > { %v11382_v17 = vpop.f32.mrf.mxu0  ;;  %v11401_v47 = vpop.f32.mrf.mxu1 }
 0xdbd   : > { %v10738_v29 = vadd.f32 %v11381_v34, %v10682_v54 }
 0xdbe   : > { %v11383_v24 = vpop.f32.mrf.mxu0  ;;  %v11402_v39 = vpop.f32.mrf.mxu1 }
 0xdbf   : > { %v11403_v44 = vadd.f32 %v11402_v39, %v11401_v47 }
 0xdc0   : > { %v11404_v23 = vpop.f32.mrf.mxu1  ;;  %v11435_v7 = vpop.f32.mrf.mxu0 }
 0xdc1   : > { %v10778_v11 = vadd.f32 %v11403_v44, %v10722_v26 }
 0xdc2   : > { %v11405_v30 = vpop.f32.mrf.mxu1  ;;  %v11436_v4 = vpop.f32.mrf.mxu0 }
 0xdc3   : > { %v11406_v2 = vadd.f32 %v11405_v30, %v11404_v23  ;;  %v11437_v13 = vadd.f32 %v11436_v4, %v11435_v7 }
 0xdc4   : > { %v11407_v57 = vpop.f32.mrf.mxu1  ;;  %v11438_v3 = vpop.f32.mrf.mxu0 }
 0xdc5   : > { %v10834_v58 = vadd.f32 %v11437_v13, %v10778_v11  ;;  %v10781_v20 = vadd.f32 %v11406_v2, %v10725_v8 }
 0xdc6   : > { %v11408_v6 = vpop.f32.mrf.mxu1  ;;  %v11439_v5 = vpop.f32.mrf.mxu0 }
 0xdc7   : > { %10855 = vst.msk [vmem:[%s21329_s26] sm:$0x1f] %vm6068_vm0, %v10834_v58  ;;  %v11409_v35 = vadd.f32 %v11408_v6, %v11407_v57  ;;  %v11440_v46 = vadd.f32 %v11439_v5, %v11438_v3 }
 0xdc8   : > { %v11410_v56 = vpop.f32.mrf.mxu1  ;;  %v11441_v25 = vpop.f32.mrf.mxu0 }
 0xdc9   : > { %v10837_v38 = vadd.f32 %v11440_v46, %v10781_v20  ;;  %v10786_v15 = vadd.f32 %v11409_v35, %v10730_v19 }
 0xdca   : > { %v11411_v21 = vpop.f32.mrf.mxu1  ;;  %v11442_v43 = vpop.f32.mrf.mxu0 }
 0xdcb   : > { %11099 = vst.msk [vmem:[%s21329_s26 + $0x8] sm:$0x1f] %vm6068_vm0, %v10837_v38  ;;  %v11412_v42 = vadd.f32 %v11411_v21, %v11410_v56  ;;  %v11443_v36 = vadd.f32 %v11442_v43, %v11441_v25 }
 0xdcc   : > { %v11413_v48 = vpop.f32.mrf.mxu1  ;;  %v11444_v18 = vpop.f32.mrf.mxu0 }
 0xdcd   : > { %v10842_v40 = vadd.f32 %v11443_v36, %v10786_v15  ;;  %v10789_v22 = vadd.f32 %v11412_v42, %v10733_v28 }
 0xdce   : > { %v11414_v33 = vpop.f32.mrf.mxu1  ;;  %v11445_v0 = vpop.f32.mrf.mxu0 }
 0xdcf   : > { %11100 = vst.msk [vmem:[%s21329_s26 + $0x10] sm:$0x1f] %vm6068_vm0, %v10842_v40  ;;  %v11415_v59 = vadd.f32 %v11414_v33, %v11413_v48  ;;  %v11446_v45 = vadd.f32 %v11445_v0, %v11444_v18 }
 0xdd0   : > { %v11447_v55 = vpop.f32.mrf.mxu0  ;;  %v11416_v49 = vpop.f32.mrf.mxu1 }
 0xdd1   : > { %v10845_v41 = vadd.f32 %v11446_v45, %v10789_v22  ;;  %v10794_v16 = vadd.f32 %v11415_v59, %v10738_v29 }
 0xdd2   : > { %v11448_v53 = vpop.f32.mrf.mxu0  ;;  %v11417_v32 = vpop.f32.mrf.mxu1 }
 0xdd3   : > { %11101 = vst.msk [vmem:[%s21329_s26 + $0x18] sm:$0x1f] %vm6068_vm0, %v10845_v41  ;;  %v11449_v60 = vadd.f32 %v11448_v53, %v11447_v55 }
 0xdd4   : > { %v11450_v52 = vpop.f32.mrf.mxu0 }
 0xdd5   : > { %v10850_v17 = vadd.f32 %v11449_v60, %v10794_v16 }
 0xdd6   : > { %v11451_v47 = vpop.f32.mrf.mxu0 }
 0xdd7   : > { %11102 = vst.msk [vmem:[%s21329_s26 + $0x20] sm:$0x1f] %vm6068_vm0, %v10850_v17 }
 0xdd8 PF: > { %s24_s29 = sadd.s32 1, %s14802_s29  }
 0xdd9   : > { %p21_p4 = scmp.ge.s32.totalorder %s24_s29, 4  }
 0xddb   :  { %23 = sbr.rel (!%p21_p4) target bundleno = 2 (0x2), region = 138 }

</bundles_post_ra>
